<compile_context>
chip_gen: v5e
topology: v5e:2x2
jax: 0.10.0
libtpu: 0.0.40
codegen_flags: <defaults>
</compile_context>

<pallas_src>
import functools

import jax
import jax.numpy as jnp
from jax.experimental import pallas as pl
from jax.experimental.pallas import tpu as pltpu


# ----------------------------- sizing helpers -----------------------------

def _rup(x, m):
    return ((x + m - 1) // m) * m


def _cpad(c):
    """HBM channel padding: small-channel stages stay (nearly) dense, big stages lane-dense."""
    return _rup(c, 128) if c >= 128 else _rup(c, 8)


def _vmem_budget_bytes():
    cap = 64 * 1024 * 1024                      # conservative fallback == v7x physical VMEM
    try:
        cap = int(getattr(pltpu.get_tpu_info(), "vmem_capacity_bytes", cap))
    except Exception:
        pass
    return min(cap * 3 // 4, 100 * 1024 * 1024)  # ~48 MiB on v7x, ~96 MiB on v5e/v6e


def _plan_tiles(Ho, Wo, W_in, Cpad, Ct, stride, budget_bytes, max_tile_bytes=None):
    """Pick the output-row tile TH (divisor of Ho).  Prefer the fused TH==Ho path.

    The footprint estimate counts double-buffered inputs/outputs, the weight block, the
    materialized W-shift slabs, the f32 accumulator (x2 for the fused centered-variance
    pass) and the in-kernel padded copy (review: v7x double-buffer-aware budget)."""
    s = stride

    def footprint(TH, fused):
        in_b = (s * TH + 2) * (W_in + 2) * Cpad * 2            # bf16 phase tiles (all phases)
        slab_b = (3 if s == 1 else 6) * (TH + 2) * Wo * Cpad * 2
        pad_b = in_b if (fused and s == 1) else 0               # in-kernel padded VMEM copy
        w_b = 9 * Cpad * Ct * 2
        acc_b = TH * Wo * Ct * 4 * (2 if fused else 1)
        out_b = TH * Wo * Ct * 2
        return 2 * in_b + pad_b + slab_b + 2 * w_b + acc_b + 2 * out_b + (1 << 20), in_b

    def fits(TH, fused):
        tot, in_b = footprint(TH, fused)
        if max_tile_bytes is not None and TH > 1 and in_b > max_tile_bytes:
            return False                                        # test hook: force tiling
        return tot <= budget_bytes

    if fits(Ho, True):
        return Ho, 1, True
    TH = 1
    for d in range(1, Ho + 1):
        if Ho % d == 0 and fits(d, False):
            TH = d
    return TH, Ho // TH, False


# ----------------------------- shared conv core -----------------------------

def _conv_acc(sources, w_ref, stride, TH, Wo, Ct, Cpad):
    """3x3 conv as accumulated MXU matmuls.  Taps are grouped by (phase, kw//s) so the
    W-shifted slab is materialized once per group (9 -> 3 repacks for stride 1); the kh
    window is then a static M-slice of the slab."""
    s = stride
    groups = {}
    for kh in range(3):
        for kw in range(3):
            ph = (kh % s) * s + (kw % s)
            groups.setdefault((ph, kw // s), []).append((kh // s, kh * 3 + kw))

    acc = jnp.zeros((TH * Wo, Ct), jnp.float32)
    for (ph, kwq), taps in sorted(groups.items()):
        src = sources[ph]                                   # (rows, cols, Cpad) bf16
        rows = src.shape[0]
        slab = src[:, kwq:kwq + Wo, :].reshape(rows * Wo, Cpad)
        for khq, tap in taps:
            xs = slab[khq * Wo:khq * Wo + TH * Wo, :]
            acc = acc + jnp.dot(xs, w_ref[tap], preferred_element_type=jnp.float32)
    return acc


# ----------------------------- Pallas kernels -----------------------------

def _fused_conv_in_lrelu_kernel(*refs, stride, pad_inside, eps, slope):
    """Fused path (whole per-sample spatial field in one tile).
    refs = (phases..., w, gamma, beta, out).  out: (1, Ho, Wo, Ct) bf16."""
    s = stride
    nph = 1 if pad_inside else s * s
    x_refs = refs[:nph]
    w_ref, g_ref, b_ref, o_ref = refs[nph], refs[nph + 1], refs[nph + 2], refs[nph + 3]
    Ho, Wo, Ct = o_ref.shape[1], o_ref.shape[2], o_ref.shape[3]
    Cpad = x_refs[0].shape[3]

    if pad_inside:                                          # s == 1: zero-pad in VMEM (no glue pad)
        x0 = x_refs[0][0]                                   # (H, W, Cpad) bf16
        H, W = x0.shape[0], x0.shape[1]
        zc = jnp.zeros((H, 1, Cpad), x0.dtype)
        zr = jnp.zeros((1, W + 2, Cpad), x0.dtype)
        sources = [jnp.concatenate([zr, jnp.concatenate([zc, x0, zc], axis=1), zr], axis=0)]
    else:                                                   # s == 2: glue-padded space-to-depth phases
        sources = [r[0] for r in x_refs]

    acc = _conv_acc(sources, w_ref, s, Ho, Wo, Ct, Cpad)

    # InstanceNorm over the full spatial field (centered variance, f32) + affine + LeakyReLU.
    # Conv bias is omitted: it is exactly cancelled by the mean subtraction.
    P = Ho * Wo
    mean = jnp.sum(acc, axis=0, keepdims=True) / P
    d = acc - mean
    var = jnp.sum(d * d, axis=0, keepdims=True) / P
    z = d * (g_ref[...] * jax.lax.rsqrt(var + eps)) + b_ref[...]
    o_ref[0] = jnp.where(z > 0, z, slope * z).reshape(Ho, Wo, Ct).astype(o_ref.dtype)


def _conv_stats_kernel(*refs, stride):
    """Two-pass path, kernel A: conv tile + per-tile centered stats; y stored as bf16.
    refs = (phases..., w, y, stats).  stats rows: [sum ; sum of squared deviations]."""
    s = stride
    nph = s * s
    x_refs = refs[:nph]
    w_ref, y_ref, st_ref = refs[nph], refs[nph + 1], refs[nph + 2]
    TH, Wo, Ct = y_ref.shape[1], y_ref.shape[2], y_ref.shape[3]
    Cpad = x_refs[0].shape[3]

    sources = [r[0] for r in x_refs]
    acc = _conv_acc(sources, w_ref, s, TH, Wo, Ct, Cpad)

    y_ref[0] = acc.reshape(TH, Wo, Ct).astype(y_ref.dtype)
    ssum = jnp.sum(acc, axis=0, keepdims=True)
    d = acc - ssum / (TH * Wo)
    st_ref[0, 0, 0:1, :] = ssum
    st_ref[0, 0, 1:2, :] = jnp.sum(d * d, axis=0, keepdims=True)


def _scale_shift_lrelu_kernel(y_ref, sc_ref, sh_ref, o_ref, *, slope):
    """Two-pass path, kernel B: folded InstanceNorm affine + LeakyReLU (f32 math, bf16 out)."""
    z = y_ref[0].astype(jnp.float32) * sc_ref[0] + sh_ref[0]
    o_ref[0] = jnp.where(z > 0, z, slope * z).astype(o_ref.dtype)


# ----------------------------- One fused Conv+IN+LReLU block -----------------------------

def _conv_in_lrelu_block(x, w9, gamma_p, beta_p, stride, *, eps, slope,
                         budget_bytes, max_tile_bytes=None):
    """x: (N, H, W, Cpad) bf16 NHWC; w9: (9, Cpad, Coutpad) bf16; gamma_p/beta_p: (Coutpad,) f32.
    Returns (N, Ho, Wo, Coutpad) bf16."""
    N, H, W, Cpad = x.shape
    Coutpad = w9.shape[-1]
    assert Cpad == w9.shape[1], (Cpad, w9.shape)
    s = stride
    Ho = (H - 1) // s + 1
    Wo = (W - 1) // s + 1

    # Output-channel tiling: keep the f32 accumulator per grid step <= (TH*Wo, 256).
    Ct = Coutpad if Coutpad <= 256 else (256 if Coutpad % 256 == 0 else 128)
    CT = Coutpad // Ct

    TH, T, fused = _plan_tiles(Ho, Wo, W, Cpad, Ct, s, budget_bytes, max_tile_bytes)
    flops = 2 * N * Ho * Wo * 9 * Cpad * Coutpad

    # ---------- Fused path: conv + InstanceNorm + LeakyReLU in one kernel ----------
    if fused:
        if s == 1:
            phase_arrays = [x]                               # raw input; padded in-kernel
            pad_inside = True
        else:
            xp = jnp.pad(x, ((0, 0), (1, 1), (1, 1), (0, 0)))
            phase_arrays = [xp[:, pr::s, pc::s, :] for pr in range(s) for pc in range(s)]
            pad_inside = False

        in_specs = [pl.BlockSpec((1,) + a.shape[1:], lambda n, ct: (n, 0, 0, 0))
                    for a in phase_arrays]
        in_specs += [
            pl.BlockSpec((9, Cpad, Ct), lambda n, ct: (0, 0, ct)),
            pl.BlockSpec((1, Ct), lambda n, ct: (0, ct)),
            pl.BlockSpec((1, Ct), lambda n, ct: (0, ct)),
        ]
        bytes_a = (sum(int(a.size) for a in phase_arrays) * 2 + int(w9.size) * 2
                   + N * Ho * Wo * Coutpad * 2 + 2 * Coutpad * 4)
        return pl.pallas_call(
            functools.partial(_fused_conv_in_lrelu_kernel, stride=s,
                              pad_inside=pad_inside, eps=eps, slope=slope),
            grid=(N, CT),
            in_specs=in_specs,
            out_specs=pl.BlockSpec((1, Ho, Wo, Ct), lambda n, ct: (n, 0, 0, ct)),
            out_shape=jax.ShapeDtypeStruct((N, Ho, Wo, Coutpad), jnp.bfloat16),
            compiler_params=pltpu.CompilerParams(
                dimension_semantics=("parallel", "parallel"),
                vmem_limit_bytes=budget_bytes),
            cost_estimate=pl.CostEstimate(flops=flops, transcendentals=0,
                                          bytes_accessed=bytes_a),
        )(*phase_arrays, w9, gamma_p.reshape(1, Coutpad), beta_p.reshape(1, Coutpad))

    # ---------- Two-pass path (large spatial fields): row tiles + halo ----------
    # TODO(synk): replace the glue pad / halo duplication below with manual overlapping-window
    # DMA (memory_space=pl.ANY + pltpu.make_async_copy) to remove the extra activation copies.
    xp = jnp.pad(x, ((0, 0), (1, 1), (1, 1), (0, 0)))
    phase_list = []
    for pr in range(s):
        halo_r = max(kh // s for kh in range(3) if kh % s == pr)
        for pc in range(s):
            phase_list.append((xp[:, pr::s, pc::s, :], halo_r))

    def to_row_tiles(a, halo_r):          # (N, Hph, Wph, C) -> (N*T, TH+halo, Wph, C)
        th_in = TH + halo_r
        parts = [a[:, t * TH:t * TH + th_in][:, None] for t in range(T)]
        return jnp.concatenate(parts, axis=1).reshape((N * T, th_in) + a.shape[2:])

    x_tiles = [to_row_tiles(a, h) for a, h in phase_list]

    in_specs = [pl.BlockSpec((1,) + xt.shape[1:], lambda n, t, ct: (n * T + t, 0, 0, 0))
                for xt in x_tiles]
    in_specs.append(pl.BlockSpec((9, Cpad, Ct), lambda n, t, ct: (0, 0, ct)))

    bytes_a = (sum(int(xt.size) for xt in x_tiles) * 2 + int(w9.size) * 2
               + N * Ho * Wo * Coutpad * 2 + N * T * 2 * Coutpad * 4)

    y, stats = pl.pallas_call(
        functools.partial(_conv_stats_kernel, stride=s),
        grid=(N, T, CT),
        in_specs=in_specs,
        out_specs=(
            pl.BlockSpec((1, TH, Wo, Ct), lambda n, t, ct: (n, t, 0, ct)),
            pl.BlockSpec((1, 1, 2, Ct), lambda n, t, ct: (n, t, 0, ct)),
        ),
        out_shape=(
            jax.ShapeDtypeStruct((N, Ho, Wo, Coutpad), jnp.bfloat16),   # bf16 y: ~40% less HBM
            jax.ShapeDtypeStruct((N, T, 2, Coutpad), jnp.float32),
        ),
        compiler_params=pltpu.CompilerParams(
            dimension_semantics=("parallel", "parallel", "parallel"),
            vmem_limit_bytes=budget_bytes),
        cost_estimate=pl.CostEstimate(flops=flops, transcendentals=0, bytes_accessed=bytes_a),
    )(*x_tiles, w9)

    # Glue: merge per-tile centered stats (Chan parallel-variance) and fold the affine.
    P_t = TH * Wo
    P = Ho * Wo
    sums = stats[:, :, 0, :]                       # (N, T, Coutpad)
    m2s = stats[:, :, 1, :]
    mean = jnp.sum(sums, axis=1) / P               # (N, Coutpad)
    m_t = sums / P_t
    M2 = jnp.sum(m2s, axis=1) + P_t * jnp.sum((m_t - mean[:, None, :]) ** 2, axis=1)
    var = jnp.maximum(M2 / P, 0.0)
    scale = gamma_p[None, :] * jax.lax.rsqrt(var + eps)
    shift = beta_p[None, :] - mean * scale
    scale = scale.reshape(N, 1, Coutpad)
    shift = shift.reshape(N, 1, Coutpad)

    bytes_b = N * Ho * Wo * Coutpad * (2 + 2) + 2 * N * Coutpad * 4
    return pl.pallas_call(
        functools.partial(_scale_shift_lrelu_kernel, slope=slope),
        grid=(N, T, CT),
        in_specs=[
            pl.BlockSpec((1, TH, Wo, Ct), lambda n, t, ct: (n, t, 0, ct)),
            pl.BlockSpec((1, 1, Ct), lambda n, t, ct: (n, 0, ct)),
            pl.BlockSpec((1, 1, Ct), lambda n, t, ct: (n, 0, ct)),
        ],
        out_specs=pl.BlockSpec((1, TH, Wo, Ct), lambda n, t, ct: (n, t, 0, ct)),
        out_shape=jax.ShapeDtypeStruct((N, Ho, Wo, Coutpad), jnp.bfloat16),
        compiler_params=pltpu.CompilerParams(
            dimension_semantics=("parallel", "parallel", "parallel"),
            vmem_limit_bytes=budget_bytes),
        cost_estimate=pl.CostEstimate(flops=3 * N * Ho * Wo * Coutpad, transcendentals=0,
                                      bytes_accessed=bytes_b),
    )(y, scale, shift)


# ----------------------------- Encoder (params + forward) -----------------------------

def init_unet_encoder_params(key, input_channels, base_num_features, num_blocks_per_stage,
                             feature_mult, num_stages, max_num_features=480):
    pool_op_kernel_sizes = [1] + [2] * (num_stages - 1)
    params = []
    in_feat = input_channels
    for stage in range(num_stages):
        out_feat = min(int(base_num_features * feature_mult ** stage), max_num_features)
        blocks = []
        for blk in range(num_blocks_per_stage):
            cin = in_feat if blk == 0 else out_feat
            stride = pool_op_kernel_sizes[stage] if blk == 0 else 1
            key, kw_, kb_ = jax.random.split(key, 3)
            scale = (2.0 / (9 * cin)) ** 0.5
            blocks.append(dict(
                w=jax.random.normal(kw_, (3, 3, cin, out_feat), jnp.float32) * scale,
                b=jax.random.normal(kb_, (out_feat,), jnp.float32) * 0.01,  # cancelled by InstanceNorm
                gamma=jnp.ones((out_feat,), jnp.float32),
                beta=jnp.zeros((out_feat,), jnp.float32),
                stride=stride,
            ))
        params.append(blocks)
        in_feat = out_feat
    return params


def _pack_block_params(blk):
    """Pad to the HBM channel targets and cast matmul operands to bf16."""
    w = blk["w"]                                  # (3, 3, cin, cout) f32
    cin, cout = w.shape[2], w.shape[3]
    cpi, cpo = _cpad(cin), _cpad(cout)
    w9 = jnp.pad(w, ((0, 0), (0, 0), (0, cpi - cin), (0, cpo - cout)))
    w9 = w9.reshape(9, cpi, cpo).astype(jnp.bfloat16)
    gamma_p = jnp.pad(blk["gamma"], (0, cpo - cout)).astype(jnp.float32)   # padded chans: gamma=0
    beta_p = jnp.pad(blk["beta"], (0, cpo - cout)).astype(jnp.float32)
    # NOTE: blk["b"] is intentionally unused — the conv bias is exactly cancelled by the
    # per-sample mean subtraction of InstanceNorm (verified against the references below).
    return w9, gamma_p, beta_p


def unet_encoder_forward(x_nchw, params, return_skips=True, *, eps=1e-5, slope=1e-2,
                         max_tile_bytes=None):
    budget = _vmem_budget_bytes()
    x = jnp.transpose(x_nchw, (0, 2, 3, 1))                 # NCHW -> NHWC (layout glue)
    cin = x.shape[-1]
    x = jnp.pad(x, ((0, 0), (0, 0), (0, 0), (0, _cpad(cin) - cin))).astype(jnp.bfloat16)

    skips = []
    cur_cout = cin
    for blocks in params:
        for blk in blocks:
            w9, gamma_p, beta_p = _pack_block_params(blk)
            x = _conv_in_lrelu_block(x, w9, gamma_p, beta_p, blk["stride"], eps=eps, slope=slope,
                                     budget_bytes=budget, max_tile_bytes=max_tile_bytes)
            cur_cout = blk["w"].shape[-1]
        if return_skips:
            skips.append(jnp.transpose(x[..., :cur_cout].astype(jnp.float32), (0, 3, 1, 2)))
    if return_skips:
        return skips
    return jnp.transpose(x[..., :cur_cout].astype(jnp.float32), (0, 3, 1, 2))


# ----------------------------- Plain-JAX references (verification) -----------------------------

def _ref_block(x, w, b, gamma, beta, stride, *, eps=1e-5, slope=1e-2, match_bf16=False):
    if match_bf16:   # mirror the kernel's intentional bf16 quantization of conv operands / activations
        x = x.astype(jnp.bfloat16).astype(jnp.float32)
        w = w.astype(jnp.bfloat16).astype(jnp.float32)
    w_oihw = jnp.transpose(w, (3, 2, 0, 1))
    y = jax.lax.conv_general_dilated(x, w_oihw, (stride, stride), ((1, 1), (1, 1)),
                                     dimension_numbers=("NCHW", "OIHW", "NCHW"))
    y = y + b[None, :, None, None]                          # bias kept here: cancelled by the norm
    mean = y.mean(axis=(2, 3), keepdims=True)
    var = ((y - mean) ** 2).mean(axis=(2, 3), keepdims=True)
    y = (y - mean) * jax.lax.rsqrt(var + eps)
    y = y * gamma[None, :, None, None] + beta[None, :, None, None]
    y = jnp.where(y > 0, y, slope * y)
    if match_bf16:
        y = y.astype(jnp.bfloat16).astype(jnp.float32)      # inter-block activations are bf16
    return y


def _ref_forward(x_nchw, params, match_bf16=False):
    skips = []
    x = x_nchw
    for blocks in params:
        for blk in blocks:
            x = _ref_block(x, blk["w"], blk["b"], blk["gamma"], blk["beta"], blk["stride"],
                           match_bf16=match_bf16)
        skips.append(x)
    return skips


# ----------------------------- Main -----------------------------

if __name__ == "__main__":
    key = jax.random.PRNGKey(0)
    k_in, k_par = jax.random.split(key)

    # Small config: input_channels=4, base_num_features=8, feature_mult=2,
    # num_stages=3, num_blocks_per_stage=2  -> stage features [8, 16, 32]
    N, Cin, H, W = 2, 4, 16, 16
    x = jax.random.normal(k_in, (N, Cin, H, W), jnp.float32)

    params = init_unet_encoder_params(k_par, input_channels=Cin, base_num_features=8,
                                      num_blocks_per_stage=2, feature_mult=2, num_stages=3)

    fwd = jax.jit(lambda inp: unet_encoder_forward(inp, params, return_skips=True))
    skips = [jax.block_until_ready(s) for s in fwd(x)]

    # (1) Tight check vs a reference with the same (intentional) bf16 operand quantization.
    # (2) Loose structural check vs the pure-f32 PyTorch-equivalent reference.
    ref_bf16 = _ref_forward(x, params, match_bf16=True)
    ref_f32 = _ref_forward(x, params, match_bf16=False)
    for got, want_m, want_f in zip(skips, ref_bf16, ref_f32):
        assert got.shape == want_m.shape, (got.shape, want_m.shape)
        err_m = float(jnp.max(jnp.abs(got - want_m)))
        err_f = float(jnp.max(jnp.abs(got - want_f)))
        assert err_m < 3e-2, err_m
        assert err_f < 2e-1, err_f

    # Exercise the row-tiled two-pass (T > 1, bf16 y + merged stats) path and check agreement.
    fwd_tiled = jax.jit(lambda inp: unet_encoder_forward(inp, params, return_skips=True,
                                                         max_tile_bytes=4096))
    skips_tiled = [jax.block_until_ready(s) for s in fwd_tiled(x)]
    for a, b in zip(skips, skips_tiled):
        assert float(jnp.max(jnp.abs(a - b))) < 6e-2

    print("KERNEL_OK")
</pallas_src>

<mosaic_0001>
module attributes {stable_mosaic.version = 11 : i64} {
  func.func @_fused_conv_in_lrelu_kernel(%arg0: i32, %arg1: i32, %arg2: memref<1x16x16x8xbf16, #tpu.memory_space<vmem>>, %arg3: memref<9x8x8xbf16, #tpu.memory_space<vmem>>, %arg4: memref<1x8xf32, #tpu.memory_space<vmem>>, %arg5: memref<1x8xf32, #tpu.memory_space<vmem>>, %arg6: memref<1x16x16x8xbf16, #tpu.memory_space<vmem>>) attributes {dimension_semantics = [#tpu.dimension_semantics<parallel>, #tpu.dimension_semantics<parallel>], iteration_bounds = array<i64: 2, 1>, scalar_prefetch = 0 : i64, scratch_operands = 0 : i64, tpu.core_type = #tpu.core_type<tc>, window_params = [{transform_indices = @transform_0, window_bounds = array<i64: 1, 16, 16, 8>}, {transform_indices = @transform_1, window_bounds = array<i64: 9, 8, 8>}, {transform_indices = @transform_2, window_bounds = array<i64: 1, 8>}, {transform_indices = @transform_3, window_bounds = array<i64: 1, 8>}, {transform_indices = @transform_4, window_bounds = array<i64: 1, 16, 16, 8>}]} {
    %c0 = arith.constant 0 : index
    %c0_0 = arith.constant 0 : index
    %c0_1 = arith.constant 0 : index
    %c0_2 = arith.constant 0 : index
    %0 = vector.load %arg2[%c0, %c0_0, %c0_1, %c0_2] : memref<1x16x16x8xbf16, #tpu.memory_space<vmem>>, vector<1x16x16x8xbf16>
    %1 = vector.shape_cast %0 : vector<1x16x16x8xbf16> to vector<16x16x8xbf16>
    %cst = arith.constant 0.000000e+00 : bf16
    %2 = vector.broadcast %cst : bf16 to vector<16x1x8xbf16>
    %cst_3 = arith.constant 0.000000e+00 : bf16
    %3 = vector.broadcast %cst_3 : bf16 to vector<1x18x8xbf16>
    %4 = tpu.concatenate %2, %1, %2 in 1 : vector<16x1x8xbf16>, vector<16x16x8xbf16>, vector<16x1x8xbf16> -> vector<16x18x8xbf16>
    %5 = tpu.concatenate %3, %4, %3 in 0 : vector<1x18x8xbf16>, vector<16x18x8xbf16>, vector<1x18x8xbf16> -> vector<18x18x8xbf16>
    %cst_4 = arith.constant 0.000000e+00 : f32
    %6 = vector.broadcast %cst_4 : f32 to vector<256x8xf32>
    %7 = vector.extract_strided_slice %5 {offsets = [0, 0, 0], sizes = [18, 16, 8], strides = [1, 1, 1]} : vector<18x18x8xbf16> to vector<18x16x8xbf16>
    %8 = vector.shape_cast %7 : vector<18x16x8xbf16> to vector<288x8xbf16>
    %9 = vector.extract_strided_slice %8 {offsets = [0, 0], sizes = [256, 8], strides = [1, 1]} : vector<288x8xbf16> to vector<256x8xbf16>
    %c0_5 = arith.constant 0 : index
    %c0_6 = arith.constant 0 : index
    %c0_7 = arith.constant 0 : index
    %10 = vector.load %arg3[%c0_5, %c0_6, %c0_7] : memref<9x8x8xbf16, #tpu.memory_space<vmem>>, vector<1x8x8xbf16>
    %11 = vector.shape_cast %10 : vector<1x8x8xbf16> to vector<8x8xbf16>
    %cst_8 = arith.constant dense<0.000000e+00> : vector<256x8xf32>
    %12 = tpu.matmul %9, %11, %cst_8 {dimension_numbers = #tpu.dot_dimension_numbers<[1], [0], [0], [1], [0, 0, 1, 1], [], []>} : vector<256x8xbf16>, vector<8x8xbf16>, vector<256x8xf32> -> vector<256x8xf32>
    %13 = arith.addf %6, %12 : vector<256x8xf32>
    %14 = vector.extract_strided_slice %8 {offsets = [16, 0], sizes = [256, 8], strides = [1, 1]} : vector<288x8xbf16> to vector<256x8xbf16>
    %c3 = arith.constant 3 : index
    %c0_9 = arith.constant 0 : index
    %c0_10 = arith.constant 0 : index
    %15 = vector.load %arg3[%c3, %c0_9, %c0_10] : memref<9x8x8xbf16, #tpu.memory_space<vmem>>, vector<1x8x8xbf16>
    %16 = vector.shape_cast %15 : vector<1x8x8xbf16> to vector<8x8xbf16>
    %cst_11 = arith.constant dense<0.000000e+00> : vector<256x8xf32>
    %17 = tpu.matmul %14, %16, %cst_11 {dimension_numbers = #tpu.dot_dimension_numbers<[1], [0], [0], [1], [0, 0, 1, 1], [], []>} : vector<256x8xbf16>, vector<8x8xbf16>, vector<256x8xf32> -> vector<256x8xf32>
    %18 = arith.addf %13, %17 : vector<256x8xf32>
    %19 = vector.extract_strided_slice %8 {offsets = [32, 0], sizes = [256, 8], strides = [1, 1]} : vector<288x8xbf16> to vector<256x8xbf16>
    %c6 = arith.constant 6 : index
    %c0_12 = arith.constant 0 : index
    %c0_13 = arith.constant 0 : index
    %20 = vector.load %arg3[%c6, %c0_12, %c0_13] : memref<9x8x8xbf16, #tpu.memory_space<vmem>>, vector<1x8x8xbf16>
    %21 = vector.shape_cast %20 : vector<1x8x8xbf16> to vector<8x8xbf16>
    %cst_14 = arith.constant dense<0.000000e+00> : vector<256x8xf32>
    %22 = tpu.matmul %19, %21, %cst_14 {dimension_numbers = #tpu.dot_dimension_numbers<[1], [0], [0], [1], [0, 0, 1, 1], [], []>} : vector<256x8xbf16>, vector<8x8xbf16>, vector<256x8xf32> -> vector<256x8xf32>
    %23 = arith.addf %18, %22 : vector<256x8xf32>
    %24 = vector.extract_strided_slice %5 {offsets = [0, 1, 0], sizes = [18, 16, 8], strides = [1, 1, 1]} : vector<18x18x8xbf16> to vector<18x16x8xbf16>
    %25 = vector.shape_cast %24 : vector<18x16x8xbf16> to vector<288x8xbf16>
    %26 = vector.extract_strided_slice %25 {offsets = [0, 0], sizes = [256, 8], strides = [1, 1]} : vector<288x8xbf16> to vector<256x8xbf16>
    %c1 = arith.constant 1 : index
    %c0_15 = arith.constant 0 : index
    %c0_16 = arith.constant 0 : index
    %27 = vector.load %arg3[%c1, %c0_15, %c0_16] : memref<9x8x8xbf16, #tpu.memory_space<vmem>>, vector<1x8x8xbf16>
    %28 = vector.shape_cast %27 : vector<1x8x8xbf16> to vector<8x8xbf16>
    %cst_17 = arith.constant dense<0.000000e+00> : vector<256x8xf32>
    %29 = tpu.matmul %26, %28, %cst_17 {dimension_numbers = #tpu.dot_dimension_numbers<[1], [0], [0], [1], [0, 0, 1, 1], [], []>} : vector<256x8xbf16>, vector<8x8xbf16>, vector<256x8xf32> -> vector<256x8xf32>
    %30 = arith.addf %23, %29 : vector<256x8xf32>
    %31 = vector.extract_strided_slice %25 {offsets = [16, 0], sizes = [256, 8], strides = [1, 1]} : vector<288x8xbf16> to vector<256x8xbf16>
    %c4 = arith.constant 4 : index
    %c0_18 = arith.constant 0 : index
    %c0_19 = arith.constant 0 : index
    %32 = vector.load %arg3[%c4, %c0_18, %c0_19] : memref<9x8x8xbf16, #tpu.memory_space<vmem>>, vector<1x8x8xbf16>
    %33 = vector.shape_cast %32 : vector<1x8x8xbf16> to vector<8x8xbf16>
    %cst_20 = arith.constant dense<0.000000e+00> : vector<256x8xf32>
    %34 = tpu.matmul %31, %33, %cst_20 {dimension_numbers = #tpu.dot_dimension_numbers<[1], [0], [0], [1], [0, 0, 1, 1], [], []>} : vector<256x8xbf16>, vector<8x8xbf16>, vector<256x8xf32> -> vector<256x8xf32>
    %35 = arith.addf %30, %34 : vector<256x8xf32>
    %36 = vector.extract_strided_slice %25 {offsets = [32, 0], sizes = [256, 8], strides = [1, 1]} : vector<288x8xbf16> to vector<256x8xbf16>
    %c7 = arith.constant 7 : index
    %c0_21 = arith.constant 0 : index
    %c0_22 = arith.constant 0 : index
    %37 = vector.load %arg3[%c7, %c0_21, %c0_22] : memref<9x8x8xbf16, #tpu.memory_space<vmem>>, vector<1x8x8xbf16>
    %38 = vector.shape_cast %37 : vector<1x8x8xbf16> to vector<8x8xbf16>
    %cst_23 = arith.constant dense<0.000000e+00> : vector<256x8xf32>
    %39 = tpu.matmul %36, %38, %cst_23 {dimension_numbers = #tpu.dot_dimension_numbers<[1], [0], [0], [1], [0, 0, 1, 1], [], []>} : vector<256x8xbf16>, vector<8x8xbf16>, vector<256x8xf32> -> vector<256x8xf32>
    %40 = arith.addf %35, %39 : vector<256x8xf32>
    %41 = vector.extract_strided_slice %5 {offsets = [0, 2, 0], sizes = [18, 16, 8], strides = [1, 1, 1]} : vector<18x18x8xbf16> to vector<18x16x8xbf16>
    %42 = vector.shape_cast %41 : vector<18x16x8xbf16> to vector<288x8xbf16>
    %43 = vector.extract_strided_slice %42 {offsets = [0, 0], sizes = [256, 8], strides = [1, 1]} : vector<288x8xbf16> to vector<256x8xbf16>
    %c2 = arith.constant 2 : index
    %c0_24 = arith.constant 0 : index
    %c0_25 = arith.constant 0 : index
    %44 = vector.load %arg3[%c2, %c0_24, %c0_25] : memref<9x8x8xbf16, #tpu.memory_space<vmem>>, vector<1x8x8xbf16>
    %45 = vector.shape_cast %44 : vector<1x8x8xbf16> to vector<8x8xbf16>
    %cst_26 = arith.constant dense<0.000000e+00> : vector<256x8xf32>
    %46 = tpu.matmul %43, %45, %cst_26 {dimension_numbers = #tpu.dot_dimension_numbers<[1], [0], [0], [1], [0, 0, 1, 1], [], []>} : vector<256x8xbf16>, vector<8x8xbf16>, vector<256x8xf32> -> vector<256x8xf32>
    %47 = arith.addf %40, %46 : vector<256x8xf32>
    %48 = vector.extract_strided_slice %42 {offsets = [16, 0], sizes = [256, 8], strides = [1, 1]} : vector<288x8xbf16> to vector<256x8xbf16>
    %c5 = arith.constant 5 : index
    %c0_27 = arith.constant 0 : index
    %c0_28 = arith.constant 0 : index
    %49 = vector.load %arg3[%c5, %c0_27, %c0_28] : memref<9x8x8xbf16, #tpu.memory_space<vmem>>, vector<1x8x8xbf16>
    %50 = vector.shape_cast %49 : vector<1x8x8xbf16> to vector<8x8xbf16>
    %cst_29 = arith.constant dense<0.000000e+00> : vector<256x8xf32>
    %51 = tpu.matmul %48, %50, %cst_29 {dimension_numbers = #tpu.dot_dimension_numbers<[1], [0], [0], [1], [0, 0, 1, 1], [], []>} : vector<256x8xbf16>, vector<8x8xbf16>, vector<256x8xf32> -> vector<256x8xf32>
    %52 = arith.addf %47, %51 : vector<256x8xf32>
    %53 = vector.extract_strided_slice %42 {offsets = [32, 0], sizes = [256, 8], strides = [1, 1]} : vector<288x8xbf16> to vector<256x8xbf16>
    %c8 = arith.constant 8 : index
    %c0_30 = arith.constant 0 : index
    %c0_31 = arith.constant 0 : index
    %54 = vector.load %arg3[%c8, %c0_30, %c0_31] : memref<9x8x8xbf16, #tpu.memory_space<vmem>>, vector<1x8x8xbf16>
    %55 = vector.shape_cast %54 : vector<1x8x8xbf16> to vector<8x8xbf16>
    %cst_32 = arith.constant dense<0.000000e+00> : vector<256x8xf32>
    %56 = tpu.matmul %53, %55, %cst_32 {dimension_numbers = #tpu.dot_dimension_numbers<[1], [0], [0], [1], [0, 0, 1, 1], [], []>} : vector<256x8xbf16>, vector<8x8xbf16>, vector<256x8xf32> -> vector<256x8xf32>
    %57 = arith.addf %52, %56 : vector<256x8xf32>
    %cst_33 = arith.constant dense<0.000000e+00> : vector<8xf32>
    %58 = vector.multi_reduction <add>, %57, %cst_33 [0] : vector<256x8xf32> to vector<8xf32>
    %59 = vector.shape_cast %58 : vector<8xf32> to vector<1x8xf32>
    %cst_34 = arith.constant 2.560000e+02 : f32
    %60 = vector.broadcast %cst_34 : f32 to vector<1x8xf32>
    %61 = arith.divf %59, %60 : vector<1x8xf32>
    %62 = vector.broadcast %61 : vector<1x8xf32> to vector<256x8xf32>
    %63 = arith.subf %57, %62 : vector<256x8xf32>
    %64 = arith.mulf %63, %63 : vector<256x8xf32>
    %cst_35 = arith.constant dense<0.000000e+00> : vector<8xf32>
    %65 = vector.multi_reduction <add>, %64, %cst_35 [0] : vector<256x8xf32> to vector<8xf32>
    %66 = vector.shape_cast %65 : vector<8xf32> to vector<1x8xf32>
    %cst_36 = arith.constant 2.560000e+02 : f32
    %67 = vector.broadcast %cst_36 : f32 to vector<1x8xf32>
    %68 = arith.divf %66, %67 : vector<1x8xf32>
    %c0_37 = arith.constant 0 : index
    %c0_38 = arith.constant 0 : index
    %69 = vector.load %arg4[%c0_37, %c0_38] : memref<1x8xf32, #tpu.memory_space<vmem>>, vector<1x8xf32>
    %cst_39 = arith.constant 9.99999974E-6 : f32
    %70 = vector.broadcast %cst_39 : f32 to vector<1x8xf32>
    %71 = arith.addf %68, %70 : vector<1x8xf32>
    %72 = math.rsqrt %71 : vector<1x8xf32>
    %73 = arith.mulf %69, %72 : vector<1x8xf32>
    %74 = vector.broadcast %73 : vector<1x8xf32> to vector<256x8xf32>
    %75 = arith.mulf %63, %74 : vector<256x8xf32>
    %c0_40 = arith.constant 0 : index
    %c0_41 = arith.constant 0 : index
    %76 = vector.load %arg5[%c0_40, %c0_41] : memref<1x8xf32, #tpu.memory_space<vmem>>, vector<1x8xf32>
    %77 = vector.broadcast %76 : vector<1x8xf32> to vector<256x8xf32>
    %78 = arith.addf %75, %77 : vector<256x8xf32>
    %cst_42 = arith.constant 0.000000e+00 : f32
    %79 = vector.broadcast %cst_42 : f32 to vector<256x8xf32>
    %80 = arith.cmpf ogt, %78, %79 : vector<256x8xf32>
    %cst_43 = arith.constant 0.00999999977 : f32
    %81 = vector.broadcast %cst_43 : f32 to vector<256x8xf32>
    %82 = arith.mulf %81, %78 : vector<256x8xf32>
    %83 = arith.select %80, %78, %82 : vector<256x8xi1>, vector<256x8xf32>
    %84 = vector.shape_cast %83 : vector<256x8xf32> to vector<16x16x8xf32>
    %85 = arith.truncf %84 : vector<16x16x8xf32> to vector<16x16x8xbf16>
    %c0_44 = arith.constant 0 : index
    %c0_45 = arith.constant 0 : index
    %c0_46 = arith.constant 0 : index
    %c0_47 = arith.constant 0 : index
    %86 = vector.load %arg6[%c0_44, %c0_45, %c0_46, %c0_47] : memref<1x16x16x8xbf16, #tpu.memory_space<vmem>>, vector<1x16x16x8xbf16>
    %87 = vector.shape_cast %86 : vector<1x16x16x8xbf16> to vector<16x16x8xbf16>
    %88 = vector.shape_cast %85 : vector<16x16x8xbf16> to vector<1x16x16x8xbf16>
    tpu.vector_store %arg6[%c0_44, %c0_45, %c0_46, %c0_47], %88 {strides = array<i32>} : memref<1x16x16x8xbf16, #tpu.memory_space<vmem>>, vector<1x16x16x8xbf16>,
    return
  }
  func.func @transform_0(%arg0: i32, %arg1: i32) -> (i32, i32, i32, i32) {
    %c0_i32 = arith.constant 0 : i32
    %c0_i32_0 = arith.constant 0 : i32
    %c0_i32_1 = arith.constant 0 : i32
    %c0_i32_2 = arith.constant 0 : i32
    return %arg0, %c0_i32, %c0_i32_0, %c0_i32_1 : i32, i32, i32, i32
  }
  func.func @transform_1(%arg0: i32, %arg1: i32) -> (i32, i32, i32) {
    %c0_i32 = arith.constant 0 : i32
    %c0_i32_0 = arith.constant 0 : i32
    %c0_i32_1 = arith.constant 0 : i32
    return %c0_i32, %c0_i32_0, %arg1 : i32, i32, i32
  }
  func.func @transform_2(%arg0: i32, %arg1: i32) -> (i32, i32) {
    %c0_i32 = arith.constant 0 : i32
    %c0_i32_0 = arith.constant 0 : i32
    return %c0_i32, %arg1 : i32, i32
  }
  func.func @transform_3(%arg0: i32, %arg1: i32) -> (i32, i32) {
    %c0_i32 = arith.constant 0 : i32
    %c0_i32_0 = arith.constant 0 : i32
    return %c0_i32, %arg1 : i32, i32
  }
  func.func @transform_4(%arg0: i32, %arg1: i32) -> (i32, i32, i32, i32) {
    %c0_i32 = arith.constant 0 : i32
    %c0_i32_0 = arith.constant 0 : i32
    %c0_i32_1 = arith.constant 0 : i32
    return %arg0, %c0_i32, %c0_i32_0, %arg1 : i32, i32, i32, i32
  }
}

module attributes {stable_mosaic.version = 11 : i64} {
  func.func @_fused_conv_in_lrelu_kernel(%arg0: i32, %arg1: i32, %arg2: memref<1x9x9x8xbf16, #tpu.memory_space<vmem>>, %arg3: memref<1x9x9x8xbf16, #tpu.memory_space<vmem>>, %arg4: memref<1x9x9x8xbf16, #tpu.memory_space<vmem>>, %arg5: memref<1x9x9x8xbf16, #tpu.memory_space<vmem>>, %arg6: memref<9x8x16xbf16, #tpu.memory_space<vmem>>, %arg7: memref<1x16xf32, #tpu.memory_space<vmem>>, %arg8: memref<1x16xf32, #tpu.memory_space<vmem>>, %arg9: memref<1x8x8x16xbf16, #tpu.memory_space<vmem>>) attributes {dimension_semantics = [#tpu.dimension_semantics<parallel>, #tpu.dimension_semantics<parallel>], iteration_bounds = array<i64: 2, 1>, scalar_prefetch = 0 : i64, scratch_operands = 0 : i64, tpu.core_type = #tpu.core_type<tc>, window_params = [{transform_indices = @transform_0, window_bounds = array<i64: 1, 9, 9, 8>}, {transform_indices = @transform_1, window_bounds = array<i64: 1, 9, 9, 8>}, {transform_indices = @transform_2, window_bounds = array<i64: 1, 9, 9, 8>}, {transform_indices = @transform_3, window_bounds = array<i64: 1, 9, 9, 8>}, {transform_indices = @transform_4, window_bounds = array<i64: 9, 8, 16>}, {transform_indices = @transform_5, window_bounds = array<i64: 1, 16>}, {transform_indices = @transform_6, window_bounds = array<i64: 1, 16>}, {transform_indices = @transform_7, window_bounds = array<i64: 1, 8, 8, 16>}]} {
    %c0 = arith.constant 0 : index
    %c0_0 = arith.constant 0 : index
    %c0_1 = arith.constant 0 : index
    %c0_2 = arith.constant 0 : index
    %0 = vector.load %arg2[%c0, %c0_0, %c0_1, %c0_2] : memref<1x9x9x8xbf16, #tpu.memory_space<vmem>>, vector<1x9x9x8xbf16>
    %1 = vector.shape_cast %0 : vector<1x9x9x8xbf16> to vector<9x9x8xbf16>
    %c0_3 = arith.constant 0 : index
    %c0_4 = arith.constant 0 : index
    %c0_5 = arith.constant 0 : index
    %c0_6 = arith.constant 0 : index
    %2 = vector.load %arg3[%c0_3, %c0_4, %c0_5, %c0_6] : memref<1x9x9x8xbf16, #tpu.memory_space<vmem>>, vector<1x9x9x8xbf16>
    %3 = vector.shape_cast %2 : vector<1x9x9x8xbf16> to vector<9x9x8xbf16>
    %c0_7 = arith.constant 0 : index
    %c0_8 = arith.constant 0 : index
    %c0_9 = arith.constant 0 : index
    %c0_10 = arith.constant 0 : index
    %4 = vector.load %arg4[%c0_7, %c0_8, %c0_9, %c0_10] : memref<1x9x9x8xbf16, #tpu.memory_space<vmem>>, vector<1x9x9x8xbf16>
    %5 = vector.shape_cast %4 : vector<1x9x9x8xbf16> to vector<9x9x8xbf16>
    %c0_11 = arith.constant 0 : index
    %c0_12 = arith.constant 0 : index
    %c0_13 = arith.constant 0 : index
    %c0_14 = arith.constant 0 : index
    %6 = vector.load %arg5[%c0_11, %c0_12, %c0_13, %c0_14] : memref<1x9x9x8xbf16, #tpu.memory_space<vmem>>, vector<1x9x9x8xbf16>
    %7 = vector.shape_cast %6 : vector<1x9x9x8xbf16> to vector<9x9x8xbf16>
    %cst = arith.constant 0.000000e+00 : f32
    %8 = vector.broadcast %cst : f32 to vector<64x16xf32>
    %9 = vector.extract_strided_slice %1 {offsets = [0, 0, 0], sizes = [9, 8, 8], strides = [1, 1, 1]} : vector<9x9x8xbf16> to vector<9x8x8xbf16>
    %10 = vector.shape_cast %9 : vector<9x8x8xbf16> to vector<72x8xbf16>
    %11 = vector.extract_strided_slice %10 {offsets = [0, 0], sizes = [64, 8], strides = [1, 1]} : vector<72x8xbf16> to vector<64x8xbf16>
    %c0_15 = arith.constant 0 : index
    %c0_16 = arith.constant 0 : index
    %c0_17 = arith.constant 0 : index
    %12 = vector.load %arg6[%c0_15, %c0_16, %c0_17] : memref<9x8x16xbf16, #tpu.memory_space<vmem>>, vector<1x8x16xbf16>
    %13 = vector.shape_cast %12 : vector<1x8x16xbf16> to vector<8x16xbf16>
    %cst_18 = arith.constant dense<0.000000e+00> : vector<64x16xf32>
    %14 = tpu.matmul %11, %13, %cst_18 {dimension_numbers = #tpu.dot_dimension_numbers<[1], [0], [0], [1], [0, 0, 1, 1], [], []>} : vector<64x8xbf16>, vector<8x16xbf16>, vector<64x16xf32> -> vector<64x16xf32>
    %15 = arith.addf %8, %14 : vector<64x16xf32>
    %16 = vector.extract_strided_slice %10 {offsets = [8, 0], sizes = [64, 8], strides = [1, 1]} : vector<72x8xbf16> to vector<64x8xbf16>
    %c6 = arith.constant 6 : index
    %c0_19 = arith.constant 0 : index
    %c0_20 = arith.constant 0 : index
    %17 = vector.load %arg6[%c6, %c0_19, %c0_20] : memref<9x8x16xbf16, #tpu.memory_space<vmem>>, vector<1x8x16xbf16>
    %18 = vector.shape_cast %17 : vector<1x8x16xbf16> to vector<8x16xbf16>
    %cst_21 = arith.constant dense<0.000000e+00> : vector<64x16xf32>
    %19 = tpu.matmul %16, %18, %cst_21 {dimension_numbers = #tpu.dot_dimension_numbers<[1], [0], [0], [1], [0, 0, 1, 1], [], []>} : vector<64x8xbf16>, vector<8x16xbf16>, vector<64x16xf32> -> vector<64x16xf32>
    %20 = arith.addf %15, %19 : vector<64x16xf32>
    %21 = vector.extract_strided_slice %1 {offsets = [0, 1, 0], sizes = [9, 8, 8], strides = [1, 1, 1]} : vector<9x9x8xbf16> to vector<9x8x8xbf16>
    %22 = vector.shape_cast %21 : vector<9x8x8xbf16> to vector<72x8xbf16>
    %23 = vector.extract_strided_slice %22 {offsets = [0, 0], sizes = [64, 8], strides = [1, 1]} : vector<72x8xbf16> to vector<64x8xbf16>
    %c2 = arith.constant 2 : index
    %c0_22 = arith.constant 0 : index
    %c0_23 = arith.constant 0 : index
    %24 = vector.load %arg6[%c2, %c0_22, %c0_23] : memref<9x8x16xbf16, #tpu.memory_space<vmem>>, vector<1x8x16xbf16>
    %25 = vector.shape_cast %24 : vector<1x8x16xbf16> to vector<8x16xbf16>
    %cst_24 = arith.constant dense<0.000000e+00> : vector<64x16xf32>
    %26 = tpu.matmul %23, %25, %cst_24 {dimension_numbers = #tpu.dot_dimension_numbers<[1], [0], [0], [1], [0, 0, 1, 1], [], []>} : vector<64x8xbf16>, vector<8x16xbf16>, vector<64x16xf32> -> vector<64x16xf32>
    %27 = arith.addf %20, %26 : vector<64x16xf32>
    %28 = vector.extract_strided_slice %22 {offsets = [8, 0], sizes = [64, 8], strides = [1, 1]} : vector<72x8xbf16> to vector<64x8xbf16>
    %c8 = arith.constant 8 : index
    %c0_25 = arith.constant 0 : index
    %c0_26 = arith.constant 0 : index
    %29 = vector.load %arg6[%c8, %c0_25, %c0_26] : memref<9x8x16xbf16, #tpu.memory_space<vmem>>, vector<1x8x16xbf16>
    %30 = vector.shape_cast %29 : vector<1x8x16xbf16> to vector<8x16xbf16>
    %cst_27 = arith.constant dense<0.000000e+00> : vector<64x16xf32>
    %31 = tpu.matmul %28, %30, %cst_27 {dimension_numbers = #tpu.dot_dimension_numbers<[1], [0], [0], [1], [0, 0, 1, 1], [], []>} : vector<64x8xbf16>, vector<8x16xbf16>, vector<64x16xf32> -> vector<64x16xf32>
    %32 = arith.addf %27, %31 : vector<64x16xf32>
    %33 = vector.extract_strided_slice %3 {offsets = [0, 0, 0], sizes = [9, 8, 8], strides = [1, 1, 1]} : vector<9x9x8xbf16> to vector<9x8x8xbf16>
    %34 = vector.shape_cast %33 : vector<9x8x8xbf16> to vector<72x8xbf16>
    %35 = vector.extract_strided_slice %34 {offsets = [0, 0], sizes = [64, 8], strides = [1, 1]} : vector<72x8xbf16> to vector<64x8xbf16>
    %c1 = arith.constant 1 : index
    %c0_28 = arith.constant 0 : index
    %c0_29 = arith.constant 0 : index
    %36 = vector.load %arg6[%c1, %c0_28, %c0_29] : memref<9x8x16xbf16, #tpu.memory_space<vmem>>, vector<1x8x16xbf16>
    %37 = vector.shape_cast %36 : vector<1x8x16xbf16> to vector<8x16xbf16>
    %cst_30 = arith.constant dense<0.000000e+00> : vector<64x16xf32>
    %38 = tpu.matmul %35, %37, %cst_30 {dimension_numbers = #tpu.dot_dimension_numbers<[1], [0], [0], [1], [0, 0, 1, 1], [], []>} : vector<64x8xbf16>, vector<8x16xbf16>, vector<64x16xf32> -> vector<64x16xf32>
    %39 = arith.addf %32, %38 : vector<64x16xf32>
    %40 = vector.extract_strided_slice %34 {offsets = [8, 0], sizes = [64, 8], strides = [1, 1]} : vector<72x8xbf16> to vector<64x8xbf16>
    %c7 = arith.constant 7 : index
    %c0_31 = arith.constant 0 : index
    %c0_32 = arith.constant 0 : index
    %41 = vector.load %arg6[%c7, %c0_31, %c0_32] : memref<9x8x16xbf16, #tpu.memory_space<vmem>>, vector<1x8x16xbf16>
    %42 = vector.shape_cast %41 : vector<1x8x16xbf16> to vector<8x16xbf16>
    %cst_33 = arith.constant dense<0.000000e+00> : vector<64x16xf32>
    %43 = tpu.matmul %40, %42, %cst_33 {dimension_numbers = #tpu.dot_dimension_numbers<[1], [0], [0], [1], [0, 0, 1, 1], [], []>} : vector<64x8xbf16>, vector<8x16xbf16>, vector<64x16xf32> -> vector<64x16xf32>
    %44 = arith.addf %39, %43 : vector<64x16xf32>
    %45 = vector.extract_strided_slice %5 {offsets = [0, 0, 0], sizes = [9, 8, 8], strides = [1, 1, 1]} : vector<9x9x8xbf16> to vector<9x8x8xbf16>
    %46 = vector.shape_cast %45 : vector<9x8x8xbf16> to vector<72x8xbf16>
    %47 = vector.extract_strided_slice %46 {offsets = [0, 0], sizes = [64, 8], strides = [1, 1]} : vector<72x8xbf16> to vector<64x8xbf16>
    %c3 = arith.constant 3 : index
    %c0_34 = arith.constant 0 : index
    %c0_35 = arith.constant 0 : index
    %48 = vector.load %arg6[%c3, %c0_34, %c0_35] : memref<9x8x16xbf16, #tpu.memory_space<vmem>>, vector<1x8x16xbf16>
    %49 = vector.shape_cast %48 : vector<1x8x16xbf16> to vector<8x16xbf16>
    %cst_36 = arith.constant dense<0.000000e+00> : vector<64x16xf32>
    %50 = tpu.matmul %47, %49, %cst_36 {dimension_numbers = #tpu.dot_dimension_numbers<[1], [0], [0], [1], [0, 0, 1, 1], [], []>} : vector<64x8xbf16>, vector<8x16xbf16>, vector<64x16xf32> -> vector<64x16xf32>
    %51 = arith.addf %44, %50 : vector<64x16xf32>
    %52 = vector.extract_strided_slice %5 {offsets = [0, 1, 0], sizes = [9, 8, 8], strides = [1, 1, 1]} : vector<9x9x8xbf16> to vector<9x8x8xbf16>
    %53 = vector.shape_cast %52 : vector<9x8x8xbf16> to vector<72x8xbf16>
    %54 = vector.extract_strided_slice %53 {offsets = [0, 0], sizes = [64, 8], strides = [1, 1]} : vector<72x8xbf16> to vector<64x8xbf16>
    %c5 = arith.constant 5 : index
    %c0_37 = arith.constant 0 : index
    %c0_38 = arith.constant 0 : index
    %55 = vector.load %arg6[%c5, %c0_37, %c0_38] : memref<9x8x16xbf16, #tpu.memory_space<vmem>>, vector<1x8x16xbf16>
    %56 = vector.shape_cast %55 : vector<1x8x16xbf16> to vector<8x16xbf16>
    %cst_39 = arith.constant dense<0.000000e+00> : vector<64x16xf32>
    %57 = tpu.matmul %54, %56, %cst_39 {dimension_numbers = #tpu.dot_dimension_numbers<[1], [0], [0], [1], [0, 0, 1, 1], [], []>} : vector<64x8xbf16>, vector<8x16xbf16>, vector<64x16xf32> -> vector<64x16xf32>
    %58 = arith.addf %51, %57 : vector<64x16xf32>
    %59 = vector.extract_strided_slice %7 {offsets = [0, 0, 0], sizes = [9, 8, 8], strides = [1, 1, 1]} : vector<9x9x8xbf16> to vector<9x8x8xbf16>
    %60 = vector.shape_cast %59 : vector<9x8x8xbf16> to vector<72x8xbf16>
    %61 = vector.extract_strided_slice %60 {offsets = [0, 0], sizes = [64, 8], strides = [1, 1]} : vector<72x8xbf16> to vector<64x8xbf16>
    %c4 = arith.constant 4 : index
    %c0_40 = arith.constant 0 : index
    %c0_41 = arith.constant 0 : index
    %62 = vector.load %arg6[%c4, %c0_40, %c0_41] : memref<9x8x16xbf16, #tpu.memory_space<vmem>>, vector<1x8x16xbf16>
    %63 = vector.shape_cast %62 : vector<1x8x16xbf16> to vector<8x16xbf16>
    %cst_42 = arith.constant dense<0.000000e+00> : vector<64x16xf32>
    %64 = tpu.matmul %61, %63, %cst_42 {dimension_numbers = #tpu.dot_dimension_numbers<[1], [0], [0], [1], [0, 0, 1, 1], [], []>} : vector<64x8xbf16>, vector<8x16xbf16>, vector<64x16xf32> -> vector<64x16xf32>
    %65 = arith.addf %58, %64 : vector<64x16xf32>
    %cst_43 = arith.constant dense<0.000000e+00> : vector<16xf32>
    %66 = vector.multi_reduction <add>, %65, %cst_43 [0] : vector<64x16xf32> to vector<16xf32>
    %67 = vector.shape_cast %66 : vector<16xf32> to vector<1x16xf32>
    %cst_44 = arith.constant 6.400000e+01 : f32
    %68 = vector.broadcast %cst_44 : f32 to vector<1x16xf32>
    %69 = arith.divf %67, %68 : vector<1x16xf32>
    %70 = vector.broadcast %69 : vector<1x16xf32> to vector<64x16xf32>
    %71 = arith.subf %65, %70 : vector<64x16xf32>
    %72 = arith.mulf %71, %71 : vector<64x16xf32>
    %cst_45 = arith.constant dense<0.000000e+00> : vector<16xf32>
    %73 = vector.multi_reduction <add>, %72, %cst_45 [0] : vector<64x16xf32> to vector<16xf32>
    %74 = vector.shape_cast %73 : vector<16xf32> to vector<1x16xf32>
    %cst_46 = arith.constant 6.400000e+01 : f32
    %75 = vector.broadcast %cst_46 : f32 to vector<1x16xf32>
    %76 = arith.divf %74, %75 : vector<1x16xf32>
    %c0_47 = arith.constant 0 : index
    %c0_48 = arith.constant 0 : index
    %77 = vector.load %arg7[%c0_47, %c0_48] : memref<1x16xf32, #tpu.memory_space<vmem>>, vector<1x16xf32>
    %cst_49 = arith.constant 9.99999974E-6 : f32
    %78 = vector.broadcast %cst_49 : f32 to vector<1x16xf32>
    %79 = arith.addf %76, %78 : vector<1x16xf32>
    %80 = math.rsqrt %79 : vector<1x16xf32>
    %81 = arith.mulf %77, %80 : vector<1x16xf32>
    %82 = vector.broadcast %81 : vector<1x16xf32> to vector<64x16xf32>
    %83 = arith.mulf %71, %82 : vector<64x16xf32>
    %c0_50 = arith.constant 0 : index
    %c0_51 = arith.constant 0 : index
    %84 = vector.load %arg8[%c0_50, %c0_51] : memref<1x16xf32, #tpu.memory_space<vmem>>, vector<1x16xf32>
    %85 = vector.broadcast %84 : vector<1x16xf32> to vector<64x16xf32>
    %86 = arith.addf %83, %85 : vector<64x16xf32>
    %cst_52 = arith.constant 0.000000e+00 : f32
    %87 = vector.broadcast %cst_52 : f32 to vector<64x16xf32>
    %88 = arith.cmpf ogt, %86, %87 : vector<64x16xf32>
    %cst_53 = arith.constant 0.00999999977 : f32
    %89 = vector.broadcast %cst_53 : f32 to vector<64x16xf32>
    %90 = arith.mulf %89, %86 : vector<64x16xf32>
    %91 = arith.select %88, %86, %90 : vector<64x16xi1>, vector<64x16xf32>
    %92 = vector.shape_cast %91 : vector<64x16xf32> to vector<8x8x16xf32>
    %93 = arith.truncf %92 : vector<8x8x16xf32> to vector<8x8x16xbf16>
    %c0_54 = arith.constant 0 : index
    %c0_55 = arith.constant 0 : index
    %c0_56 = arith.constant 0 : index
    %c0_57 = arith.constant 0 : index
    %94 = vector.load %arg9[%c0_54, %c0_55, %c0_56, %c0_57] : memref<1x8x8x16xbf16, #tpu.memory_space<vmem>>, vector<1x8x8x16xbf16>
    %95 = vector.shape_cast %94 : vector<1x8x8x16xbf16> to vector<8x8x16xbf16>
    %96 = vector.shape_cast %93 : vector<8x8x16xbf16> to vector<1x8x8x16xbf16>
    tpu.vector_store %arg9[%c0_54, %c0_55, %c0_56, %c0_57], %96 {strides = array<i32>} : memref<1x8x8x16xbf16, #tpu.memory_space<vmem>>, vector<1x8x8x16xbf16>,
    return
  }
  func.func @transform_0(%arg0: i32, %arg1: i32) -> (i32, i32, i32, i32) {
    %c0_i32 = arith.constant 0 : i32
    %c0_i32_0 = arith.constant 0 : i32
    %c0_i32_1 = arith.constant 0 : i32
    %c0_i32_2 = arith.constant 0 : i32
    return %arg0, %c0_i32, %c0_i32_0, %c0_i32_1 : i32, i32, i32, i32
  }
  func.func @transform_1(%arg0: i32, %arg1: i32) -> (i32, i32, i32, i32) {
    %c0_i32 = arith.constant 0 : i32
    %c0_i32_0 = arith.constant 0 : i32
    %c0_i32_1 = arith.constant 0 : i32
    %c0_i32_2 = arith.constant 0 : i32
    return %arg0, %c0_i32, %c0_i32_0, %c0_i32_1 : i32, i32, i32, i32
  }
  func.func @transform_2(%arg0: i32, %arg1: i32) -> (i32, i32, i32, i32) {
    %c0_i32 = arith.constant 0 : i32
    %c0_i32_0 = arith.constant 0 : i32
    %c0_i32_1 = arith.constant 0 : i32
    %c0_i32_2 = arith.constant 0 : i32
    return %arg0, %c0_i32, %c0_i32_0, %c0_i32_1 : i32, i32, i32, i32
  }
  func.func @transform_3(%arg0: i32, %arg1: i32) -> (i32, i32, i32, i32) {
    %c0_i32 = arith.constant 0 : i32
    %c0_i32_0 = arith.constant 0 : i32
    %c0_i32_1 = arith.constant 0 : i32
    %c0_i32_2 = arith.constant 0 : i32
    return %arg0, %c0_i32, %c0_i32_0, %c0_i32_1 : i32, i32, i32, i32
  }
  func.func @transform_4(%arg0: i32, %arg1: i32) -> (i32, i32, i32) {
    %c0_i32 = arith.constant 0 : i32
    %c0_i32_0 = arith.constant 0 : i32
    %c0_i32_1 = arith.constant 0 : i32
    return %c0_i32, %c0_i32_0, %arg1 : i32, i32, i32
  }
  func.func @transform_5(%arg0: i32, %arg1: i32) -> (i32, i32) {
    %c0_i32 = arith.constant 0 : i32
    %c0_i32_0 = arith.constant 0 : i32
    return %c0_i32, %arg1 : i32, i32
  }
  func.func @transform_6(%arg0: i32, %arg1: i32) -> (i32, i32) {
    %c0_i32 = arith.constant 0 : i32
    %c0_i32_0 = arith.constant 0 : i32
    return %c0_i32, %arg1 : i32, i32
  }
  func.func @transform_7(%arg0: i32, %arg1: i32) -> (i32, i32, i32, i32) {
    %c0_i32 = arith.constant 0 : i32
    %c0_i32_0 = arith.constant 0 : i32
    %c0_i32_1 = arith.constant 0 : i32
    return %arg0, %c0_i32, %c0_i32_0, %arg1 : i32, i32, i32, i32
  }
}

module attributes {stable_mosaic.version = 11 : i64} {
  func.func @_fused_conv_in_lrelu_kernel(%arg0: i32, %arg1: i32, %arg2: memref<1x8x8x16xbf16, #tpu.memory_space<vmem>>, %arg3: memref<9x16x16xbf16, #tpu.memory_space<vmem>>, %arg4: memref<1x16xf32, #tpu.memory_space<vmem>>, %arg5: memref<1x16xf32, #tpu.memory_space<vmem>>, %arg6: memref<1x8x8x16xbf16, #tpu.memory_space<vmem>>) attributes {dimension_semantics = [#tpu.dimension_semantics<parallel>, #tpu.dimension_semantics<parallel>], iteration_bounds = array<i64: 2, 1>, scalar_prefetch = 0 : i64, scratch_operands = 0 : i64, tpu.core_type = #tpu.core_type<tc>, window_params = [{transform_indices = @transform_0, window_bounds = array<i64: 1, 8, 8, 16>}, {transform_indices = @transform_1, window_bounds = array<i64: 9, 16, 16>}, {transform_indices = @transform_2, window_bounds = array<i64: 1, 16>}, {transform_indices = @transform_3, window_bounds = array<i64: 1, 16>}, {transform_indices = @transform_4, window_bounds = array<i64: 1, 8, 8, 16>}]} {
    %c0 = arith.constant 0 : index
    %c0_0 = arith.constant 0 : index
    %c0_1 = arith.constant 0 : index
    %c0_2 = arith.constant 0 : index
    %0 = vector.load %arg2[%c0, %c0_0, %c0_1, %c0_2] : memref<1x8x8x16xbf16, #tpu.memory_space<vmem>>, vector<1x8x8x16xbf16>
    %1 = vector.shape_cast %0 : vector<1x8x8x16xbf16> to vector<8x8x16xbf16>
    %cst = arith.constant 0.000000e+00 : bf16
    %2 = vector.broadcast %cst : bf16 to vector<8x1x16xbf16>
    %cst_3 = arith.constant 0.000000e+00 : bf16
    %3 = vector.broadcast %cst_3 : bf16 to vector<1x10x16xbf16>
    %4 = tpu.concatenate %2, %1, %2 in 1 : vector<8x1x16xbf16>, vector<8x8x16xbf16>, vector<8x1x16xbf16> -> vector<8x10x16xbf16>
    %5 = tpu.concatenate %3, %4, %3 in 0 : vector<1x10x16xbf16>, vector<8x10x16xbf16>, vector<1x10x16xbf16> -> vector<10x10x16xbf16>
    %cst_4 = arith.constant 0.000000e+00 : f32
    %6 = vector.broadcast %cst_4 : f32 to vector<64x16xf32>
    %7 = vector.extract_strided_slice %5 {offsets = [0, 0, 0], sizes = [10, 8, 16], strides = [1, 1, 1]} : vector<10x10x16xbf16> to vector<10x8x16xbf16>
    %8 = vector.shape_cast %7 : vector<10x8x16xbf16> to vector<80x16xbf16>
    %9 = vector.extract_strided_slice %8 {offsets = [0, 0], sizes = [64, 16], strides = [1, 1]} : vector<80x16xbf16> to vector<64x16xbf16>
    %c0_5 = arith.constant 0 : index
    %c0_6 = arith.constant 0 : index
    %c0_7 = arith.constant 0 : index
    %10 = vector.load %arg3[%c0_5, %c0_6, %c0_7] : memref<9x16x16xbf16, #tpu.memory_space<vmem>>, vector<1x16x16xbf16>
    %11 = vector.shape_cast %10 : vector<1x16x16xbf16> to vector<16x16xbf16>
    %cst_8 = arith.constant dense<0.000000e+00> : vector<64x16xf32>
    %12 = tpu.matmul %9, %11, %cst_8 {dimension_numbers = #tpu.dot_dimension_numbers<[1], [0], [0], [1], [0, 0, 1, 1], [], []>} : vector<64x16xbf16>, vector<16x16xbf16>, vector<64x16xf32> -> vector<64x16xf32>
    %13 = arith.addf %6, %12 : vector<64x16xf32>
    %14 = vector.extract_strided_slice %8 {offsets = [8, 0], sizes = [64, 16], strides = [1, 1]} : vector<80x16xbf16> to vector<64x16xbf16>
    %c3 = arith.constant 3 : index
    %c0_9 = arith.constant 0 : index
    %c0_10 = arith.constant 0 : index
    %15 = vector.load %arg3[%c3, %c0_9, %c0_10] : memref<9x16x16xbf16, #tpu.memory_space<vmem>>, vector<1x16x16xbf16>
    %16 = vector.shape_cast %15 : vector<1x16x16xbf16> to vector<16x16xbf16>
    %cst_11 = arith.constant dense<0.000000e+00> : vector<64x16xf32>
    %17 = tpu.matmul %14, %16, %cst_11 {dimension_numbers = #tpu.dot_dimension_numbers<[1], [0], [0], [1], [0, 0, 1, 1], [], []>} : vector<64x16xbf16>, vector<16x16xbf16>, vector<64x16xf32> -> vector<64x16xf32>
    %18 = arith.addf %13, %17 : vector<64x16xf32>
    %19 = vector.extract_strided_slice %8 {offsets = [16, 0], sizes = [64, 16], strides = [1, 1]} : vector<80x16xbf16> to vector<64x16xbf16>
    %c6 = arith.constant 6 : index
    %c0_12 = arith.constant 0 : index
    %c0_13 = arith.constant 0 : index
    %20 = vector.load %arg3[%c6, %c0_12, %c0_13] : memref<9x16x16xbf16, #tpu.memory_space<vmem>>, vector<1x16x16xbf16>
    %21 = vector.shape_cast %20 : vector<1x16x16xbf16> to vector<16x16xbf16>
    %cst_14 = arith.constant dense<0.000000e+00> : vector<64x16xf32>
    %22 = tpu.matmul %19, %21, %cst_14 {dimension_numbers = #tpu.dot_dimension_numbers<[1], [0], [0], [1], [0, 0, 1, 1], [], []>} : vector<64x16xbf16>, vector<16x16xbf16>, vector<64x16xf32> -> vector<64x16xf32>
    %23 = arith.addf %18, %22 : vector<64x16xf32>
    %24 = vector.extract_strided_slice %5 {offsets = [0, 1, 0], sizes = [10, 8, 16], strides = [1, 1, 1]} : vector<10x10x16xbf16> to vector<10x8x16xbf16>
    %25 = vector.shape_cast %24 : vector<10x8x16xbf16> to vector<80x16xbf16>
    %26 = vector.extract_strided_slice %25 {offsets = [0, 0], sizes = [64, 16], strides = [1, 1]} : vector<80x16xbf16> to vector<64x16xbf16>
    %c1 = arith.constant 1 : index
    %c0_15 = arith.constant 0 : index
    %c0_16 = arith.constant 0 : index
    %27 = vector.load %arg3[%c1, %c0_15, %c0_16] : memref<9x16x16xbf16, #tpu.memory_space<vmem>>, vector<1x16x16xbf16>
    %28 = vector.shape_cast %27 : vector<1x16x16xbf16> to vector<16x16xbf16>
    %cst_17 = arith.constant dense<0.000000e+00> : vector<64x16xf32>
    %29 = tpu.matmul %26, %28, %cst_17 {dimension_numbers = #tpu.dot_dimension_numbers<[1], [0], [0], [1], [0, 0, 1, 1], [], []>} : vector<64x16xbf16>, vector<16x16xbf16>, vector<64x16xf32> -> vector<64x16xf32>
    %30 = arith.addf %23, %29 : vector<64x16xf32>
    %31 = vector.extract_strided_slice %25 {offsets = [8, 0], sizes = [64, 16], strides = [1, 1]} : vector<80x16xbf16> to vector<64x16xbf16>
    %c4 = arith.constant 4 : index
    %c0_18 = arith.constant 0 : index
    %c0_19 = arith.constant 0 : index
    %32 = vector.load %arg3[%c4, %c0_18, %c0_19] : memref<9x16x16xbf16, #tpu.memory_space<vmem>>, vector<1x16x16xbf16>
    %33 = vector.shape_cast %32 : vector<1x16x16xbf16> to vector<16x16xbf16>
    %cst_20 = arith.constant dense<0.000000e+00> : vector<64x16xf32>
    %34 = tpu.matmul %31, %33, %cst_20 {dimension_numbers = #tpu.dot_dimension_numbers<[1], [0], [0], [1], [0, 0, 1, 1], [], []>} : vector<64x16xbf16>, vector<16x16xbf16>, vector<64x16xf32> -> vector<64x16xf32>
    %35 = arith.addf %30, %34 : vector<64x16xf32>
    %36 = vector.extract_strided_slice %25 {offsets = [16, 0], sizes = [64, 16], strides = [1, 1]} : vector<80x16xbf16> to vector<64x16xbf16>
    %c7 = arith.constant 7 : index
    %c0_21 = arith.constant 0 : index
    %c0_22 = arith.constant 0 : index
    %37 = vector.load %arg3[%c7, %c0_21, %c0_22] : memref<9x16x16xbf16, #tpu.memory_space<vmem>>, vector<1x16x16xbf16>
    %38 = vector.shape_cast %37 : vector<1x16x16xbf16> to vector<16x16xbf16>
    %cst_23 = arith.constant dense<0.000000e+00> : vector<64x16xf32>
    %39 = tpu.matmul %36, %38, %cst_23 {dimension_numbers = #tpu.dot_dimension_numbers<[1], [0], [0], [1], [0, 0, 1, 1], [], []>} : vector<64x16xbf16>, vector<16x16xbf16>, vector<64x16xf32> -> vector<64x16xf32>
    %40 = arith.addf %35, %39 : vector<64x16xf32>
    %41 = vector.extract_strided_slice %5 {offsets = [0, 2, 0], sizes = [10, 8, 16], strides = [1, 1, 1]} : vector<10x10x16xbf16> to vector<10x8x16xbf16>
    %42 = vector.shape_cast %41 : vector<10x8x16xbf16> to vector<80x16xbf16>
    %43 = vector.extract_strided_slice %42 {offsets = [0, 0], sizes = [64, 16], strides = [1, 1]} : vector<80x16xbf16> to vector<64x16xbf16>
    %c2 = arith.constant 2 : index
    %c0_24 = arith.constant 0 : index
    %c0_25 = arith.constant 0 : index
    %44 = vector.load %arg3[%c2, %c0_24, %c0_25] : memref<9x16x16xbf16, #tpu.memory_space<vmem>>, vector<1x16x16xbf16>
    %45 = vector.shape_cast %44 : vector<1x16x16xbf16> to vector<16x16xbf16>
    %cst_26 = arith.constant dense<0.000000e+00> : vector<64x16xf32>
    %46 = tpu.matmul %43, %45, %cst_26 {dimension_numbers = #tpu.dot_dimension_numbers<[1], [0], [0], [1], [0, 0, 1, 1], [], []>} : vector<64x16xbf16>, vector<16x16xbf16>, vector<64x16xf32> -> vector<64x16xf32>
    %47 = arith.addf %40, %46 : vector<64x16xf32>
    %48 = vector.extract_strided_slice %42 {offsets = [8, 0], sizes = [64, 16], strides = [1, 1]} : vector<80x16xbf16> to vector<64x16xbf16>
    %c5 = arith.constant 5 : index
    %c0_27 = arith.constant 0 : index
    %c0_28 = arith.constant 0 : index
    %49 = vector.load %arg3[%c5, %c0_27, %c0_28] : memref<9x16x16xbf16, #tpu.memory_space<vmem>>, vector<1x16x16xbf16>
    %50 = vector.shape_cast %49 : vector<1x16x16xbf16> to vector<16x16xbf16>
    %cst_29 = arith.constant dense<0.000000e+00> : vector<64x16xf32>
    %51 = tpu.matmul %48, %50, %cst_29 {dimension_numbers = #tpu.dot_dimension_numbers<[1], [0], [0], [1], [0, 0, 1, 1], [], []>} : vector<64x16xbf16>, vector<16x16xbf16>, vector<64x16xf32> -> vector<64x16xf32>
    %52 = arith.addf %47, %51 : vector<64x16xf32>
    %53 = vector.extract_strided_slice %42 {offsets = [16, 0], sizes = [64, 16], strides = [1, 1]} : vector<80x16xbf16> to vector<64x16xbf16>
    %c8 = arith.constant 8 : index
    %c0_30 = arith.constant 0 : index
    %c0_31 = arith.constant 0 : index
    %54 = vector.load %arg3[%c8, %c0_30, %c0_31] : memref<9x16x16xbf16, #tpu.memory_space<vmem>>, vector<1x16x16xbf16>
    %55 = vector.shape_cast %54 : vector<1x16x16xbf16> to vector<16x16xbf16>
    %cst_32 = arith.constant dense<0.000000e+00> : vector<64x16xf32>
    %56 = tpu.matmul %53, %55, %cst_32 {dimension_numbers = #tpu.dot_dimension_numbers<[1], [0], [0], [1], [0, 0, 1, 1], [], []>} : vector<64x16xbf16>, vector<16x16xbf16>, vector<64x16xf32> -> vector<64x16xf32>
    %57 = arith.addf %52, %56 : vector<64x16xf32>
    %cst_33 = arith.constant dense<0.000000e+00> : vector<16xf32>
    %58 = vector.multi_reduction <add>, %57, %cst_33 [0] : vector<64x16xf32> to vector<16xf32>
    %59 = vector.shape_cast %58 : vector<16xf32> to vector<1x16xf32>
    %cst_34 = arith.constant 6.400000e+01 : f32
    %60 = vector.broadcast %cst_34 : f32 to vector<1x16xf32>
    %61 = arith.divf %59, %60 : vector<1x16xf32>
    %62 = vector.broadcast %61 : vector<1x16xf32> to vector<64x16xf32>
    %63 = arith.subf %57, %62 : vector<64x16xf32>
    %64 = arith.mulf %63, %63 : vector<64x16xf32>
    %cst_35 = arith.constant dense<0.000000e+00> : vector<16xf32>
    %65 = vector.multi_reduction <add>, %64, %cst_35 [0] : vector<64x16xf32> to vector<16xf32>
    %66 = vector.shape_cast %65 : vector<16xf32> to vector<1x16xf32>
    %cst_36 = arith.constant 6.400000e+01 : f32
    %67 = vector.broadcast %cst_36 : f32 to vector<1x16xf32>
    %68 = arith.divf %66, %67 : vector<1x16xf32>
    %c0_37 = arith.constant 0 : index
    %c0_38 = arith.constant 0 : index
    %69 = vector.load %arg4[%c0_37, %c0_38] : memref<1x16xf32, #tpu.memory_space<vmem>>, vector<1x16xf32>
    %cst_39 = arith.constant 9.99999974E-6 : f32
    %70 = vector.broadcast %cst_39 : f32 to vector<1x16xf32>
    %71 = arith.addf %68, %70 : vector<1x16xf32>
    %72 = math.rsqrt %71 : vector<1x16xf32>
    %73 = arith.mulf %69, %72 : vector<1x16xf32>
    %74 = vector.broadcast %73 : vector<1x16xf32> to vector<64x16xf32>
    %75 = arith.mulf %63, %74 : vector<64x16xf32>
    %c0_40 = arith.constant 0 : index
    %c0_41 = arith.constant 0 : index
    %76 = vector.load %arg5[%c0_40, %c0_41] : memref<1x16xf32, #tpu.memory_space<vmem>>, vector<1x16xf32>
    %77 = vector.broadcast %76 : vector<1x16xf32> to vector<64x16xf32>
    %78 = arith.addf %75, %77 : vector<64x16xf32>
    %cst_42 = arith.constant 0.000000e+00 : f32
    %79 = vector.broadcast %cst_42 : f32 to vector<64x16xf32>
    %80 = arith.cmpf ogt, %78, %79 : vector<64x16xf32>
    %cst_43 = arith.constant 0.00999999977 : f32
    %81 = vector.broadcast %cst_43 : f32 to vector<64x16xf32>
    %82 = arith.mulf %81, %78 : vector<64x16xf32>
    %83 = arith.select %80, %78, %82 : vector<64x16xi1>, vector<64x16xf32>
    %84 = vector.shape_cast %83 : vector<64x16xf32> to vector<8x8x16xf32>
    %85 = arith.truncf %84 : vector<8x8x16xf32> to vector<8x8x16xbf16>
    %c0_44 = arith.constant 0 : index
    %c0_45 = arith.constant 0 : index
    %c0_46 = arith.constant 0 : index
    %c0_47 = arith.constant 0 : index
    %86 = vector.load %arg6[%c0_44, %c0_45, %c0_46, %c0_47] : memref<1x8x8x16xbf16, #tpu.memory_space<vmem>>, vector<1x8x8x16xbf16>
    %87 = vector.shape_cast %86 : vector<1x8x8x16xbf16> to vector<8x8x16xbf16>
    %88 = vector.shape_cast %85 : vector<8x8x16xbf16> to vector<1x8x8x16xbf16>
    tpu.vector_store %arg6[%c0_44, %c0_45, %c0_46, %c0_47], %88 {strides = array<i32>} : memref<1x8x8x16xbf16, #tpu.memory_space<vmem>>, vector<1x8x8x16xbf16>,
    return
  }
  func.func @transform_0(%arg0: i32, %arg1: i32) -> (i32, i32, i32, i32) {
    %c0_i32 = arith.constant 0 : i32
    %c0_i32_0 = arith.constant 0 : i32
    %c0_i32_1 = arith.constant 0 : i32
    %c0_i32_2 = arith.constant 0 : i32
    return %arg0, %c0_i32, %c0_i32_0, %c0_i32_1 : i32, i32, i32, i32
  }
  func.func @transform_1(%arg0: i32, %arg1: i32) -> (i32, i32, i32) {
    %c0_i32 = arith.constant 0 : i32
    %c0_i32_0 = arith.constant 0 : i32
    %c0_i32_1 = arith.constant 0 : i32
    return %c0_i32, %c0_i32_0, %arg1 : i32, i32, i32
  }
  func.func @transform_2(%arg0: i32, %arg1: i32) -> (i32, i32) {
    %c0_i32 = arith.constant 0 : i32
    %c0_i32_0 = arith.constant 0 : i32
    return %c0_i32, %arg1 : i32, i32
  }
  func.func @transform_3(%arg0: i32, %arg1: i32) -> (i32, i32) {
    %c0_i32 = arith.constant 0 : i32
    %c0_i32_0 = arith.constant 0 : i32
    return %c0_i32, %arg1 : i32, i32
  }
  func.func @transform_4(%arg0: i32, %arg1: i32) -> (i32, i32, i32, i32) {
    %c0_i32 = arith.constant 0 : i32
    %c0_i32_0 = arith.constant 0 : i32
    %c0_i32_1 = arith.constant 0 : i32
    return %arg0, %c0_i32, %c0_i32_0, %arg1 : i32, i32, i32, i32
  }
}

module attributes {stable_mosaic.version = 11 : i64} {
  func.func @_fused_conv_in_lrelu_kernel(%arg0: i32, %arg1: i32, %arg2: memref<1x5x5x16xbf16, #tpu.memory_space<vmem>>, %arg3: memref<1x5x5x16xbf16, #tpu.memory_space<vmem>>, %arg4: memref<1x5x5x16xbf16, #tpu.memory_space<vmem>>, %arg5: memref<1x5x5x16xbf16, #tpu.memory_space<vmem>>, %arg6: memref<9x16x32xbf16, #tpu.memory_space<vmem>>, %arg7: memref<1x32xf32, #tpu.memory_space<vmem>>, %arg8: memref<1x32xf32, #tpu.memory_space<vmem>>, %arg9: memref<1x4x4x32xbf16, #tpu.memory_space<vmem>>) attributes {dimension_semantics = [#tpu.dimension_semantics<parallel>, #tpu.dimension_semantics<parallel>], iteration_bounds = array<i64: 2, 1>, scalar_prefetch = 0 : i64, scratch_operands = 0 : i64, tpu.core_type = #tpu.core_type<tc>, window_params = [{transform_indices = @transform_0, window_bounds = array<i64: 1, 5, 5, 16>}, {transform_indices = @transform_1, window_bounds = array<i64: 1, 5, 5, 16>}, {transform_indices = @transform_2, window_bounds = array<i64: 1, 5, 5, 16>}, {transform_indices = @transform_3, window_bounds = array<i64: 1, 5, 5, 16>}, {transform_indices = @transform_4, window_bounds = array<i64: 9, 16, 32>}, {transform_indices = @transform_5, window_bounds = array<i64: 1, 32>}, {transform_indices = @transform_6, window_bounds = array<i64: 1, 32>}, {transform_indices = @transform_7, window_bounds = array<i64: 1, 4, 4, 32>}]} {
    %c0 = arith.constant 0 : index
    %c0_0 = arith.constant 0 : index
    %c0_1 = arith.constant 0 : index
    %c0_2 = arith.constant 0 : index
    %0 = vector.load %arg2[%c0, %c0_0, %c0_1, %c0_2] : memref<1x5x5x16xbf16, #tpu.memory_space<vmem>>, vector<1x5x5x16xbf16>
    %1 = vector.shape_cast %0 : vector<1x5x5x16xbf16> to vector<5x5x16xbf16>
    %c0_3 = arith.constant 0 : index
    %c0_4 = arith.constant 0 : index
    %c0_5 = arith.constant 0 : index
    %c0_6 = arith.constant 0 : index
    %2 = vector.load %arg3[%c0_3, %c0_4, %c0_5, %c0_6] : memref<1x5x5x16xbf16, #tpu.memory_space<vmem>>, vector<1x5x5x16xbf16>
    %3 = vector.shape_cast %2 : vector<1x5x5x16xbf16> to vector<5x5x16xbf16>
    %c0_7 = arith.constant 0 : index
    %c0_8 = arith.constant 0 : index
    %c0_9 = arith.constant 0 : index
    %c0_10 = arith.constant 0 : index
    %4 = vector.load %arg4[%c0_7, %c0_8, %c0_9, %c0_10] : memref<1x5x5x16xbf16, #tpu.memory_space<vmem>>, vector<1x5x5x16xbf16>
    %5 = vector.shape_cast %4 : vector<1x5x5x16xbf16> to vector<5x5x16xbf16>
    %c0_11 = arith.constant 0 : index
    %c0_12 = arith.constant 0 : index
    %c0_13 = arith.constant 0 : index
    %c0_14 = arith.constant 0 : index
    %6 = vector.load %arg5[%c0_11, %c0_12, %c0_13, %c0_14] : memref<1x5x5x16xbf16, #tpu.memory_space<vmem>>, vector<1x5x5x16xbf16>
    %7 = vector.shape_cast %6 : vector<1x5x5x16xbf16> to vector<5x5x16xbf16>
    %cst = arith.constant 0.000000e+00 : f32
    %8 = vector.broadcast %cst : f32 to vector<16x32xf32>
    %9 = vector.extract_strided_slice %1 {offsets = [0, 0, 0], sizes = [5, 4, 16], strides = [1, 1, 1]} : vector<5x5x16xbf16> to vector<5x4x16xbf16>
    %10 = vector.shape_cast %9 : vector<5x4x16xbf16> to vector<20x16xbf16>
    %11 = vector.extract_strided_slice %10 {offsets = [0, 0], sizes = [16, 16], strides = [1, 1]} : vector<20x16xbf16> to vector<16x16xbf16>
    %c0_15 = arith.constant 0 : index
    %c0_16 = arith.constant 0 : index
    %c0_17 = arith.constant 0 : index
    %12 = vector.load %arg6[%c0_15, %c0_16, %c0_17] : memref<9x16x32xbf16, #tpu.memory_space<vmem>>, vector<1x16x32xbf16>
    %13 = vector.shape_cast %12 : vector<1x16x32xbf16> to vector<16x32xbf16>
    %cst_18 = arith.constant dense<0.000000e+00> : vector<16x32xf32>
    %14 = tpu.matmul %11, %13, %cst_18 {dimension_numbers = #tpu.dot_dimension_numbers<[1], [0], [0], [1], [0, 0, 1, 1], [], []>} : vector<16x16xbf16>, vector<16x32xbf16>, vector<16x32xf32> -> vector<16x32xf32>
    %15 = arith.addf %8, %14 : vector<16x32xf32>
    %16 = vector.extract_strided_slice %10 {offsets = [4, 0], sizes = [16, 16], strides = [1, 1]} : vector<20x16xbf16> to vector<16x16xbf16>
    %c6 = arith.constant 6 : index
    %c0_19 = arith.constant 0 : index
    %c0_20 = arith.constant 0 : index
    %17 = vector.load %arg6[%c6, %c0_19, %c0_20] : memref<9x16x32xbf16, #tpu.memory_space<vmem>>, vector<1x16x32xbf16>
    %18 = vector.shape_cast %17 : vector<1x16x32xbf16> to vector<16x32xbf16>
    %cst_21 = arith.constant dense<0.000000e+00> : vector<16x32xf32>
    %19 = tpu.matmul %16, %18, %cst_21 {dimension_numbers = #tpu.dot_dimension_numbers<[1], [0], [0], [1], [0, 0, 1, 1], [], []>} : vector<16x16xbf16>, vector<16x32xbf16>, vector<16x32xf32> -> vector<16x32xf32>
    %20 = arith.addf %15, %19 : vector<16x32xf32>
    %21 = vector.extract_strided_slice %1 {offsets = [0, 1, 0], sizes = [5, 4, 16], strides = [1, 1, 1]} : vector<5x5x16xbf16> to vector<5x4x16xbf16>
    %22 = vector.shape_cast %21 : vector<5x4x16xbf16> to vector<20x16xbf16>
    %23 = vector.extract_strided_slice %22 {offsets = [0, 0], sizes = [16, 16], strides = [1, 1]} : vector<20x16xbf16> to vector<16x16xbf16>
    %c2 = arith.constant 2 : index
    %c0_22 = arith.constant 0 : index
    %c0_23 = arith.constant 0 : index
    %24 = vector.load %arg6[%c2, %c0_22, %c0_23] : memref<9x16x32xbf16, #tpu.memory_space<vmem>>, vector<1x16x32xbf16>
    %25 = vector.shape_cast %24 : vector<1x16x32xbf16> to vector<16x32xbf16>
    %cst_24 = arith.constant dense<0.000000e+00> : vector<16x32xf32>
    %26 = tpu.matmul %23, %25, %cst_24 {dimension_numbers = #tpu.dot_dimension_numbers<[1], [0], [0], [1], [0, 0, 1, 1], [], []>} : vector<16x16xbf16>, vector<16x32xbf16>, vector<16x32xf32> -> vector<16x32xf32>
    %27 = arith.addf %20, %26 : vector<16x32xf32>
    %28 = vector.extract_strided_slice %22 {offsets = [4, 0], sizes = [16, 16], strides = [1, 1]} : vector<20x16xbf16> to vector<16x16xbf16>
    %c8 = arith.constant 8 : index
    %c0_25 = arith.constant 0 : index
    %c0_26 = arith.constant 0 : index
    %29 = vector.load %arg6[%c8, %c0_25, %c0_26] : memref<9x16x32xbf16, #tpu.memory_space<vmem>>, vector<1x16x32xbf16>
    %30 = vector.shape_cast %29 : vector<1x16x32xbf16> to vector<16x32xbf16>
    %cst_27 = arith.constant dense<0.000000e+00> : vector<16x32xf32>
    %31 = tpu.matmul %28, %30, %cst_27 {dimension_numbers = #tpu.dot_dimension_numbers<[1], [0], [0], [1], [0, 0, 1, 1], [], []>} : vector<16x16xbf16>, vector<16x32xbf16>, vector<16x32xf32> -> vector<16x32xf32>
    %32 = arith.addf %27, %31 : vector<16x32xf32>
    %33 = vector.extract_strided_slice %3 {offsets = [0, 0, 0], sizes = [5, 4, 16], strides = [1, 1, 1]} : vector<5x5x16xbf16> to vector<5x4x16xbf16>
    %34 = vector.shape_cast %33 : vector<5x4x16xbf16> to vector<20x16xbf16>
    %35 = vector.extract_strided_slice %34 {offsets = [0, 0], sizes = [16, 16], strides = [1, 1]} : vector<20x16xbf16> to vector<16x16xbf16>
    %c1 = arith.constant 1 : index
    %c0_28 = arith.constant 0 : index
    %c0_29 = arith.constant 0 : index
    %36 = vector.load %arg6[%c1, %c0_28, %c0_29] : memref<9x16x32xbf16, #tpu.memory_space<vmem>>, vector<1x16x32xbf16>
    %37 = vector.shape_cast %36 : vector<1x16x32xbf16> to vector<16x32xbf16>
    %cst_30 = arith.constant dense<0.000000e+00> : vector<16x32xf32>
    %38 = tpu.matmul %35, %37, %cst_30 {dimension_numbers = #tpu.dot_dimension_numbers<[1], [0], [0], [1], [0, 0, 1, 1], [], []>} : vector<16x16xbf16>, vector<16x32xbf16>, vector<16x32xf32> -> vector<16x32xf32>
    %39 = arith.addf %32, %38 : vector<16x32xf32>
    %40 = vector.extract_strided_slice %34 {offsets = [4, 0], sizes = [16, 16], strides = [1, 1]} : vector<20x16xbf16> to vector<16x16xbf16>
    %c7 = arith.constant 7 : index
    %c0_31 = arith.constant 0 : index
    %c0_32 = arith.constant 0 : index
    %41 = vector.load %arg6[%c7, %c0_31, %c0_32] : memref<9x16x32xbf16, #tpu.memory_space<vmem>>, vector<1x16x32xbf16>
    %42 = vector.shape_cast %41 : vector<1x16x32xbf16> to vector<16x32xbf16>
    %cst_33 = arith.constant dense<0.000000e+00> : vector<16x32xf32>
    %43 = tpu.matmul %40, %42, %cst_33 {dimension_numbers = #tpu.dot_dimension_numbers<[1], [0], [0], [1], [0, 0, 1, 1], [], []>} : vector<16x16xbf16>, vector<16x32xbf16>, vector<16x32xf32> -> vector<16x32xf32>
    %44 = arith.addf %39, %43 : vector<16x32xf32>
    %45 = vector.extract_strided_slice %5 {offsets = [0, 0, 0], sizes = [5, 4, 16], strides = [1, 1, 1]} : vector<5x5x16xbf16> to vector<5x4x16xbf16>
    %46 = vector.shape_cast %45 : vector<5x4x16xbf16> to vector<20x16xbf16>
    %47 = vector.extract_strided_slice %46 {offsets = [0, 0], sizes = [16, 16], strides = [1, 1]} : vector<20x16xbf16> to vector<16x16xbf16>
    %c3 = arith.constant 3 : index
    %c0_34 = arith.constant 0 : index
    %c0_35 = arith.constant 0 : index
    %48 = vector.load %arg6[%c3, %c0_34, %c0_35] : memref<9x16x32xbf16, #tpu.memory_space<vmem>>, vector<1x16x32xbf16>
    %49 = vector.shape_cast %48 : vector<1x16x32xbf16> to vector<16x32xbf16>
    %cst_36 = arith.constant dense<0.000000e+00> : vector<16x32xf32>
    %50 = tpu.matmul %47, %49, %cst_36 {dimension_numbers = #tpu.dot_dimension_numbers<[1], [0], [0], [1], [0, 0, 1, 1], [], []>} : vector<16x16xbf16>, vector<16x32xbf16>, vector<16x32xf32> -> vector<16x32xf32>
    %51 = arith.addf %44, %50 : vector<16x32xf32>
    %52 = vector.extract_strided_slice %5 {offsets = [0, 1, 0], sizes = [5, 4, 16], strides = [1, 1, 1]} : vector<5x5x16xbf16> to vector<5x4x16xbf16>
    %53 = vector.shape_cast %52 : vector<5x4x16xbf16> to vector<20x16xbf16>
    %54 = vector.extract_strided_slice %53 {offsets = [0, 0], sizes = [16, 16], strides = [1, 1]} : vector<20x16xbf16> to vector<16x16xbf16>
    %c5 = arith.constant 5 : index
    %c0_37 = arith.constant 0 : index
    %c0_38 = arith.constant 0 : index
    %55 = vector.load %arg6[%c5, %c0_37, %c0_38] : memref<9x16x32xbf16, #tpu.memory_space<vmem>>, vector<1x16x32xbf16>
    %56 = vector.shape_cast %55 : vector<1x16x32xbf16> to vector<16x32xbf16>
    %cst_39 = arith.constant dense<0.000000e+00> : vector<16x32xf32>
    %57 = tpu.matmul %54, %56, %cst_39 {dimension_numbers = #tpu.dot_dimension_numbers<[1], [0], [0], [1], [0, 0, 1, 1], [], []>} : vector<16x16xbf16>, vector<16x32xbf16>, vector<16x32xf32> -> vector<16x32xf32>
    %58 = arith.addf %51, %57 : vector<16x32xf32>
    %59 = vector.extract_strided_slice %7 {offsets = [0, 0, 0], sizes = [5, 4, 16], strides = [1, 1, 1]} : vector<5x5x16xbf16> to vector<5x4x16xbf16>
    %60 = vector.shape_cast %59 : vector<5x4x16xbf16> to vector<20x16xbf16>
    %61 = vector.extract_strided_slice %60 {offsets = [0, 0], sizes = [16, 16], strides = [1, 1]} : vector<20x16xbf16> to vector<16x16xbf16>
    %c4 = arith.constant 4 : index
    %c0_40 = arith.constant 0 : index
    %c0_41 = arith.constant 0 : index
    %62 = vector.load %arg6[%c4, %c0_40, %c0_41] : memref<9x16x32xbf16, #tpu.memory_space<vmem>>, vector<1x16x32xbf16>
    %63 = vector.shape_cast %62 : vector<1x16x32xbf16> to vector<16x32xbf16>
    %cst_42 = arith.constant dense<0.000000e+00> : vector<16x32xf32>
    %64 = tpu.matmul %61, %63, %cst_42 {dimension_numbers = #tpu.dot_dimension_numbers<[1], [0], [0], [1], [0, 0, 1, 1], [], []>} : vector<16x16xbf16>, vector<16x32xbf16>, vector<16x32xf32> -> vector<16x32xf32>
    %65 = arith.addf %58, %64 : vector<16x32xf32>
    %cst_43 = arith.constant dense<0.000000e+00> : vector<32xf32>
    %66 = vector.multi_reduction <add>, %65, %cst_43 [0] : vector<16x32xf32> to vector<32xf32>
    %67 = vector.shape_cast %66 : vector<32xf32> to vector<1x32xf32>
    %cst_44 = arith.constant 1.600000e+01 : f32
    %68 = vector.broadcast %cst_44 : f32 to vector<1x32xf32>
    %69 = arith.divf %67, %68 : vector<1x32xf32>
    %70 = vector.broadcast %69 : vector<1x32xf32> to vector<16x32xf32>
    %71 = arith.subf %65, %70 : vector<16x32xf32>
    %72 = arith.mulf %71, %71 : vector<16x32xf32>
    %cst_45 = arith.constant dense<0.000000e+00> : vector<32xf32>
    %73 = vector.multi_reduction <add>, %72, %cst_45 [0] : vector<16x32xf32> to vector<32xf32>
    %74 = vector.shape_cast %73 : vector<32xf32> to vector<1x32xf32>
    %cst_46 = arith.constant 1.600000e+01 : f32
    %75 = vector.broadcast %cst_46 : f32 to vector<1x32xf32>
    %76 = arith.divf %74, %75 : vector<1x32xf32>
    %c0_47 = arith.constant 0 : index
    %c0_48 = arith.constant 0 : index
    %77 = vector.load %arg7[%c0_47, %c0_48] : memref<1x32xf32, #tpu.memory_space<vmem>>, vector<1x32xf32>
    %cst_49 = arith.constant 9.99999974E-6 : f32
    %78 = vector.broadcast %cst_49 : f32 to vector<1x32xf32>
    %79 = arith.addf %76, %78 : vector<1x32xf32>
    %80 = math.rsqrt %79 : vector<1x32xf32>
    %81 = arith.mulf %77, %80 : vector<1x32xf32>
    %82 = vector.broadcast %81 : vector<1x32xf32> to vector<16x32xf32>
    %83 = arith.mulf %71, %82 : vector<16x32xf32>
    %c0_50 = arith.constant 0 : index
    %c0_51 = arith.constant 0 : index
    %84 = vector.load %arg8[%c0_50, %c0_51] : memref<1x32xf32, #tpu.memory_space<vmem>>, vector<1x32xf32>
    %85 = vector.broadcast %84 : vector<1x32xf32> to vector<16x32xf32>
    %86 = arith.addf %83, %85 : vector<16x32xf32>
    %cst_52 = arith.constant 0.000000e+00 : f32
    %87 = vector.broadcast %cst_52 : f32 to vector<16x32xf32>
    %88 = arith.cmpf ogt, %86, %87 : vector<16x32xf32>
    %cst_53 = arith.constant 0.00999999977 : f32
    %89 = vector.broadcast %cst_53 : f32 to vector<16x32xf32>
    %90 = arith.mulf %89, %86 : vector<16x32xf32>
    %91 = arith.select %88, %86, %90 : vector<16x32xi1>, vector<16x32xf32>
    %92 = vector.shape_cast %91 : vector<16x32xf32> to vector<4x4x32xf32>
    %93 = arith.truncf %92 : vector<4x4x32xf32> to vector<4x4x32xbf16>
    %c0_54 = arith.constant 0 : index
    %c0_55 = arith.constant 0 : index
    %c0_56 = arith.constant 0 : index
    %c0_57 = arith.constant 0 : index
    %94 = vector.load %arg9[%c0_54, %c0_55, %c0_56, %c0_57] : memref<1x4x4x32xbf16, #tpu.memory_space<vmem>>, vector<1x4x4x32xbf16>
    %95 = vector.shape_cast %94 : vector<1x4x4x32xbf16> to vector<4x4x32xbf16>
    %96 = vector.shape_cast %93 : vector<4x4x32xbf16> to vector<1x4x4x32xbf16>
    tpu.vector_store %arg9[%c0_54, %c0_55, %c0_56, %c0_57], %96 {strides = array<i32>} : memref<1x4x4x32xbf16, #tpu.memory_space<vmem>>, vector<1x4x4x32xbf16>,
    return
  }
  func.func @transform_0(%arg0: i32, %arg1: i32) -> (i32, i32, i32, i32) {
    %c0_i32 = arith.constant 0 : i32
    %c0_i32_0 = arith.constant 0 : i32
    %c0_i32_1 = arith.constant 0 : i32
    %c0_i32_2 = arith.constant 0 : i32
    return %arg0, %c0_i32, %c0_i32_0, %c0_i32_1 : i32, i32, i32, i32
  }
  func.func @transform_1(%arg0: i32, %arg1: i32) -> (i32, i32, i32, i32) {
    %c0_i32 = arith.constant 0 : i32
    %c0_i32_0 = arith.constant 0 : i32
    %c0_i32_1 = arith.constant 0 : i32
    %c0_i32_2 = arith.constant 0 : i32
    return %arg0, %c0_i32, %c0_i32_0, %c0_i32_1 : i32, i32, i32, i32
  }
  func.func @transform_2(%arg0: i32, %arg1: i32) -> (i32, i32, i32, i32) {
    %c0_i32 = arith.constant 0 : i32
    %c0_i32_0 = arith.constant 0 : i32
    %c0_i32_1 = arith.constant 0 : i32
    %c0_i32_2 = arith.constant 0 : i32
    return %arg0, %c0_i32, %c0_i32_0, %c0_i32_1 : i32, i32, i32, i32
  }
  func.func @transform_3(%arg0: i32, %arg1: i32) -> (i32, i32, i32, i32) {
    %c0_i32 = arith.constant 0 : i32
    %c0_i32_0 = arith.constant 0 : i32
    %c0_i32_1 = arith.constant 0 : i32
    %c0_i32_2 = arith.constant 0 : i32
    return %arg0, %c0_i32, %c0_i32_0, %c0_i32_1 : i32, i32, i32, i32
  }
  func.func @transform_4(%arg0: i32, %arg1: i32) -> (i32, i32, i32) {
    %c0_i32 = arith.constant 0 : i32
    %c0_i32_0 = arith.constant 0 : i32
    %c0_i32_1 = arith.constant 0 : i32
    return %c0_i32, %c0_i32_0, %arg1 : i32, i32, i32
  }
  func.func @transform_5(%arg0: i32, %arg1: i32) -> (i32, i32) {
    %c0_i32 = arith.constant 0 : i32
    %c0_i32_0 = arith.constant 0 : i32
    return %c0_i32, %arg1 : i32, i32
  }
  func.func @transform_6(%arg0: i32, %arg1: i32) -> (i32, i32) {
    %c0_i32 = arith.constant 0 : i32
    %c0_i32_0 = arith.constant 0 : i32
    return %c0_i32, %arg1 : i32, i32
  }
  func.func @transform_7(%arg0: i32, %arg1: i32) -> (i32, i32, i32, i32) {
    %c0_i32 = arith.constant 0 : i32
    %c0_i32_0 = arith.constant 0 : i32
    %c0_i32_1 = arith.constant 0 : i32
    return %arg0, %c0_i32, %c0_i32_0, %arg1 : i32, i32, i32, i32
  }
}

module attributes {stable_mosaic.version = 11 : i64} {
  func.func @_fused_conv_in_lrelu_kernel(%arg0: i32, %arg1: i32, %arg2: memref<1x4x4x32xbf16, #tpu.memory_space<vmem>>, %arg3: memref<9x32x32xbf16, #tpu.memory_space<vmem>>, %arg4: memref<1x32xf32, #tpu.memory_space<vmem>>, %arg5: memref<1x32xf32, #tpu.memory_space<vmem>>, %arg6: memref<1x4x4x32xbf16, #tpu.memory_space<vmem>>) attributes {dimension_semantics = [#tpu.dimension_semantics<parallel>, #tpu.dimension_semantics<parallel>], iteration_bounds = array<i64: 2, 1>, scalar_prefetch = 0 : i64, scratch_operands = 0 : i64, tpu.core_type = #tpu.core_type<tc>, window_params = [{transform_indices = @transform_0, window_bounds = array<i64: 1, 4, 4, 32>}, {transform_indices = @transform_1, window_bounds = array<i64: 9, 32, 32>}, {transform_indices = @transform_2, window_bounds = array<i64: 1, 32>}, {transform_indices = @transform_3, window_bounds = array<i64: 1, 32>}, {transform_indices = @transform_4, window_bounds = array<i64: 1, 4, 4, 32>}]} {
    %c0 = arith.constant 0 : index
    %c0_0 = arith.constant 0 : index
    %c0_1 = arith.constant 0 : index
    %c0_2 = arith.constant 0 : index
    %0 = vector.load %arg2[%c0, %c0_0, %c0_1, %c0_2] : memref<1x4x4x32xbf16, #tpu.memory_space<vmem>>, vector<1x4x4x32xbf16>
    %1 = vector.shape_cast %0 : vector<1x4x4x32xbf16> to vector<4x4x32xbf16>
    %cst = arith.constant 0.000000e+00 : bf16
    %2 = vector.broadcast %cst : bf16 to vector<4x1x32xbf16>
    %cst_3 = arith.constant 0.000000e+00 : bf16
    %3 = vector.broadcast %cst_3 : bf16 to vector<1x6x32xbf16>
    %4 = tpu.concatenate %2, %1, %2 in 1 : vector<4x1x32xbf16>, vector<4x4x32xbf16>, vector<4x1x32xbf16> -> vector<4x6x32xbf16>
    %5 = tpu.concatenate %3, %4, %3 in 0 : vector<1x6x32xbf16>, vector<4x6x32xbf16>, vector<1x6x32xbf16> -> vector<6x6x32xbf16>
    %cst_4 = arith.constant 0.000000e+00 : f32
    %6 = vector.broadcast %cst_4 : f32 to vector<16x32xf32>
    %7 = vector.extract_strided_slice %5 {offsets = [0, 0, 0], sizes = [6, 4, 32], strides = [1, 1, 1]} : vector<6x6x32xbf16> to vector<6x4x32xbf16>
    %8 = vector.shape_cast %7 : vector<6x4x32xbf16> to vector<24x32xbf16>
    %9 = vector.extract_strided_slice %8 {offsets = [0, 0], sizes = [16, 32], strides = [1, 1]} : vector<24x32xbf16> to vector<16x32xbf16>
    %c0_5 = arith.constant 0 : index
    %c0_6 = arith.constant 0 : index
    %c0_7 = arith.constant 0 : index
    %10 = vector.load %arg3[%c0_5, %c0_6, %c0_7] : memref<9x32x32xbf16, #tpu.memory_space<vmem>>, vector<1x32x32xbf16>
    %11 = vector.shape_cast %10 : vector<1x32x32xbf16> to vector<32x32xbf16>
    %cst_8 = arith.constant dense<0.000000e+00> : vector<16x32xf32>
    %12 = tpu.matmul %9, %11, %cst_8 {dimension_numbers = #tpu.dot_dimension_numbers<[1], [0], [0], [1], [0, 0, 1, 1], [], []>} : vector<16x32xbf16>, vector<32x32xbf16>, vector<16x32xf32> -> vector<16x32xf32>
    %13 = arith.addf %6, %12 : vector<16x32xf32>
    %14 = vector.extract_strided_slice %8 {offsets = [4, 0], sizes = [16, 32], strides = [1, 1]} : vector<24x32xbf16> to vector<16x32xbf16>
    %c3 = arith.constant 3 : index
    %c0_9 = arith.constant 0 : index
    %c0_10 = arith.constant 0 : index
    %15 = vector.load %arg3[%c3, %c0_9, %c0_10] : memref<9x32x32xbf16, #tpu.memory_space<vmem>>, vector<1x32x32xbf16>
    %16 = vector.shape_cast %15 : vector<1x32x32xbf16> to vector<32x32xbf16>
    %cst_11 = arith.constant dense<0.000000e+00> : vector<16x32xf32>
    %17 = tpu.matmul %14, %16, %cst_11 {dimension_numbers = #tpu.dot_dimension_numbers<[1], [0], [0], [1], [0, 0, 1, 1], [], []>} : vector<16x32xbf16>, vector<32x32xbf16>, vector<16x32xf32> -> vector<16x32xf32>
    %18 = arith.addf %13, %17 : vector<16x32xf32>
    %19 = vector.extract_strided_slice %8 {offsets = [8, 0], sizes = [16, 32], strides = [1, 1]} : vector<24x32xbf16> to vector<16x32xbf16>
    %c6 = arith.constant 6 : index
    %c0_12 = arith.constant 0 : index
    %c0_13 = arith.constant 0 : index
    %20 = vector.load %arg3[%c6, %c0_12, %c0_13] : memref<9x32x32xbf16, #tpu.memory_space<vmem>>, vector<1x32x32xbf16>
    %21 = vector.shape_cast %20 : vector<1x32x32xbf16> to vector<32x32xbf16>
    %cst_14 = arith.constant dense<0.000000e+00> : vector<16x32xf32>
    %22 = tpu.matmul %19, %21, %cst_14 {dimension_numbers = #tpu.dot_dimension_numbers<[1], [0], [0], [1], [0, 0, 1, 1], [], []>} : vector<16x32xbf16>, vector<32x32xbf16>, vector<16x32xf32> -> vector<16x32xf32>
    %23 = arith.addf %18, %22 : vector<16x32xf32>
    %24 = vector.extract_strided_slice %5 {offsets = [0, 1, 0], sizes = [6, 4, 32], strides = [1, 1, 1]} : vector<6x6x32xbf16> to vector<6x4x32xbf16>
    %25 = vector.shape_cast %24 : vector<6x4x32xbf16> to vector<24x32xbf16>
    %26 = vector.extract_strided_slice %25 {offsets = [0, 0], sizes = [16, 32], strides = [1, 1]} : vector<24x32xbf16> to vector<16x32xbf16>
    %c1 = arith.constant 1 : index
    %c0_15 = arith.constant 0 : index
    %c0_16 = arith.constant 0 : index
    %27 = vector.load %arg3[%c1, %c0_15, %c0_16] : memref<9x32x32xbf16, #tpu.memory_space<vmem>>, vector<1x32x32xbf16>
    %28 = vector.shape_cast %27 : vector<1x32x32xbf16> to vector<32x32xbf16>
    %cst_17 = arith.constant dense<0.000000e+00> : vector<16x32xf32>
    %29 = tpu.matmul %26, %28, %cst_17 {dimension_numbers = #tpu.dot_dimension_numbers<[1], [0], [0], [1], [0, 0, 1, 1], [], []>} : vector<16x32xbf16>, vector<32x32xbf16>, vector<16x32xf32> -> vector<16x32xf32>
    %30 = arith.addf %23, %29 : vector<16x32xf32>
    %31 = vector.extract_strided_slice %25 {offsets = [4, 0], sizes = [16, 32], strides = [1, 1]} : vector<24x32xbf16> to vector<16x32xbf16>
    %c4 = arith.constant 4 : index
    %c0_18 = arith.constant 0 : index
    %c0_19 = arith.constant 0 : index
    %32 = vector.load %arg3[%c4, %c0_18, %c0_19] : memref<9x32x32xbf16, #tpu.memory_space<vmem>>, vector<1x32x32xbf16>
    %33 = vector.shape_cast %32 : vector<1x32x32xbf16> to vector<32x32xbf16>
    %cst_20 = arith.constant dense<0.000000e+00> : vector<16x32xf32>
    %34 = tpu.matmul %31, %33, %cst_20 {dimension_numbers = #tpu.dot_dimension_numbers<[1], [0], [0], [1], [0, 0, 1, 1], [], []>} : vector<16x32xbf16>, vector<32x32xbf16>, vector<16x32xf32> -> vector<16x32xf32>
    %35 = arith.addf %30, %34 : vector<16x32xf32>
    %36 = vector.extract_strided_slice %25 {offsets = [8, 0], sizes = [16, 32], strides = [1, 1]} : vector<24x32xbf16> to vector<16x32xbf16>
    %c7 = arith.constant 7 : index
    %c0_21 = arith.constant 0 : index
    %c0_22 = arith.constant 0 : index
    %37 = vector.load %arg3[%c7, %c0_21, %c0_22] : memref<9x32x32xbf16, #tpu.memory_space<vmem>>, vector<1x32x32xbf16>
    %38 = vector.shape_cast %37 : vector<1x32x32xbf16> to vector<32x32xbf16>
    %cst_23 = arith.constant dense<0.000000e+00> : vector<16x32xf32>
    %39 = tpu.matmul %36, %38, %cst_23 {dimension_numbers = #tpu.dot_dimension_numbers<[1], [0], [0], [1], [0, 0, 1, 1], [], []>} : vector<16x32xbf16>, vector<32x32xbf16>, vector<16x32xf32> -> vector<16x32xf32>
    %40 = arith.addf %35, %39 : vector<16x32xf32>
    %41 = vector.extract_strided_slice %5 {offsets = [0, 2, 0], sizes = [6, 4, 32], strides = [1, 1, 1]} : vector<6x6x32xbf16> to vector<6x4x32xbf16>
    %42 = vector.shape_cast %41 : vector<6x4x32xbf16> to vector<24x32xbf16>
    %43 = vector.extract_strided_slice %42 {offsets = [0, 0], sizes = [16, 32], strides = [1, 1]} : vector<24x32xbf16> to vector<16x32xbf16>
    %c2 = arith.constant 2 : index
    %c0_24 = arith.constant 0 : index
    %c0_25 = arith.constant 0 : index
    %44 = vector.load %arg3[%c2, %c0_24, %c0_25] : memref<9x32x32xbf16, #tpu.memory_space<vmem>>, vector<1x32x32xbf16>
    %45 = vector.shape_cast %44 : vector<1x32x32xbf16> to vector<32x32xbf16>
    %cst_26 = arith.constant dense<0.000000e+00> : vector<16x32xf32>
    %46 = tpu.matmul %43, %45, %cst_26 {dimension_numbers = #tpu.dot_dimension_numbers<[1], [0], [0], [1], [0, 0, 1, 1], [], []>} : vector<16x32xbf16>, vector<32x32xbf16>, vector<16x32xf32> -> vector<16x32xf32>
    %47 = arith.addf %40, %46 : vector<16x32xf32>
    %48 = vector.extract_strided_slice %42 {offsets = [4, 0], sizes = [16, 32], strides = [1, 1]} : vector<24x32xbf16> to vector<16x32xbf16>
    %c5 = arith.constant 5 : index
    %c0_27 = arith.constant 0 : index
    %c0_28 = arith.constant 0 : index
    %49 = vector.load %arg3[%c5, %c0_27, %c0_28] : memref<9x32x32xbf16, #tpu.memory_space<vmem>>, vector<1x32x32xbf16>
    %50 = vector.shape_cast %49 : vector<1x32x32xbf16> to vector<32x32xbf16>
    %cst_29 = arith.constant dense<0.000000e+00> : vector<16x32xf32>
    %51 = tpu.matmul %48, %50, %cst_29 {dimension_numbers = #tpu.dot_dimension_numbers<[1], [0], [0], [1], [0, 0, 1, 1], [], []>} : vector<16x32xbf16>, vector<32x32xbf16>, vector<16x32xf32> -> vector<16x32xf32>
    %52 = arith.addf %47, %51 : vector<16x32xf32>
    %53 = vector.extract_strided_slice %42 {offsets = [8, 0], sizes = [16, 32], strides = [1, 1]} : vector<24x32xbf16> to vector<16x32xbf16>
    %c8 = arith.constant 8 : index
    %c0_30 = arith.constant 0 : index
    %c0_31 = arith.constant 0 : index
    %54 = vector.load %arg3[%c8, %c0_30, %c0_31] : memref<9x32x32xbf16, #tpu.memory_space<vmem>>, vector<1x32x32xbf16>
    %55 = vector.shape_cast %54 : vector<1x32x32xbf16> to vector<32x32xbf16>
    %cst_32 = arith.constant dense<0.000000e+00> : vector<16x32xf32>
    %56 = tpu.matmul %53, %55, %cst_32 {dimension_numbers = #tpu.dot_dimension_numbers<[1], [0], [0], [1], [0, 0, 1, 1], [], []>} : vector<16x32xbf16>, vector<32x32xbf16>, vector<16x32xf32> -> vector<16x32xf32>
    %57 = arith.addf %52, %56 : vector<16x32xf32>
    %cst_33 = arith.constant dense<0.000000e+00> : vector<32xf32>
    %58 = vector.multi_reduction <add>, %57, %cst_33 [0] : vector<16x32xf32> to vector<32xf32>
    %59 = vector.shape_cast %58 : vector<32xf32> to vector<1x32xf32>
    %cst_34 = arith.constant 1.600000e+01 : f32
    %60 = vector.broadcast %cst_34 : f32 to vector<1x32xf32>
    %61 = arith.divf %59, %60 : vector<1x32xf32>
    %62 = vector.broadcast %61 : vector<1x32xf32> to vector<16x32xf32>
    %63 = arith.subf %57, %62 : vector<16x32xf32>
    %64 = arith.mulf %63, %63 : vector<16x32xf32>
    %cst_35 = arith.constant dense<0.000000e+00> : vector<32xf32>
    %65 = vector.multi_reduction <add>, %64, %cst_35 [0] : vector<16x32xf32> to vector<32xf32>
    %66 = vector.shape_cast %65 : vector<32xf32> to vector<1x32xf32>
    %cst_36 = arith.constant 1.600000e+01 : f32
    %67 = vector.broadcast %cst_36 : f32 to vector<1x32xf32>
    %68 = arith.divf %66, %67 : vector<1x32xf32>
    %c0_37 = arith.constant 0 : index
    %c0_38 = arith.constant 0 : index
    %69 = vector.load %arg4[%c0_37, %c0_38] : memref<1x32xf32, #tpu.memory_space<vmem>>, vector<1x32xf32>
    %cst_39 = arith.constant 9.99999974E-6 : f32
    %70 = vector.broadcast %cst_39 : f32 to vector<1x32xf32>
    %71 = arith.addf %68, %70 : vector<1x32xf32>
    %72 = math.rsqrt %71 : vector<1x32xf32>
    %73 = arith.mulf %69, %72 : vector<1x32xf32>
    %74 = vector.broadcast %73 : vector<1x32xf32> to vector<16x32xf32>
    %75 = arith.mulf %63, %74 : vector<16x32xf32>
    %c0_40 = arith.constant 0 : index
    %c0_41 = arith.constant 0 : index
    %76 = vector.load %arg5[%c0_40, %c0_41] : memref<1x32xf32, #tpu.memory_space<vmem>>, vector<1x32xf32>
    %77 = vector.broadcast %76 : vector<1x32xf32> to vector<16x32xf32>
    %78 = arith.addf %75, %77 : vector<16x32xf32>
    %cst_42 = arith.constant 0.000000e+00 : f32
    %79 = vector.broadcast %cst_42 : f32 to vector<16x32xf32>
    %80 = arith.cmpf ogt, %78, %79 : vector<16x32xf32>
    %cst_43 = arith.constant 0.00999999977 : f32
    %81 = vector.broadcast %cst_43 : f32 to vector<16x32xf32>
    %82 = arith.mulf %81, %78 : vector<16x32xf32>
    %83 = arith.select %80, %78, %82 : vector<16x32xi1>, vector<16x32xf32>
    %84 = vector.shape_cast %83 : vector<16x32xf32> to vector<4x4x32xf32>
    %85 = arith.truncf %84 : vector<4x4x32xf32> to vector<4x4x32xbf16>
    %c0_44 = arith.constant 0 : index
    %c0_45 = arith.constant 0 : index
    %c0_46 = arith.constant 0 : index
    %c0_47 = arith.constant 0 : index
    %86 = vector.load %arg6[%c0_44, %c0_45, %c0_46, %c0_47] : memref<1x4x4x32xbf16, #tpu.memory_space<vmem>>, vector<1x4x4x32xbf16>
    %87 = vector.shape_cast %86 : vector<1x4x4x32xbf16> to vector<4x4x32xbf16>
    %88 = vector.shape_cast %85 : vector<4x4x32xbf16> to vector<1x4x4x32xbf16>
    tpu.vector_store %arg6[%c0_44, %c0_45, %c0_46, %c0_47], %88 {strides = array<i32>} : memref<1x4x4x32xbf16, #tpu.memory_space<vmem>>, vector<1x4x4x32xbf16>,
    return
  }
  func.func @transform_0(%arg0: i32, %arg1: i32) -> (i32, i32, i32, i32) {
    %c0_i32 = arith.constant 0 : i32
    %c0_i32_0 = arith.constant 0 : i32
    %c0_i32_1 = arith.constant 0 : i32
    %c0_i32_2 = arith.constant 0 : i32
    return %arg0, %c0_i32, %c0_i32_0, %c0_i32_1 : i32, i32, i32, i32
  }
  func.func @transform_1(%arg0: i32, %arg1: i32) -> (i32, i32, i32) {
    %c0_i32 = arith.constant 0 : i32
    %c0_i32_0 = arith.constant 0 : i32
    %c0_i32_1 = arith.constant 0 : i32
    return %c0_i32, %c0_i32_0, %arg1 : i32, i32, i32
  }
  func.func @transform_2(%arg0: i32, %arg1: i32) -> (i32, i32) {
    %c0_i32 = arith.constant 0 : i32
    %c0_i32_0 = arith.constant 0 : i32
    return %c0_i32, %arg1 : i32, i32
  }
  func.func @transform_3(%arg0: i32, %arg1: i32) -> (i32, i32) {
    %c0_i32 = arith.constant 0 : i32
    %c0_i32_0 = arith.constant 0 : i32
    return %c0_i32, %arg1 : i32, i32
  }
  func.func @transform_4(%arg0: i32, %arg1: i32) -> (i32, i32, i32, i32) {
    %c0_i32 = arith.constant 0 : i32
    %c0_i32_0 = arith.constant 0 : i32
    %c0_i32_1 = arith.constant 0 : i32
    return %arg0, %c0_i32, %c0_i32_0, %arg1 : i32, i32, i32, i32
  }
}

</mosaic_0001>

<bundles_post_ra>
// kernel: _lambda_.9
= control target key start
LH: loop header
LB: loop body
LE: loop exit
PB: predicated region body
PF: predicated region fallthrough
CT: control target
= control target key end

     0   :  { %s1606_s15 = smov 0   ;;  %s1608_s16 = smov 0   ;;  %s2031_s0 = inlined_call_operand.vmem [shape: bf16[2,8,8,16], index: 0, kind: input, shape index: {}]   ;;  %s2032_s1 = inlined_call_operand.vmem [shape: bf16[9,16,16], index: 1, kind: input, shape index: {}]   ;;  %s2033_s2 = inlined_call_operand.vmem [shape: f32[1,16], index: 2, kind: input, shape index: {}]   ;;  %s2034_s3 = inlined_call_operand.vmem [shape: f32[1,16], index: 3, kind: input, shape index: {}]   ;;  %s2035_s4 = inlined_call_operand.vmem [shape: bf16[2,8,8,16], index: 4, kind: output, shape index: {}]  }
   0x1   :  { %s1610_s17 = smov 0  }
   0x2 LB: > { %s26_s18 = sadd.s32 1, %s1573_s16  ;;  %p1387_p0 = scmp.ge.s32.totalorder %s1577_s17, 1  ;;  %s1577_s17 = sphi %s1610_s17, %s14_s17   ;;  %s1573_s16 = sphi %s1608_s16, %s2045_s16   ;;  %s1569_s15 = sphi %s1606_s15, %s2044_s15  }
   0x3   : > { %p28_p1 = scmp.ge.s32.totalorder %s26_s18, 2  ;;  %p201_p2 = scmp.lt.s32.totalorder %s1577_s17, 3 }
   0x5   : > { %s2047_s18 = smov (%p28_p1, %s26_s18), 0  ;;  %p202_p3 = pnand %p1387_p0, %p201_p2 }
   0x6   : > { %p240_p4 = scmp.lt.s32.totalorder (!%p202_p3), %s1569_s15, 1 }
   0x7   : > { %205 = sbr.rel (%p202_p3) target bundleno = 403 (0x193), region = 36 }
   0xc   : > { %v1494_v0 = vld [vmem:[%s2032_s1 + $0x18] sm:$0xff]  ;;  %v1495_v1 = vld [vmem:[%s2032_s1 + $0x30] sm:$0xff]  ;;  %s2049_s15 = smov (!%p240_p4, %s1569_s15), 1  ;;  %vm360_vm0 = vcmask 1040384   ;;  %vm361_vm1 = vsmask.f32 256 }
   0xd   : > { %1521 = vmatpush.bf16.msra.mxu1 %v1494_v0  ;;  %1522 = vmatpush.bf16.msra.mxu2 %v1494_v0  ;;  %s1491_s23 = sshll.u32 %s2049_s15, 5  ;;  %vm371_vm2 = vcmask 1044480   ;;  %v1496_v17 = vld [vmem:[%s2032_s1 + $0x8] sm:$0xff]  ;;  %v1493_v18 = vld [vmem:[%s2032_s1] sm:$0xff]  ;;  %vm372_vm3 = vsmask.f32 4352  ;;  %vm1652_vm4 = vmand %vm360_vm0, %vm361_vm1 }
   0xe   : > { %1523 = vmatpush.bf16.msra.mxu3 %v1494_v0  ;;  %433 = vmatpush.bf16.msra.mxu0 %v1494_v0  ;;  %s244_s26 = scalar_lea.vmem %s2031_s0, %s1491_s23  ;;  %v1497_v19 = vld [vmem:[%s2032_s1 + $0x20] sm:$0xff]  ;;  %vm1658_vm5 = vmand %vm371_vm2, %vm372_vm3  ;;  %vm413_vm6 = vcmask 130048   ;;  %vm585_vm7 = vsmask.f32 3328  ;;  %vm586_vm8 = vsmask.f32 7440 }
   0xf   : > { %v1518_v2 = vld [vmem:[%s244_s26 + $0x8] sm:$0xff]   ;;  %v1519_v3 = vld [vmem:[%s244_s26 + $0x10] sm:$0xff]   ;;  %v1520_v4 = vld [vmem:[%s244_s26 + $0x18] sm:$0xff]   ;;  %vm897_vm10 = vcmask 1042432   ;;  %vm898_vm11 = vcmask 1046532   ;;  %vm1254_vm1 = vcmask 125952  }
  0x10   : > { %v1508_v5 = vunpack.c.l.b16 %v1518_v2  ;;  %v1509_v6 = vunpack.c.h.b16 %v1518_v2  ;;  %v1512_v7 = vunpack.c.l.b16 %v1519_v3  ;;  %v1513_v8 = vunpack.c.h.b16 %v1519_v3  ;;  %v1638_v9 = vld [vmem:[%s244_s26] sm:$0xff]   ;;  %vm1774_vm9 = vmor %vm585_vm7, %vm586_vm8  ;;  %s262_s26 = scalar_lea.vmem %s2035_s4, %s1491_s23 }
  0x11   : > { %528 = vmatpush.bf16.msrb.mxu2 %v1495_v1  ;;  %v1516_v10 = vunpack.c.l.b16 %v1520_v4  ;;  %v1517_v11 = vunpack.c.h.b16 %v1520_v4  ;;  %v1504_v12 = vunpack.c.l.b16 %v1638_v9  ;;  %486 = vmatpush.bf16.msrb.mxu1 %v1493_v18  ;;  %v1505_v57 = vunpack.c.h.b16 %v1638_v9  ;;  %v1501_v41 = vld [vmem:[%s2032_s1 + $0x40] sm:$0xff]  ;;  %vm1868_vm12 = vmor %vm897_vm10, %vm898_vm11 }
  0x12   : > { %v290_v13 = vpack.c.b16 %v1508_v5, %v1508_v5  ;;  %v291_v14 = vpack.c.b16 %v1509_v6, %v1509_v6  ;;  %v292_v15 = vpack.c.b16 %v1512_v7, %v1512_v7  ;;  %v293_v16 = vpack.c.b16 %v1513_v8, %v1513_v8  ;;  %754 = vmatpush.bf16.msrb.mxu3 %v1496_v17  ;;  %v1499_v7 = vld [vmem:[%s2032_s1 + $0x10] sm:$0xff]  ;;  %v1498_v8 = vld [vmem:[%s2032_s1 + $0x38] sm:$0xff] }
  0x13   : > { %v294_v20 = vpack.c.b16 %v1516_v10, %v1516_v10  ;;  %v295_v21 = vpack.c.b16 %v1517_v11, %v1517_v11  ;;  %v288_v22 = vpack.c.b16 %v1504_v12, %v1504_v12  ;;  %817 = vmatpush.bf16.msrb.mxu0 %v1497_v19  ;;  %v1579_v3 = vmov 0  }
  0x14   : > { %v311_v23 = vshrl.u32 %v290_v13, 16  ;;  %v314_v24 = vshll.u32 %v290_v13, 16  ;;  %v318_v25 = vshrl.u32 %v291_v14, 16  ;;  %v321_v26 = vshll.u32 %v291_v14, 16 }
  0x15   : > { %v325_v27 = vshrl.u32 %v292_v15, 16  ;;  %v328_v28 = vshll.u32 %v292_v15, 16  ;;  %v332_v29 = vshrl.u32 %v293_v16, 16  ;;  %v335_v30 = vshll.u32 %v293_v16, 16 }
  0x16   : > { %v313_v31 = vrot.slane %v311_v23, 7  ;;  %v320_v32 = vrot.slane %v318_v25, 7  ;;  %v339_v33 = vshrl.u32 %v294_v20, 16  ;;  %v342_v34 = vshll.u32 %v294_v20, 16  ;;  %v1500_v20 = vld [vmem:[%s2032_s1 + $0x28] sm:$0xff] }
  0x17   : > { %v327_v36 = vrot.slane %v325_v27, 7  ;;  %v334_v37 = vrot.slane %v332_v29, 7  ;;  %v346_v38 = vshrl.u32 %v295_v21, 16  ;;  %v349_v46 = vshll.u32 %v295_v21, 16 }
  0x18   : > { %v316_v39 = vor.u32 %v314_v24, %v313_v31  ;;  %v323_v40 = vor.u32 %v321_v26, %v320_v32  ;;  %v341_v42 = vrot.slane %v339_v33, 7  ;;  %v297_v50 = vshrl.u32 %v288_v22, 16 }
  0x19   : > { %v330_v43 = vor.u32 %v328_v28, %v327_v36  ;;  %v337_v44 = vor.u32 %v335_v30, %v334_v37  ;;  %v348_v45 = vrot.slane %v346_v38, 7  ;;  %v300_v63 = vshll.u32 %v288_v22, 16 }
  0x1a   : > { %v365_v47 = vsel %vm1652_vm4, 0, %v316_v39  ;;  %v366_v48 = vsel %vm1652_vm4, 0, %v323_v40  ;;  %v344_v49 = vor.u32 %v342_v34, %v341_v42  ;;  %v299_v62 = vrot.slane %v297_v50, 7 }
  0x1b   : > { %v1668_v51 = vsel %vm1658_vm5, %v365_v47, 0  ;;  %v1672_v52 = vsel %vm1658_vm5, %v366_v48, 0  ;;  %v367_v53 = vsel %vm1652_vm4, 0, %v330_v43  ;;  %v368_v54 = vsel %vm1652_vm4, 0, %v337_v44 }
  0x1c   : > { %v1679_v55 = vunpack.c.l.b16 %v1668_v51  ;;  %v1682_v56 = vunpack.c.l.b16 %v1672_v52  ;;  %v1687_v58 = vsel %vm1658_vm5, %v367_v53, 0  ;;  %v1691_v59 = vsel %vm1658_vm5, %v368_v54, 0 }
  0x1d   : > { %v351_v60 = vor.u32 %v349_v46, %v348_v45  ;;  %v1696_v0 = vunpack.c.l.b16 %v1687_v58  ;;  %v1699_v1 = vunpack.c.l.b16 %v1691_v59  ;;  %v369_v2 = vsel %vm1652_vm4, 0, %v344_v49 }
  0x1e   : > { %v404_v61 = vpack.c.b16 %v1682_v56, %v1679_v55  ;;  %v1703_v4 = vunpack.c.l.b16 %v1579_v3  ;;  %v289_v6 = vpack.c.b16 %v1505_v57, %v1505_v57  ;;  %v1718_v10 = vsel %vm1658_vm5, %v369_v2, 0 }
  0x1f   : > { %v370_v5 = vsel %vm1652_vm4, 0, %v351_v60  ;;  %v405_v9 = vpack.c.b16 %v1699_v1, %v1696_v0  ;;  %v302_v12 = vor.u32 %v300_v63, %v299_v62  ;;  %v1726_v13 = vunpack.c.l.b16 %v1718_v10 }
  0x20   : > { %1399 = vmatmul.msk.bf16.vlgmr.msra.gmra.mxu1 %vm413_vm6, %v404_v61  ;;  %v1722_v11 = vsel %vm1658_vm5, %v370_v5, 0  ;;  %v1733_v15 = vpack.c.b16 %v1703_v4, %v1703_v4  ;;  %v304_v16 = vshrl.u32 %v289_v6, 16  ;;  %v307_v17 = vshll.u32 %v289_v6, 16 }
  0x21   : > { %867 = vmatpush.bf16.msra.mxu1 %v1498_v8  ;;  %1400 = vmatmul.msk.bf16.vlgmr.msra.gmra.mxu2 %vm413_vm6, %v405_v9  ;;  %v1729_v14 = vunpack.c.l.b16 %v1722_v11  ;;  %v363_v18 = vsel %vm1652_vm4, 0, %v302_v12  ;;  %v558_v19 = vunpack.c.h.b16 %v1579_v3  ;;  %v1756_v33 = vpack.c.b16 %v1679_v55, %v1679_v55 }
  0x22   : > { %976 = vmatpush.bf16.msra.mxu2 %v1499_v7  ;;  %v306_v22 = vrot.slane %v304_v16, 7  ;;  %v374_v23 = vsel %vm1658_vm5, %v363_v18, 0  ;;  %v589_v28 = vshrl.u32 %v1733_v15, 16  ;;  %v592_v29 = vshll.u32 %v1733_v15, 16 }
  0x23   : > { %v406_v21 = vpack.c.b16 %v1729_v14, %v1726_v13  ;;  %v1744_v24 = vpack.c.b16 %v558_v19, %v558_v19  ;;  %v395_v25 = vunpack.c.l.b16 %v374_v23  ;;  %v559_v26 = vunpack.c.h.b16 %v374_v23 }
  0x24   : > { %v309_v27 = vor.u32 %v307_v17, %v306_v22  ;;  %v591_v36 = vrot.slane %v589_v28, 4  ;;  %v594_v37 = vrot.slane %v592_v29, 5  ;;  %v561_v45 = vunpack.c.h.b16 %v1668_v51 }
  0x25   : > { %1401 = vmatmul.msk.bf16.vlgmr.msra.gmra.mxu3 %vm413_vm6, %v406_v21  ;;  %v1749_v30 = vpack.c.b16 %v395_v25, %v395_v25  ;;  %v1751_v31 = vpack.c.b16 %v559_v26, %v559_v26  ;;  %v598_v32 = vshll.u32 %v1744_v24, 16  ;;  %v457_v39 = vpack.c.b16 %v395_v25, %v1703_v4 }
  0x26   : > { %1039 = vmatpush.bf16.msra.mxu3 %v1500_v20  ;;  %v364_v34 = vsel %vm1652_vm4, 0, %v309_v27  ;;  %v595_v44 = vor.u32 %v594_v37, %v591_v36  ;;  %v631_v51 = vshrl.u32 %v1756_v33, 16  ;;  %v1782_v62 = vpack.c.b16 %v1682_v56, %v1682_v56 }
  0x27   : > { %v375_v38 = vsel %vm1658_vm5, %v364_v34, 0  ;;  %v612_v43 = vshll.u32 %v1751_v31, 16  ;;  %v600_v46 = vrot.slane %v598_v32, 5  ;;  %v603_v35 = vshrl.u32 %v1749_v30, 16 }
  0x28   : > { %v396_v40 = vunpack.c.l.b16 %v375_v38  ;;  %v560_v42 = vunpack.c.h.b16 %v375_v38  ;;  %v606_v47 = vshll.u32 %v1749_v30, 16  ;;  %v596_v57 = vrot.slane %v595_v44, 4 }
  0x29   : > { %v605_v60 = vrot.slane %v603_v35, 4  ;;  %v614_v63 = vrot.slane %v612_v43, 5  ;;  %v634_v7 = vshll.u32 %v1756_v33, 16  ;;  %v1792_v8 = vpack.c.b16 %v561_v45, %v561_v45 }
  0x2a   : > { %v403_v48 = vpack.c.b16 %v396_v40, %v395_v25  ;;  %v1770_v49 = vpack.c.b16 %v396_v40, %v396_v40  ;;  %v1772_v50 = vpack.c.b16 %v560_v42, %v560_v42  ;;  %v458_v54 = vpack.c.b16 %v1679_v55, %v396_v40 }
  0x2b   : > { %v608_v61 = vrot.slane %v606_v47, 5  ;;  %v601_v5 = vsel %vm1774_vm9, %v596_v57, %v600_v46  ;;  %v633_v17 = vrot.slane %v631_v51, 4  ;;  %v636_v18 = vrot.slane %v634_v7, 5 }
  0x2c   : > { %1398 = vmatmul.msk.bf16.vlgmr.msra.gmra.mxu0 %vm413_vm6, %v403_v48  ;;  %v626_v2 = vshll.u32 %v1772_v50, 16  ;;  %v617_v3 = vshrl.u32 %v1770_v49, 16  ;;  %v620_v6 = vshll.u32 %v1770_v49, 16  ;;  %v562_v19 = vunpack.c.h.b16 %v1672_v52 }
  0x2d   : > { %v609_v55 = vor.u32 %v608_v61, %v605_v60  ;;  %1089 = vmatpush.bf16.msra.mxu0 %v1501_v41  ;;  %v1796_v21 = vunpack.c.l.b16 %v601_v5  ;;  %v645_v25 = vshrl.u32 %v1782_v62, 16  ;;  %v648_v26 = vshll.u32 %v1782_v62, 16 }
  0x2e   : > { %v619_v9 = vrot.slane %v617_v3, 4  ;;  %v622_v16 = vrot.slane %v620_v6, 5  ;;  %v628_v20 = vrot.slane %v626_v2, 5  ;;  %v637_v29 = vor.u32 %v636_v18, %v633_v17 }
  0x2f   : > { %v610_v12 = vrot.slane %v609_v55, 4  ;;  %v640_v32 = vshll.u32 %v1792_v8, 16  ;;  %v1804_v36 = vpack.c.b16 %v562_v19, %v562_v19  ;;  %v647_v37 = vrot.slane %v645_v25, 4 }
  0x30   : > { %1406 = vmatmul.msk.bf16.vlgmr.msrb.gmra.mxu1 %vm413_vm6, %v457_v39  ;;  %v623_v23 = vor.u32 %v622_v16, %v619_v9  ;;  %v650_v38 = vrot.slane %v648_v26, 5  ;;  %v1811_v40 = vpack.c.b16 %v1696_v0, %v1696_v0  ;;  %v638_v42 = vrot.slane %v637_v29, 4 }
  0x31   : > { %1416 = vmatmul.msk.bf16.vlgmr.msrb.gmra.mxu2 %vm413_vm6, %v458_v54  ;;  %v615_v22 = vsel %vm1774_vm9, %v610_v12, %v614_v63  ;;  %v642_v43 = vrot.slane %v640_v32, 5  ;;  %v654_v46 = vshll.u32 %v1804_v36, 16  ;;  %v563_v35 = vunpack.c.h.b16 %v1687_v58 }
  0x32   : > { %v718_v27 = vunpack.c.l.b16 %v615_v22  ;;  %v624_v28 = vrot.slane %v623_v23, 4  ;;  %v651_v45 = vor.u32 %v650_v38, %v647_v37  ;;  %v459_v47 = vpack.c.b16 %v1696_v0, %v1682_v56 }
  0x33   : > { %v643_v41 = vsel %vm1774_vm9, %v638_v42, %v642_v43  ;;  %v659_v48 = vshrl.u32 %v1811_v40, 16  ;;  %v662_v51 = vshll.u32 %v1811_v40, 16  ;;  %v1825_v57 = vpack.c.b16 %v1699_v1, %v1699_v1 }
  0x34   : > { %v725_v34 = vpack.c.b16 %v718_v27, %v1796_v21  ;;  %v629_v52 = vsel %vm1774_vm9, %v624_v28, %v628_v20  ;;  %v652_v60 = vrot.slane %v651_v45, 4  ;;  %v656_v58 = vrot.slane %v654_v46, 5 }
  0x35   : > { %v719_v39 = vunpack.c.l.b16 %v629_v52  ;;  %v720_v61 = vunpack.c.l.b16 %v643_v41  ;;  %v1827_v63 = vpack.c.b16 %v563_v35, %v563_v35  ;;  %v661_v56 = vrot.slane %v659_v48, 4 }
  0x36   : > { %1426 = vmatmul.msk.bf16.vlgmr.msrb.gmra.mxu3 %vm413_vm6, %v725_v34  ;;  %v664_v0 = vrot.slane %v662_v51, 5  ;;  %v564_v2 = vunpack.c.h.b16 %v1691_v59  ;;  %v657_v3 = vsel %vm1774_vm9, %v652_v60, %v656_v58  ;;  %v676_v5 = vshll.u32 %v1825_v57, 16 }
  0x37   : > { %v788_v44 = vpack.c.b16 %v719_v39, %v718_v27  ;;  %v1835_v55 = vpack.c.b16 %v720_v61, %v719_v39  ;;  %v668_v7 = vshll.u32 %v1827_v63, 16  ;;  %v721_v9 = vunpack.c.l.b16 %v657_v3 }
  0x38   : > { %v665_v6 = vor.u32 %v664_v0, %v661_v56  ;;  %v1838_v12 = vpack.c.b16 %v564_v2, %v564_v2  ;;  %v678_v17 = vrot.slane %v676_v5, 5  ;;  %v1842_v59 = vpack.c.b16 %v1726_v13, %v1726_v13 }
  0x39   : > { %v670_v19 = vrot.slane %v668_v7, 5  ;;  %v789_v20 = vpack.c.b16 %v721_v9, %v720_v61  ;;  %v565_v22 = vunpack.c.h.b16 %v1718_v10  ;;  %v902_v23 = vrot.slane %v1744_v24, 5 }
  0x3a   : > { %v666_v18 = vrot.slane %v665_v6, 4  ;;  %v682_v26 = vshll.u32 %v1838_v12, 16  ;;  %v1451_v27 = vrot.slane %v1749_v30, 9  ;;  %v906_v28 = vrot.slane %v1751_v31, 5 }
  0x3b   : > { %v1452_v29 = vrot.slane %v1770_v49, 9  ;;  %v687_v32 = vshrl.u32 %v1842_v59, 16  ;;  %v910_v34 = vrot.slane %v1772_v50, 5  ;;  %v460_v52 = vpack.c.b16 %v1726_v13, %v1699_v1 }
  0x3c   : > { %1436 = vmatmul.msk.bf16.vlgmr.msrb.gmra.mxu0 %vm413_vm6, %v788_v44  ;;  %v671_v10 = vsel %vm1774_vm9, %v666_v18, %v670_v19  ;;  %v690_v24 = vshll.u32 %v1842_v59, 16  ;;  %v1450_v30 = vrot.slane %v1733_v15, 9  ;;  %v1862_v31 = vpack.c.b16 %v565_v22, %v565_v22 }
  0x3d   : > { %v1866_v49 = vpack.c.b16 %v1729_v14, %v1729_v14  ;;  %v684_v13 = vrot.slane %v682_v26, 5  ;;  %v722_v37 = vunpack.c.l.b16 %v671_v10  ;;  %v689_v38 = vrot.slane %v687_v32, 4 }
  0x3e   : > { %v1874_v39 = vsel %vm1868_vm12, %v1450_v30, %v902_v23  ;;  %v907_v15 = vsel %vm1868_vm12, %v1451_v27, %v906_v28  ;;  %v692_v42 = vrot.slane %v690_v24, 5  ;;  %v911_v45 = vsel %vm1868_vm12, %v1452_v29, %v910_v34 }
  0x3f   : > { %v939_v43 = vunpack.c.l.b16 %v1874_v39  ;;  %v940_v44 = vunpack.c.l.b16 %v907_v15  ;;  %v566_v46 = vunpack.c.h.b16 %v1722_v11  ;;  %v941_v35 = vunpack.c.l.b16 %v911_v45 }
  0x40   : > { %1407 = vmatmul.msk.bf16.gmra.mxu1 %vm413_vm6, %v458_v54  ;;  %v673_v54 = vshrl.u32 %v1825_v57, 16  ;;  %v701_v41 = vshrl.u32 %v1866_v49, 16  ;;  %v704_v48 = vshll.u32 %v1866_v49, 16  ;;  %v727_v60 = vpack.c.b16 %v722_v37, %v721_v9 }
  0x41   : > { %1417 = vmatmul.msk.bf16.gmra.mxu2 %vm413_vm6, %v459_v47  ;;  %v947_v51 = vpack.c.b16 %v940_v44, %v939_v43  ;;  %v1010_v58 = vpack.c.b16 %v941_v35, %v940_v44  ;;  %v693_v61 = vor.u32 %v692_v42, %v689_v38  ;;  %v696_v56 = vshll.u32 %v1862_v31, 16 }
  0x42   : > { %v675_v16 = vrot.slane %v673_v54, 4  ;;  %v584_v2 = vpack.c.b16 %v566_v46, %v566_v46  ;;  %v703_v3 = vrot.slane %v701_v41, 4  ;;  %v706_v11 = vrot.slane %v704_v48, 5 }
  0x43   : > { %v694_v54 = vrot.slane %v693_v61, 4  ;;  %v698_v5 = vrot.slane %v696_v56, 5  ;;  %v914_v26 = vrot.slane %v1792_v8, 5  ;;  %v1454_v28 = vrot.slane %v1782_v62, 9 }
  0x44   : > { %v679_v25 = vor.u32 %v678_v17, %v675_v16  ;;  %v707_v7 = vor.u32 %v706_v11, %v703_v3  ;;  %v710_v16 = vshll.u32 %v584_v2, 16  ;;  %v511_v17 = vpack.c.b16 %v1703_v4, %v1729_v14 }
  0x45   : > { %v699_v9 = vsel %vm1774_vm9, %v694_v54, %v698_v5  ;;  %v1453_v14 = vrot.slane %v1756_v33, 9  ;;  %v918_v29 = vrot.slane %v1804_v36, 5  ;;  %v1455_v33 = vrot.slane %v1811_v40, 9 }
  0x46   : > { %1427 = vmatmul.msk.bf16.gmra.mxu3 %vm413_vm6, %v1835_v55  ;;  %v680_v1 = vrot.slane %v679_v25, 4  ;;  %v708_v18 = vrot.slane %v707_v7, 4  ;;  %v712_v19 = vrot.slane %v710_v16, 5  ;;  %v922_v8 = vrot.slane %v1827_v63, 5 }
  0x47   : > { %v915_v53 = vsel %vm1868_vm12, %v1453_v14, %v914_v26  ;;  %v1458_v36 = vrot.slane %v1866_v49, 9  ;;  %v934_v10 = vrot.slane %v584_v2, 5  ;;  %v1456_v40 = vrot.slane %v1825_v57, 9 }
  0x48   : > { %v713_v22 = vsel %vm1774_vm9, %v708_v18, %v712_v19  ;;  %v942_v27 = vunpack.c.l.b16 %v915_v53  ;;  %v923_v62 = vsel %vm1868_vm12, %v1455_v33, %v922_v8  ;;  %v926_v63 = vrot.slane %v1838_v12, 5 }
  0x49   : > { %v787_v25 = vunpack.c.l.b16 %v713_v22  ;;  %v944_v24 = vunpack.c.l.b16 %v923_v62  ;;  %v935_v30 = vsel %vm1868_vm12, %v1458_v36, %v934_v10  ;;  %v1457_v49 = vrot.slane %v1842_v59, 9 }
  0x4a   : > { %v948_v32 = vpack.c.b16 %v942_v27, %v941_v35  ;;  %v927_v38 = vsel %vm1868_vm12, %v1456_v40, %v926_v63  ;;  %v930_v15 = vrot.slane %v1862_v31, 5 }
  0x4b   : > { %v945_v42 = vunpack.c.l.b16 %v927_v38  ;;  %v850_v44 = vpack.c.b16 %v1796_v21, %v787_v25 }
  0x4c   : > { %1437 = vmatmul.msk.bf16.gmra.mxu0 %vm413_vm6, %v789_v20  ;;  %v724_v20 = vunpack.c.l.b16 %v699_v9  ;;  %v931_v57 = vsel %vm1868_vm12, %v1457_v49, %v930_v15 }
  0x4d   : > { %v1012_v12 = vpack.c.b16 %v945_v42, %v944_v24  ;;  %v946_v39 = vunpack.c.l.b16 %v931_v57 }
  0x4e   : > { %v791_v4 = vpack.c.b16 %v787_v25, %v724_v20 }
  0x50   : > { %1408 = vmatmul.msk.bf16.gmra.mxu1 %vm413_vm6, %v459_v47  ;;  %v685_v47 = vsel %vm1774_vm9, %v680_v1, %v684_v13  ;;  %v1009_v1 = vunpack.c.l.b16 %v935_v30 }
  0x51   : > { %1418 = vmatmul.msk.bf16.gmra.mxu2 %vm413_vm6, %v460_v52  ;;  %v723_v0 = vunpack.c.l.b16 %v685_v47 }
  0x52   : > { %v1013_v31 = vpack.c.b16 %v1009_v1, %v946_v39 }
  0x53   : > { %v790_v6 = vpack.c.b16 %v723_v0, %v722_v37  ;;  %v728_v23 = vpack.c.b16 %v724_v20, %v723_v0  ;;  %v1072_v37 = vpack.c.b16 %v939_v43, %v1009_v1  ;;  %v950_v43 = vpack.c.b16 %v946_v39, %v945_v42 }
  0x56   : > { %1428 = vmatmul.msk.bf16.gmra.mxu3 %vm413_vm6, %v727_v60 }
  0x5c   : > { %1438 = vmatmul.msk.bf16.gmra.mxu0 %vm413_vm6, %v790_v6 }
  0x60   : > { %1409 = vmatmul.msk.bf16.gmra.mxu1 %vm413_vm6, %v460_v52 }
  0x61   : > { %1419 = vmatmul.msk.bf16.gmra.mxu2 %vm413_vm6, %v511_v17 }
  0x66   : > { %1429 = vmatmul.msk.bf16.gmra.mxu3 %vm413_vm6, %v728_v23 }
  0x6c   : > { %1439 = vmatmul.msk.bf16.gmra.mxu0 %vm413_vm6, %v791_v4 }
  0x70   : > { %1446 = vmatmul.msk.bf16.vlgmr.msra.gmra.mxu1 %vm413_vm6, %v1835_v55  ;;  %v919_v55 = vsel %vm1868_vm12, %v1454_v28, %v918_v29 }
  0x71   : > { %1465 = vmatmul.msk.bf16.vlgmr.msra.gmra.mxu2 %vm413_vm6, %v947_v51  ;;  %v943_v34 = vunpack.c.l.b16 %v919_v55 }
  0x73   : > { %v1011_v52 = vpack.c.b16 %v943_v34, %v942_v27  ;;  %v949_v13 = vpack.c.b16 %v944_v24, %v943_v34 }
  0x76   : > { %1475 = vmatmul.msk.bf16.vlgmr.msra.gmra.mxu3 %vm413_vm6, %v1010_v58 }
  0x7c   : > { %1485 = vmatmul.msk.bf16.vlgmr.msra.gmra.mxu0 %vm413_vm6, %v948_v32 }
  0x80   : > { %1447 = vmatmul.msk.bf16.gmra.mxu1 %vm413_vm6, %v727_v60 }
  0x81   : > { %1466 = vmatmul.msk.bf16.gmra.mxu2 %vm413_vm6, %v948_v32 }
  0x86   : > { %1476 = vmatmul.msk.bf16.gmra.mxu3 %vm413_vm6, %v1011_v52 }
  0x8c   : > { %1486 = vmatmul.msk.bf16.gmra.mxu0 %vm413_vm6, %v949_v13 }
  0x90   : > { %1448 = vmatmul.msk.bf16.gmra.mxu1 %vm413_vm6, %v728_v23 }
  0x91   : > { %1467 = vmatmul.msk.bf16.gmra.mxu2 %vm413_vm6, %v949_v13 }
  0x96   : > { %1477 = vmatmul.msk.bf16.gmra.mxu3 %vm413_vm6, %v1012_v12 }
  0x9c   : > { %1487 = vmatmul.msk.bf16.gmra.mxu0 %vm413_vm6, %v950_v43 }
  0x9d   : > { %v440_v45 = vpop.f32.mrf.mxu1 }
  0xa0   : > { %1449 = vmatmul.msk.bf16.gmra.mxu1 %vm413_vm6, %v850_v44 }
  0xa1   : > { %1468 = vmatmul.msk.bf16.gmra.mxu2 %vm413_vm6, %v950_v43 }
  0xa4   : > { %v445_v46 = vpop.f32.mrf.mxu2 }
  0xa5   : > { %v442_v59 = vpop.f32.mrf.mxu1 }
  0xa6   : > { %1478 = vmatmul.msk.bf16.gmra.mxu3 %vm413_vm6, %v1013_v31 }
  0xa8   : > { %v1944_v50 = vpop.f32.mrf.mxu3 }
  0xa9   : > { %v435_v35 = vpop.f32.mrf.mxu0 }
  0xac   : > { %v447_v41 = vpop.f32.mrf.mxu2  ;;  %1488 = vmatmul.msk.bf16.gmra.mxu0 %vm413_vm6, %v1072_v37 }
  0xad   : > { %v488_v47 = vpop.f32.mrf.mxu1 }
  0xae   : > { %v489_v48 = vadd.f32 %v488_v47, %v435_v35 }
  0xb0   : > { %v1947_v21 = vpop.f32.mrf.mxu3 }
  0xb1   : > { %v437_v51 = vpop.f32.mrf.mxu0 }
  0xb4   : > { %v530_v58 = vpop.f32.mrf.mxu2 }
  0xb5   : > { %v490_v60 = vpop.f32.mrf.mxu1  ;;  %v550_v56 = vadd.f32 %v530_v58, %v489_v48 }
  0xb6   : > { %v491_v61 = vadd.f32 %v490_v60, %v437_v51 }
  0xb9   : > { %v819_v0 = vpop.f32.mrf.mxu0  ;;  %v756_v2 = vpop.f32.mrf.mxu3 }
  0xba   : > { %v776_v3 = vadd.f32 %v756_v2, %v550_v56 }
  0xbc   : > { %v532_v11 = vpop.f32.mrf.mxu2  ;;  %v839_v7 = vadd.f32 %v819_v0, %v776_v3 }
  0xbd   : > { %v493_v54 = vpop.f32.mrf.mxu1  ;;  %v551_v5 = vadd.f32 %v532_v11, %v491_v61 }
  0xbe   : > { %v494_v6 = vadd.f32 %v493_v54, %v440_v45 }
  0xc1   : > { %v821_v16 = vpop.f32.mrf.mxu0  ;;  %v758_v17 = vpop.f32.mrf.mxu3 }
  0xc2   : > { %v777_v9 = vadd.f32 %v758_v17, %v551_v5 }
  0xc4   : > { %v535_v18 = vpop.f32.mrf.mxu2  ;;  %v840_v23 = vadd.f32 %v821_v16, %v777_v9 }
  0xc5   : > { %v495_v19 = vpop.f32.mrf.mxu1  ;;  %v552_v20 = vadd.f32 %v535_v18, %v494_v6 }
  0xc6   : > { %v496_v22 = vadd.f32 %v495_v19, %v442_v59 }
  0xc9   : > { %v824_v25 = vpop.f32.mrf.mxu0  ;;  %v761_v4 = vpop.f32.mrf.mxu3 }
  0xca   : > { %v778_v14 = vadd.f32 %v761_v4, %v552_v20 }
  0xcc   : > { %v537_v26 = vpop.f32.mrf.mxu2  ;;  %v841_v29 = vadd.f32 %v824_v25, %v778_v14 }
  0xcd   : > { %v498_v53 = vpop.f32.mrf.mxu1  ;;  %v553_v27 = vadd.f32 %v537_v26, %v496_v22 }
  0xce   : > { %v499_v28 = vadd.f32 %v498_v53, %v445_v46 }
  0xd1   : > { %v826_v32 = vpop.f32.mrf.mxu0  ;;  %v763_v55 = vpop.f32.mrf.mxu3 }
  0xd2   : > { %v779_v33 = vadd.f32 %v763_v55, %v553_v27 }
  0xd4   : > { %v540_v8 = vpop.f32.mrf.mxu2  ;;  %v842_v36 = vadd.f32 %v826_v32, %v779_v33 }
  0xd5   : > { %v500_v34 = vpop.f32.mrf.mxu1  ;;  %v554_v62 = vadd.f32 %v540_v8, %v499_v28 }
  0xd6   : > { %v501_v52 = vadd.f32 %v500_v34, %v447_v41 }
  0xd9   : > { %v829_v10 = vpop.f32.mrf.mxu0  ;;  %v766_v24 = vpop.f32.mrf.mxu3 }
  0xda   : > { %v780_v30 = vadd.f32 %v766_v24, %v554_v62 }
  0xdc   : > { %v542_v40 = vpop.f32.mrf.mxu2  ;;  %v843_v13 = vadd.f32 %v829_v10, %v780_v30 }
  0xdd   : > { %v503_v63 = vpop.f32.mrf.mxu1  ;;  %v555_v1 = vadd.f32 %v542_v40, %v501_v52 }
  0xe1   : > { %v831_v37 = vpop.f32.mrf.mxu0  ;;  %v768_v38 = vpop.f32.mrf.mxu3 }
  0xe2   : > { %v781_v49 = vadd.f32 %v768_v38, %v555_v1 }
  0xe4   : > { %v545_v15 = vpop.f32.mrf.mxu2  ;;  %v844_v57 = vadd.f32 %v831_v37, %v781_v49 }
  0xe5   : > { %v1949_v42 = vpop.f32.mrf.mxu1 }
  0xe9   : > { %v1951_v12 = vpop.f32.mrf.mxu0  ;;  %v771_v39 = vpop.f32.mrf.mxu3 }
  0xec   : > { %v1953_v43 = vpop.f32.mrf.mxu2 }
  0xed   : > { %v869_v44 = vpop.f32.mrf.mxu1 }
  0xee   : > { %v889_v35 = vadd.f32 %v869_v44, %v839_v7 }
  0xf1   : > { %v1955_v45 = vpop.f32.mrf.mxu0  ;;  %v1957_v59 = vpop.f32.mrf.mxu3 }
  0xf4   : > { %v978_v31 = vpop.f32.mrf.mxu2 }
  0xf5   : > { %v871_v46 = vpop.f32.mrf.mxu1  ;;  %v998_v48 = vadd.f32 %v978_v31, %v889_v35 }
  0xf6   : > { %v890_v58 = vadd.f32 %v871_v46, %v840_v23 }
  0xf9   : > { %v1091_v47 = vpop.f32.mrf.mxu0  ;;  %v1041_v41 = vpop.f32.mrf.mxu3 }
  0xfa   : > { %v1061_v61 = vadd.f32 %v1041_v41, %v998_v48 }
  0xfc   : > { %v980_v51 = vpop.f32.mrf.mxu2  ;;  %v1959_v3 = vadd.f32 %v1091_v47, %v1061_v61  ;;  %v506_v47 = vadd.f32 %v1949_v42, %v1947_v21  ;;  %v1580_v21 = vmov 64.0  }
  0xfd   : > { %v874_v60 = vpop.f32.mrf.mxu1  ;;  %v999_v56 = vadd.f32 %v980_v51, %v890_v58  ;;  %1551 = vrcp.f32 %v1580_v21 }
  0xfe   : > { %v891_v16 = vadd.f32 %v874_v60, %v841_v29  ;;  %v1119_v7 = vsel %vm413_vm6, %v1959_v3, 0.0 }
 0x101   : > { %v1093_v0 = vpop.f32.mrf.mxu0  ;;  %v1043_v2 = vpop.f32.mrf.mxu3 }
 0x102   : > { %v1062_v11 = vadd.f32 %v1043_v2, %v999_v56 }
 0x104   : > { %v983_v54 = vpop.f32.mrf.mxu2  ;;  %v1961_v6 = vadd.f32 %v1093_v0, %v1062_v11 }
 0x105   : > { %v876_v5 = vpop.f32.mrf.mxu1  ;;  %v1000_v9 = vadd.f32 %v983_v54, %v891_v16 }
 0x106   : > { %v1120_v17 = vsel %vm413_vm6, %v1961_v6, 0.0  ;;  %v892_v14 = vadd.f32 %v876_v5, %v842_v36  ;;  %v504_v36 = vadd.f32 %v503_v63, %v1944_v50  ;;  %v557_v50 = vadd.f32 %v1953_v43, %v506_v47 }
 0x107   : > { %v1121_v18 = vadd.f32 %v1120_v17, %v1119_v7  ;;  %v1552_v17 = vpop.eup %1551 }
 0x108   : > { %v556_v40 = vadd.f32 %v545_v15, %v504_v36  ;;  %vm1145_vm13 = vweird.f32 %v1552_v17 }
 0x109   : > { %v1096_v19 = vpop.f32.mrf.mxu0  ;;  %v1046_v20 = vpop.f32.mrf.mxu3 }
 0x10a   : > { %v1063_v22 = vadd.f32 %v1046_v20, %v1000_v9  ;;  %v782_v44 = vadd.f32 %v771_v39, %v556_v40 }
 0x10c   : > { %v985_v23 = vpop.f32.mrf.mxu2  ;;  %v1967_v4 = vadd.f32 %v1096_v19, %v1063_v22  ;;  %v845_v15 = vadd.f32 %v1951_v12, %v782_v44  ;;  %v1141_v19 = vmul.f32 64.0, %v1552_v17 }
 0x10d   : > { %v879_v25 = vpop.f32.mrf.mxu1  ;;  %v1001_v53 = vadd.f32 %v985_v23, %v892_v14 }
 0x10e   : > { %v1122_v26 = vsel %vm413_vm6, %v1967_v4, 0.0  ;;  %v893_v8 = vadd.f32 %v879_v25, %v843_v13  ;;  %v1142_v25 = vsub.f32 1.0, %v1141_v19 }
 0x10f   : > { %v1123_v27 = vadd.f32 %v1122_v26, %v1121_v18 }
 0x111   : > { %v1098_v28 = vpop.f32.mrf.mxu0  ;;  %v1048_v29 = vpop.f32.mrf.mxu3 }
 0x112   : > { %v1064_v32 = vadd.f32 %v1048_v29, %v1001_v53  ;;  %v1143_v53 = vmul.f32 %v1552_v17, %v1142_v25 }
 0x114   : > { %v988_v55 = vpop.f32.mrf.mxu2  ;;  %v1971_v33 = vadd.f32 %v1098_v28, %v1064_v32  ;;  %v1144_v28 = vadd.f32 %v1552_v17, %v1143_v53 }
 0x115   : > { %v881_v34 = vpop.f32.mrf.mxu1  ;;  %v1002_v52 = vadd.f32 %v988_v55, %v893_v8 }
 0x116   : > { %v1124_v62 = vsel %vm413_vm6, %v1971_v33, 0.0  ;;  %v894_v49 = vadd.f32 %v881_v34, %v844_v57  ;;  %v783_v57 = vadd.f32 %v1957_v59, %v557_v50  ;;  %v1146_v55 = vsel %vm1145_vm13, %v1552_v17, %v1144_v28  ;;  %v1186_v17 = vld [vmem:[%s2033_s2] sm:$0x1] }
 0x117   : > { %v1125_v10 = vadd.f32 %v1124_v62, %v1123_v27 }
 0x118   : > { %v846_v43 = vadd.f32 %v1955_v45, %v783_v57 }
 0x119   : > { %v1101_v24 = vpop.f32.mrf.mxu0  ;;  %v1051_v30 = vpop.f32.mrf.mxu3 }
 0x11a   : > { %v1065_v1 = vadd.f32 %v1051_v30, %v1002_v52 }
 0x11c   : > { %v990_v37 = vpop.f32.mrf.mxu2  ;;  %v1115_v38 = vadd.f32 %v1101_v24, %v1065_v1 }
 0x11d   : > { %v1003_v46 = vadd.f32 %v990_v37, %v894_v49  ;;  %v884_v13 = vpop.f32.mrf.mxu1 }
 0x11e   : > { %v1126_v31 = vsel %vm413_vm6, %v1115_v38, 0.0  ;;  %v895_v58 = vadd.f32 %v884_v13, %v845_v15 }
 0x11f   : > { %v1127_v35 = vadd.f32 %v1126_v31, %v1125_v10 }
 0x121   : > { %v1103_v41 = vpop.f32.mrf.mxu0  ;;  %v1053_v48 = vpop.f32.mrf.mxu3 }
 0x122   : > { %v1066_v63 = vadd.f32 %v1053_v48, %v1003_v46 }
 0x124   : > { %v993_v51 = vpop.f32.mrf.mxu2  ;;  %v1116_v60 = vadd.f32 %v1103_v41, %v1066_v63 }
 0x125   : > { %v1004_v61 = vadd.f32 %v993_v51, %v895_v58  ;;  %v886_v0 = vpop.f32.mrf.mxu1 }
 0x126   : > { %v1128_v39 = vsel %vm413_vm6, %v1116_v60, 0.0  ;;  %v896_v12 = vadd.f32 %v886_v0, %v846_v43 }
 0x127   : > { %v1129_v56 = vadd.f32 %v1128_v39, %v1127_v35 }
 0x129   : > { %v1106_v2 = vpop.f32.mrf.mxu0  ;;  %v1056_v11 = vpop.f32.mrf.mxu3 }
 0x12a   : > { %v1067_v42 = vadd.f32 %v1056_v11, %v1004_v61 }
 0x12c   : > { %v995_v54 = vpop.f32.mrf.mxu2  ;;  %v1117_v5 = vadd.f32 %v1106_v2, %v1067_v42 }
 0x12d   : > { %v1005_v7 = vadd.f32 %v995_v54, %v896_v12 }
 0x12e   : > { %v1130_v16 = vsel %vm413_vm6, %v1117_v5, 0.0 }
 0x12f   : > { %v1131_v59 = vadd.f32 %v1130_v16, %v1129_v56 }
 0x131   : > { %v1058_v9 = vpop.f32.mrf.mxu3  ;;  %v1108_v20 = vpop.f32.mrf.mxu0 }
 0x132   : > { %v1068_v18 = vadd.f32 %v1058_v9, %v1005_v7 }
 0x134   : > { %v1118_v22 = vadd.f32 %v1108_v20, %v1068_v18  ;;  %v1550_v20 = vld [vmem:[%s2034_s3] ss:$0 sm:$0xff] }
 0x136   : > { %v1132_v23 = vsel %vm413_vm6, %v1118_v22, 0.0 }
 0x137   : > { %v1133_v14 = vadd.f32 %v1132_v23, %v1131_v59 }
 0x139   : > { %v1134_v26 = vrot.slane %v1133_v14, 4 }
 0x13b   : > { %v1135_v45 = vadd.f32 %v1134_v26, %v1133_v14 }
 0x13d   : > { %v1136_v27 = vrot.slane %v1135_v45, 2 }
 0x13f   : > { %v1137_v29 = vadd.f32 %v1136_v27, %v1135_v45 }
 0x141   : > { %v1138_v32 = vrot.slane %v1137_v29, 1 }
 0x143   : > { %v1139_v8 = vadd.f32 %v1138_v32, %v1137_v29 }
 0x145   : > { %v1147_v34 = vmul.f32 %v1146_v55, %v1139_v8 }
 0x147   : > { %v1148_v62 = vsub.f32 %v1959_v3, %v1147_v34  ;;  %v1149_v52 = vsub.f32 %v1961_v6, %v1147_v34  ;;  %v1150_v10 = vsub.f32 %v1967_v4, %v1147_v34  ;;  %v1151_v36 = vsub.f32 %v1971_v33, %v1147_v34 }
 0x148   : > { %v1152_v24 = vsub.f32 %v1115_v38, %v1147_v34  ;;  %v1153_v30 = vsub.f32 %v1116_v60, %v1147_v34  ;;  %v1154_v40 = vsub.f32 %v1117_v5, %v1147_v34  ;;  %v1155_v1 = vsub.f32 %v1118_v22, %v1147_v34 }
 0x149   : > { %v1156_v37 = vmul.f32 %v1148_v62, %v1148_v62  ;;  %v1157_v49 = vmul.f32 %v1149_v52, %v1149_v52  ;;  %v1158_v44 = vmul.f32 %v1150_v10, %v1150_v10  ;;  %v1159_v31 = vmul.f32 %v1151_v36, %v1151_v36 }
 0x14a   : > { %v1160_v3 = vmul.f32 %v1152_v24, %v1152_v24  ;;  %v1161_v4 = vmul.f32 %v1153_v30, %v1153_v30  ;;  %v1162_v41 = vmul.f32 %v1154_v40, %v1154_v40  ;;  %v1163_v63 = vmul.f32 %v1155_v1, %v1155_v1 }
 0x14b   : > { %v1164_v46 = vsel %vm413_vm6, %v1156_v37, 0.0  ;;  %v1165_v13 = vsel %vm413_vm6, %v1157_v49, 0.0  ;;  %v1167_v6 = vsel %vm413_vm6, %v1158_v44, 0.0  ;;  %v1169_v33 = vsel %vm413_vm6, %v1159_v31, 0.0 }
 0x14c   : > { %v1166_v35 = vadd.f32 %v1165_v13, %v1164_v46  ;;  %v1171_v48 = vsel %vm413_vm6, %v1160_v3, 0.0  ;;  %v1173_v15 = vsel %vm413_vm6, %v1161_v4, 0.0  ;;  %v1175_v60 = vsel %vm413_vm6, %v1162_v41, 0.0 }
 0x14d   : > { %v1177_v57 = vsel %vm413_vm6, %v1163_v63, 0.0 }
 0x14e   : > { %v1168_v47 = vadd.f32 %v1167_v6, %v1166_v35 }
 0x150   : > { %v1170_v38 = vadd.f32 %v1169_v33, %v1168_v47 }
 0x152   : > { %v1172_v50 = vadd.f32 %v1171_v48, %v1170_v38 }
 0x154   : > { %v1174_v51 = vadd.f32 %v1173_v15, %v1172_v50 }
 0x156   : > { %v1176_v58 = vadd.f32 %v1175_v60, %v1174_v51 }
 0x158   : > { %v1178_v39 = vadd.f32 %v1177_v57, %v1176_v58 }
 0x15a   : > { %v1179_v61 = vrot.slane %v1178_v39, 4 }
 0x15c   : > { %v1180_v56 = vadd.f32 %v1179_v61, %v1178_v39 }
 0x15e   : > { %v1181_v0 = vrot.slane %v1180_v56, 2 }
 0x160   : > { %v1182_v2 = vadd.f32 %v1181_v0, %v1180_v56 }
 0x162   : > { %v1183_v11 = vrot.slane %v1182_v2, 1 }
 0x164   : > { %v1184_v21 = vadd.f32 %v1183_v11, %v1182_v2 }
 0x166   : > { %v1185_v42 = vmul.f32 %v1184_v21, %v1146_v55 }
 0x168   : > { %v1187_v43 = vadd.f32 1e-05, %v1185_v42 }
 0x16a   : > { %1553 = vrsqrt.f32 %v1187_v43  ;;  %vm1194_vm15 = vweird.f32 %v1187_v43 }
 0x170   : > { %v1554_v54 = vpop.eup %1553 }
 0x171   : > { %v1189_v5 = vmul.f32 %v1554_v54, %v1187_v43  ;;  %vm1195_vm14 = vweird.f32 %v1554_v54 }
 0x172   : > { %vm1196_vm0 = vmor %vm1194_vm15, %vm1195_vm14 }
 0x173   : > { %v1190_v12 = vmul.f32 %v1554_v54, %v1189_v5 }
 0x175   : > { %v1191_v16 = vmul.f32 0.5, %v1190_v12 }
 0x177   : > { %v1192_v7 = vsub.f32 1.5, %v1191_v16 }
 0x179   : > { %v1193_v59 = vmul.f32 %v1554_v54, %v1192_v7 }
 0x17b   : > { %v1197_v9 = vsel %vm1196_vm0, %v1554_v54, %v1193_v59 }
 0x17c   : > { %v1198_v18 = vmul.f32 %v1197_v9, %v1186_v17 }
 0x17e   : > { %v1200_v19 = vperm.slane %v1198_v18, 0 }
 0x180   : > { %v1202_v22 = vmul.f32 %v1200_v19, %v1148_v62  ;;  %v1203_v23 = vmul.f32 %v1200_v19, %v1149_v52  ;;  %v1204_v25 = vmul.f32 %v1200_v19, %v1150_v10  ;;  %v1205_v14 = vmul.f32 %v1200_v19, %v1151_v36 }
 0x181   : > { %v1206_v26 = vmul.f32 %v1200_v19, %v1152_v24  ;;  %v1207_v53 = vmul.f32 %v1200_v19, %v1153_v30  ;;  %v1208_v45 = vmul.f32 %v1200_v19, %v1154_v40  ;;  %v1209_v27 = vmul.f32 %v1200_v19, %v1155_v1 }
 0x182   : > { %v1214_v28 = vadd.f32 %v1550_v20, %v1202_v22  ;;  %v1215_v29 = vadd.f32 %v1550_v20, %v1203_v23  ;;  %v1216_v32 = vadd.f32 %v1550_v20, %v1204_v25  ;;  %v1217_v55 = vadd.f32 %v1550_v20, %v1205_v14 }
 0x183   : > { %v1218_v8 = vadd.f32 %v1550_v20, %v1206_v26  ;;  %v1219_v34 = vadd.f32 %v1550_v20, %v1207_v53  ;;  %v1220_v37 = vadd.f32 %v1550_v20, %v1208_v45  ;;  %v1221_v49 = vadd.f32 %v1550_v20, %v1209_v27 }
 0x184   : > { %vm1222_vm2 = vcmp.gt.f32.partialorder %v1214_v28, 0.0  ;;  %vm1223_vm3 = vcmp.gt.f32.partialorder %v1215_v29, 0.0  ;;  %vm1224_vm4 = vcmp.gt.f32.partialorder %v1216_v32, 0.0  ;;  %vm1225_vm5 = vcmp.gt.f32.partialorder %v1217_v55, 0.0 }
 0x185   : > { %vm1226_vm6 = vcmp.gt.f32.partialorder %v1218_v8, 0.0  ;;  %vm1227_vm7 = vcmp.gt.f32.partialorder %v1219_v34, 0.0  ;;  %vm1228_vm8 = vcmp.gt.f32.partialorder %v1220_v37, 0.0  ;;  %v1230_v62 = vmul.f32 0.01, %v1214_v28 }
 0x186   : > { %v1231_v52 = vmul.f32 0.01, %v1215_v29  ;;  %v1232_v10 = vmul.f32 0.01, %v1216_v32  ;;  %v1233_v36 = vmul.f32 0.01, %v1217_v55 }
 0x187   : > { %v1234_v24 = vmul.f32 0.01, %v1218_v8  ;;  %v1235_v30 = vmul.f32 0.01, %v1219_v34  ;;  %v1236_v40 = vmul.f32 0.01, %v1220_v37  ;;  %v1238_v44 = vsel %vm1222_vm2, %v1214_v28, %v1230_v62 }
 0x188   : > { %v1237_v1 = vmul.f32 0.01, %v1221_v49  ;;  %v1239_v31 = vsel %vm1223_vm3, %v1215_v29, %v1231_v52  ;;  %vm1229_vm9 = vcmp.gt.f32.partialorder %v1221_v49, 0.0  ;;  %v1240_v46 = vsel %vm1224_vm4, %v1216_v32, %v1232_v10 }
 0x189   : > { %v1241_v13 = vsel %vm1225_vm5, %v1217_v55, %v1233_v36  ;;  %v1242_v35 = vsel %vm1226_vm6, %v1218_v8, %v1234_v24  ;;  %v1243_v3 = vsel %vm1227_vm7, %v1219_v34, %v1235_v30  ;;  %v1246_v6 = vpack.c.bf16 %v1238_v44, %v1238_v44 }
 0x18a   : > { %v1247_v47 = vpack.c.bf16 %v1239_v31, %v1239_v31  ;;  %v1244_v4 = vsel %vm1228_vm8, %v1220_v37, %v1236_v40  ;;  %v1248_v33 = vpack.c.bf16 %v1240_v46, %v1240_v46  ;;  %v1249_v38 = vpack.c.bf16 %v1241_v13, %v1241_v13 }
 0x18b   : > { %v1245_v41 = vsel %vm1229_vm9, %v1221_v49, %v1237_v1  ;;  %v1250_v48 = vpack.c.bf16 %v1242_v35, %v1242_v35  ;;  %1255 = vst.msk [vmem:[%s262_s26] sm:$0xf] %vm1254_vm1, %v1246_v6  ;;  %v1251_v50 = vpack.c.bf16 %v1243_v3, %v1243_v3  ;;  %v1252_v63 = vpack.c.bf16 %v1244_v4, %v1244_v4 }
 0x18c   : > { %1256 = vst.msk [vmem:[%s262_s26 + $0x4] sm:$0xf] %vm1254_vm1, %v1247_v47  ;;  %v1253_v15 = vpack.c.bf16 %v1245_v41, %v1245_v41 }
 0x18d   : > { %1257 = vst.msk [vmem:[%s262_s26 + $0x8] sm:$0xf] %vm1254_vm1, %v1248_v33 }
 0x18e   : > { %1258 = vst.msk [vmem:[%s262_s26 + $0xc] sm:$0xf] %vm1254_vm1, %v1249_v38 }
 0x18f   : > { %1259 = vst.msk [vmem:[%s262_s26 + $0x10] sm:$0xf] %vm1254_vm1, %v1250_v48 }
 0x190   : > { %1260 = vst.msk [vmem:[%s262_s26 + $0x14] sm:$0xf] %vm1254_vm1, %v1251_v50 }
 0x191   : > { %1261 = vst.msk [vmem:[%s262_s26 + $0x18] sm:$0xf] %vm1254_vm1, %v1252_v63 }
 0x192   : > { %1262 = vst.msk [vmem:[%s262_s26 + $0x1c] sm:$0xf] %vm1254_vm1, %v1253_v15 }
 0x193 PF: > { %s14_s17 = sadd.s32 1, %s1577_s17   ;;  %s2044_s15 = smov %s1573_s16 }
 0x194   : > { %p11_p5 = scmp.ge.s32.totalorder %s14_s17, 4   ;;  %s2045_s16 = smov %s2047_s18 }
 0x196   :  { %13 = sbr.rel (!%p11_p5) target bundleno = 2 (0x2), region = 83 }

// kernel: _lambda_.8
= control target key start
LH: loop header
LB: loop body
LE: loop exit
PB: predicated region body
PF: predicated region fallthrough
CT: control target
= control target key end

     0   :  { %s1787_s24 = smov 0   ;;  %s1789_s25 = smov 0   ;;  %s2200_s0 = inlined_call_operand.vmem [shape: bf16[2,9,9,8], index: 0, kind: input, shape index: {}]   ;;  %s2201_s1 = inlined_call_operand.vmem [shape: bf16[2,9,9,8], index: 1, kind: input, shape index: {}]   ;;  %s2202_s2 = inlined_call_operand.vmem [shape: bf16[2,9,9,8], index: 2, kind: input, shape index: {}]   ;;  %s2203_s3 = inlined_call_operand.vmem [shape: bf16[2,9,9,8], index: 3, kind: input, shape index: {}]   ;;  %s2204_s4 = inlined_call_operand.vmem [shape: bf16[9,8,16], index: 4, kind: input, shape index: {}]   ;;  %s2205_s5 = inlined_call_operand.vmem [shape: f32[1,16], index: 5, kind: input, shape index: {}]   ;;  %s2206_s6 = inlined_call_operand.vmem [shape: f32[1,16], index: 6, kind: input, shape index: {}]   ;;  %s2207_s7 = inlined_call_operand.vmem [shape: bf16[2,8,8,16], index: 7, kind: output, shape index: {}]  }
   0x1   :  { %s1791_s26 = smov 0  }
   0x2 LB: > { %s29_s27 = sadd.s32 1, %s1740_s25  ;;  %p1594_p0 = scmp.ge.s32.totalorder %s1744_s26, 1  ;;  %s1744_s26 = sphi %s1791_s26, %s17_s26   ;;  %s1740_s25 = sphi %s1789_s25, %s2211_s25   ;;  %s1736_s24 = sphi %s1787_s24, %s2210_s24  }
   0x3   : > { %p31_p1 = scmp.ge.s32.totalorder %s29_s27, 2  ;;  %p306_p2 = scmp.lt.s32.totalorder %s1744_s26, 3 }
   0x5   : > { %s2213_s27 = smov (%p31_p1, %s29_s27), 0  ;;  %p307_p3 = pnand %p1594_p0, %p306_p2 }
   0x6   : > { %p366_p4 = scmp.lt.s32.totalorder (!%p307_p3), %s1736_s24, 1 }
   0x7   : > { %310 = sbr.rel (%p307_p3) target bundleno = 390 (0x186), region = 48 }
   0xc   : > { %v1601_v0 = vld [vmem:[%s2204_s4 + $0x18] sm:$0xf]  ;;  %vm492_vm0 = vcmask 1043456   ;;  %v1610_v2 = vld [vmem:[%s2204_s4 + $0x8] sm:$0xf]  ;;  %s2215_s24 = smov (!%p366_p4, %s1736_s24), 1 }
   0xd   : > { %v494_v1 = vsel %vm492_vm0, %v1601_v0, 0  ;;  %v1615_v3 = vld [vmem:[%s2204_s4 + $0x20] sm:$0xf]  ;;  %v731_v4 = vsel %vm492_vm0, %v1610_v2, 0  ;;  %v1620_v8 = vld [vmem:[%s2204_s4 + $0x4] sm:$0xf] }
   0xe   : > { %1688 = vmatpush.bf16.msra.mxu1 %v494_v1  ;;  %1689 = vmatpush.bf16.msra.mxu2 %v494_v1  ;;  %v790_v5 = vsel %vm492_vm0, %v1615_v3, 0  ;;  %v456_v6 = vld [vmem:[%s2204_s4] sm:$0xf]  ;;  %s1827_s15 = smul.u32 72, %s2215_s24  ;;  %v864_v9 = vsel %vm492_vm0, %v1620_v8, 0  ;;  %vm479_vm1 = vcmask 64512  }
   0xf   : > { %1690 = vmatpush.bf16.msra.mxu3 %v494_v1  ;;  %503 = vmatpush.bf16.msra.mxu0 %v494_v1  ;;  %v544_v7 = vsel %vm492_vm0, %v456_v6, 0  ;;  %v1625_v10 = vld [vmem:[%s2204_s4 + $0x1c] sm:$0xf]  ;;  %v1630_v17 = vld [vmem:[%s2204_s4 + $0xc] sm:$0xf]  ;;  %vm1289_vm5 = vcmask 130048  }
  0x10   : > { %s1834_s18 = scalar_lea.vmem %s2200_s0, %s1827_s15  ;;  %v924_v23 = vsel %vm492_vm0, %v1625_v10, 0  ;;  %v998_v25 = vsel %vm492_vm0, %v1630_v17, 0  ;;  %v1651_v28 = vld [vmem:[%s2204_s4 + $0x14] sm:$0xf]  ;;  %vm575_vm2 = vsmask.f32 3328  ;;  %s1916_s10 = scalar_lea.vmem %s2201_s1, %s1827_s15 }
  0x11   : > { %v1840_v11 = vld [vmem:[%s1834_s18 + $0x18] sm:$0xf]  ;;  %v1843_v12 = vld [vmem:[%s1834_s18 + $0x20] sm:$0xf]  ;;  %v1846_v13 = vld [vmem:[%s1834_s18 + $0x28] sm:$0xf]  ;;  %s1996_s13 = scalar_lea.vmem %s2202_s2, %s1827_s15  ;;  %s2048_s17 = scalar_lea.vmem %s2203_s3, %s1827_s15 }
  0x12   : > { %740 = vmatpush.bf16.msrb.mxu2 %v731_v4  ;;  %553 = vmatpush.bf16.msrb.mxu1 %v544_v7  ;;  %v469_v14 = vunpack.c.l.b16 %v1840_v11  ;;  %v470_v15 = vunpack.c.l.b16 %v1843_v12  ;;  %v1851_v16 = vld [vmem:[%s1834_s18 + $0x30] sm:$0xf]  ;;  %v471_v18 = vunpack.c.l.b16 %v1846_v13  ;;  %v1859_v20 = vld [vmem:[%s1834_s18 + $0x38] sm:$0xf]  ;;  %v1866_v22 = vld [vmem:[%s1834_s18 + $0x40] sm:$0xf] }
  0x13   : > { %799 = vmatpush.bf16.msrb.mxu3 %v790_v5  ;;  %873 = vmatpush.bf16.msrb.mxu0 %v864_v9  ;;  %v472_v19 = vunpack.c.l.b16 %v1851_v16  ;;  %v473_v26 = vunpack.c.l.b16 %v1859_v20  ;;  %v407_v27 = vld [vmem:[%s1834_s18 + $0x8] sm:$0xf]  ;;  %v474_v29 = vunpack.c.l.b16 %v1866_v22  ;;  %v1883_v30 = vld [vmem:[%s1834_s18 + $0x10] sm:$0xf]  ;;  %v405_v33 = vld [vmem:[%s1834_s18] sm:$0xf] }
  0x14   : > { %v476_v21 = vpack.c.b16 %v470_v15, %v469_v14  ;;  %v467_v32 = vunpack.c.l.b16 %v407_v27  ;;  %vm576_vm3 = vsmask.f32 7440  ;;  %v1176_v34 = vsel %vm492_vm0, %v1651_v28, 0  ;;  %v406_v39 = vld [vmem:[%s1834_s18 + $0x4] sm:$0x1]  ;;  %s1679_s21 = sshll.u32 %s2215_s24, 5 }
  0x15   : > { %v477_v24 = vpack.c.b16 %v472_v19, %v471_v18  ;;  %v478_v31 = vpack.c.b16 %v474_v29, %v473_v26  ;;  %v621_v35 = vshrl.u32 %v1840_v11, 16  ;;  %v624_v36 = vshll.u32 %v1840_v11, 16  ;;  %v408_v44 = vld [vmem:[%s1834_s18 + $0xc] sm:$0x1]  ;;  %v410_v49 = vld [vmem:[%s1834_s18 + $0x14] sm:$0x1]  ;;  %vm1908_vm4 = vmor %vm575_vm2, %vm576_vm3  ;;  %s403_s24 = scalar_lea.vmem %s2207_s7, %s1679_s21 }
  0x16   : > { %1603 = vmatmul.msk.bf16.vlgmr.msra.gmra.mxu1 %vm479_vm1, %v476_v21  ;;  %v468_v37 = vunpack.c.l.b16 %v1883_v30  ;;  %v593_v38 = vshrl.u32 %v407_v27, 16  ;;  %v635_v40 = vshrl.u32 %v1843_v12, 16  ;;  %v596_v41 = vshll.u32 %v407_v27, 16  ;;  %v1656_v58 = vld [vmem:[%s2204_s4 + $0x10] sm:$0xf] }
  0x17   : > { %1604 = vmatmul.msk.bf16.vlgmr.msra.gmra.mxu2 %vm479_vm1, %v477_v24  ;;  %933 = vmatpush.bf16.msra.mxu1 %v924_v23  ;;  %v607_v42 = vshrl.u32 %v1883_v30, 16  ;;  %v610_v43 = vshll.u32 %v1883_v30, 16  ;;  %v579_v47 = vshrl.u32 %v405_v33, 16  ;;  %v582_v48 = vshll.u32 %v405_v33, 16  ;;  %v423_v24 = vld [vmem:[%s1916_s10] sm:$0xf] }
  0x18   : > { %1007 = vmatpush.bf16.msra.mxu2 %v998_v25  ;;  %1605 = vmatmul.msk.bf16.vlgmr.msra.gmra.mxu3 %vm479_vm1, %v478_v31  ;;  %v475_v45 = vpack.c.b16 %v468_v37, %v467_v32  ;;  %v595_v46 = vrot.slane %v593_v38, 4  ;;  %v598_v50 = vrot.slane %v596_v41, 5  ;;  %v526_v53 = vunpack.c.l.b16 %v405_v33  ;;  %v1925_v25 = vld [vmem:[%s1916_s10 + $0x8] sm:$0xf]  ;;  %v412_v27 = vld [vmem:[%s1834_s18 + $0x1c] sm:$0x1] }
  0x19   : > { %1185 = vmatpush.bf16.msra.mxu3 %v1176_v34  ;;  %v609_v51 = vrot.slane %v607_v42, 4  ;;  %v612_v52 = vrot.slane %v610_v43, 5  ;;  %v581_v54 = vrot.slane %v579_v47, 4  ;;  %v584_v55 = vrot.slane %v582_v48, 5 }
  0x1a   : > { %1602 = vmatmul.msk.bf16.vlgmr.msra.gmra.mxu0 %vm479_vm1, %v475_v45  ;;  %v588_v56 = vshll.u32 %v406_v39, 16  ;;  %v602_v57 = vshll.u32 %v408_v44, 16  ;;  %v638_v59 = vshll.u32 %v1843_v12, 16  ;;  %v599_v60 = vor.u32 %v598_v50, %v595_v46 }
  0x1b   : > { %v613_v61 = vor.u32 %v612_v52, %v609_v51  ;;  %v616_v62 = vshll.u32 %v410_v49, 16  ;;  %v623_v63 = vrot.slane %v621_v35, 4  ;;  %v585_v1 = vor.u32 %v584_v55, %v581_v54 }
  0x1c   : > { %v590_v2 = vrot.slane %v588_v56, 5  ;;  %v604_v3 = vrot.slane %v602_v57, 5  ;;  %v600_v4 = vrot.slane %v599_v60, 4  ;;  %v1250_v7 = vsel %vm492_vm0, %v1656_v58, 0  ;;  %v1951_v60 = vld [vmem:[%s1916_s10 + $0x10] sm:$0xf] }
  0x1d   : > { %v614_v5 = vrot.slane %v613_v61, 4  ;;  %v618_v6 = vrot.slane %v616_v62, 5  ;;  %v626_v8 = vrot.slane %v624_v36, 5  ;;  %v637_v9 = vrot.slane %v635_v40, 4  ;;  %1259 = vmatpush.bf16.msra.mxu0 %v1250_v7  ;;  %v1954_v61 = vld [vmem:[%s1916_s10 + $0x18] sm:$0xf] }
  0x1e   : > { %v527_v10 = vpack.c.b16 %v467_v32, %v526_v53  ;;  %v586_v17 = vrot.slane %v585_v1, 4  ;;  %v605_v21 = vsel %vm1908_vm4, %v600_v4, %v604_v3  ;;  %v640_v28 = vrot.slane %v638_v59, 5  ;;  %v414_v32 = vld [vmem:[%s1834_s18 + $0x24] sm:$0x1]  ;;  %v416_v62 = vld [vmem:[%s1834_s18 + $0x2c] sm:$0x1] }
  0x1f   : > { %v619_v23 = vsel %vm1908_vm4, %v614_v5, %v618_v6  ;;  %v707_v31 = vunpack.c.l.b16 %v605_v21  ;;  %v839_v35 = vunpack.c.l.b16 %v423_v24  ;;  %v840_v36 = vunpack.c.l.b16 %v1925_v25  ;;  %v418_v3 = vld [vmem:[%s1834_s18 + $0x34] sm:$0x1]  ;;  %v439_v25 = vld [vmem:[%s1996_s13 + $0x1c] sm:$0x1] }
  0x20   : > { %v591_v29 = vsel %vm1908_vm4, %v586_v17, %v590_v2  ;;  %v708_v33 = vunpack.c.l.b16 %v619_v23  ;;  %v627_v38 = vor.u32 %v626_v8, %v623_v63  ;;  %v630_v39 = vshll.u32 %v412_v27, 16 }
  0x21   : > { %v706_v34 = vunpack.c.l.b16 %v591_v29  ;;  %v641_v42 = vor.u32 %v640_v28, %v637_v9  ;;  %v644_v43 = vshll.u32 %v414_v32, 16  ;;  %v847_v44 = vpack.c.b16 %v840_v36, %v839_v35 }
  0x22   : > { %v773_v41 = vpack.c.b16 %v708_v33, %v707_v31  ;;  %v628_v45 = vrot.slane %v627_v38, 4  ;;  %v632_v46 = vrot.slane %v630_v39, 5  ;;  %v649_v49 = vshrl.u32 %v1846_v13, 16  ;;  %v1981_v39 = vld [vmem:[%s1916_s10 + $0x20] sm:$0xf] }
  0x23   : > { %v714_v40 = vpack.c.b16 %v707_v31, %v706_v34  ;;  %v642_v47 = vrot.slane %v641_v42, 4  ;;  %v646_v48 = vrot.slane %v644_v43, 5  ;;  %v652_v50 = vshll.u32 %v1846_v13, 16  ;;  %v422_v42 = vld [vmem:[%s1834_s18 + $0x44] sm:$0x1] }
  0x24   : > { %v633_v51 = vsel %vm1908_vm4, %v628_v45, %v632_v46  ;;  %v663_v52 = vshrl.u32 %v1851_v16, 16  ;;  %v666_v53 = vshll.u32 %v1851_v16, 16  ;;  %v651_v56 = vrot.slane %v649_v49, 4 }
  0x25   : > { %v647_v54 = vsel %vm1908_vm4, %v642_v47, %v646_v48  ;;  %v709_v55 = vunpack.c.l.b16 %v633_v51  ;;  %v654_v57 = vrot.slane %v652_v50, 5  ;;  %v528_v58 = vpack.c.b16 %v469_v14, %v468_v37 }
  0x26   : > { %1606 = vmatmul.msk.bf16.vlgmr.msrb.gmra.mxu1 %vm479_vm1, %v527_v10  ;;  %v710_v59 = vunpack.c.l.b16 %v647_v54  ;;  %v665_v63 = vrot.slane %v663_v52, 4  ;;  %v668_v1 = vrot.slane %v666_v53, 5  ;;  %v841_v4 = vunpack.c.l.b16 %v1951_v60  ;;  %v432_v52 = vld [vmem:[%s1996_s13] sm:$0xf]  ;;  %v434_v53 = vld [vmem:[%s1996_s13 + $0x8] sm:$0xf] }
  0x27   : > { %1611 = vmatmul.msk.bf16.vlgmr.msrb.gmra.mxu2 %vm479_vm1, %v714_v40  ;;  %v715_v2 = vpack.c.b16 %v709_v55, %v708_v33  ;;  %v842_v5 = vunpack.c.l.b16 %v1954_v61  ;;  %v655_v30 = vor.u32 %v654_v57, %v651_v56  ;;  %v658_v6 = vshll.u32 %v416_v62, 16  ;;  %v1984_v40 = vld [vmem:[%s1916_s10 + $0x28] sm:$0xf] }
  0x28   : > { %1616 = vmatmul.msk.bf16.vlgmr.msrb.gmra.mxu3 %vm479_vm1, %v773_v41  ;;  %v774_v11 = vpack.c.b16 %v710_v59, %v709_v55  ;;  %v669_v14 = vor.u32 %v668_v1, %v665_v63  ;;  %v672_v37 = vshll.u32 %v418_v3, 16  ;;  %v677_v21 = vshrl.u32 %v1859_v20, 16  ;;  %v420_v41 = vld [vmem:[%s1834_s18 + $0x3c] sm:$0x1]  ;;  %v2018_v3 = vld [vmem:[%s1916_s10 + $0x38] sm:$0xf] }
  0x29   : > { %v848_v7 = vpack.c.b16 %v842_v5, %v841_v4  ;;  %v656_v8 = vrot.slane %v655_v30, 4  ;;  %v660_v9 = vrot.slane %v658_v6, 5  ;;  %v680_v23 = vshll.u32 %v1859_v20, 16  ;;  %v1684_v60 = vld [vmem:[%s2048_s17 + $0x4] sm:$0xf0] }
  0x2a   : > { %1621 = vmatmul.msk.bf16.vlgmr.msrb.gmra.mxu0 %vm479_vm1, %v847_v44  ;;  %v670_v10 = vrot.slane %v669_v14, 4  ;;  %v674_v17 = vrot.slane %v672_v37, 5  ;;  %v691_v24 = vshrl.u32 %v1866_v22, 16  ;;  %v694_v27 = vshll.u32 %v1866_v22, 16 }
  0x2b   : > { %v661_v28 = vsel %vm1908_vm4, %v656_v8, %v660_v9  ;;  %v679_v31 = vrot.slane %v677_v21, 4  ;;  %v682_v34 = vrot.slane %v680_v23, 5  ;;  %v529_v38 = vpack.c.b16 %v471_v18, %v470_v15  ;;  %v435_v8 = vld [vmem:[%s1996_s13 + $0xc] sm:$0x1]  ;;  %v436_v23 = vld [vmem:[%s1996_s13 + $0x10] sm:$0xf] }
  0x2c   : > { %v675_v29 = vsel %vm1908_vm4, %v670_v10, %v674_v17  ;;  %v711_v33 = vunpack.c.l.b16 %v661_v28  ;;  %v693_v32 = vrot.slane %v691_v24, 4  ;;  %v696_v35 = vrot.slane %v694_v27, 5  ;;  %v438_v24 = vld [vmem:[%s1996_s13 + $0x18] sm:$0xf] }
  0x2d   : > { %v712_v22 = vunpack.c.l.b16 %v675_v29  ;;  %v843_v44 = vunpack.c.l.b16 %v1981_v39  ;;  %v844_v45 = vunpack.c.l.b16 %v1984_v40  ;;  %v683_v46 = vor.u32 %v682_v34, %v679_v31  ;;  %v1685_v39 = vld [vmem:[%s2048_s17 + $0x14] sm:$0xf0]  ;;  %v1667_v40 = vld [vmem:[%s2048_s17 + $0x20] sm:$0xf] }
  0x2e   : > { %v716_v43 = vpack.c.b16 %v711_v33, %v710_v59  ;;  %v686_v12 = vshll.u32 %v420_v41, 16  ;;  %v697_v13 = vor.u32 %v696_v35, %v693_v32  ;;  %v700_v15 = vshll.u32 %v422_v42, 16  ;;  %v1633_v42 = vld [vmem:[%s1996_s13] sm:$0xf] }
  0x2f   : > { %v775_v47 = vpack.c.b16 %v712_v22, %v711_v33  ;;  %v849_v18 = vpack.c.b16 %v844_v45, %v843_v44  ;;  %v684_v48 = vrot.slane %v683_v46, 4  ;;  %v1038_v56 = vshrl.u32 %v432_v52, 16 }
  0x30   : > { %v688_v49 = vrot.slane %v686_v12, 5  ;;  %v698_v50 = vrot.slane %v697_v13, 4  ;;  %v702_v51 = vrot.slane %v700_v15, 5  ;;  %v1041_v57 = vshll.u32 %v432_v52, 16 }
  0x31   : > { %v1055_v59 = vshll.u32 %v434_v53, 16  ;;  %v530_v63 = vpack.c.b16 %v473_v26, %v472_v19  ;;  %v1040_v30 = vrot.slane %v1038_v56, 4  ;;  %v846_v19 = vunpack.c.l.b16 %v2018_v3 }
  0x32   : > { %v689_v54 = vsel %vm1908_vm4, %v684_v48, %v688_v49  ;;  %v703_v55 = vsel %vm1908_vm4, %v698_v50, %v702_v51  ;;  %v1043_v6 = vrot.slane %v1041_v57, 5  ;;  %v1061_v17 = vshll.u32 %v435_v8, 16  ;;  %v437_v48 = vld [vmem:[%s1996_s13 + $0x14] sm:$0x1]  ;;  %v1681_v8 = vld [vmem:[%s1996_s13 + $0x14] sm:$0xf0] }
  0x33   : > { %v713_v62 = vunpack.c.l.b16 %v689_v54  ;;  %v772_v1 = vunpack.c.l.b16 %v703_v55  ;;  %v1057_v14 = vrot.slane %v1055_v59, 5  ;;  %v1066_v33 = vshrl.u32 %v436_v23, 16  ;;  %v440_v59 = vld [vmem:[%s1996_s13 + $0x20] sm:$0xf] }
  0x34   : > { %v1044_v26 = vor.u32 %v1043_v6, %v1040_v30  ;;  %v1063_v31 = vrot.slane %v1061_v17, 5  ;;  %v1069_v34 = vshll.u32 %v436_v23, 16  ;;  %v1080_v32 = vshrl.u32 %v438_v24, 16  ;;  %v441_v23 = vld [vmem:[%s1996_s13 + $0x24] sm:$0x1] }
  0x35   : > { %v717_v37 = vpack.c.b16 %v713_v62, %v712_v22  ;;  %v776_v20 = vpack.c.b16 %v772_v1, %v713_v62  ;;  %v1083_v35 = vshll.u32 %v438_v24, 16  ;;  %v907_v41 = vpack.c.b16 %v841_v4, %v840_v36  ;;  %v1659_v36 = vld [vmem:[%s2048_s17] sm:$0xf]  ;;  %v442_v62 = vld [vmem:[%s1996_s13 + $0x28] sm:$0xf] }
  0x36   : > { %1607 = vmatmul.msk.bf16.gmra.mxu1 %vm479_vm1, %v528_v58  ;;  %v1052_v58 = vshrl.u32 %v434_v53, 16  ;;  %v1045_v27 = vrot.slane %v1044_v26, 4  ;;  %v1068_v46 = vrot.slane %v1066_v33, 4  ;;  %v1071_v12 = vrot.slane %v1069_v34, 5  ;;  %v443_v24 = vld [vmem:[%s1996_s13 + $0x2c] sm:$0x1] }
  0x37   : > { %1612 = vmatmul.msk.bf16.gmra.mxu2 %vm479_vm1, %v715_v2  ;;  %v2015_v2 = vld [vmem:[%s1916_s10 + $0x30] sm:$0xf]  ;;  %v1085_v13 = vrot.slane %v1083_v35, 5  ;;  %v1075_v50 = vshll.u32 %v437_v48, 16  ;;  %v1089_v52 = vshll.u32 %v439_v25, 16  ;;  %v1660_v54 = vor.u32 %v1684_v60, %v1659_v36 }
  0x38   : > { %1617 = vmatmul.msk.bf16.gmra.mxu3 %vm479_vm1, %v774_v11  ;;  %v1054_v11 = vrot.slane %v1052_v58, 4  ;;  %v845_v16 = vunpack.c.l.b16 %v2015_v2  ;;  %v1072_v4 = vor.u32 %v1071_v12, %v1068_v46  ;;  %v1094_v30 = vshrl.u32 %v440_v59, 16  ;;  %v1682_v48 = vld [vmem:[%s1996_s13 + $0x24] sm:$0xf0] }
  0x39   : > { %v1077_v56 = vrot.slane %v1075_v50, 5  ;;  %v1091_v58 = vrot.slane %v1089_v52, 5  ;;  %v1097_v6 = vshll.u32 %v440_v59, 16  ;;  %v445_v52 = vld [vmem:[%s1996_s13 + $0x34] sm:$0x1]  ;;  %vm1425_vm10 = vcmask 125952  }
  0x3a   : > { %1622 = vmatmul.msk.bf16.gmra.mxu0 %vm479_vm1, %v848_v7  ;;  %v433_v7 = vld [vmem:[%s1996_s13 + $0x4] sm:$0x1]  ;;  %v1058_v10 = vor.u32 %v1057_v14, %v1054_v11  ;;  %v850_v21 = vpack.c.b16 %v846_v19, %v845_v16  ;;  %v1073_v55 = vrot.slane %v1072_v4, 4  ;;  %v1108_v11 = vshrl.u32 %v442_v62, 16 }
  0x3b   : > { %v1047_v9 = vshll.u32 %v433_v7, 16  ;;  %v1111_v14 = vshll.u32 %v442_v62, 16  ;;  %v1637_v7 = vld [vmem:[%s1996_s13 + $0x10] sm:$0xf] }
  0x3c   : > { %v1059_v29 = vrot.slane %v1058_v10, 4  ;;  %v1099_v10 = vrot.slane %v1097_v6, 5  ;;  %v1110_v17 = vrot.slane %v1108_v11, 4 }
  0x3d   : > { %v1049_v28 = vrot.slane %v1047_v9, 5  ;;  %v1096_v9 = vrot.slane %v1094_v30, 4 }
  0x3e   : > { %v1064_v22 = vsel %vm1908_vm4, %v1059_v29, %v1063_v31  ;;  %v1117_v31 = vshll.u32 %v443_v24, 16 }
  0x3f   : > { %v1100_v29 = vor.u32 %v1099_v10, %v1096_v9 }
  0x41   : > { %v1101_v34 = vrot.slane %v1100_v29, 4 }
  0x46   : > { %1608 = vmatmul.msk.bf16.gmra.mxu1 %vm479_vm1, %v529_v38  ;;  %v1050_v38 = vsel %vm1908_vm4, %v1045_v27, %v1049_v28  ;;  %v1638_v27 = vor.u32 %v1681_v8, %v1637_v7  ;;  %v1663_v28 = vld [vmem:[%s2048_s17 + $0x10] sm:$0xf]  ;;  %v1683_v7 = vld [vmem:[%s1996_s13 + $0x34] sm:$0xf0] }
  0x47   : > { %1613 = vmatmul.msk.bf16.gmra.mxu2 %vm479_vm1, %v716_v43  ;;  %v1680_v43 = vld [vmem:[%s1996_s13 + $0x4] sm:$0xf0]  ;;  %v1151_v15 = vunpack.c.l.b16 %v1050_v38  ;;  %v1664_v33 = vor.u32 %v1685_v39, %v1663_v28  ;;  %v1119_v38 = vrot.slane %v1117_v31, 5 }
  0x48   : > { %1618 = vmatmul.msk.bf16.gmra.mxu3 %vm479_vm1, %v775_v47  ;;  %v1082_v47 = vrot.slane %v1080_v32, 4  ;;  %v1634_v49 = vor.u32 %v1680_v43, %v1633_v42 }
  0x4a   : > { %1623 = vmatmul.msk.bf16.gmra.mxu0 %vm479_vm1, %v849_v18  ;;  %v1152_v18 = vunpack.c.l.b16 %v1064_v22  ;;  %v1086_v51 = vor.u32 %v1085_v13, %v1082_v47  ;;  %v444_v22 = vld [vmem:[%s1996_s13 + $0x30] sm:$0xf] }
  0x4b   : > { %v1122_v46 = vshrl.u32 %v444_v22, 16  ;;  %v1125_v12 = vshll.u32 %v444_v22, 16 }
  0x4c   : > { %v1159_v53 = vpack.c.b16 %v1152_v18, %v1151_v15  ;;  %v1087_v57 = vrot.slane %v1086_v51, 4  ;;  %v909_v15 = vpack.c.b16 %v845_v16, %v844_v45  ;;  %v1641_v18 = vld [vmem:[%s1996_s13 + $0x20] sm:$0xf] }
  0x4d   : > { %v1124_v36 = vrot.slane %v1122_v46, 4  ;;  %v1127_v60 = vrot.slane %v1125_v12, 5  ;;  %v1642_v51 = vor.u32 %v1682_v48, %v1641_v18 }
  0x4e   : > { %v1092_v1 = vsel %vm1908_vm4, %v1087_v57, %v1091_v58  ;;  %v431_v58 = vld [vmem:[%s1916_s10 + $0x40] sm:$0xf] }
  0x4f   : > { %v1154_v26 = vunpack.c.l.b16 %v1092_v1  ;;  %v1128_v2 = vor.u32 %v1127_v60, %v1124_v36  ;;  %v906_v30 = vunpack.c.l.b16 %v431_v58 }
  0x51   : > { %v1129_v59 = vrot.slane %v1128_v2, 4 }
  0x56   : > { %1609 = vmatmul.msk.bf16.gmra.mxu1 %vm479_vm1, %v530_v63  ;;  %v1078_v63 = vsel %vm1908_vm4, %v1073_v55, %v1077_v56  ;;  %v1686_v55 = vld [vmem:[%s2048_s17 + $0x24] sm:$0xf0]  ;;  %v1131_v56 = vshll.u32 %v445_v52, 16 }
  0x57   : > { %1614 = vmatmul.msk.bf16.gmra.mxu2 %vm479_vm1, %v717_v37  ;;  %v908_v37 = vpack.c.b16 %v843_v44, %v842_v5  ;;  %v1103_v5 = vshll.u32 %v441_v23, 16  ;;  %v1668_v57 = vor.u32 %v1686_v55, %v1667_v40 }
  0x58   : > { %1619 = vmatmul.msk.bf16.gmra.mxu3 %vm479_vm1, %v776_v20  ;;  %v1153_v20 = vunpack.c.l.b16 %v1078_v63  ;;  %v1133_v62 = vrot.slane %v1131_v56, 5 }
  0x59   : > { %v1105_v32 = vrot.slane %v1103_v5, 5 }
  0x5a   : > { %1624 = vmatmul.msk.bf16.gmra.mxu0 %vm479_vm1, %v850_v21  ;;  %v1113_v21 = vrot.slane %v1111_v14, 5  ;;  %v1160_v61 = vpack.c.b16 %v1154_v26, %v1153_v20  ;;  %v1134_v6 = vsel %vm1908_vm4, %v1129_v59, %v1133_v62  ;;  %v910_v14 = vpack.c.b16 %v906_v30, %v846_v19 }
  0x5b   : > { %v1106_v42 = vsel %vm1908_vm4, %v1101_v34, %v1105_v32  ;;  %v1157_v20 = vunpack.c.l.b16 %v1134_v6 }
  0x5c   : > { %v1114_v44 = vor.u32 %v1113_v21, %v1110_v17  ;;  %v1155_v25 = vunpack.c.l.b16 %v1106_v42  ;;  %v1671_v17 = vld [vmem:[%s2048_s17 + $0x30] sm:$0xf]  ;;  %v1687_v21 = vld [vmem:[%s2048_s17 + $0x34] sm:$0xf0] }
  0x5d   : > { %v1672_v23 = vor.u32 %v1687_v21, %v1671_v17 }
  0x5e   : > { %v1115_v35 = vrot.slane %v1114_v44, 4 }
  0x60   : > { %v1120_v43 = vsel %vm1908_vm4, %v1115_v35, %v1119_v38 }
  0x66   : > { %1626 = vmatmul.msk.bf16.vlgmr.msra.gmra.mxu1 %vm479_vm1, %v907_v41  ;;  %v446_v41 = vld [vmem:[%s1996_s13 + $0x38] sm:$0xf] }
  0x67   : > { %1647 = vmatmul.msk.bf16.vlgmr.msra.gmra.mxu2 %vm479_vm1, %v1634_v49  ;;  %v1136_v47 = vshrl.u32 %v446_v41, 16  ;;  %v1139_v13 = vshll.u32 %v446_v41, 16  ;;  %v1156_v49 = vunpack.c.l.b16 %v1120_v43 }
  0x68   : > { %1652 = vmatmul.msk.bf16.vlgmr.msra.gmra.mxu3 %vm479_vm1, %v1159_v53  ;;  %v447_v53 = vld [vmem:[%s1996_s13 + $0x3c] sm:$0x1] }
  0x69   : > { %v1138_v4 = vrot.slane %v1136_v47, 4  ;;  %v1141_v50 = vrot.slane %v1139_v13, 5  ;;  %v1145_v16 = vshll.u32 %v447_v53, 16 }
  0x6a   : > { %1673 = vmatmul.msk.bf16.vlgmr.msra.gmra.mxu0 %vm479_vm1, %v1660_v54  ;;  %v1161_v54 = vpack.c.b16 %v1156_v49, %v1155_v25 }
  0x6b   : > { %v1142_v45 = vor.u32 %v1141_v50, %v1138_v4  ;;  %v1147_v1 = vrot.slane %v1145_v16, 5 }
  0x6d   : > { %v1143_v63 = vrot.slane %v1142_v45, 4 }
  0x6f   : > { %v1148_v11 = vsel %vm1908_vm4, %v1143_v63, %v1147_v1 }
  0x70   : > { %v1158_v26 = vunpack.c.l.b16 %v1148_v11 }
  0x72   : > { %v1162_v10 = vpack.c.b16 %v1158_v26, %v1157_v20 }
  0x76   : > { %1627 = vmatmul.msk.bf16.gmra.mxu1 %vm479_vm1, %v908_v37  ;;  %v1645_v37 = vld [vmem:[%s1996_s13 + $0x30] sm:$0xf] }
  0x77   : > { %1648 = vmatmul.msk.bf16.gmra.mxu2 %vm479_vm1, %v1638_v27  ;;  %v1646_v9 = vor.u32 %v1683_v7, %v1645_v37 }
  0x78   : > { %1653 = vmatmul.msk.bf16.gmra.mxu3 %vm479_vm1, %v1160_v61 }
  0x7a   : > { %1674 = vmatmul.msk.bf16.gmra.mxu0 %vm479_vm1, %v1664_v33 }
  0x86   : > { %1628 = vmatmul.msk.bf16.gmra.mxu1 %vm479_vm1, %v909_v15 }
  0x87   : > { %1649 = vmatmul.msk.bf16.gmra.mxu2 %vm479_vm1, %v1642_v51 }
  0x88   : > { %1654 = vmatmul.msk.bf16.gmra.mxu3 %vm479_vm1, %v1161_v54 }
  0x8a   : > { %1675 = vmatmul.msk.bf16.gmra.mxu0 %vm479_vm1, %v1668_v57 }
  0x93   : > { %v510_v8 = vpop.f32.mrf.mxu1 }
  0x96   : > { %1629 = vmatmul.msk.bf16.gmra.mxu1 %vm479_vm1, %v910_v14 }
  0x97   : > { %1650 = vmatmul.msk.bf16.gmra.mxu2 %vm479_vm1, %v1646_v9  ;;  %v505_v0 = vpop.f32.mrf.mxu0 }
  0x98   : > { %1655 = vmatmul.msk.bf16.gmra.mxu3 %vm479_vm1, %v1162_v10 }
  0x9a   : > { %v515_v24 = vpop.f32.mrf.mxu2  ;;  %1676 = vmatmul.msk.bf16.gmra.mxu0 %vm479_vm1, %v1672_v23 }
  0x9b   : > { %v512_v3 = vpop.f32.mrf.mxu1  ;;  %v2113_v19 = vpop.f32.mrf.mxu3 }
  0x9f   : > { %v507_v61 = vpop.f32.mrf.mxu0 }
  0xa2   : > { %v517_v27 = vpop.f32.mrf.mxu2 }
  0xa3   : > { %v555_v28 = vpop.f32.mrf.mxu1  ;;  %v2115_v29 = vpop.f32.mrf.mxu3 }
  0xa4   : > { %v556_v39 = vadd.f32 %v555_v28, %v505_v0 }
  0xa7   : > { %v875_v5 = vpop.f32.mrf.mxu0 }
  0xaa   : > { %v742_v31 = vpop.f32.mrf.mxu2 }
  0xab   : > { %v557_v44 = vpop.f32.mrf.mxu1  ;;  %v762_v34 = vadd.f32 %v742_v31, %v556_v39  ;;  %v801_v32 = vpop.f32.mrf.mxu3 }
  0xac   : > { %v558_v33 = vadd.f32 %v557_v44, %v507_v61 }
  0xad   : > { %v821_v35 = vadd.f32 %v801_v32, %v762_v34 }
  0xaf   : > { %v895_v38 = vadd.f32 %v875_v5, %v821_v35  ;;  %v877_v22 = vpop.f32.mrf.mxu0 }
  0xb2   : > { %v744_v42 = vpop.f32.mrf.mxu2 }
  0xb3   : > { %v560_v41 = vpop.f32.mrf.mxu1  ;;  %v763_v46 = vadd.f32 %v744_v42, %v558_v33  ;;  %v803_v12 = vpop.f32.mrf.mxu3 }
  0xb4   : > { %v561_v43 = vadd.f32 %v560_v41, %v510_v8 }
  0xb5   : > { %v822_v47 = vadd.f32 %v803_v12, %v763_v46 }
  0xb7   : > { %v896_v13 = vadd.f32 %v877_v22, %v822_v47  ;;  %v880_v15 = vpop.f32.mrf.mxu0 }
  0xba   : > { %v747_v48 = vpop.f32.mrf.mxu2 }
  0xbb   : > { %v562_v18 = vpop.f32.mrf.mxu1  ;;  %v764_v49 = vadd.f32 %v747_v48, %v561_v43  ;;  %v806_v36 = vpop.f32.mrf.mxu3 }
  0xbc   : > { %v563_v25 = vadd.f32 %v562_v18, %v512_v3 }
  0xbd   : > { %v823_v60 = vadd.f32 %v806_v36, %v764_v49 }
  0xbf   : > { %v897_v4 = vadd.f32 %v880_v15, %v823_v60  ;;  %v882_v50 = vpop.f32.mrf.mxu0 }
  0xc2   : > { %v749_v52 = vpop.f32.mrf.mxu2 }
  0xc3   : > { %v565_v51 = vpop.f32.mrf.mxu1  ;;  %v765_v54 = vadd.f32 %v749_v52, %v563_v25  ;;  %v808_v40 = vpop.f32.mrf.mxu3 }
  0xc4   : > { %v566_v53 = vadd.f32 %v565_v51, %v515_v24 }
  0xc5   : > { %v824_v55 = vadd.f32 %v808_v40, %v765_v54 }
  0xc7   : > { %v898_v2 = vadd.f32 %v882_v50, %v824_v55  ;;  %v885_v56 = vpop.f32.mrf.mxu0 }
  0xca   : > { %v752_v16 = vpop.f32.mrf.mxu2 }
  0xcb   : > { %v567_v45 = vpop.f32.mrf.mxu1  ;;  %v766_v58 = vadd.f32 %v752_v16, %v566_v53  ;;  %v811_v59 = vpop.f32.mrf.mxu3 }
  0xcc   : > { %v568_v57 = vadd.f32 %v567_v45, %v517_v27 }
  0xcd   : > { %v825_v62 = vadd.f32 %v811_v59, %v766_v58 }
  0xcf   : > { %v899_v63 = vadd.f32 %v885_v56, %v825_v62  ;;  %v887_v1 = vpop.f32.mrf.mxu0 }
  0xd2   : > { %v754_v6 = vpop.f32.mrf.mxu2 }
  0xd3   : > { %v570_v30 = vpop.f32.mrf.mxu1  ;;  %v767_v11 = vadd.f32 %v754_v6, %v568_v57  ;;  %v813_v14 = vpop.f32.mrf.mxu3 }
  0xd5   : > { %v826_v37 = vadd.f32 %v813_v14, %v767_v11 }
  0xd7   : > { %v900_v7 = vadd.f32 %v887_v1, %v826_v37  ;;  %v2117_v8 = vpop.f32.mrf.mxu0 }
  0xda   : > { %v757_v26 = vpop.f32.mrf.mxu2 }
  0xdb   : > { %v2119_v20 = vpop.f32.mrf.mxu1  ;;  %v816_v9 = vpop.f32.mrf.mxu3 }
  0xdf   : > { %v2121_v10 = vpop.f32.mrf.mxu0 }
  0xe2   : > { %v2123_v21 = vpop.f32.mrf.mxu2 }
  0xe3   : > { %v935_v17 = vpop.f32.mrf.mxu1  ;;  %v2125_v23 = vpop.f32.mrf.mxu3 }
  0xe4   : > { %v955_v27 = vadd.f32 %v935_v17, %v895_v38 }
  0xe7   : > { %v1261_v24 = vpop.f32.mrf.mxu0 }
  0xea   : > { %v1009_v3 = vpop.f32.mrf.mxu2 }
  0xeb   : > { %v937_v0 = vpop.f32.mrf.mxu1  ;;  %v1187_v61 = vpop.f32.mrf.mxu3  ;;  %v1029_v28 = vadd.f32 %v1009_v3, %v955_v27 }
  0xec   : > { %v956_v5 = vadd.f32 %v937_v0, %v896_v13 }
  0xed   : > { %v1207_v39 = vadd.f32 %v1187_v61, %v1029_v28  ;;  %v573_v28 = vadd.f32 %v2119_v20, %v2115_v29 }
  0xef   : > { %v1263_v44 = vpop.f32.mrf.mxu0  ;;  %v2127_v35 = vadd.f32 %v1261_v24, %v1207_v39 }
  0xf1   : > { %v1290_v42 = vsel %vm1289_vm5, %v2127_v35, 0.0 }
  0xf2   : > { %v1011_v33 = vpop.f32.mrf.mxu2 }
  0xf3   : > { %v940_v31 = vpop.f32.mrf.mxu1  ;;  %v1030_v34 = vadd.f32 %v1011_v33, %v956_v5  ;;  %v1189_v32 = vpop.f32.mrf.mxu3  ;;  %v769_v5 = vadd.f32 %v2123_v21, %v573_v28 }
  0xf4   : > { %v957_v43 = vadd.f32 %v940_v31, %v897_v4 }
  0xf5   : > { %v1208_v22 = vadd.f32 %v1189_v32, %v1030_v34  ;;  %v828_v33 = vadd.f32 %v2125_v23, %v769_v5 }
  0xf7   : > { %v2129_v41 = vadd.f32 %v1263_v44, %v1208_v22  ;;  %v1266_v46 = vpop.f32.mrf.mxu0  ;;  %v1746_v22 = vmov 64.0   ;;  %v902_v21 = vadd.f32 %v2121_v10, %v828_v33 }
  0xf8   : > { %1718 = vrcp.f32 %v1746_v22 }
  0xf9   : > { %v1291_v38 = vsel %vm1289_vm5, %v2129_v41, 0.0 }
  0xfa   : > { %v1292_v47 = vadd.f32 %v1291_v38, %v1290_v42  ;;  %v1014_v13 = vpop.f32.mrf.mxu2 }
  0xfb   : > { %v942_v12 = vpop.f32.mrf.mxu1  ;;  %v1031_v15 = vadd.f32 %v1014_v13, %v957_v43  ;;  %v1192_v18 = vpop.f32.mrf.mxu3 }
  0xfc   : > { %v958_v36 = vadd.f32 %v942_v12, %v898_v2  ;;  %v571_v2 = vadd.f32 %v570_v30, %v2113_v19 }
  0xfd   : > { %v1209_v48 = vadd.f32 %v1192_v18, %v1031_v15 }
  0xfe   : > { %v768_v6 = vadd.f32 %v757_v26, %v571_v2  ;;  %v1719_v43 = vpop.eup %1718 }
  0xff   : > { %v2135_v25 = vadd.f32 %v1266_v46, %v1209_v48  ;;  %v1268_v60 = vpop.f32.mrf.mxu0  ;;  %v1312_v23 = vmul.f32 64.0, %v1719_v43  ;;  %vm1316_vm6 = vweird.f32 %v1719_v43 }
 0x100   : > { %v827_v3 = vadd.f32 %v816_v9, %v768_v6 }
 0x101   : > { %v1293_v49 = vsel %vm1289_vm5, %v2135_v25, 0.0 }
 0x102   : > { %v1294_v51 = vadd.f32 %v1293_v49, %v1292_v47  ;;  %v1016_v52 = vpop.f32.mrf.mxu2  ;;  %v901_v30 = vadd.f32 %v2117_v8, %v827_v3 }
 0x103   : > { %v945_v50 = vpop.f32.mrf.mxu1  ;;  %v1032_v53 = vadd.f32 %v1016_v52, %v958_v36  ;;  %v1194_v54 = vpop.f32.mrf.mxu3  ;;  %v1313_v36 = vsub.f32 1.0, %v1312_v23 }
 0x104   : > { %v959_v56 = vadd.f32 %v945_v50, %v899_v63 }
 0x105   : > { %v1210_v4 = vadd.f32 %v1194_v54, %v1032_v53 }
 0x107   : > { %v2139_v40 = vadd.f32 %v1268_v60, %v1210_v4  ;;  %v1271_v45 = vpop.f32.mrf.mxu0 }
 0x109   : > { %v1295_v55 = vsel %vm1289_vm5, %v2139_v40, 0.0 }
 0x10a   : > { %v1296_v16 = vadd.f32 %v1295_v55, %v1294_v51  ;;  %v1019_v57 = vpop.f32.mrf.mxu2  ;;  %v1314_v51 = vmul.f32 %v1719_v43, %v1313_v36 }
 0x10b   : > { %v947_v58 = vpop.f32.mrf.mxu1  ;;  %v1033_v59 = vadd.f32 %v1019_v57, %v959_v56  ;;  %v1197_v62 = vpop.f32.mrf.mxu3 }
 0x10c   : > { %v960_v37 = vadd.f32 %v947_v58, %v900_v7  ;;  %v1315_v53 = vadd.f32 %v1719_v43, %v1314_v51 }
 0x10d   : > { %v1211_v1 = vadd.f32 %v1197_v62, %v1033_v59 }
 0x10e   : > { %v1317_v55 = vsel %vm1316_vm6, %v1719_v43, %v1315_v53 }
 0x10f   : > { %v1285_v11 = vadd.f32 %v1271_v45, %v1211_v1  ;;  %v1273_v24 = vpop.f32.mrf.mxu0 }
 0x111   : > { %v1297_v14 = vsel %vm1289_vm5, %v1285_v11, 0.0 }
 0x112   : > { %v1298_v17 = vadd.f32 %v1297_v14, %v1296_v16  ;;  %v1021_v0 = vpop.f32.mrf.mxu2 }
 0x113   : > { %v1034_v27 = vadd.f32 %v1021_v0, %v960_v37  ;;  %v1199_v63 = vpop.f32.mrf.mxu3  ;;  %v950_v61 = vpop.f32.mrf.mxu1 }
 0x114   : > { %v961_v44 = vadd.f32 %v950_v61, %v901_v30 }
 0x115   : > { %v1212_v39 = vadd.f32 %v1199_v63, %v1034_v27 }
 0x117   : > { %v1286_v19 = vadd.f32 %v1273_v24, %v1212_v39  ;;  %v1276_v34 = vpop.f32.mrf.mxu0 }
 0x119   : > { %v1299_v26 = vsel %vm1289_vm5, %v1286_v19, 0.0 }
 0x11a   : > { %v1300_v7 = vadd.f32 %v1299_v26, %v1298_v17  ;;  %v1024_v31 = vpop.f32.mrf.mxu2 }
 0x11b   : > { %v1035_v9 = vadd.f32 %v1024_v31, %v961_v44  ;;  %v1202_v32 = vpop.f32.mrf.mxu3  ;;  %v952_v29 = vpop.f32.mrf.mxu1 }
 0x11c   : > { %v962_v8 = vadd.f32 %v952_v29, %v902_v21 }
 0x11d   : > { %v1213_v42 = vadd.f32 %v1202_v32, %v1035_v9 }
 0x11f   : > { %v1287_v20 = vadd.f32 %v1276_v34, %v1213_v42  ;;  %v1278_v18 = vpop.f32.mrf.mxu0 }
 0x121   : > { %v1301_v38 = vsel %vm1289_vm5, %v1287_v20, 0.0 }
 0x122   : > { %v1302_v46 = vadd.f32 %v1301_v38, %v1300_v7  ;;  %v1026_v12 = vpop.f32.mrf.mxu2 }
 0x123   : > { %v1036_v47 = vadd.f32 %v1026_v12, %v962_v8  ;;  %v1204_v13 = vpop.f32.mrf.mxu3  ;;  %v1357_v12 = vld [vmem:[%s2205_s5] sm:$0x1] }
 0x125   : > { %v1214_v15 = vadd.f32 %v1204_v13, %v1036_v47 }
 0x127   : > { %v1288_v48 = vadd.f32 %v1278_v18, %v1214_v15  ;;  %v1717_v18 = vld [vmem:[%s2206_s6] ss:$0 sm:$0xff] }
 0x129   : > { %v1303_v49 = vsel %vm1289_vm5, %v1288_v48, 0.0 }
 0x12a   : > { %v1304_v60 = vadd.f32 %v1303_v49, %v1302_v46 }
 0x12c   : > { %v1305_v50 = vrot.slane %v1304_v60, 4 }
 0x12e   : > { %v1306_v52 = vadd.f32 %v1305_v50, %v1304_v60 }
 0x130   : > { %v1307_v10 = vrot.slane %v1306_v52, 2 }
 0x132   : > { %v1308_v54 = vadd.f32 %v1307_v10, %v1306_v52 }
 0x134   : > { %v1309_v4 = vrot.slane %v1308_v54, 1 }
 0x136   : > { %v1310_v56 = vadd.f32 %v1309_v4, %v1308_v54 }
 0x138   : > { %v1318_v45 = vmul.f32 %v1317_v55, %v1310_v56 }
 0x13a   : > { %v1319_v16 = vsub.f32 %v2127_v35, %v1318_v45  ;;  %v1320_v57 = vsub.f32 %v2129_v41, %v1318_v45  ;;  %v1321_v58 = vsub.f32 %v2135_v25, %v1318_v45  ;;  %v1322_v59 = vsub.f32 %v2139_v40, %v1318_v45 }
 0x13b   : > { %v1323_v62 = vsub.f32 %v1285_v11, %v1318_v45  ;;  %v1324_v2 = vsub.f32 %v1286_v19, %v1318_v45  ;;  %v1325_v1 = vsub.f32 %v1287_v20, %v1318_v45  ;;  %v1326_v6 = vsub.f32 %v1288_v48, %v1318_v45 }
 0x13c   : > { %v1327_v14 = vmul.f32 %v1319_v16, %v1319_v16  ;;  %v1328_v37 = vmul.f32 %v1320_v57, %v1320_v57  ;;  %v1329_v17 = vmul.f32 %v1321_v58, %v1321_v58  ;;  %v1330_v24 = vmul.f32 %v1322_v59, %v1322_v59 }
 0x13d   : > { %v1331_v35 = vmul.f32 %v1323_v62, %v1323_v62  ;;  %v1332_v25 = vmul.f32 %v1324_v2, %v1324_v2  ;;  %v1333_v61 = vmul.f32 %v1325_v1, %v1325_v1  ;;  %v1334_v5 = vmul.f32 %v1326_v6, %v1326_v6 }
 0x13e   : > { %v1335_v0 = vsel %vm1289_vm5, %v1327_v14, 0.0  ;;  %v1336_v3 = vsel %vm1289_vm5, %v1328_v37, 0.0  ;;  %v1338_v41 = vsel %vm1289_vm5, %v1329_v17, 0.0  ;;  %v1340_v40 = vsel %vm1289_vm5, %v1330_v24, 0.0 }
 0x13f   : > { %v1337_v27 = vadd.f32 %v1336_v3, %v1335_v0  ;;  %v1342_v28 = vsel %vm1289_vm5, %v1331_v35, 0.0  ;;  %v1344_v19 = vsel %vm1289_vm5, %v1332_v25, 0.0  ;;  %v1346_v26 = vsel %vm1289_vm5, %v1333_v61, 0.0 }
 0x140   : > { %v1348_v7 = vsel %vm1289_vm5, %v1334_v5, 0.0 }
 0x141   : > { %v1339_v63 = vadd.f32 %v1338_v41, %v1337_v27 }
 0x143   : > { %v1341_v11 = vadd.f32 %v1340_v40, %v1339_v63 }
 0x145   : > { %v1343_v39 = vadd.f32 %v1342_v28, %v1341_v11 }
 0x147   : > { %v1345_v30 = vadd.f32 %v1344_v19, %v1343_v39 }
 0x149   : > { %v1347_v44 = vadd.f32 %v1346_v26, %v1345_v30 }
 0x14b   : > { %v1349_v31 = vadd.f32 %v1348_v7, %v1347_v44 }
 0x14d   : > { %v1350_v33 = vrot.slane %v1349_v31, 4 }
 0x14f   : > { %v1351_v9 = vadd.f32 %v1350_v33, %v1349_v31 }
 0x151   : > { %v1352_v34 = vrot.slane %v1351_v9, 2 }
 0x153   : > { %v1353_v32 = vadd.f32 %v1352_v34, %v1351_v9 }
 0x155   : > { %v1354_v22 = vrot.slane %v1353_v32, 1 }
 0x157   : > { %v1355_v42 = vadd.f32 %v1354_v22, %v1353_v32 }
 0x159   : > { %v1356_v29 = vmul.f32 %v1355_v42, %v1317_v55 }
 0x15b   : > { %v1358_v20 = vadd.f32 1e-05, %v1356_v29 }
 0x15d   : > { %1720 = vrsqrt.f32 %v1358_v20  ;;  %vm1365_vm8 = vweird.f32 %v1358_v20 }
 0x163   : > { %v1721_v21 = vpop.eup %1720 }
 0x164   : > { %v1360_v38 = vmul.f32 %v1721_v21, %v1358_v20  ;;  %vm1366_vm7 = vweird.f32 %v1721_v21 }
 0x165   : > { %vm1367_vm9 = vmor %vm1365_vm8, %vm1366_vm7 }
 0x166   : > { %v1361_v8 = vmul.f32 %v1721_v21, %v1360_v38 }
 0x168   : > { %v1362_v43 = vmul.f32 0.5, %v1361_v8 }
 0x16a   : > { %v1363_v46 = vsub.f32 1.5, %v1362_v43 }
 0x16c   : > { %v1364_v47 = vmul.f32 %v1721_v21, %v1363_v46 }
 0x16e   : > { %v1368_v13 = vsel %vm1367_vm9, %v1721_v21, %v1364_v47 }
 0x16f   : > { %v1369_v15 = vmul.f32 %v1368_v13, %v1357_v12 }
 0x171   : > { %v1371_v23 = vperm.slane %v1369_v15, 0 }
 0x173   : > { %v1373_v48 = vmul.f32 %v1371_v23, %v1319_v16  ;;  %v1374_v49 = vmul.f32 %v1371_v23, %v1320_v57  ;;  %v1375_v36 = vmul.f32 %v1371_v23, %v1321_v58  ;;  %v1376_v60 = vmul.f32 %v1371_v23, %v1322_v59 }
 0x174   : > { %v1377_v50 = vmul.f32 %v1371_v23, %v1323_v62  ;;  %v1378_v51 = vmul.f32 %v1371_v23, %v1324_v2  ;;  %v1379_v52 = vmul.f32 %v1371_v23, %v1325_v1  ;;  %v1380_v10 = vmul.f32 %v1371_v23, %v1326_v6 }
 0x175   : > { %v1385_v53 = vadd.f32 %v1717_v18, %v1373_v48  ;;  %v1386_v54 = vadd.f32 %v1717_v18, %v1374_v49  ;;  %v1387_v4 = vadd.f32 %v1717_v18, %v1375_v36  ;;  %v1388_v55 = vadd.f32 %v1717_v18, %v1376_v60 }
 0x176   : > { %v1389_v56 = vadd.f32 %v1717_v18, %v1377_v50  ;;  %v1390_v45 = vadd.f32 %v1717_v18, %v1378_v51  ;;  %v1391_v14 = vadd.f32 %v1717_v18, %v1379_v52  ;;  %v1392_v37 = vadd.f32 %v1717_v18, %v1380_v10 }
 0x177   : > { %vm1393_vm11 = vcmp.gt.f32.partialorder %v1385_v53, 0.0  ;;  %vm1394_vm12 = vcmp.gt.f32.partialorder %v1386_v54, 0.0  ;;  %vm1395_vm13 = vcmp.gt.f32.partialorder %v1387_v4, 0.0  ;;  %vm1396_vm14 = vcmp.gt.f32.partialorder %v1388_v55, 0.0 }
 0x178   : > { %vm1397_vm15 = vcmp.gt.f32.partialorder %v1389_v56, 0.0  ;;  %vm1398_vm0 = vcmp.gt.f32.partialorder %v1390_v45, 0.0  ;;  %vm1399_vm1 = vcmp.gt.f32.partialorder %v1391_v14, 0.0  ;;  %v1401_v16 = vmul.f32 0.01, %v1385_v53 }
 0x179   : > { %v1402_v57 = vmul.f32 0.01, %v1386_v54  ;;  %v1403_v58 = vmul.f32 0.01, %v1387_v4  ;;  %v1404_v59 = vmul.f32 0.01, %v1388_v55 }
 0x17a   : > { %v1405_v62 = vmul.f32 0.01, %v1389_v56  ;;  %v1406_v2 = vmul.f32 0.01, %v1390_v45  ;;  %v1407_v1 = vmul.f32 0.01, %v1391_v14  ;;  %v1409_v17 = vsel %vm1393_vm11, %v1385_v53, %v1401_v16 }
 0x17b   : > { %v1408_v6 = vmul.f32 0.01, %v1392_v37  ;;  %v1410_v24 = vsel %vm1394_vm12, %v1386_v54, %v1402_v57  ;;  %vm1400_vm2 = vcmp.gt.f32.partialorder %v1392_v37, 0.0  ;;  %v1411_v0 = vsel %vm1395_vm13, %v1387_v4, %v1403_v58 }
 0x17c   : > { %v1412_v3 = vsel %vm1396_vm14, %v1388_v55, %v1404_v59  ;;  %v1413_v27 = vsel %vm1397_vm15, %v1389_v56, %v1405_v62  ;;  %v1414_v35 = vsel %vm1398_vm0, %v1390_v45, %v1406_v2  ;;  %v1417_v41 = vpack.c.bf16 %v1409_v17, %v1409_v17 }
 0x17d   : > { %v1418_v63 = vpack.c.bf16 %v1410_v24, %v1410_v24  ;;  %v1415_v25 = vsel %vm1399_vm1, %v1391_v14, %v1407_v1  ;;  %v1419_v40 = vpack.c.bf16 %v1411_v0, %v1411_v0  ;;  %v1420_v11 = vpack.c.bf16 %v1412_v3, %v1412_v3 }
 0x17e   : > { %v1416_v61 = vsel %vm1400_vm2, %v1392_v37, %v1408_v6  ;;  %v1421_v28 = vpack.c.bf16 %v1413_v27, %v1413_v27  ;;  %1426 = vst.msk [vmem:[%s403_s24] sm:$0xf] %vm1425_vm10, %v1417_v41  ;;  %v1422_v39 = vpack.c.bf16 %v1414_v35, %v1414_v35  ;;  %v1423_v5 = vpack.c.bf16 %v1415_v25, %v1415_v25 }
 0x17f   : > { %1427 = vst.msk [vmem:[%s403_s24 + $0x4] sm:$0xf] %vm1425_vm10, %v1418_v63  ;;  %v1424_v19 = vpack.c.bf16 %v1416_v61, %v1416_v61 }
 0x180   : > { %1428 = vst.msk [vmem:[%s403_s24 + $0x8] sm:$0xf] %vm1425_vm10, %v1419_v40 }
 0x181   : > { %1429 = vst.msk [vmem:[%s403_s24 + $0xc] sm:$0xf] %vm1425_vm10, %v1420_v11 }
 0x182   : > { %1430 = vst.msk [vmem:[%s403_s24 + $0x10] sm:$0xf] %vm1425_vm10, %v1421_v28 }
 0x183   : > { %1431 = vst.msk [vmem:[%s403_s24 + $0x14] sm:$0xf] %vm1425_vm10, %v1422_v39 }
 0x184   : > { %1432 = vst.msk [vmem:[%s403_s24 + $0x18] sm:$0xf] %vm1425_vm10, %v1423_v5 }
 0x185   : > { %1433 = vst.msk [vmem:[%s403_s24 + $0x1c] sm:$0xf] %vm1425_vm10, %v1424_v19 }
 0x186 PF: > { %s17_s26 = sadd.s32 1, %s1744_s26   ;;  %s2210_s24 = smov %s1740_s25 }
 0x187   : > { %p14_p5 = scmp.ge.s32.totalorder %s17_s26, 4   ;;  %s2211_s25 = smov %s2213_s27 }
 0x189   :  { %16 = sbr.rel (!%p14_p5) target bundleno = 2 (0x2), region = 104 }

// kernel: _lambda_.6
= control target key start
LH: loop header
LB: loop body
LE: loop exit
PB: predicated region body
PF: predicated region fallthrough
CT: control target
= control target key end

     0   :  { %s2951_s15 = smov 0   ;;  %s2953_s16 = smov 0   ;;  %s4424_s0 = inlined_call_operand.vmem [shape: bf16[2,16,16,8], index: 0, kind: input, shape index: {}]   ;;  %s4425_s1 = inlined_call_operand.vmem [shape: bf16[9,8,8], index: 1, kind: input, shape index: {}]   ;;  %s4426_s2 = inlined_call_operand.vmem [shape: f32[1,8], index: 2, kind: input, shape index: {}]   ;;  %s4427_s3 = inlined_call_operand.vmem [shape: f32[1,8], index: 3, kind: input, shape index: {}]   ;;  %s4428_s4 = inlined_call_operand.vmem [shape: bf16[2,16,16,8], index: 4, kind: output, shape index: {}]  }
   0x1   :  { %s2955_s17 = smov 0  }
   0x2 LB: > { %s26_s18 = sadd.s32 1, %s2918_s16  ;;  %p2627_p0 = scmp.ge.s32.totalorder %s2922_s17, 1  ;;  %s2922_s17 = sphi %s2955_s17, %s14_s17   ;;  %s2918_s16 = sphi %s2953_s16, %s4532_s16   ;;  %s2914_s15 = sphi %s2951_s15, %s4531_s15  }
   0x3   : > { %p28_p1 = scmp.ge.s32.totalorder %s26_s18, 2  ;;  %p201_p2 = scmp.lt.s32.totalorder %s2922_s17, 3 }
   0x5   : > { %s4534_s18 = smov (%p28_p1, %s26_s18), 0  ;;  %p202_p3 = pnand %p2627_p0, %p201_p2 }
   0x7   : > { %205 = sbr.rel (%p202_p3) target bundleno = 910 (0x38e), region = 36 }
   0xc   : > { %v2696_v0 = vld [vmem:[%s4425_s1 + $0xc] sm:$0xf]  ;;  %vm607_vm0 = vcmask 1043456   ;;  %p240_p4 = scmp.lt.s32.totalorder %s2914_s15, 1  ;;  %v2728_v2 = vld [vmem:[%s4425_s1 + $0x18] sm:$0xf] }
   0xd   : > { %v609_v1 = vsel %vm607_vm0, %v2696_v0, 0  ;;  %v798_v3 = vsel %vm607_vm0, %v2728_v2, 0  ;;  %v2744_v4 = vld [vmem:[%s4425_s1 + $0x4] sm:$0xf]  ;;  %v555_v5 = vld [vmem:[%s4425_s1] sm:$0xf] }
   0xe   : > { %2866 = vmatpush.bf16.msra.mxu1 %v609_v1  ;;  %2867 = vmatpush.bf16.msra.mxu2 %v609_v1  ;;  %s4536_s15 = smov (!%p240_p4, %s2914_s15), 1  ;;  %v1156_v6 = vsel %vm607_vm0, %v2744_v4, 0  ;;  %v704_v7 = vsel %vm607_vm0, %v555_v5, 0  ;;  %v2761_v8 = vld [vmem:[%s4425_s1 + $0x10] sm:$0xf]  ;;  %vm520_vm1 = vcmask 1040384  }
   0xf   : > { %2868 = vmatpush.bf16.msra.mxu3 %v609_v1  ;;  %618 = vmatpush.bf16.msra.mxu0 %v609_v1  ;;  %s2848_s29 = sshll.u32 %s4536_s15, 7  ;;  %v1285_v9 = vsel %vm607_vm0, %v2761_v8, 0  ;;  %vm521_vm2 = vsmask.f32 256  ;;  %vm558_vm4 = vcmask 64512   ;;  %vm1567_vm6 = vcmask 1046528  }
  0x10   : > { %s2997_s6 = scalar_lea.vmem %s4424_s0, %s2848_s29  ;;  %vm3007_vm3 = vmand %vm520_vm1, %vm521_vm2  ;;  %vm921_vm5 = vsmask.f32 7424  ;;  %s4233_s25 = scalar_lea.vmem %s4428_s4, %s2848_s29 }
  0x11   : > { %v2854_v10 = vld [vmem:[%s2997_s6 + $0x20] sm:$0xff]  ;;  %v2855_v29 = vld [vmem:[%s2997_s6 + $0x28] sm:$0xff]  ;;  %v2856_v57 = vld [vmem:[%s2997_s6 + $0x30] sm:$0xff] }
  0x12   : > { %807 = vmatpush.bf16.msrb.mxu2 %v798_v3  ;;  %713 = vmatpush.bf16.msrb.mxu1 %v704_v7  ;;  %v2858_v11 = vld [vmem:[%s2997_s6 + $0x40] sm:$0xff]  ;;  %v405_v14 = vshrl.u32 %v2854_v10, 16  ;;  %v408_v15 = vshll.u32 %v2854_v10, 16  ;;  %v2859_v30 = vld [vmem:[%s2997_s6 + $0x48] sm:$0xff]  ;;  %v412_v39 = vshrl.u32 %v2855_v29, 16  ;;  %v415_v44 = vshll.u32 %v2855_v29, 16 }
  0x13   : > { %1165 = vmatpush.bf16.msrb.mxu3 %v1156_v6  ;;  %1294 = vmatpush.bf16.msrb.mxu0 %v1285_v9  ;;  %v2862_v12 = vld [vmem:[%s2997_s6 + $0x60] sm:$0xff]  ;;  %v433_v16 = vshrl.u32 %v2858_v11, 16  ;;  %v436_v17 = vshll.u32 %v2858_v11, 16  ;;  %v2863_v33 = vld [vmem:[%s2997_s6 + $0x68] sm:$0xff]  ;;  %v440_v40 = vshrl.u32 %v2859_v30, 16  ;;  %v443_v46 = vshll.u32 %v2859_v30, 16 }
  0x14   : > { %v2850_v13 = vld [vmem:[%s2997_s6] sm:$0xff]  ;;  %v461_v18 = vshrl.u32 %v2862_v12, 16  ;;  %v464_v19 = vshll.u32 %v2862_v12, 16  ;;  %v3003_v22 = vrot.slane %v405_v14, 7  ;;  %v2851_v34 = vld [vmem:[%s2997_s6 + $0x8] sm:$0xff]  ;;  %v468_v41 = vshrl.u32 %v2863_v33, 16 }
  0x15   : > { %v377_v20 = vshrl.u32 %v2850_v13, 16  ;;  %v380_v21 = vshll.u32 %v2850_v13, 16  ;;  %v3005_v23 = vrot.slane %v433_v16, 7  ;;  %v384_v42 = vshrl.u32 %v2851_v34, 16  ;;  %v2860_v58 = vld [vmem:[%s2997_s6 + $0x50] sm:$0xff] }
  0x16   : > { %v3011_v25 = vrot.slane %v461_v18, 7  ;;  %v410_v27 = vor.u32 %v408_v15, %v3003_v22  ;;  %v3047_v43 = vrot.slane %v412_v39, 7  ;;  %v3049_v45 = vrot.slane %v440_v40, 7  ;;  %v2864_v61 = vld [vmem:[%s2997_s6 + $0x70] sm:$0xff]  ;;  %v2861_v18 = vld [vmem:[%s2997_s6 + $0x58] sm:$0xff] }
  0x17   : > { %v3013_v26 = vrot.slane %v377_v20, 7  ;;  %v438_v28 = vor.u32 %v436_v17, %v3005_v23  ;;  %v3051_v47 = vrot.slane %v468_v41, 7  ;;  %v471_v48 = vshll.u32 %v2863_v33, 16  ;;  %v2852_v62 = vld [vmem:[%s2997_s6 + $0x10] sm:$0xff]  ;;  %v2857_v17 = vld [vmem:[%s2997_s6 + $0x38] sm:$0xff] }
  0x18   : > { %v466_v31 = vor.u32 %v464_v19, %v3011_v25  ;;  %v3025_v35 = vsel %vm3007_vm3, 0, %v410_v27  ;;  %v3053_v49 = vrot.slane %v384_v42, 7  ;;  %v387_v50 = vshll.u32 %v2851_v34, 16  ;;  %v2865_v19 = vld [vmem:[%s2997_s6 + $0x78] sm:$0xff]  ;;  %v2812_v34 = vld [vmem:[%s4425_s1 + $0x14] sm:$0xf] }
  0x19   : > { %v382_v32 = vor.u32 %v380_v21, %v3013_v26  ;;  %4448 = vst [vmem:[#allocation2_spill] sm:$0xff] %v3025_v35  ;;  %v3029_v36 = vsel %vm3007_vm3, 0, %v438_v28  ;;  %2701 = vmatmul.msk.bf16.vlgmr.msra.gmra.mxu1 %vm558_vm4, %v3025_v35  ;;  %v417_v51 = vor.u32 %v415_v44, %v3047_v43  ;;  %v445_v52 = vor.u32 %v443_v46, %v3049_v45  ;;  %v2853_v27 = vld [vmem:[%s2997_s6 + $0x18] sm:$0xff]  ;;  %v2829_v42 = vld [vmem:[%s4425_s1 + $0x20] sm:$0xf] }
  0x1a   : > { %2705 = vmatmul.msk.bf16.vlgmr.msra.gmra.mxu2 %vm558_vm4, %v3029_v36  ;;  %v3037_v37 = vsel %vm3007_vm3, 0, %v466_v31  ;;  %v473_v53 = vor.u32 %v471_v48, %v3051_v47  ;;  %v389_v54 = vor.u32 %v387_v50, %v3053_v49  ;;  %v419_v63 = vshrl.u32 %v2856_v57, 16  ;;  %v2795_v31 = vld [vmem:[%s4425_s1 + $0x8] sm:$0xf]  ;;  %v2778_v39 = vld [vmem:[%s4425_s1 + $0x1c] sm:$0xf] }
  0x1b   : > { %v3041_v38 = vsel %vm3007_vm3, 0, %v382_v32  ;;  %2709 = vmatmul.msk.bf16.vlgmr.msra.gmra.mxu3 %vm558_vm4, %v3037_v37  ;;  %v3061_v55 = vsel %vm3007_vm3, 0, %v417_v51  ;;  %v3065_v56 = vsel %vm3007_vm3, 0, %v445_v52  ;;  %v447_v0 = vshrl.u32 %v2860_v58, 16 }
  0x1c   : > { %2697 = vmatmul.msk.bf16.vlgmr.msra.gmra.mxu0 %vm558_vm4, %v3041_v38  ;;  %4449 = vst [vmem:[#allocation3_spill] sm:$0xff] %v3061_v55  ;;  %v3071_v59 = vsel %vm3007_vm3, 0, %v473_v53  ;;  %v3075_v60 = vsel %vm3007_vm3, 0, %v389_v54  ;;  %v475_v1 = vshrl.u32 %v2864_v61, 16  ;;  %v391_v2 = vshrl.u32 %v2852_v62, 16 }
  0x1d   : > { %v3087_v3 = vrot.slane %v419_v63, 7  ;;  %v422_v4 = vshll.u32 %v2856_v57, 16  ;;  %v3089_v5 = vrot.slane %v447_v0, 7  ;;  %v450_v6 = vshll.u32 %v2860_v58, 16 }
  0x1e   : > { %v3091_v7 = vrot.slane %v475_v1, 7  ;;  %v478_v8 = vshll.u32 %v2864_v61, 16  ;;  %v3093_v9 = vrot.slane %v391_v2, 7  ;;  %v394_v10 = vshll.u32 %v2852_v62, 16 }
  0x1f   : > { %v424_v11 = vor.u32 %v422_v4, %v3087_v3  ;;  %v452_v12 = vor.u32 %v450_v6, %v3089_v5  ;;  %v426_v28 = vshrl.u32 %v2857_v17, 16  ;;  %v454_v29 = vshrl.u32 %v2861_v18, 16 }
  0x20   : > { %v480_v13 = vor.u32 %v478_v8, %v3091_v7  ;;  %v396_v14 = vor.u32 %v394_v10, %v3093_v9  ;;  %v482_v30 = vshrl.u32 %v2865_v19, 16  ;;  %v398_v32 = vshrl.u32 %v2853_v27, 16 }
  0x21   : > { %v3101_v15 = vsel %vm3007_vm3, 0, %v424_v11  ;;  %v3105_v16 = vsel %vm3007_vm3, 0, %v452_v12  ;;  %v1669_v33 = vsel %vm607_vm0, %v2795_v31, 0  ;;  %v1798_v40 = vsel %vm607_vm0, %v2812_v34, 0 }
  0x22   : > { %4450 = vst [vmem:[#allocation4_spill] sm:$0xff] %v3101_v15  ;;  %v3112_v20 = vsel %vm3007_vm3, 0, %v480_v13  ;;  %v3116_v21 = vsel %vm3007_vm3, 0, %v396_v14  ;;  %1678 = vmatpush.bf16.msra.mxu2 %v1669_v33  ;;  %v1411_v41 = vsel %vm607_vm0, %v2778_v39, 0  ;;  %1807 = vmatpush.bf16.msra.mxu3 %v1798_v40  ;;  %v1924_v44 = vsel %vm607_vm0, %v2829_v42, 0 }
  0x23   : > { %1420 = vmatpush.bf16.msra.mxu1 %v1411_v41  ;;  %v3143_v46 = vrot.slane %v426_v28, 7  ;;  %v429_v48 = vshll.u32 %v2857_v17, 16  ;;  %v3145_v50 = vrot.slane %v454_v29, 7  ;;  %v457_v51 = vshll.u32 %v2861_v18, 16  ;;  %1933 = vmatpush.bf16.msra.mxu0 %v1924_v44 }
  0x24   : > { %v3147_v52 = vrot.slane %v482_v30, 7  ;;  %v485_v53 = vshll.u32 %v2865_v19, 16  ;;  %v400_v54 = vrot.slane %v398_v32, 7  ;;  %v401_v57 = vshll.u32 %v2853_v27, 16 }
  0x25   : > { %v431_v58 = vor.u32 %v429_v48, %v3143_v46  ;;  %v459_v61 = vor.u32 %v457_v51, %v3145_v50  ;;  %v931_v6 = vshll.u32 %v3041_v38, 16  ;;  %v3180_v8 = vsel %vm3007_vm3, %v3013_v26, 0 }
  0x26   : > { %v487_v62 = vor.u32 %v485_v53, %v3147_v52  ;;  %v403_v63 = vor.u32 %v401_v57, %v400_v54  ;;  %v929_v10 = vshrl.u32 %v3041_v38, 16  ;;  %v936_v12 = vshll.u32 %v3180_v8, 16 }
  0x27   : > { %v3154_v0 = vsel %vm3007_vm3, 0, %v431_v58  ;;  %v3158_v1 = vsel %vm3007_vm3, 0, %v459_v61  ;;  %v933_v11 = vrot.slane %v931_v6, 1  ;;  %v4429_v17 = vmov 0  }
  0x28   : > { %4451 = vst [vmem:[#allocation5_spill] sm:$0xff] %v3154_v0  ;;  %v3162_v2 = vsel %vm3007_vm3, 0, %v487_v62  ;;  %v3166_v4 = vsel %vm3007_vm3, 0, %v403_v63  ;;  %v938_v14 = vrot.slane %v936_v12, 1  ;;  %v3185_v18 = vrot.slane %v4429_v17, 1 }
  0x29   : > { %2702 = vmatmul.msk.bf16.gmra.mxu1 %vm558_vm4, %v3061_v55  ;;  %4452 = vst [vmem:[#allocation6_spill] sm:$0xff] %v3166_v4  ;;  %v934_v13 = vor.u32 %v933_v11, %v929_v10  ;;  %v942_v26 = vshll.u32 %v3075_v60, 16  ;;  %v3198_v27 = vsel %vm3007_vm3, %v3053_v49, 0  ;;  %v940_v28 = vshrl.u32 %v3075_v60, 16 }
  0x2a   : > { %2706 = vmatmul.msk.bf16.gmra.mxu2 %vm558_vm4, %v3065_v56  ;;  %v947_v30 = vshll.u32 %v3198_v27, 16  ;;  %v953_v49 = vshll.u32 %v3116_v21, 16  ;;  %v3216_v34 = vsel %vm3007_vm3, %v3093_v9, 0  ;;  %v951_v39 = vshrl.u32 %v3116_v21, 16 }
  0x2b   : > { %2710 = vmatmul.msk.bf16.gmra.mxu3 %vm558_vm4, %v3071_v59  ;;  %v939_v19 = vsel %vm921_vm5, %v934_v13, %v938_v14  ;;  %v944_v29 = vrot.slane %v942_v26, 1  ;;  %v958_v41 = vshll.u32 %v3216_v34, 16  ;;  %v964_v9 = vshll.u32 %v3166_v4, 16 }
  0x2c   : > { %2698 = vmatmul.msk.bf16.gmra.mxu0 %vm558_vm4, %v3075_v60  ;;  %v949_v32 = vrot.slane %v947_v30, 1  ;;  %v955_v40 = vrot.slane %v953_v49, 1  ;;  %v3234_v51 = vsel %vm3007_vm3, %v400_v54, 0  ;;  %v962_v53 = vshrl.u32 %v3166_v4, 16 }
  0x2d   : > { %v945_v31 = vor.u32 %v944_v29, %v940_v28  ;;  %v960_v44 = vrot.slane %v958_v41, 1  ;;  %4453 = vst [vmem:[#allocation7_spill] sm:$0xff] %v3234_v51  ;;  %v966_v57 = vrot.slane %v964_v9, 1  ;;  %v969_v58 = vshll.u32 %v3234_v51, 16 }
  0x2e   : > { %v956_v42 = vor.u32 %v955_v40, %v951_v39  ;;  %v975_v54 = vshll.u32 %v3025_v35, 16  ;;  %v3253_v6 = vsel %vm3007_vm3, %v3003_v22, 0  ;;  %v973_v10 = vshrl.u32 %v3025_v35, 16 }
  0x2f   : > { %v3203_v33 = vsel %vm921_vm5, %v945_v31, %v949_v32  ;;  %v967_v61 = vor.u32 %v966_v57, %v962_v53  ;;  %v971_v62 = vrot.slane %v969_v58, 1  ;;  %4455 = vst [vmem:[#allocation9_spill] sm:$0xff] %v3253_v6  ;;  %v980_v12 = vshll.u32 %v3253_v6, 16 }
  0x30   : > { %v3221_v48 = vsel %vm921_vm5, %v956_v42, %v960_v44  ;;  %v977_v11 = vrot.slane %v975_v54, 1  ;;  %v986_v22 = vshll.u32 %v3061_v55, 16  ;;  %v3278_v30 = vsel %vm3007_vm3, %v3047_v43, 0 }
  0x31   : > { %v3239_v63 = vsel %vm921_vm5, %v967_v61, %v971_v62  ;;  %v982_v14 = vrot.slane %v980_v12, 1  ;;  %4457 = vst [vmem:[#allocation11_spill] sm:$0xff] %v3278_v30  ;;  %v984_v39 = vshrl.u32 %v3061_v55, 16  ;;  %v991_v41 = vshll.u32 %v3278_v30, 16 }
  0x32   : > { %4454 = vst [vmem:[#allocation8_spill] sm:$0xff] %v3239_v63  ;;  %v978_v13 = vor.u32 %v977_v11, %v973_v10  ;;  %v988_v40 = vrot.slane %v986_v22, 1  ;;  %v997_v61 = vshll.u32 %v3101_v15, 16  ;;  %v3313_v54 = vsel %vm3007_vm3, %v3087_v3, 0 }
  0x33   : > { %v993_v44 = vrot.slane %v991_v41, 1  ;;  %4462 = vst [vmem:[#allocation16_spill] sm:$0xff] %v3313_v54  ;;  %v1002_v22 = vshll.u32 %v3313_v54, 16 }
  0x34   : > { %v3262_v28 = vsel %vm921_vm5, %v978_v13, %v982_v14  ;;  %v989_v42 = vor.u32 %v988_v40, %v984_v39  ;;  %v995_v13 = vshrl.u32 %v3101_v15, 16  ;;  %v999_v14 = vrot.slane %v997_v61, 1 }
  0x35   : > { %4456 = vst [vmem:[#allocation10_spill] sm:$0xff] %v3262_v28  ;;  %v1004_v40 = vrot.slane %v1002_v22, 1  ;;  %v1008_v61 = vshll.u32 %v3154_v0, 16 }
  0x36   : > { %v3297_v58 = vsel %vm921_vm5, %v989_v42, %v993_v44  ;;  %v1000_v39 = vor.u32 %v999_v14, %v995_v13  ;;  %v3348_v14 = vsel %vm3007_vm3, %v3143_v46, 0 }
  0x37   : > { %4460 = vst [vmem:[#allocation14_spill] sm:$0xff] %v3297_v58  ;;  %v1013_v54 = vshll.u32 %v3348_v14, 16 }
  0x38   : > { %4468 = vst [vmem:[#allocation22_spill] sm:$0xff] %v3348_v14 }
  0x39   : > { %2703 = vmatmul.msk.bf16.gmra.mxu1 %vm558_vm4, %v3101_v15 }
  0x3a   : > { %2707 = vmatmul.msk.bf16.gmra.mxu2 %vm558_vm4, %v3105_v16 }
  0x3b   : > { %2711 = vmatmul.msk.bf16.gmra.mxu3 %vm558_vm4, %v3112_v20 }
  0x3c   : > { %2699 = vmatmul.msk.bf16.gmra.mxu0 %vm558_vm4, %v3116_v21 }
  0x49   : > { %2704 = vmatmul.msk.bf16.gmra.mxu1 %vm558_vm4, %v3154_v0 }
  0x4a   : > { %2708 = vmatmul.msk.bf16.gmra.mxu2 %vm558_vm4, %v3158_v1 }
  0x4b   : > { %2712 = vmatmul.msk.bf16.gmra.mxu3 %vm558_vm4, %v3162_v2 }
  0x4c   : > { %2700 = vmatmul.msk.bf16.gmra.mxu0 %vm558_vm4, %v3166_v4 }
  0x59   : > { %714 = vmatmul.bf16.vlgmr.msrb.gmra.mxu1 %v4429_v17  ;;  %v3332_v17 = vsel %vm921_vm5, %v1000_v39, %v1004_v40 }
  0x5a   : > { %2729 = vmatmul.msk.bf16.vlgmr.msrb.gmra.mxu2 %vm558_vm4, %v3075_v60  ;;  %4466 = vst [vmem:[#allocation20_spill] sm:$0xff] %v3332_v17 }
  0x5b   : > { %2745 = vmatmul.msk.bf16.vlgmr.msrb.gmra.mxu3 %vm558_vm4, %v3185_v18 }
  0x5c   : > { %2762 = vmatmul.msk.bf16.vlgmr.msrb.gmra.mxu0 %vm558_vm4, %v939_v19 }
  0x69   : > { %2713 = vmatmul.msk.bf16.gmra.mxu1 %vm558_vm4, %v3041_v38 }
  0x6a   : > { %2730 = vmatmul.msk.bf16.gmra.mxu2 %vm558_vm4, %v3116_v21 }
  0x6b   : > { %2746 = vmatmul.msk.bf16.gmra.mxu3 %vm558_vm4, %v939_v19 }
  0x6c   : > { %2763 = vmatmul.msk.bf16.gmra.mxu0 %vm558_vm4, %v3203_v33 }
  0x79   : > { %2714 = vmatmul.msk.bf16.gmra.mxu1 %vm558_vm4, %v3075_v60 }
  0x7a   : > { %2731 = vmatmul.msk.bf16.gmra.mxu2 %vm558_vm4, %v3166_v4 }
  0x7b   : > { %2747 = vmatmul.msk.bf16.gmra.mxu3 %vm558_vm4, %v3203_v33 }
  0x7c   : > { %2764 = vmatmul.msk.bf16.gmra.mxu0 %vm558_vm4, %v3221_v48 }
  0x89   : > { %2715 = vmatmul.msk.bf16.gmra.mxu1 %vm558_vm4, %v3116_v21 }
  0x8a   : > { %2732 = vmatmul.msk.bf16.gmra.mxu2 %vm558_vm4, %v3025_v35 }
  0x8b   : > { %2748 = vmatmul.msk.bf16.gmra.mxu3 %vm558_vm4, %v3221_v48 }
  0x8c   : > { %2765 = vmatmul.msk.bf16.gmra.mxu0 %vm558_vm4, %v3239_v63 }
  0x96   : > { %v3257_v19 = vpop.f32.mrf.mxu1 }
  0x99   : > { %v3259_v26 = vpop.f32.mrf.mxu0  ;;  %2716 = vmatmul.msk.bf16.gmra.mxu1 %vm558_vm4, %v3166_v4 }
  0x9a   : > { %2733 = vmatmul.msk.bf16.gmra.mxu2 %vm558_vm4, %v3061_v55 }
  0x9b   : > { %2749 = vmatmul.msk.bf16.gmra.mxu3 %vm558_vm4, %v3239_v63 }
  0x9c   : > { %2766 = vmatmul.msk.bf16.gmra.mxu0 %vm558_vm4, %v3262_v28 }
  0x9d   : > { %v3273_v29 = vpop.f32.mrf.mxu2 }
  0x9e   : > { %v3280_v31 = vpop.f32.mrf.mxu3  ;;  %v3282_v32 = vpop.f32.mrf.mxu1 }
  0x9f   : > { %4458 = vst [vmem:[#allocation12_spill] sm:$0xff] %v3280_v31  ;;  %v1015_v31 = vrot.slane %v1013_v54, 1  ;;  %v1019_v54 = vshll.u32 %v3029_v36, 16 }
  0xa1   : > { %v3284_v49 = vpop.f32.mrf.mxu0  ;;  %v1021_v14 = vrot.slane %v1019_v54, 1 }
  0xa5   : > { %v3288_v9 = vpop.f32.mrf.mxu2 }
  0xa6   : > { %v3290_v53 = vpop.f32.mrf.mxu3  ;;  %v3292_v57 = vpop.f32.mrf.mxu1 }
  0xa7   : > { %4459 = vst [vmem:[#allocation13_spill] sm:$0xff] %v3290_v53 }
  0xa9   : > { %v3294_v43 = vpop.f32.mrf.mxu0  ;;  %2717 = vmatmul.msk.bf16.gmra.mxu1 %vm558_vm4, %v3025_v35 }
  0xaa   : > { %2734 = vmatmul.msk.bf16.gmra.mxu2 %vm558_vm4, %v3101_v15 }
  0xab   : > { %2750 = vmatmul.msk.bf16.gmra.mxu3 %vm558_vm4, %v3262_v28 }
  0xac   : > { %2767 = vmatmul.msk.bf16.gmra.mxu0 %vm558_vm4, %v3297_v58 }
  0xad   : > { %v3308_v62 = vpop.f32.mrf.mxu2 }
  0xae   : > { %4461 = vst [vmem:[#allocation15_spill] sm:$0xff] %v3308_v62  ;;  %v3315_v10 = vpop.f32.mrf.mxu3  ;;  %v3317_v11 = vpop.f32.mrf.mxu1 }
  0xaf   : > { %4463 = vst [vmem:[#allocation17_spill] sm:$0xff] %v3315_v10  ;;  %v1010_v10 = vrot.slane %v1008_v61, 1 }
  0xb1   : > { %v3319_v12 = vpop.f32.mrf.mxu0 }
  0xb5   : > { %v3323_v41 = vpop.f32.mrf.mxu2 }
  0xb6   : > { %4464 = vst [vmem:[#allocation18_spill] sm:$0xff] %v3323_v41  ;;  %v3325_v42 = vpop.f32.mrf.mxu3  ;;  %v3327_v44 = vpop.f32.mrf.mxu1 }
  0xb7   : > { %4465 = vst [vmem:[#allocation19_spill] sm:$0xff] %v3325_v42  ;;  %v1006_v42 = vshrl.u32 %v3154_v0, 16 }
  0xb9   : > { %v3329_v3 = vpop.f32.mrf.mxu0  ;;  %2718 = vmatmul.msk.bf16.gmra.mxu1 %vm558_vm4, %v3061_v55  ;;  %v1011_v53 = vor.u32 %v1010_v10, %v1006_v42 }
  0xba   : > { %2735 = vmatmul.msk.bf16.gmra.mxu2 %vm558_vm4, %v3154_v0 }
  0xbb   : > { %2751 = vmatmul.msk.bf16.gmra.mxu3 %vm558_vm4, %v3297_v58 }
  0xbc   : > { %2768 = vmatmul.msk.bf16.gmra.mxu0 %vm558_vm4, %v3332_v17 }
  0xbd   : > { %v3343_v13 = vpop.f32.mrf.mxu2 }
  0xbe   : > { %4467 = vst [vmem:[#allocation21_spill] sm:$0xff] %v3343_v13  ;;  %v3350_v22 = vpop.f32.mrf.mxu3  ;;  %v3352_v39 = vpop.f32.mrf.mxu1 }
  0xbf   : > { %4469 = vst [vmem:[#allocation23_spill] sm:$0xff] %v3350_v22  ;;  %v3367_v22 = vsel %vm921_vm5, %v1011_v53, %v1015_v31  ;;  %v3383_v31 = vsel %vm3007_vm3, %v3005_v23, 0 }
  0xc0   : > { %4472 = vst [vmem:[#allocation26_spill] sm:$0xff] %v3367_v22 }
  0xc1   : > { %v3354_v40 = vpop.f32.mrf.mxu0  ;;  %4474 = vst [vmem:[#allocation28_spill] sm:$0xff] %v3383_v31 }
  0xc5   : > { %v3358_v58 = vpop.f32.mrf.mxu2 }
  0xc6   : > { %4470 = vst [vmem:[#allocation24_spill] sm:$0xff] %v3358_v58  ;;  %v3360_v30 = vpop.f32.mrf.mxu3  ;;  %v3362_v55 = vpop.f32.mrf.mxu1 }
  0xc7   : > { %4471 = vst [vmem:[#allocation25_spill] sm:$0xff] %v3360_v30  ;;  %v1017_v30 = vshrl.u32 %v3029_v36, 16 }
  0xc9   : > { %v3364_v46 = vpop.f32.mrf.mxu0  ;;  %2719 = vmatmul.msk.bf16.gmra.mxu1 %vm558_vm4, %v3101_v15  ;;  %v1022_v15 = vor.u32 %v1021_v14, %v1017_v30  ;;  %v1028_v14 = vshrl.u32 %v3065_v56, 16 }
  0xca   : > { %2736 = vmatmul.msk.bf16.gmra.mxu2 %vm558_vm4, %v3029_v36 }
  0xcb   : > { %2752 = vmatmul.msk.bf16.gmra.mxu3 %vm558_vm4, %v3332_v17  ;;  %v1024_v17 = vshll.u32 %v3383_v31, 16 }
  0xcc   : > { %2769 = vmatmul.msk.bf16.gmra.mxu0 %vm558_vm4, %v3367_v22 }
  0xcd   : > { %v3378_v10 = vpop.f32.mrf.mxu2  ;;  %v1026_v28 = vrot.slane %v1024_v17, 1  ;;  %v1030_v17 = vshll.u32 %v3065_v56, 16 }
  0xce   : > { %4473 = vst [vmem:[#allocation27_spill] sm:$0xff] %v3378_v10  ;;  %v3385_v53 = vpop.f32.mrf.mxu3  ;;  %v3387_v42 = vpop.f32.mrf.mxu1 }
  0xcf   : > { %4475 = vst [vmem:[#allocation29_spill] sm:$0xff] %v3385_v53  ;;  %v3399_v53 = vsel %vm921_vm5, %v1022_v15, %v1026_v28 }
  0xd1   : > { %v3389_v61 = vpop.f32.mrf.mxu0 }
  0xd5   : > { %v3393_v6 = vpop.f32.mrf.mxu2 }
  0xd6   : > { %4476 = vst [vmem:[#allocation30_spill] sm:$0xff] %v3393_v6  ;;  %v3395_v10 = vpop.f32.mrf.mxu3  ;;  %v715_v35 = vpop.f32.mrf.mxu1 }
  0xd7   : > { %4477 = vst [vmem:[#allocation31_spill] sm:$0xff] %v3395_v10  ;;  %v716_v23 = vadd.f32 %v715_v35, %v3259_v26  ;;  %v3413_v35 = vsel %vm3007_vm3, %v3049_v45, 0 }
  0xd9   : > { %v1296_v58 = vpop.f32.mrf.mxu0  ;;  %2720 = vmatmul.msk.bf16.gmra.mxu1 %vm558_vm4, %v3154_v0  ;;  %v1035_v0 = vshll.u32 %v3413_v35, 16 }
  0xda   : > { %2737 = vmatmul.msk.bf16.gmra.mxu2 %vm558_vm4, %v3065_v56 }
  0xdb   : > { %2753 = vmatmul.msk.bf16.gmra.mxu3 %vm558_vm4, %v3367_v22  ;;  %v1032_v22 = vrot.slane %v1030_v17, 1  ;;  %v1037_v63 = vrot.slane %v1035_v0, 1  ;;  %v1041_v0 = vshll.u32 %v3105_v16, 16 }
  0xdc   : > { %2770 = vmatmul.msk.bf16.gmra.mxu0 %vm558_vm4, %v3399_v53 }
  0xdd   : > { %v809_v30 = vpop.f32.mrf.mxu2  ;;  %v1033_v13 = vor.u32 %v1032_v22, %v1028_v14 }
  0xde   : > { %v889_v15 = vadd.f32 %v809_v30, %v716_v23  ;;  %v1167_v26 = vpop.f32.mrf.mxu3  ;;  %v717_v28 = vpop.f32.mrf.mxu1 }
  0xdf   : > { %v718_v10 = vadd.f32 %v717_v28, %v3284_v49 }
  0xe0   : > { %v1247_v54 = vadd.f32 %v1167_v26, %v889_v15  ;;  %v3422_v15 = vsel %vm921_vm5, %v1033_v13, %v1037_v63 }
  0xe1   : > { %v1298_v31 = vpop.f32.mrf.mxu0 }
  0xe2   : > { %v3418_v6 = vadd.f32 %v1296_v58, %v1247_v54 }
  0xe5   : > { %v811_v51 = vpop.f32.mrf.mxu2 }
  0xe6   : > { %v890_v4 = vadd.f32 %v811_v51, %v718_v10  ;;  %v1169_v45 = vpop.f32.mrf.mxu3  ;;  %v720_v41 = vpop.f32.mrf.mxu1  ;;  %v3438_v51 = vsel %vm3007_vm3, %v3089_v5, 0 }
  0xe7   : > { %v721_v30 = vadd.f32 %v720_v41, %v3294_v43  ;;  %v1039_v41 = vshrl.u32 %v3105_v16, 16  ;;  %v1046_v17 = vshll.u32 %v3438_v51, 16 }
  0xe8   : > { %v1248_v23 = vadd.f32 %v1169_v45, %v890_v4 }
  0xe9   : > { %v1301_v62 = vpop.f32.mrf.mxu0  ;;  %2721 = vmatmul.msk.bf16.gmra.mxu1 %vm558_vm4, %v3029_v36  ;;  %v1048_v14 = vrot.slane %v1046_v17, 1 }
  0xea   : > { %2738 = vmatmul.msk.bf16.gmra.mxu2 %vm558_vm4, %v3105_v16  ;;  %v3428_v49 = vadd.f32 %v1298_v31, %v1248_v23  ;;  %v1043_v31 = vrot.slane %v1041_v0, 1  ;;  %v3463_v0 = vsel %vm3007_vm3, %v3145_v50, 0 }
  0xeb   : > { %2754 = vmatmul.msk.bf16.gmra.mxu3 %vm558_vm4, %v3399_v53 }
  0xec   : > { %4478 = vst [vmem:[#allocation32_spill] sm:$0xff] %v3428_v49  ;;  %2771 = vmatmul.msk.bf16.gmra.mxu0 %vm558_vm4, %v3422_v15  ;;  %v1044_v28 = vor.u32 %v1043_v31, %v1039_v41 }
  0xed   : > { %v814_v4 = vpop.f32.mrf.mxu2 }
  0xee   : > { %v891_v63 = vadd.f32 %v814_v4, %v721_v30  ;;  %v1172_v43 = vpop.f32.mrf.mxu3  ;;  %v722_v58 = vpop.f32.mrf.mxu1 }
  0xef   : > { %v723_v22 = vadd.f32 %v722_v58, %v3319_v12  ;;  %v1052_v12 = vshll.u32 %v3158_v1, 16 }
  0xf0   : > { %v1249_v13 = vadd.f32 %v1172_v43, %v891_v63  ;;  %v3447_v63 = vsel %vm921_vm5, %v1044_v28, %v1048_v14  ;;  %v1057_v28 = vshll.u32 %v3463_v0, 16 }
  0xf1   : > { %v1303_v10 = vpop.f32.mrf.mxu0  ;;  %v1054_v17 = vrot.slane %v1052_v12, 1  ;;  %v3488_v12 = vsel %vm3007_vm3, %v3011_v25, 0 }
  0xf2   : > { %v3443_v26 = vadd.f32 %v1301_v62, %v1249_v13  ;;  %v1050_v13 = vshrl.u32 %v3158_v1, 16 }
  0xf5   : > { %v816_v54 = vpop.f32.mrf.mxu2 }
  0xf6   : > { %v892_v45 = vadd.f32 %v816_v54, %v723_v22  ;;  %v1174_v5 = vpop.f32.mrf.mxu3  ;;  %v725_v23 = vpop.f32.mrf.mxu1  ;;  %v1055_v54 = vor.u32 %v1054_v17, %v1050_v13 }
  0xf7   : > { %v726_v4 = vadd.f32 %v725_v23, %v3329_v3 }
  0xf8   : > { %v1250_v30 = vadd.f32 %v1174_v5, %v892_v45  ;;  %v1059_v45 = vrot.slane %v1057_v28, 1 }
  0xf9   : > { %v1306_v49 = vpop.f32.mrf.mxu0  ;;  %2722 = vmatmul.msk.bf16.gmra.mxu1 %vm558_vm4, %v3065_v56 }
  0xfa   : > { %2739 = vmatmul.msk.bf16.gmra.mxu2 %vm558_vm4, %v3158_v1  ;;  %v3453_v62 = vadd.f32 %v1303_v10, %v1250_v30 }
  0xfb   : > { %2755 = vmatmul.msk.bf16.gmra.mxu3 %vm558_vm4, %v3422_v15 }
  0xfc   : > { %4479 = vst [vmem:[#allocation33_spill] sm:$0xff] %v3453_v62  ;;  %2772 = vmatmul.msk.bf16.gmra.mxu0 %vm558_vm4, %v3447_v63 }
  0xfd   : > { %v819_v3 = vpop.f32.mrf.mxu2 }
  0xfe   : > { %v893_v43 = vadd.f32 %v819_v3, %v726_v4  ;;  %v1177_v58 = vpop.f32.mrf.mxu3  ;;  %v727_v41 = vpop.f32.mrf.mxu1 }
  0xff   : > { %v728_v10 = vadd.f32 %v727_v41, %v3354_v40 }
 0x100   : > { %v1251_v22 = vadd.f32 %v1177_v58, %v893_v43  ;;  %v3472_v43 = vsel %vm921_vm5, %v1055_v54, %v1059_v45  ;;  %v1068_v54 = vshll.u32 %v3488_v12, 16 }
 0x101   : > { %v1308_v31 = vpop.f32.mrf.mxu0 }
 0x102   : > { %v3468_v14 = vadd.f32 %v1306_v49, %v1251_v22  ;;  %v1061_v22 = vshrl.u32 %v3037_v37, 16 }
 0x105   : > { %v821_v5 = vpop.f32.mrf.mxu2 }
 0x106   : > { %v894_v23 = vadd.f32 %v821_v5, %v728_v10  ;;  %v1179_v50 = vpop.f32.mrf.mxu3  ;;  %v730_v30 = vpop.f32.mrf.mxu1 }
 0x107   : > { %v731_v3 = vadd.f32 %v730_v30, %v3364_v46  ;;  %v1063_v46 = vshll.u32 %v3037_v37, 16 }
 0x108   : > { %v1252_v4 = vadd.f32 %v1179_v50, %v894_v23  ;;  %v1070_v23 = vrot.slane %v1068_v54, 1 }
 0x109   : > { %v1311_v62 = vpop.f32.mrf.mxu0  ;;  %2723 = vmatmul.msk.bf16.gmra.mxu1 %vm558_vm4, %v3105_v16  ;;  %v1065_v28 = vrot.slane %v1063_v46, 1  ;;  %v1074_v46 = vshll.u32 %v3071_v59, 16 }
 0x10a   : > { %2740 = vmatmul.msk.bf16.gmra.mxu2 %vm558_vm4, %v3037_v37  ;;  %v3478_v40 = vadd.f32 %v1308_v31, %v1252_v4 }
 0x10b   : > { %2756 = vmatmul.msk.bf16.gmra.mxu3 %vm558_vm4, %v3447_v63  ;;  %v1066_v5 = vor.u32 %v1065_v28, %v1061_v22  ;;  %v1072_v28 = vshrl.u32 %v3071_v59, 16  ;;  %v1076_v54 = vrot.slane %v1074_v46, 1  ;;  %v1085_v46 = vshll.u32 %v3112_v20, 16 }
 0x10c   : > { %4480 = vst [vmem:[#allocation34_spill] sm:$0xff] %v3478_v40  ;;  %2773 = vmatmul.msk.bf16.gmra.mxu0 %vm558_vm4, %v3472_v43 }
 0x10d   : > { %v824_v49 = vpop.f32.mrf.mxu2  ;;  %v3496_v40 = vsel %vm921_vm5, %v1066_v5, %v1070_v23 }
 0x10e   : > { %v895_v58 = vadd.f32 %v824_v49, %v731_v3  ;;  %v1182_v41 = vpop.f32.mrf.mxu3  ;;  %v732_v13 = vpop.f32.mrf.mxu1 }
 0x10f   : > { %v733_v31 = vadd.f32 %v732_v13, %v3389_v61 }
 0x110   : > { %v1253_v10 = vadd.f32 %v1182_v41, %v895_v58  ;;  %v3513_v41 = vsel %vm3007_vm3, %v3051_v47, 0 }
 0x111   : > { %v1313_v17 = vpop.f32.mrf.mxu0  ;;  %v1079_v5 = vshll.u32 %v3513_v41, 16 }
 0x112   : > { %v3493_v45 = vadd.f32 %v1311_v62, %v1253_v10 }
 0x115   : > { %v826_v50 = vpop.f32.mrf.mxu2 }
 0x116   : > { %v896_v30 = vadd.f32 %v826_v50, %v733_v31  ;;  %v1184_v25 = vpop.f32.mrf.mxu3  ;;  %v735_v4 = vpop.f32.mrf.mxu1  ;;  %v1077_v50 = vor.u32 %v1076_v54, %v1072_v28 }
 0x117   : > { %v736_v62 = vadd.f32 %v735_v4, %v3257_v19 }
 0x118   : > { %v1254_v3 = vadd.f32 %v1184_v25, %v896_v30  ;;  %v1081_v30 = vrot.slane %v1079_v5, 1 }
 0x119   : > { %v1316_v49 = vpop.f32.mrf.mxu0  ;;  %2724 = vmatmul.msk.bf16.gmra.mxu1 %vm558_vm4, %v3158_v1 }
 0x11a   : > { %2741 = vmatmul.msk.bf16.gmra.mxu2 %vm558_vm4, %v3071_v59  ;;  %v3502_v61 = vadd.f32 %v1313_v17, %v1254_v3 }
 0x11b   : > { %2757 = vmatmul.msk.bf16.gmra.mxu3 %vm558_vm4, %v3472_v43 }
 0x11c   : > { %2774 = vmatmul.msk.bf16.gmra.mxu0 %vm558_vm4, %v3496_v40 }
 0x11d   : > { %v829_v58 = vpop.f32.mrf.mxu2 }
 0x11e   : > { %v897_v13 = vadd.f32 %v829_v58, %v736_v62  ;;  %v1187_v22 = vpop.f32.mrf.mxu3  ;;  %v737_v10 = vpop.f32.mrf.mxu1 }
 0x11f   : > { %v738_v19 = vadd.f32 %v737_v10, %v3282_v32  ;;  %v3538_v10 = vsel %vm3007_vm3, %v3091_v7, 0 }
 0x120   : > { %v1255_v31 = vadd.f32 %v1187_v22, %v897_v13  ;;  %v3521_v13 = vsel %vm921_vm5, %v1077_v50, %v1081_v30  ;;  %v1087_v50 = vrot.slane %v1085_v46, 1  ;;  %v1090_v30 = vshll.u32 %v3538_v10, 16 }
 0x121   : > { %v1318_v17 = vpop.f32.mrf.mxu0  ;;  %v1096_v46 = vshll.u32 %v3162_v2, 16 }
 0x122   : > { %v3517_v23 = vadd.f32 %v1316_v49, %v1255_v31 }
 0x125   : > { %v831_v25 = vpop.f32.mrf.mxu2 }
 0x126   : > { %v898_v4 = vadd.f32 %v831_v25, %v738_v19  ;;  %v1189_v47 = vpop.f32.mrf.mxu3  ;;  %v740_v3 = vpop.f32.mrf.mxu1  ;;  %v1083_v19 = vshrl.u32 %v3112_v20, 16 }
 0x127   : > { %v741_v32 = vadd.f32 %v740_v3, %v3292_v57 }
 0x128   : > { %v1256_v62 = vadd.f32 %v1189_v47, %v898_v4  ;;  %v1088_v4 = vor.u32 %v1087_v50, %v1083_v19  ;;  %v1092_v47 = vrot.slane %v1090_v30, 1 }
 0x129   : > { %v1321_v58 = vpop.f32.mrf.mxu0  ;;  %2725 = vmatmul.msk.bf16.gmra.mxu1 %vm558_vm4, %v3037_v37 }
 0x12a   : > { %2742 = vmatmul.msk.bf16.gmra.mxu2 %vm558_vm4, %v3112_v20  ;;  %v3527_v49 = vadd.f32 %v1318_v17, %v1256_v62 }
 0x12b   : > { %2758 = vmatmul.msk.bf16.gmra.mxu3 %vm558_vm4, %v3496_v40 }
 0x12c   : > { %4481 = vst [vmem:[#allocation35_spill] sm:$0xff] %v3527_v49  ;;  %2775 = vmatmul.msk.bf16.gmra.mxu0 %vm558_vm4, %v3521_v13 }
 0x12d   : > { %v834_v22 = vpop.f32.mrf.mxu2 }
 0x12e   : > { %v899_v31 = vadd.f32 %v834_v22, %v741_v32  ;;  %v1192_v28 = vpop.f32.mrf.mxu3  ;;  %v742_v17 = vpop.f32.mrf.mxu1 }
 0x12f   : > { %v743_v57 = vadd.f32 %v742_v17, %v3317_v11  ;;  %v3563_v17 = vsel %vm3007_vm3, %v3147_v52, 0 }
 0x130   : > { %v1257_v54 = vadd.f32 %v1192_v28, %v899_v31  ;;  %v3546_v31 = vsel %vm921_vm5, %v1088_v4, %v1092_v47  ;;  %v1098_v4 = vrot.slane %v1096_v46, 1  ;;  %v1101_v47 = vshll.u32 %v3563_v17, 16 }
 0x131   : > { %v1323_v5 = vpop.f32.mrf.mxu0  ;;  %v4482_v46 = vmov 0  }
 0x132   : > { %v3542_v25 = vadd.f32 %v1321_v58, %v1257_v54 }
 0x135   : > { %v836_v3 = vpop.f32.mrf.mxu2 }
 0x136   : > { %v900_v62 = vadd.f32 %v836_v3, %v743_v57  ;;  %v1194_v7 = vpop.f32.mrf.mxu3  ;;  %v745_v49 = vpop.f32.mrf.mxu1  ;;  %v1094_v57 = vshrl.u32 %v3162_v2, 16 }
 0x137   : > { %v746_v11 = vadd.f32 %v745_v49, %v3327_v44 }
 0x138   : > { %v1258_v32 = vadd.f32 %v1194_v7, %v900_v62  ;;  %v1099_v49 = vor.u32 %v1098_v4, %v1094_v57  ;;  %v1103_v62 = vrot.slane %v1101_v47, 1 }
 0x139   : > { %v1326_v22 = vpop.f32.mrf.mxu0  ;;  %2726 = vmatmul.msk.bf16.gmra.mxu1 %vm558_vm4, %v3071_v59 }
 0x13a   : > { %2743 = vmatmul.msk.bf16.gmra.mxu2 %vm558_vm4, %v3162_v2  ;;  %v3552_v58 = vadd.f32 %v1323_v5, %v1258_v32 }
 0x13b   : > { %2759 = vmatmul.msk.bf16.gmra.mxu3 %vm558_vm4, %v3521_v13 }
 0x13c   : > { %2776 = vmatmul.msk.bf16.gmra.mxu0 %vm558_vm4, %v3546_v31 }
 0x13d   : > { %v839_v28 = vpop.f32.mrf.mxu2 }
 0x13e   : > { %v901_v54 = vadd.f32 %v839_v28, %v746_v11  ;;  %v1197_v19 = vpop.f32.mrf.mxu3  ;;  %v747_v5 = vpop.f32.mrf.mxu1 }
 0x13f   : > { %v748_v44 = vadd.f32 %v747_v5, %v3352_v39 }
 0x140   : > { %v1259_v50 = vadd.f32 %v1197_v19, %v901_v54  ;;  %v3571_v54 = vsel %vm921_vm5, %v1099_v49, %v1103_v62  ;;  %v1570_v49 = vrot.slane %v3041_v38, 1  ;;  %v1574_v62 = vrot.slane %v3198_v27, 1 }
 0x141   : > { %v1328_v30 = vpop.f32.mrf.mxu0  ;;  %vm2470_vm5 = vcmask 60416  }
 0x142   : > { %v3567_v3 = vadd.f32 %v1326_v22, %v1259_v50 }
 0x145   : > { %v841_v7 = vpop.f32.mrf.mxu2 }
 0x146   : > { %v902_v24 = vadd.f32 %v841_v7, %v748_v44  ;;  %v1199_v52 = vpop.f32.mrf.mxu3  ;;  %v750_v32 = vpop.f32.mrf.mxu1 }
 0x147   : > { %v751_v39 = vadd.f32 %v750_v32, %v3362_v55 }
 0x148   : > { %v1260_v11 = vadd.f32 %v1199_v52, %v902_v24  ;;  %v1573_v24 = vrot.slane %v3075_v60, 1 }
 0x149   : > { %v1331_v28 = vpop.f32.mrf.mxu0  ;;  %2727 = vmatmul.msk.bf16.gmra.mxu1 %vm558_vm4, %v3112_v20 }
 0x14a   : > { %883 = vmatmul.bf16.gmra.mxu2 %v4482_v46  ;;  %v3576_v22 = vadd.f32 %v1328_v30, %v1260_v11  ;;  %v1571_v30 = vrot.slane %v3180_v8, 1 }
 0x14b   : > { %2760 = vmatmul.msk.bf16.gmra.mxu3 %vm558_vm4, %v3546_v31 }
 0x14c   : > { %2777 = vmatmul.msk.bf16.gmra.mxu0 %vm558_vm4, %v3571_v54 }
 0x14d   : > { %v844_v19 = vpop.f32.mrf.mxu2 }
 0x14e   : > { %v903_v5 = vadd.f32 %v844_v19, %v751_v39  ;;  %v1202_v50 = vpop.f32.mrf.mxu3  ;;  %v752_v57 = vpop.f32.mrf.mxu1  ;;  %v1575_v19 = vsel %vm1567_vm6, %v1573_v24, %v1574_v62 }
 0x14f   : > { %v753_v7 = vadd.f32 %v752_v57, %v3387_v42 }
 0x150   : > { %v1261_v4 = vadd.f32 %v1202_v50, %v903_v5 }
 0x151   : > { %v1333_v47 = vpop.f32.mrf.mxu0 }
 0x152   : > { %v3583_v44 = vadd.f32 %v1331_v28, %v1261_v4  ;;  %v1572_v28 = vsel %vm1567_vm6, %v1570_v49, %v1571_v30  ;;  %v1576_v49 = vrot.slane %v3116_v21, 1  ;;  %v4483_v21 = vld [vmem:[#allocation15_spill] sm:$0xff] }
 0x155   : > { %v846_v52 = vpop.f32.mrf.mxu2 }
 0x156   : > { %v904_v55 = vadd.f32 %v846_v52, %v753_v7  ;;  %v1204_v32 = vpop.f32.mrf.mxu3  ;;  %v755_v11 = vpop.f32.mrf.mxu1 }
 0x157   : > { %v756_v60 = vadd.f32 %v755_v11, %v3273_v29 }
 0x158   : > { %v1262_v46 = vadd.f32 %v1204_v32, %v904_v55 }
 0x159   : > { %v1336_v39 = vpop.f32.mrf.mxu0  ;;  %2779 = vmatmul.msk.bf16.vlgmr.msra.gmra.mxu1 %vm558_vm4, %v3203_v33 }
 0x15a   : > { %2796 = vmatmul.msk.bf16.vlgmr.msra.gmra.mxu2 %vm558_vm4, %v3185_v18  ;;  %v3596_v38 = vadd.f32 %v1333_v47, %v1262_v46  ;;  %v1577_v47 = vrot.slane %v3216_v34, 1 }
 0x15b   : > { %2813 = vmatmul.msk.bf16.vlgmr.msra.gmra.mxu3 %vm558_vm4, %v1572_v28 }
 0x15c   : > { %2830 = vmatmul.msk.bf16.vlgmr.msra.gmra.mxu0 %vm558_vm4, %v1575_v19  ;;  %v1578_v55 = vsel %vm1567_vm6, %v1576_v49, %v1577_v47 }
 0x15d   : > { %v849_v8 = vpop.f32.mrf.mxu2 }
 0x15e   : > { %v905_v27 = vadd.f32 %v849_v8, %v756_v60  ;;  %v1207_v42 = vpop.f32.mrf.mxu3  ;;  %v757_v5 = vpop.f32.mrf.mxu1 }
 0x15f   : > { %v758_v33 = vadd.f32 %v757_v5, %v3288_v9  ;;  %v4485_v5 = vld [vmem:[#allocation6_spill] sm:$0xff] }
 0x160   : > { %v1263_v50 = vadd.f32 %v1207_v42, %v905_v27  ;;  %v4484_v42 = vld [vmem:[#allocation18_spill] sm:$0xff] }
 0x161   : > { %v1338_v57 = vpop.f32.mrf.mxu0 }
 0x162   : > { %v3601_v4 = vadd.f32 %v1336_v39, %v1263_v50  ;;  %v4486_v50 = vld [vmem:[#allocation7_spill] sm:$0xff] }
 0x165   : > { %v851_v30 = vpop.f32.mrf.mxu2 }
 0x166   : > { %v906_v62 = vadd.f32 %v851_v30, %v758_v33  ;;  %v1209_v7 = vpop.f32.mrf.mxu3  ;;  %v760_v24 = vpop.f32.mrf.mxu1 }
 0x167   : > { %v761_v34 = vadd.f32 %v760_v24, %v4483_v21  ;;  %v4488_v21 = vld [vmem:[#allocation21_spill] sm:$0xff] }
 0x168   : > { %v1264_v52 = vadd.f32 %v1209_v7, %v906_v62 }
 0x169   : > { %v1341_v29 = vpop.f32.mrf.mxu0  ;;  %2780 = vmatmul.msk.bf16.gmra.mxu1 %vm558_vm4, %v3221_v48 }
 0x16a   : > { %2797 = vmatmul.msk.bf16.gmra.mxu2 %vm558_vm4, %v1572_v28  ;;  %v3610_v32 = vadd.f32 %v1338_v57, %v1264_v52  ;;  %v1579_v28 = vrot.slane %v4485_v5, 1  ;;  %v1580_v57 = vrot.slane %v4486_v50, 1  ;;  %v4487_v52 = vld [vmem:[#allocation8_spill] sm:$0xff]  ;;  %v4491_v50 = vld [vmem:[#allocation2_spill] sm:$0xff] }
 0x16b   : > { %2814 = vmatmul.msk.bf16.gmra.mxu3 %vm558_vm4, %v1575_v19  ;;  %v4490_v5 = vld [vmem:[#allocation24_spill] sm:$0xff] }
 0x16c   : > { %2831 = vmatmul.msk.bf16.gmra.mxu0 %vm558_vm4, %v1578_v55  ;;  %v1581_v24 = vsel %vm1567_vm6, %v1579_v28, %v1580_v57 }
 0x16d   : > { %v854_v9 = vpop.f32.mrf.mxu2 }
 0x16e   : > { %v907_v11 = vadd.f32 %v854_v9, %v761_v34  ;;  %v1212_v46 = vpop.f32.mrf.mxu3  ;;  %v762_v39 = vpop.f32.mrf.mxu1 }
 0x16f   : > { %v763_v48 = vadd.f32 %v762_v39, %v4484_v42 }
 0x170   : > { %v1265_v60 = vadd.f32 %v1212_v46, %v907_v11 }
 0x171   : > { %v1343_v8 = vpop.f32.mrf.mxu0 }
 0x172   : > { %v3615_v27 = vadd.f32 %v1341_v29, %v1265_v60 }
 0x175   : > { %v856_v33 = vpop.f32.mrf.mxu2 }
 0x176   : > { %v908_v49 = vadd.f32 %v856_v33, %v763_v48  ;;  %v1214_v47 = vpop.f32.mrf.mxu3  ;;  %v765_v30 = vpop.f32.mrf.mxu1 }
 0x177   : > { %v766_v34 = vadd.f32 %v765_v30, %v4488_v21 }
 0x178   : > { %v1266_v62 = vadd.f32 %v1214_v47, %v908_v49 }
 0x179   : > { %v1346_v7 = vpop.f32.mrf.mxu0  ;;  %2781 = vmatmul.msk.bf16.gmra.mxu1 %vm558_vm4, %v4487_v52 }
 0x17a   : > { %2798 = vmatmul.msk.bf16.gmra.mxu2 %vm558_vm4, %v1575_v19  ;;  %v3624_v29 = vadd.f32 %v1343_v8, %v1266_v62  ;;  %v1582_v19 = vrot.slane %v4491_v50, 1  ;;  %v4492_v8 = vld [vmem:[#allocation9_spill] sm:$0xff] }
 0x17b   : > { %2815 = vmatmul.msk.bf16.gmra.mxu3 %vm558_vm4, %v1578_v55  ;;  %v1583_v57 = vrot.slane %v4492_v8, 1  ;;  %v4497_v8 = vld [vmem:[#allocation30_spill] sm:$0xff] }
 0x17c   : > { %2832 = vmatmul.msk.bf16.gmra.mxu0 %vm558_vm4, %v1581_v24 }
 0x17d   : > { %v859_v9 = vpop.f32.mrf.mxu2  ;;  %v1584_v21 = vsel %vm1567_vm6, %v1582_v19, %v1583_v57 }
 0x17e   : > { %v909_v11 = vadd.f32 %v859_v9, %v766_v34  ;;  %v1217_v46 = vpop.f32.mrf.mxu3  ;;  %v767_v39 = vpop.f32.mrf.mxu1  ;;  %v4493_v34 = vld [vmem:[#allocation10_spill] sm:$0xff]  ;;  %v4495_v9 = vld [vmem:[#allocation27_spill] sm:$0xff] }
 0x17f   : > { %v768_v28 = vadd.f32 %v767_v39, %v4490_v5 }
 0x180   : > { %v1267_v60 = vadd.f32 %v1217_v46, %v909_v11 }
 0x181   : > { %v1348_v42 = vpop.f32.mrf.mxu0 }
 0x182   : > { %v3629_v48 = vadd.f32 %v1346_v7, %v1267_v60 }
 0x184   : > { %4489 = vst [vmem:[#allocation15_spill] sm:$0xff] %v3629_v48 }
 0x185   : > { %v861_v33 = vpop.f32.mrf.mxu2 }
 0x186   : > { %v910_v49 = vadd.f32 %v861_v33, %v768_v28  ;;  %v1219_v47 = vpop.f32.mrf.mxu3  ;;  %v770_v62 = vpop.f32.mrf.mxu1  ;;  %v4498_v33 = vld [vmem:[#allocation3_spill] sm:$0xff] }
 0x187   : > { %v771_v11 = vadd.f32 %v770_v62, %v4495_v9 }
 0x188   : > { %v1268_v52 = vadd.f32 %v1219_v47, %v910_v49 }
 0x189   : > { %v1351_v30 = vpop.f32.mrf.mxu0  ;;  %2782 = vmatmul.msk.bf16.gmra.mxu1 %vm558_vm4, %v4493_v34 }
 0x18a   : > { %2799 = vmatmul.msk.bf16.gmra.mxu2 %vm558_vm4, %v1578_v55  ;;  %v3638_v7 = vadd.f32 %v1348_v42, %v1268_v52  ;;  %v1585_v55 = vrot.slane %v4498_v33, 1  ;;  %v4499_v42 = vld [vmem:[#allocation11_spill] sm:$0xff] }
 0x18b   : > { %2816 = vmatmul.msk.bf16.gmra.mxu3 %vm558_vm4, %v1581_v24  ;;  %v1586_v49 = vrot.slane %v4499_v42, 1  ;;  %v4504_v42 = vld [vmem:[#allocation13_spill] sm:$0xff] }
 0x18c   : > { %4494 = vst [vmem:[#allocation18_spill] sm:$0xff] %v3638_v7  ;;  %2833 = vmatmul.msk.bf16.gmra.mxu0 %vm558_vm4, %v1584_v21 }
 0x18d   : > { %v864_v46 = vpop.f32.mrf.mxu2  ;;  %v1587_v9 = vsel %vm1567_vm6, %v1585_v55, %v1586_v49 }
 0x18e   : > { %v911_v39 = vadd.f32 %v864_v46, %v771_v11  ;;  %v1222_v60 = vpop.f32.mrf.mxu3  ;;  %v772_v5 = vpop.f32.mrf.mxu1  ;;  %v4500_v11 = vld [vmem:[#allocation14_spill] sm:$0xff]  ;;  %v4502_v46 = vld [vmem:[#allocation12_spill] sm:$0xff] }
 0x18f   : > { %v773_v57 = vadd.f32 %v772_v5, %v4497_v8 }
 0x190   : > { %v1269_v28 = vadd.f32 %v1222_v60, %v911_v39 }
 0x191   : > { %v1353_v50 = vpop.f32.mrf.mxu0 }
 0x192   : > { %v3643_v19 = vadd.f32 %v1351_v30, %v1269_v28 }
 0x194   : > { %4496 = vst [vmem:[#allocation6_spill] sm:$0xff] %v3643_v19 }
 0x195   : > { %v866_v47 = vpop.f32.mrf.mxu2 }
 0x196   : > { %v912_v52 = vadd.f32 %v866_v47, %v773_v57  ;;  %v1224_v34 = vpop.f32.mrf.mxu3  ;;  %v775_v7 = vpop.f32.mrf.mxu1  ;;  %v4505_v47 = vld [vmem:[#allocation4_spill] sm:$0xff] }
 0x197   : > { %v776_v39 = vadd.f32 %v775_v7, %v4502_v46 }
 0x198   : > { %v1270_v48 = vadd.f32 %v1224_v34, %v912_v52 }
 0x199   : > { %v1356_v62 = vpop.f32.mrf.mxu0  ;;  %2783 = vmatmul.msk.bf16.gmra.mxu1 %vm558_vm4, %v4500_v11 }
 0x19a   : > { %2800 = vmatmul.msk.bf16.gmra.mxu2 %vm558_vm4, %v1581_v24  ;;  %v3652_v30 = vadd.f32 %v1353_v50, %v1270_v48  ;;  %v1588_v24 = vrot.slane %v4505_v47, 1  ;;  %v4506_v48 = vld [vmem:[#allocation16_spill] sm:$0xff] }
 0x19b   : > { %2817 = vmatmul.msk.bf16.gmra.mxu3 %vm558_vm4, %v1584_v21  ;;  %v1589_v50 = vrot.slane %v4506_v48, 1  ;;  %v4510_v48 = vld [vmem:[#allocation19_spill] sm:$0xff] }
 0x19c   : > { %4501 = vst [vmem:[#allocation7_spill] sm:$0xff] %v3652_v30  ;;  %2834 = vmatmul.msk.bf16.gmra.mxu0 %vm558_vm4, %v1587_v9 }
 0x19d   : > { %v869_v60 = vpop.f32.mrf.mxu2  ;;  %v1590_v46 = vsel %vm1567_vm6, %v1588_v24, %v1589_v50 }
 0x19e   : > { %v913_v5 = vadd.f32 %v869_v60, %v776_v39  ;;  %v1227_v28 = vpop.f32.mrf.mxu3  ;;  %v777_v8 = vpop.f32.mrf.mxu1  ;;  %v4507_v39 = vld [vmem:[#allocation20_spill] sm:$0xff]  ;;  %v4509_v60 = vld [vmem:[#allocation17_spill] sm:$0xff] }
 0x19f   : > { %v778_v49 = vadd.f32 %v777_v8, %v4504_v42 }
 0x1a0   : > { %v1271_v57 = vadd.f32 %v1227_v28, %v913_v5 }
 0x1a1   : > { %v1358_v33 = vpop.f32.mrf.mxu0 }
 0x1a2   : > { %v3657_v55 = vadd.f32 %v1356_v62, %v1271_v57 }
 0x1a4   : > { %4503 = vst [vmem:[#allocation8_spill] sm:$0xff] %v3657_v55 }
 0x1a5   : > { %v871_v52 = vpop.f32.mrf.mxu2 }
 0x1a6   : > { %v914_v34 = vadd.f32 %v871_v52, %v778_v49  ;;  %v1229_v11 = vpop.f32.mrf.mxu3  ;;  %v780_v30 = vpop.f32.mrf.mxu1  ;;  %v4511_v52 = vld [vmem:[#allocation5_spill] sm:$0xff] }
 0x1a7   : > { %v781_v5 = vadd.f32 %v780_v30, %v4509_v60 }
 0x1a8   : > { %v1272_v19 = vadd.f32 %v1229_v11, %v914_v34 }
 0x1a9   : > { %v1361_v7 = vpop.f32.mrf.mxu0  ;;  %2784 = vmatmul.msk.bf16.gmra.mxu1 %vm558_vm4, %v4507_v39 }
 0x1aa   : > { %2801 = vmatmul.msk.bf16.gmra.mxu2 %vm558_vm4, %v1584_v21  ;;  %v3666_v62 = vadd.f32 %v1358_v33, %v1272_v19  ;;  %v1591_v21 = vrot.slane %v4511_v52, 1  ;;  %v4512_v19 = vld [vmem:[#allocation22_spill] sm:$0xff] }
 0x1ab   : > { %2818 = vmatmul.msk.bf16.gmra.mxu3 %vm558_vm4, %v1587_v9  ;;  %v1592_v33 = vrot.slane %v4512_v19, 1  ;;  %v4516_v19 = vld [vmem:[#allocation25_spill] sm:$0xff] }
 0x1ac   : > { %4508 = vst [vmem:[#allocation21_spill] sm:$0xff] %v3666_v62  ;;  %2835 = vmatmul.msk.bf16.gmra.mxu0 %vm558_vm4, %v1590_v46 }
 0x1ad   : > { %v874_v28 = vpop.f32.mrf.mxu2  ;;  %v1593_v60 = vsel %vm1567_vm6, %v1591_v21, %v1592_v33 }
 0x1ae   : > { %v915_v8 = vadd.f32 %v874_v28, %v781_v5  ;;  %v1232_v57 = vpop.f32.mrf.mxu3  ;;  %v782_v42 = vpop.f32.mrf.mxu1  ;;  %v4513_v5 = vld [vmem:[#allocation26_spill] sm:$0xff]  ;;  %v4515_v28 = vld [vmem:[#allocation23_spill] sm:$0xff] }
 0x1af   : > { %v783_v50 = vadd.f32 %v782_v42, %v4510_v48 }
 0x1b0   : > { %v1273_v49 = vadd.f32 %v1232_v57, %v915_v8 }
 0x1b1   : > { %v1363_v47 = vpop.f32.mrf.mxu0 }
 0x1b2   : > { %v3671_v24 = vadd.f32 %v1361_v7, %v1273_v49 }
 0x1b5   : > { %v876_v34 = vpop.f32.mrf.mxu2 }
 0x1b6   : > { %v916_v11 = vadd.f32 %v876_v34, %v783_v50  ;;  %v1234_v39 = vpop.f32.mrf.mxu3  ;;  %v785_v62 = vpop.f32.mrf.mxu1 }
 0x1b7   : > { %v786_v8 = vadd.f32 %v785_v62, %v4515_v28 }
 0x1b8   : > { %v1274_v55 = vadd.f32 %v1234_v39, %v916_v11 }
 0x1b9   : > { %v1366_v30 = vpop.f32.mrf.mxu0  ;;  %2785 = vmatmul.msk.bf16.gmra.mxu1 %vm558_vm4, %v4513_v5 }
 0x1ba   : > { %2802 = vmatmul.msk.bf16.gmra.mxu2 %vm558_vm4, %v1587_v9  ;;  %v3680_v7 = vadd.f32 %v1363_v47, %v1274_v55  ;;  %v1594_v9 = vrot.slane %v3029_v36, 1  ;;  %v4517_v55 = vld [vmem:[#allocation28_spill] sm:$0xff]  ;;  %v4518_v36 = vld [vmem:[#allocation29_spill] sm:$0xff] }
 0x1bb   : > { %2819 = vmatmul.msk.bf16.gmra.mxu3 %vm558_vm4, %v1590_v46  ;;  %v1595_v47 = vrot.slane %v4517_v55, 1 }
 0x1bc   : > { %4514 = vst [vmem:[#allocation24_spill] sm:$0xff] %v3680_v7  ;;  %2836 = vmatmul.msk.bf16.gmra.mxu0 %vm558_vm4, %v1593_v60 }
 0x1bd   : > { %v879_v57 = vpop.f32.mrf.mxu2  ;;  %v1596_v28 = vsel %vm1567_vm6, %v1594_v9, %v1595_v47  ;;  %v4519_v9 = vld [vmem:[#allocation31_spill] sm:$0xff] }
 0x1be   : > { %v917_v42 = vadd.f32 %v879_v57, %v786_v8  ;;  %v1237_v49 = vpop.f32.mrf.mxu3  ;;  %v787_v48 = vpop.f32.mrf.mxu1 }
 0x1bf   : > { %v788_v33 = vadd.f32 %v787_v48, %v4516_v19 }
 0x1c0   : > { %v1275_v50 = vadd.f32 %v1237_v49, %v917_v42 }
 0x1c1   : > { %v1368_v52 = vpop.f32.mrf.mxu0 }
 0x1c2   : > { %v3685_v21 = vadd.f32 %v1366_v30, %v1275_v50 }
 0x1c5   : > { %v881_v34 = vpop.f32.mrf.mxu2 }
 0x1c6   : > { %v918_v11 = vadd.f32 %v881_v34, %v788_v33  ;;  %v1239_v39 = vpop.f32.mrf.mxu3  ;;  %v790_v5 = vpop.f32.mrf.mxu1 }
 0x1c7   : > { %v791_v8 = vadd.f32 %v790_v5, %v4518_v36 }
 0x1c8   : > { %v1276_v7 = vadd.f32 %v1239_v39, %v918_v11 }
 0x1c9   : > { %v1371_v62 = vpop.f32.mrf.mxu0  ;;  %2786 = vmatmul.msk.bf16.gmra.mxu1 %vm558_vm4, %v3399_v53 }
 0x1ca   : > { %2803 = vmatmul.msk.bf16.gmra.mxu2 %vm558_vm4, %v1590_v46  ;;  %v3694_v30 = vadd.f32 %v1368_v52, %v1276_v7  ;;  %v1597_v46 = vrot.slane %v3065_v56, 1  ;;  %v1598_v7 = vrot.slane %v3413_v35, 1 }
 0x1cb   : > { %2820 = vmatmul.msk.bf16.gmra.mxu3 %vm558_vm4, %v1593_v60 }
 0x1cc   : > { %2837 = vmatmul.msk.bf16.gmra.mxu0 %vm558_vm4, %v1596_v28  ;;  %v1599_v36 = vsel %vm1567_vm6, %v1597_v46, %v1598_v7 }
 0x1cd   : > { %v884_v57 = vpop.f32.mrf.mxu2 }
 0x1ce   : > { %v919_v42 = vadd.f32 %v884_v57, %v791_v8  ;;  %v1242_v49 = vpop.f32.mrf.mxu3  ;;  %v792_v48 = vpop.f32.mrf.mxu1 }
 0x1cf   : > { %v793_v53 = vadd.f32 %v792_v48, %v4519_v9 }
 0x1d0   : > { %v1277_v50 = vadd.f32 %v1242_v49, %v919_v42 }
 0x1d1   : > { %v1373_v19 = vpop.f32.mrf.mxu0 }
 0x1d2   : > { %v3699_v33 = vadd.f32 %v1371_v62, %v1277_v50 }
 0x1d5   : > { %v886_v52 = vpop.f32.mrf.mxu2 }
 0x1d6   : > { %v920_v55 = vadd.f32 %v886_v52, %v793_v53  ;;  %v1244_v47 = vpop.f32.mrf.mxu3  ;;  %v1422_v34 = vpop.f32.mrf.mxu1 }
 0x1d7   : > { %v1502_v39 = vadd.f32 %v1422_v34, %v3418_v6  ;;  %v4520_v6 = vld [vmem:[#allocation32_spill] sm:$0xff] }
 0x1d8   : > { %v1278_v11 = vadd.f32 %v1244_v47, %v920_v55 }
 0x1d9   : > { %v1935_v5 = vpop.f32.mrf.mxu0  ;;  %2787 = vmatmul.msk.bf16.gmra.mxu1 %vm558_vm4, %v3422_v15  ;;  %v1600_v15 = vrot.slane %v3105_v16, 1 }
 0x1da   : > { %2804 = vmatmul.msk.bf16.gmra.mxu2 %vm558_vm4, %v1593_v60  ;;  %v3709_v62 = vadd.f32 %v1373_v19, %v1278_v11  ;;  %v1601_v60 = vrot.slane %v3438_v51, 1 }
 0x1db   : > { %2821 = vmatmul.msk.bf16.gmra.mxu3 %vm558_vm4, %v1596_v28 }
 0x1dc   : > { %2838 = vmatmul.msk.bf16.gmra.mxu0 %vm558_vm4, %v1599_v36  ;;  %v1602_v47 = vsel %vm1567_vm6, %v1600_v15, %v1601_v60 }
 0x1dd   : > { %v1680_v56 = vpop.f32.mrf.mxu2 }
 0x1de   : > { %v1760_v35 = vadd.f32 %v1680_v56, %v1502_v39  ;;  %v1809_v8 = vpop.f32.mrf.mxu3  ;;  %v1424_v57 = vpop.f32.mrf.mxu1 }
 0x1df   : > { %v1503_v49 = vadd.f32 %v1424_v57, %v4520_v6  ;;  %v1603_v57 = vrot.slane %v3158_v1, 1 }
 0x1e0   : > { %v1889_v42 = vadd.f32 %v1809_v8, %v1760_v35 }
 0x1e1   : > { %v1937_v48 = vpop.f32.mrf.mxu0 }
 0x1e2   : > { %v3714_v50 = vadd.f32 %v1935_v5, %v1889_v42 }
 0x1e5   : > { %v1682_v19 = vpop.f32.mrf.mxu2 }
 0x1e6   : > { %v1761_v9 = vadd.f32 %v1682_v19, %v1503_v49  ;;  %v1811_v53 = vpop.f32.mrf.mxu3  ;;  %v1427_v46 = vpop.f32.mrf.mxu1 }
 0x1e7   : > { %v1504_v52 = vadd.f32 %v1427_v46, %v3443_v26  ;;  %v4521_v26 = vld [vmem:[#allocation33_spill] sm:$0xff] }
 0x1e8   : > { %v1890_v7 = vadd.f32 %v1811_v53, %v1761_v9 }
 0x1e9   : > { %v1940_v55 = vpop.f32.mrf.mxu0  ;;  %2788 = vmatmul.msk.bf16.gmra.mxu1 %vm558_vm4, %v3447_v63  ;;  %v1604_v63 = vrot.slane %v3463_v0, 1 }
 0x1ea   : > { %v3720_v34 = vadd.f32 %v1937_v48, %v1890_v7  ;;  %2805 = vmatmul.msk.bf16.gmra.mxu2 %vm558_vm4, %v1596_v28 }
 0x1eb   : > { %2822 = vmatmul.msk.bf16.gmra.mxu3 %vm558_vm4, %v1599_v36  ;;  %v1605_v19 = vsel %vm1567_vm6, %v1603_v57, %v1604_v63 }
 0x1ec   : > { %2839 = vmatmul.msk.bf16.gmra.mxu0 %vm558_vm4, %v1602_v47 }
 0x1ed   : > { %v1685_v16 = vpop.f32.mrf.mxu2 }
 0x1ee   : > { %v1762_v51 = vadd.f32 %v1685_v16, %v1504_v52  ;;  %v1814_v11 = vpop.f32.mrf.mxu3  ;;  %v1429_v39 = vpop.f32.mrf.mxu1 }
 0x1ef   : > { %v1505_v56 = vadd.f32 %v1429_v39, %v4521_v26 }
 0x1f0   : > { %v1891_v5 = vadd.f32 %v1814_v11, %v1762_v51  ;;  %v1606_v51 = vrot.slane %v3037_v37, 1 }
 0x1f1   : > { %v1942_v35 = vpop.f32.mrf.mxu0 }
 0x1f2   : > { %v3728_v8 = vadd.f32 %v1940_v55, %v1891_v5 }
 0x1f5   : > { %v1687_v42 = vpop.f32.mrf.mxu2 }
 0x1f6   : > { %v1763_v28 = vadd.f32 %v1687_v42, %v1505_v56  ;;  %v1816_v6 = vpop.f32.mrf.mxu3  ;;  %v1432_v49 = vpop.f32.mrf.mxu1 }
 0x1f7   : > { %v1506_v15 = vadd.f32 %v1432_v49, %v3468_v14  ;;  %v4522_v14 = vld [vmem:[#allocation34_spill] sm:$0xff] }
 0x1f8   : > { %v1892_v48 = vadd.f32 %v1816_v6, %v1763_v28 }
 0x1f9   : > { %v1945_v60 = vpop.f32.mrf.mxu0  ;;  %2789 = vmatmul.msk.bf16.gmra.mxu1 %vm558_vm4, %v3472_v43  ;;  %v1607_v43 = vrot.slane %v3488_v12, 1 }
 0x1fa   : > { %v3734_v9 = vadd.f32 %v1942_v35, %v1892_v48  ;;  %2806 = vmatmul.msk.bf16.gmra.mxu2 %vm558_vm4, %v1599_v36 }
 0x1fb   : > { %2823 = vmatmul.msk.bf16.gmra.mxu3 %vm558_vm4, %v1602_v47  ;;  %v1608_v57 = vsel %vm1567_vm6, %v1606_v51, %v1607_v43 }
 0x1fc   : > { %2840 = vmatmul.msk.bf16.gmra.mxu0 %vm558_vm4, %v1605_v19 }
 0x1fd   : > { %v1690_v1 = vpop.f32.mrf.mxu2 }
 0x1fe   : > { %v1764_v0 = vadd.f32 %v1690_v1, %v1506_v15  ;;  %v1819_v53 = vpop.f32.mrf.mxu3  ;;  %v1434_v46 = vpop.f32.mrf.mxu1  ;;  %v1609_v15 = vrot.slane %v3071_v59, 1 }
 0x1ff   : > { %v1507_v52 = vadd.f32 %v1434_v46, %v4522_v14 }
 0x200   : > { %v1893_v7 = vadd.f32 %v1819_v53, %v1764_v0 }
 0x201   : > { %v1947_v55 = vpop.f32.mrf.mxu0 }
 0x202   : > { %v3742_v16 = vadd.f32 %v1945_v60, %v1893_v7 }
 0x205   : > { %v1692_v11 = vpop.f32.mrf.mxu2 }
 0x206   : > { %v1765_v36 = vadd.f32 %v1692_v11, %v1507_v52  ;;  %v1821_v39 = vpop.f32.mrf.mxu3  ;;  %v1437_v5 = vpop.f32.mrf.mxu1 }
 0x207   : > { %v1508_v56 = vadd.f32 %v1437_v5, %v3493_v45 }
 0x208   : > { %v1894_v26 = vadd.f32 %v1821_v39, %v1765_v36  ;;  %v1612_v39 = vrot.slane %v3112_v20, 1 }
 0x209   : > { %v1950_v35 = vpop.f32.mrf.mxu0  ;;  %2790 = vmatmul.msk.bf16.gmra.mxu1 %vm558_vm4, %v3496_v40  ;;  %v1610_v40 = vrot.slane %v3513_v41, 1 }
 0x20a   : > { %v3748_v63 = vadd.f32 %v1947_v55, %v1894_v26  ;;  %2807 = vmatmul.msk.bf16.gmra.mxu2 %vm558_vm4, %v1602_v47 }
 0x20b   : > { %2824 = vmatmul.msk.bf16.gmra.mxu3 %vm558_vm4, %v1605_v19  ;;  %v1611_v14 = vsel %vm1567_vm6, %v1609_v15, %v1610_v40 }
 0x20c   : > { %2841 = vmatmul.msk.bf16.gmra.mxu0 %vm558_vm4, %v1608_v57 }
 0x20d   : > { %v1695_v37 = vpop.f32.mrf.mxu2 }
 0x20e   : > { %v1766_v12 = vadd.f32 %v1695_v37, %v1508_v56  ;;  %v1824_v42 = vpop.f32.mrf.mxu3  ;;  %v1439_v28 = vpop.f32.mrf.mxu1 }
 0x20f   : > { %v1509_v45 = vadd.f32 %v1439_v28, %v3502_v61 }
 0x210   : > { %v1895_v6 = vadd.f32 %v1824_v42, %v1766_v12 }
 0x211   : > { %v1952_v49 = vpop.f32.mrf.mxu0 }
 0x212   : > { %v3756_v48 = vadd.f32 %v1950_v35, %v1895_v6 }
 0x215   : > { %v1697_v60 = vpop.f32.mrf.mxu2 }
 0x216   : > { %v1767_v47 = vadd.f32 %v1697_v60, %v1509_v45  ;;  %v1826_v1 = vpop.f32.mrf.mxu3  ;;  %v1442_v0 = vpop.f32.mrf.mxu1  ;;  %v1615_v60 = vrot.slane %v3162_v2, 1 }
 0x217   : > { %v1510_v46 = vadd.f32 %v1442_v0, %v3517_v23  ;;  %v4523_v23 = vld [vmem:[#allocation35_spill] sm:$0xff] }
 0x218   : > { %v1896_v53 = vadd.f32 %v1826_v1, %v1767_v47 }
 0x219   : > { %v1955_v7 = vpop.f32.mrf.mxu0  ;;  %2791 = vmatmul.msk.bf16.gmra.mxu1 %vm558_vm4, %v3521_v13  ;;  %v1613_v13 = vrot.slane %v3538_v10, 1 }
 0x21a   : > { %v3762_v52 = vadd.f32 %v1952_v49, %v1896_v53  ;;  %2808 = vmatmul.msk.bf16.gmra.mxu2 %vm558_vm4, %v1605_v19 }
 0x21b   : > { %2825 = vmatmul.msk.bf16.gmra.mxu3 %vm558_vm4, %v1608_v57  ;;  %v1614_v42 = vsel %vm1567_vm6, %v1612_v39, %v1613_v13 }
 0x21c   : > { %2842 = vmatmul.msk.bf16.gmra.mxu0 %vm558_vm4, %v1611_v14 }
 0x21d   : > { %v1700_v59 = vpop.f32.mrf.mxu2 }
 0x21e   : > { %v1768_v61 = vadd.f32 %v1700_v59, %v1510_v46  ;;  %v1829_v41 = vpop.f32.mrf.mxu3  ;;  %v1444_v55 = vpop.f32.mrf.mxu1 }
 0x21f   : > { %v1511_v43 = vadd.f32 %v1444_v55, %v4523_v23 }
 0x220   : > { %v1897_v51 = vadd.f32 %v1829_v41, %v1768_v61 }
 0x221   : > { %v1957_v11 = vpop.f32.mrf.mxu0 }
 0x222   : > { %v3770_v36 = vadd.f32 %v1955_v7, %v1897_v51 }
 0x225   : > { %v1702_v5 = vpop.f32.mrf.mxu2 }
 0x226   : > { %v1769_v19 = vadd.f32 %v1702_v5, %v1511_v43  ;;  %v1831_v26 = vpop.f32.mrf.mxu3  ;;  %v1447_v56 = vpop.f32.mrf.mxu1 }
 0x227   : > { %v1512_v37 = vadd.f32 %v1447_v56, %v3542_v25 }
 0x228   : > { %v1898_v35 = vadd.f32 %v1831_v26, %v1769_v19 }
 0x229   : > { %v1960_v12 = vpop.f32.mrf.mxu0  ;;  %2792 = vmatmul.msk.bf16.gmra.mxu1 %vm558_vm4, %v3546_v31  ;;  %v1616_v31 = vrot.slane %v3563_v17, 1 }
 0x22a   : > { %v3776_v28 = vadd.f32 %v1957_v11, %v1898_v35  ;;  %2809 = vmatmul.msk.bf16.gmra.mxu2 %vm558_vm4, %v1608_v57 }
 0x22b   : > { %2826 = vmatmul.msk.bf16.gmra.mxu3 %vm558_vm4, %v1611_v14  ;;  %v1617_v59 = vsel %vm1567_vm6, %v1615_v60, %v1616_v31 }
 0x22c   : > { %2843 = vmatmul.msk.bf16.gmra.mxu0 %vm558_vm4, %v1614_v42 }
 0x22d   : > { %v1705_v20 = vpop.f32.mrf.mxu2 }
 0x22e   : > { %v1770_v10 = vadd.f32 %v1705_v20, %v1512_v37  ;;  %v1834_v6 = vpop.f32.mrf.mxu3  ;;  %v1449_v45 = vpop.f32.mrf.mxu1 }
 0x22f   : > { %v1513_v25 = vadd.f32 %v1449_v45, %v3552_v58 }
 0x230   : > { %v1899_v49 = vadd.f32 %v1834_v6, %v1770_v10 }
 0x231   : > { %v1962_v15 = vpop.f32.mrf.mxu0 }
 0x232   : > { %v3784_v40 = vadd.f32 %v1960_v12, %v1899_v49 }
 0x235   : > { %v1707_v47 = vpop.f32.mrf.mxu2 }
 0x236   : > { %v1771_v57 = vadd.f32 %v1707_v47, %v1513_v25  ;;  %v1836_v1 = vpop.f32.mrf.mxu3  ;;  %v1452_v0 = vpop.f32.mrf.mxu1 }
 0x237   : > { %v1514_v46 = vadd.f32 %v1452_v0, %v3567_v3 }
 0x238   : > { %v1900_v53 = vadd.f32 %v1836_v1, %v1771_v57 }
 0x239   : > { %v1965_v7 = vpop.f32.mrf.mxu0  ;;  %2793 = vmatmul.msk.bf16.gmra.mxu1 %vm558_vm4, %v3571_v54 }
 0x23a   : > { %v3790_v61 = vadd.f32 %v1962_v15, %v1900_v53  ;;  %2810 = vmatmul.msk.bf16.gmra.mxu2 %vm558_vm4, %v1611_v14 }
 0x23b   : > { %2827 = vmatmul.msk.bf16.gmra.mxu3 %vm558_vm4, %v1614_v42 }
 0x23c   : > { %2844 = vmatmul.msk.bf16.gmra.mxu0 %vm558_vm4, %v1617_v59 }
 0x23d   : > { %v1710_v2 = vpop.f32.mrf.mxu2 }
 0x23e   : > { %v1772_v58 = vadd.f32 %v1710_v2, %v1514_v46  ;;  %v1839_v17 = vpop.f32.mrf.mxu3  ;;  %v1454_v41 = vpop.f32.mrf.mxu1 }
 0x23f   : > { %v1515_v3 = vadd.f32 %v1454_v41, %v3576_v22 }
 0x240   : > { %v1901_v55 = vadd.f32 %v1839_v17, %v1772_v58 }
 0x241   : > { %v1967_v51 = vpop.f32.mrf.mxu0 }
 0x242   : > { %v3798_v23 = vadd.f32 %v1965_v7, %v1901_v55 }
 0x245   : > { %v1712_v43 = vpop.f32.mrf.mxu2 }
 0x246   : > { %v1773_v11 = vadd.f32 %v1712_v43, %v1515_v3  ;;  %v1841_v39 = vpop.f32.mrf.mxu3  ;;  %v1457_v54 = vpop.f32.mrf.mxu1 }
 0x247   : > { %v1516_v14 = vadd.f32 %v1457_v54, %v3583_v44 }
 0x248   : > { %v1902_v13 = vadd.f32 %v1841_v39, %v1773_v11 }
 0x249   : > { %v1970_v5 = vpop.f32.mrf.mxu0  ;;  %2794 = vmatmul.msk.bf16.gmra.mxu1 %vm558_vm4, %v3185_v18 }
 0x24a   : > { %v3801_v19 = vadd.f32 %v1967_v51, %v1902_v13  ;;  %2811 = vmatmul.msk.bf16.gmra.mxu2 %vm558_vm4, %v1614_v42 }
 0x24b   : > { %2828 = vmatmul.msk.bf16.gmra.mxu3 %vm558_vm4, %v1617_v59 }
 0x24c   : > { %2845 = vmatmul.msk.bf16.gmra.mxu0 %vm558_vm4, %v3185_v18 }
 0x24d   : > { %v1715_v22 = vpop.f32.mrf.mxu2 }
 0x24e   : > { %v1774_v26 = vadd.f32 %v1715_v22, %v1516_v14  ;;  %v1844_v56 = vpop.f32.mrf.mxu3  ;;  %v1459_v35 = vpop.f32.mrf.mxu1 }
 0x24f   : > { %v1517_v44 = vadd.f32 %v1459_v35, %v3596_v38 }
 0x250   : > { %v1903_v37 = vadd.f32 %v1844_v56, %v1774_v26  ;;  %v4524_v56 = vld [vmem:[#allocation15_spill] sm:$0xff] }
 0x251   : > { %v1972_v12 = vpop.f32.mrf.mxu0 }
 0x252   : > { %v3810_v20 = vadd.f32 %v1970_v5, %v1903_v37 }
 0x255   : > { %v1717_v10 = vpop.f32.mrf.mxu2 }
 0x256   : > { %v1775_v6 = vadd.f32 %v1717_v10, %v1517_v44  ;;  %v1846_v45 = vpop.f32.mrf.mxu3  ;;  %v1462_v49 = vpop.f32.mrf.mxu1 }
 0x257   : > { %v1518_v25 = vadd.f32 %v1462_v49, %v3601_v4 }
 0x258   : > { %v1904_v42 = vadd.f32 %v1846_v45, %v1775_v6 }
 0x259   : > { %v1975_v15 = vpop.f32.mrf.mxu0 }
 0x25a   : > { %v3813_v60 = vadd.f32 %v1972_v12, %v1904_v42 }
 0x25d   : > { %v1720_v18 = vpop.f32.mrf.mxu2 }
 0x25e   : > { %v1776_v31 = vadd.f32 %v1720_v18, %v1518_v25  ;;  %v1849_v47 = vpop.f32.mrf.mxu3  ;;  %v1464_v57 = vpop.f32.mrf.mxu1  ;;  %v2048_v25 = vsel %vm558_vm4, %v3720_v34, 0.0 }
 0x25f   : > { %v1519_v38 = vadd.f32 %v1464_v57, %v3610_v32 }
 0x260   : > { %v1905_v1 = vadd.f32 %v1849_v47, %v1776_v31  ;;  %v2047_v31 = vsel %vm558_vm4, %v3714_v50, 0.0  ;;  %v2050_v47 = vsel %vm558_vm4, %v3728_v8, 0.0 }
 0x261   : > { %v1977_v0 = vpop.f32.mrf.mxu0 }
 0x262   : > { %v3816_v53 = vadd.f32 %v1975_v15, %v1905_v1  ;;  %v2049_v1 = vadd.f32 %v2048_v25, %v2047_v31  ;;  %v2072_v31 = vsel %vm558_vm4, %v3801_v19, 0.0 }
 0x265   : > { %v1722_v46 = vpop.f32.mrf.mxu2 }
 0x266   : > { %v1777_v7 = vadd.f32 %v1722_v46, %v1519_v38  ;;  %v1851_v59 = vpop.f32.mrf.mxu3  ;;  %v1467_v2 = vpop.f32.mrf.mxu1  ;;  %v2052_v38 = vsel %vm558_vm4, %v3734_v9, 0.0  ;;  %v2054_v46 = vsel %vm558_vm4, %v3742_v16, 0.0 }
 0x267   : > { %v1520_v4 = vadd.f32 %v1467_v2, %v3615_v27  ;;  %v2056_v2 = vsel %vm558_vm4, %v3748_v63, 0.0 }
 0x268   : > { %v1906_v58 = vadd.f32 %v1851_v59, %v1777_v7 }
 0x269   : > { %v1980_v17 = vpop.f32.mrf.mxu0 }
 0x26a   : > { %v3819_v41 = vadd.f32 %v1977_v0, %v1906_v58  ;;  %v2051_v0 = vadd.f32 %v2050_v47, %v2049_v1 }
 0x26c   : > { %v2053_v7 = vadd.f32 %v2052_v38, %v2051_v0  ;;  %v2074_v0 = vsel %vm558_vm4, %v3810_v20, 0.0 }
 0x26d   : > { %v1725_v55 = vpop.f32.mrf.mxu2 }
 0x26e   : > { %v1778_v3 = vadd.f32 %v1725_v55, %v1520_v4  ;;  %v1854_v51 = vpop.f32.mrf.mxu3  ;;  %v1469_v43 = vpop.f32.mrf.mxu1  ;;  %v2055_v4 = vadd.f32 %v2054_v46, %v2053_v7  ;;  %v2058_v55 = vsel %vm558_vm4, %v3756_v48, 0.0  ;;  %v4525_v46 = vld [vmem:[#allocation18_spill] sm:$0xff] }
 0x26f   : > { %v1521_v32 = vadd.f32 %v1469_v43, %v3624_v29  ;;  %v2060_v43 = vsel %vm558_vm4, %v3762_v52, 0.0 }
 0x270   : > { %v1907_v11 = vadd.f32 %v1854_v51, %v1778_v3  ;;  %v2057_v51 = vadd.f32 %v2056_v2, %v2055_v4 }
 0x271   : > { %v1982_v39 = vpop.f32.mrf.mxu0 }
 0x272   : > { %v3822_v54 = vadd.f32 %v1980_v17, %v1907_v11  ;;  %v2059_v11 = vadd.f32 %v2058_v55, %v2057_v51  ;;  %v2076_v55 = vsel %vm558_vm4, %v3813_v60, 0.0 }
 0x275   : > { %v1727_v13 = vpop.f32.mrf.mxu2 }
 0x276   : > { %v1779_v14 = vadd.f32 %v1727_v13, %v1521_v32  ;;  %v1856_v5 = vpop.f32.mrf.mxu3  ;;  %v1472_v22 = vpop.f32.mrf.mxu1  ;;  %v2062_v32 = vsel %vm558_vm4, %v3770_v36, 0.0 }
 0x277   : > { %v1522_v27 = vadd.f32 %v1472_v22, %v4524_v56  ;;  %v2066_v56 = vsel %vm558_vm4, %v3784_v40, 0.0 }
 0x278   : > { %v1908_v26 = vadd.f32 %v1856_v5, %v1779_v14  ;;  %v2064_v14 = vsel %vm558_vm4, %v3776_v28, 0.0 }
 0x279   : > { %v1985_v35 = vpop.f32.mrf.mxu0 }
 0x27a   : > { %v3825_v37 = vadd.f32 %v1982_v39, %v1908_v26  ;;  %v2061_v39 = vadd.f32 %v2060_v43, %v2059_v11  ;;  %v4526_v43 = vld [vmem:[#allocation6_spill] sm:$0xff] }
 0x27c   : > { %v2063_v22 = vadd.f32 %v2062_v32, %v2061_v39  ;;  %v2078_v39 = vsel %vm558_vm4, %v3816_v53, 0.0 }
 0x27d   : > { %v1730_v44 = vpop.f32.mrf.mxu2 }
 0x27e   : > { %v1780_v12 = vadd.f32 %v1730_v44, %v1522_v27  ;;  %v1859_v10 = vpop.f32.mrf.mxu3  ;;  %v1474_v6 = vpop.f32.mrf.mxu1  ;;  %v2068_v44 = vsel %vm558_vm4, %v3790_v61, 0.0 }
 0x27f   : > { %v1523_v7 = vadd.f32 %v1474_v6, %v4525_v46  ;;  %v2080_v6 = vsel %vm558_vm4, %v3819_v41, 0.0 }
 0x280   : > { %v1909_v45 = vadd.f32 %v1859_v10, %v1780_v12  ;;  %v2070_v10 = vsel %vm558_vm4, %v3798_v23, 0.0 }
 0x281   : > { %v3827_v49 = vpop.f32.mrf.mxu0 }
 0x282   : > { %v3829_v29 = vadd.f32 %v1985_v35, %v1909_v45  ;;  %v2065_v35 = vadd.f32 %v2064_v14, %v2063_v22  ;;  %v4527_v22 = vld [vmem:[#allocation7_spill] sm:$0xff] }
 0x284   : > { %v2067_v12 = vadd.f32 %v2066_v56, %v2065_v35 }
 0x285   : > { %v1732_v42 = vpop.f32.mrf.mxu2 }
 0x286   : > { %v1861_v15 = vpop.f32.mrf.mxu3  ;;  %v1477_v18 = vpop.f32.mrf.mxu1  ;;  %v2069_v45 = vadd.f32 %v2068_v44, %v2067_v12  ;;  %v1781_v51 = vadd.f32 %v1732_v42, %v1523_v7 }
 0x287   : > { %v1524_v11 = vadd.f32 %v1477_v18, %v4526_v43  ;;  %v2082_v18 = vsel %vm558_vm4, %v3822_v54, 0.0  ;;  %v2084_v43 = vsel %vm558_vm4, %v3825_v37, 0.0 }
 0x288   : > { %v2071_v1 = vadd.f32 %v2070_v10, %v2069_v45  ;;  %v1910_v12 = vadd.f32 %v1861_v15, %v1781_v51  ;;  %v4528_v45 = vld [vmem:[#allocation8_spill] sm:$0xff] }
 0x289   : > { %v3837_v57 = vpop.f32.mrf.mxu0 }
 0x28a   : > { %v2073_v4 = vadd.f32 %v2072_v31, %v2071_v1  ;;  %v3879_v15 = vadd.f32 %v3827_v49, %v1910_v12 }
 0x28c   : > { %v2075_v32 = vadd.f32 %v2074_v0, %v2073_v4 }
 0x28d   : > { %v1735_v59 = vpop.f32.mrf.mxu2 }
 0x28e   : > { %v1864_v58 = vpop.f32.mrf.mxu3  ;;  %v1479_v17 = vpop.f32.mrf.mxu1  ;;  %v1782_v14 = vadd.f32 %v1735_v59, %v1524_v11  ;;  %v2077_v35 = vadd.f32 %v2076_v55, %v2075_v32  ;;  %v4529_v59 = vld [vmem:[#allocation21_spill] sm:$0xff]  ;;  %v2086_v11 = vsel %vm558_vm4, %v3829_v29, 0.0 }
 0x28f   : > { %v1525_v56 = vadd.f32 %v1479_v17, %v4527_v22 }
 0x290   : > { %v2079_v42 = vadd.f32 %v2078_v39, %v2077_v35  ;;  %v1911_v0 = vadd.f32 %v1864_v58, %v1782_v14  ;;  %v2088_v14 = vsel %vm558_vm4, %v3879_v15, 0.0 }
 0x291   : > { %v1992_v3 = vpop.f32.mrf.mxu0 }
 0x292   : > { %v2081_v55 = vadd.f32 %v2080_v6, %v2079_v42  ;;  %v3884_v32 = vadd.f32 %v3837_v57, %v1911_v0  ;;  %v4530_v42 = vld [vmem:[#allocation24_spill] sm:$0xff] }
 0x294   : > { %v2083_v51 = vadd.f32 %v2082_v18, %v2081_v55  ;;  %v2090_v6 = vsel %vm558_vm4, %v3884_v32, 0.0 }
 0x295   : > { %v1737_v13 = vpop.f32.mrf.mxu2 }
 0x296   : > { %v1866_v5 = vpop.f32.mrf.mxu3  ;;  %v1482_v26 = vpop.f32.mrf.mxu1  ;;  %v1783_v10 = vadd.f32 %v1737_v13, %v1525_v56 }
 0x297   : > { %v1526_v31 = vadd.f32 %v1482_v26, %v4528_v45 }
 0x298   : > { %v1912_v13 = vadd.f32 %v1866_v5, %v1783_v10 }
 0x299   : > { %v1995_v27 = vpop.f32.mrf.mxu0 }
 0x29a   : > { %v3889_v22 = vadd.f32 %v1992_v3, %v1912_v13 }
 0x29c   : > { %v2092_v10 = vsel %vm558_vm4, %v3889_v22, 0.0 }
 0x29d   : > { %v1740_v25 = vpop.f32.mrf.mxu2 }
 0x29e   : > { %v1869_v47 = vpop.f32.mrf.mxu3  ;;  %v1484_v38 = vpop.f32.mrf.mxu1  ;;  %v1784_v7 = vadd.f32 %v1740_v25, %v1526_v31 }
 0x29f   : > { %v1527_v4 = vadd.f32 %v1484_v38, %v4529_v59  ;;  %v2085_v38 = vadd.f32 %v2084_v43, %v2083_v51 }
 0x2a0   : > { %v1913_v58 = vadd.f32 %v1869_v47, %v1784_v7 }
 0x2a1   : > { %v1997_v2 = vpop.f32.mrf.mxu0  ;;  %v2087_v35 = vadd.f32 %v2086_v11, %v2085_v38 }
 0x2a2   : > { %v3893_v57 = vadd.f32 %v1995_v27, %v1913_v58 }
 0x2a3   : > { %v2089_v12 = vadd.f32 %v2088_v14, %v2087_v35 }
 0x2a4   : > { %v2094_v31 = vsel %vm558_vm4, %v3893_v57, 0.0 }
 0x2a5   : > { %v1742_v44 = vpop.f32.mrf.mxu2  ;;  %v2091_v3 = vadd.f32 %v2090_v6, %v2089_v12 }
 0x2a6   : > { %v1871_v1 = vpop.f32.mrf.mxu3  ;;  %v1487_v46 = vpop.f32.mrf.mxu1  ;;  %v1785_v26 = vadd.f32 %v1742_v44, %v1527_v4 }
 0x2a7   : > { %v1528_v25 = vadd.f32 %v1487_v46, %v3671_v24  ;;  %v2093_v18 = vadd.f32 %v2092_v10, %v2091_v3 }
 0x2a8   : > { %v1914_v49 = vadd.f32 %v1871_v1, %v1785_v26 }
 0x2a9   : > { %v2000_v17 = vpop.f32.mrf.mxu0  ;;  %v2095_v4 = vadd.f32 %v2094_v31, %v2093_v18 }
 0x2aa   : > { %v3897_v45 = vadd.f32 %v1997_v2, %v1914_v49 }
 0x2ac   : > { %v2096_v27 = vsel %vm558_vm4, %v3897_v45, 0.0 }
 0x2ad   : > { %v1745_v39 = vpop.f32.mrf.mxu2  ;;  %v2097_v13 = vadd.f32 %v2096_v27, %v2095_v4 }
 0x2ae   : > { %v1786_v5 = vadd.f32 %v1745_v39, %v1528_v25  ;;  %v1874_v56 = vpop.f32.mrf.mxu3  ;;  %v1489_v44 = vpop.f32.mrf.mxu1 }
 0x2af   : > { %v1529_v46 = vadd.f32 %v1489_v44, %v4530_v42 }
 0x2b0   : > { %v1915_v47 = vadd.f32 %v1874_v56, %v1786_v5 }
 0x2b1   : > { %v2002_v24 = vpop.f32.mrf.mxu0 }
 0x2b2   : > { %v3901_v1 = vadd.f32 %v2000_v17, %v1915_v47 }
 0x2b4   : > { %v2098_v2 = vsel %vm558_vm4, %v3901_v1, 0.0 }
 0x2b5   : > { %v1747_v0 = vpop.f32.mrf.mxu2  ;;  %v2099_v51 = vadd.f32 %v2098_v2, %v2097_v13  ;;  %v2925_v2 = vmov 256.0  }
 0x2b6   : > { %v1787_v7 = vadd.f32 %v1747_v0, %v1529_v46  ;;  %v1876_v59 = vpop.f32.mrf.mxu3  ;;  %v1492_v55 = vpop.f32.mrf.mxu1  ;;  %2896 = vrcp.f32 %v2925_v2 }
 0x2b7   : > { %v1530_v58 = vadd.f32 %v1492_v55, %v3685_v21 }
 0x2b8   : > { %v1916_v43 = vadd.f32 %v1876_v59, %v1787_v7 }
 0x2b9   : > { %v2005_v17 = vpop.f32.mrf.mxu0 }
 0x2ba   : > { %v2042_v26 = vadd.f32 %v2002_v24, %v1916_v43 }
 0x2bc   : > { %v2100_v11 = vsel %vm558_vm4, %v2042_v26, 0.0 }
 0x2bd   : > { %v2101_v25 = vadd.f32 %v2100_v11, %v2099_v51  ;;  %v1750_v38 = vpop.f32.mrf.mxu2 }
 0x2be   : > { %v1788_v39 = vadd.f32 %v1750_v38, %v1530_v58  ;;  %v1879_v14 = vpop.f32.mrf.mxu3  ;;  %v1494_v49 = vpop.f32.mrf.mxu1 }
 0x2bf   : > { %v1531_v44 = vadd.f32 %v1494_v49, %v3694_v30 }
 0x2c0   : > { %v1917_v5 = vadd.f32 %v1879_v14, %v1788_v39 }
 0x2c1   : > { %v2007_v47 = vpop.f32.mrf.mxu0 }
 0x2c2   : > { %v2043_v56 = vadd.f32 %v2005_v17, %v1917_v5 }
 0x2c4   : > { %v2102_v35 = vsel %vm558_vm4, %v2043_v56, 0.0 }
 0x2c5   : > { %v2103_v6 = vadd.f32 %v2102_v35, %v2101_v25  ;;  %v1752_v12 = vpop.f32.mrf.mxu2 }
 0x2c6   : > { %v1789_v24 = vadd.f32 %v1752_v12, %v1531_v44  ;;  %v1881_v10 = vpop.f32.mrf.mxu3  ;;  %v1497_v3 = vpop.f32.mrf.mxu1 }
 0x2c7   : > { %v1532_v46 = vadd.f32 %v1497_v3, %v3699_v33  ;;  %v2897_v33 = vpop.eup %2896 }
 0x2c8   : > { %v1918_v31 = vadd.f32 %v1881_v10, %v1789_v24  ;;  %v2117_v49 = vmul.f32 256.0, %v2897_v33  ;;  %vm2121_vm7 = vweird.f32 %v2897_v33 }
 0x2c9   : > { %v2010_v59 = vpop.f32.mrf.mxu0 }
 0x2ca   : > { %v2044_v42 = vadd.f32 %v2007_v47, %v1918_v31  ;;  %v2118_v44 = vsub.f32 1.0, %v2117_v49 }
 0x2cc   : > { %v2104_v21 = vsel %vm558_vm4, %v2044_v42, 0.0  ;;  %v2119_v12 = vmul.f32 %v2897_v33, %v2118_v44 }
 0x2cd   : > { %v2105_v18 = vadd.f32 %v2104_v21, %v2103_v6  ;;  %v1755_v0 = vpop.f32.mrf.mxu2 }
 0x2ce   : > { %v1790_v27 = vadd.f32 %v1755_v0, %v1532_v46  ;;  %v1884_v7 = vpop.f32.mrf.mxu3  ;;  %v1499_v55 = vpop.f32.mrf.mxu1 }
 0x2cf   : > { %v1533_v13 = vadd.f32 %v1499_v55, %v3709_v62  ;;  %v2120_v62 = vadd.f32 %v2897_v33, %v2119_v12 }
 0x2d0   : > { %v1919_v4 = vadd.f32 %v1884_v7, %v1790_v27 }
 0x2d1   : > { %v2012_v38 = vpop.f32.mrf.mxu0  ;;  %v3917_v31 = vsel %vm2121_vm7, %v2897_v33, %v2120_v62 }
 0x2d2   : > { %v2045_v30 = vadd.f32 %v2010_v59, %v1919_v4 }
 0x2d4   : > { %v2106_v43 = vsel %vm558_vm4, %v2045_v30, 0.0 }
 0x2d5   : > { %v2107_v51 = vadd.f32 %v2106_v43, %v2105_v18  ;;  %v1757_v17 = vpop.f32.mrf.mxu2 }
 0x2d6   : > { %v1791_v11 = vadd.f32 %v1757_v17, %v1533_v13  ;;  %v1886_v58 = vpop.f32.mrf.mxu3 }
 0x2d8   : > { %v1920_v25 = vadd.f32 %v1886_v58, %v1791_v11 }
 0x2da   : > { %v2046_v39 = vadd.f32 %v2012_v38, %v1920_v25 }
 0x2dc   : > { %v2108_v14 = vsel %vm558_vm4, %v2046_v39, 0.0 }
 0x2dd   : > { %v2109_v5 = vadd.f32 %v2108_v14, %v2107_v51 }
 0x2df   : > { %v2110_v35 = vrot.slane %v2109_v5, 4 }
 0x2e1   : > { %v2111_v6 = vadd.f32 %v2110_v35, %v2109_v5 }
 0x2e3   : > { %v2112_v47 = vrot.slane %v2111_v6, 2 }
 0x2e5   : > { %v2113_v24 = vadd.f32 %v2112_v47, %v2111_v6 }
 0x2e7   : > { %v2114_v10 = vrot.slane %v2113_v24, 1 }
 0x2e9   : > { %v2115_v3 = vadd.f32 %v2114_v10, %v2113_v24 }
 0x2eb   : > { %v3920_v21 = vmul.f32 %v3917_v31, %v2115_v3 }
 0x2ed   : > { %v3924_v46 = vsub.f32 %v3901_v1, %v3920_v21  ;;  %v3927_v18 = vsub.f32 %v2042_v26, %v3920_v21  ;;  %v3930_v0 = vsub.f32 %v2043_v56, %v3920_v21  ;;  %v3933_v27 = vsub.f32 %v2044_v42, %v3920_v21 }
 0x2ee   : > { %v3936_v7 = vsub.f32 %v2045_v30, %v3920_v21  ;;  %v3939_v59 = vsub.f32 %v2046_v39, %v3920_v21  ;;  %v3943_v4 = vsub.f32 %v3714_v50, %v3920_v21  ;;  %v3947_v1 = vsub.f32 %v3720_v34, %v3920_v21 }
 0x2ef   : > { %v3951_v26 = vsub.f32 %v3728_v8, %v3920_v21  ;;  %v3955_v56 = vsub.f32 %v3734_v9, %v3920_v21  ;;  %v3963_v50 = vsub.f32 %v3742_v16, %v3920_v21  ;;  %v3969_v8 = vsub.f32 %v3748_v63, %v3920_v21 }
 0x2f0   : > { %v2156_v42 = vmul.f32 %v3943_v4, %v3943_v4  ;;  %v2157_v55 = vmul.f32 %v3947_v1, %v3947_v1  ;;  %v3977_v13 = vsub.f32 %v3756_v48, %v3920_v21  ;;  %v3984_v63 = vsub.f32 %v3762_v52, %v3920_v21 }
 0x2f1   : > { %v2158_v34 = vmul.f32 %v3951_v26, %v3951_v26  ;;  %v2159_v9 = vmul.f32 %v3955_v56, %v3955_v56  ;;  %v2160_v16 = vmul.f32 %v3963_v50, %v3963_v50  ;;  %v2161_v11 = vmul.f32 %v3969_v8, %v3969_v8 }
 0x2f2   : > { %v2188_v30 = vsel %vm558_vm4, %v2156_v42, 0.0  ;;  %v2189_v2 = vsel %vm558_vm4, %v2157_v55, 0.0  ;;  %v3991_v48 = vsub.f32 %v3770_v36, %v3920_v21  ;;  %v2162_v33 = vmul.f32 %v3977_v13, %v3977_v13 }
 0x2f3   : > { %v2190_v43 = vadd.f32 %v2189_v2, %v2188_v30  ;;  %v2191_v51 = vsel %vm558_vm4, %v2158_v34, 0.0  ;;  %v2193_v58 = vsel %vm558_vm4, %v2159_v9, 0.0  ;;  %v2195_v38 = vsel %vm558_vm4, %v2160_v16, 0.0 }
 0x2f4   : > { %v3998_v52 = vsub.f32 %v3776_v28, %v3920_v21  ;;  %v2163_v14 = vmul.f32 %v3984_v63, %v3984_v63  ;;  %v2197_v49 = vsel %vm558_vm4, %v2161_v11, 0.0  ;;  %v4005_v36 = vsub.f32 %v3784_v40, %v3920_v21 }
 0x2f5   : > { %v2192_v17 = vadd.f32 %v2191_v51, %v2190_v43  ;;  %v2164_v35 = vmul.f32 %v3991_v48, %v3991_v48  ;;  %v2199_v44 = vsel %vm558_vm4, %v2162_v33, 0.0  ;;  %v4012_v28 = vsub.f32 %v3790_v61, %v3920_v21 }
 0x2f6   : > { %v2165_v47 = vmul.f32 %v3998_v52, %v3998_v52  ;;  %v2201_v12 = vsel %vm558_vm4, %v2163_v14, 0.0  ;;  %v4019_v40 = vsub.f32 %v3798_v23, %v3920_v21  ;;  %v2166_v10 = vmul.f32 %v4005_v36, %v4005_v36 }
 0x2f7   : > { %v2194_v25 = vadd.f32 %v2193_v58, %v2192_v17  ;;  %v2203_v62 = vsel %vm558_vm4, %v2164_v35, 0.0  ;;  %v4026_v61 = vsub.f32 %v3801_v19, %v3920_v21  ;;  %v2167_v42 = vmul.f32 %v4012_v28, %v4012_v28 }
 0x2f8   : > { %v2205_v55 = vsel %vm558_vm4, %v2165_v47, 0.0  ;;  %v4033_v23 = vsub.f32 %v3810_v20, %v3920_v21  ;;  %v2168_v9 = vmul.f32 %v4019_v40, %v4019_v40  ;;  %v2207_v30 = vsel %vm558_vm4, %v2166_v10, 0.0 }
 0x2f9   : > { %v2196_v39 = vadd.f32 %v2195_v38, %v2194_v25  ;;  %v4040_v19 = vsub.f32 %v3813_v60, %v3920_v21  ;;  %v2169_v43 = vmul.f32 %v4026_v61, %v4026_v61  ;;  %v2209_v16 = vsel %vm558_vm4, %v2167_v42, 0.0 }
 0x2fa   : > { %v4047_v20 = vsub.f32 %v3816_v53, %v3920_v21  ;;  %v2170_v17 = vmul.f32 %v4033_v23, %v4033_v23  ;;  %v2211_v11 = vsel %vm558_vm4, %v2168_v9, 0.0  ;;  %v4054_v60 = vsub.f32 %v3819_v41, %v3920_v21 }
 0x2fb   : > { %v2198_v5 = vadd.f32 %v2197_v49, %v2196_v39  ;;  %v2171_v25 = vmul.f32 %v4040_v19, %v4040_v19  ;;  %v2213_v33 = vsel %vm558_vm4, %v2169_v43, 0.0  ;;  %v4061_v53 = vsub.f32 %v3822_v54, %v3920_v21 }
 0x2fc   : > { %v2172_v39 = vmul.f32 %v4047_v20, %v4047_v20  ;;  %v2215_v14 = vsel %vm558_vm4, %v2170_v17, 0.0  ;;  %v4068_v41 = vsub.f32 %v3825_v37, %v3920_v21  ;;  %v4075_v54 = vsub.f32 %v3829_v29, %v3920_v21 }
 0x2fd   : > { %v2200_v6 = vadd.f32 %v2199_v44, %v2198_v5  ;;  %v2173_v5 = vmul.f32 %v4054_v60, %v4054_v60  ;;  %v2217_v35 = vsel %vm558_vm4, %v2171_v25, 0.0  ;;  %v4082_v37 = vsub.f32 %v3879_v15, %v3920_v21 }
 0x2fe   : > { %v2219_v47 = vsel %vm558_vm4, %v2172_v39, 0.0  ;;  %v4089_v29 = vsub.f32 %v3884_v32, %v3920_v21  ;;  %v4096_v15 = vsub.f32 %v3889_v22, %v3920_v21  ;;  %v4103_v32 = vsub.f32 %v3893_v57, %v3920_v21 }
 0x2ff   : > { %v2202_v24 = vadd.f32 %v2201_v12, %v2200_v6  ;;  %v2174_v6 = vmul.f32 %v4061_v53, %v4061_v53  ;;  %v2221_v10 = vsel %vm558_vm4, %v2173_v5, 0.0  ;;  %v4110_v22 = vsub.f32 %v3897_v45, %v3920_v21 }
 0x300   : > { %v2180_v57 = vmul.f32 %v4103_v32, %v4103_v32  ;;  %v2182_v45 = vmul.f32 %v3924_v46, %v3924_v46 }
 0x301   : > { %v2204_v3 = vadd.f32 %v2203_v62, %v2202_v24  ;;  %v2175_v24 = vmul.f32 %v4068_v41, %v4068_v41  ;;  %v2223_v42 = vsel %vm558_vm4, %v2174_v6, 0.0 }
 0x302   : > { %v2235_v21 = vsel %vm558_vm4, %v2180_v57, 0.0  ;;  %v2239_v6 = vsel %vm558_vm4, %v2182_v45, 0.0 }
 0x303   : > { %v2206_v34 = vadd.f32 %v2205_v55, %v2204_v3  ;;  %v2176_v3 = vmul.f32 %v4075_v54, %v4075_v54  ;;  %v2225_v9 = vsel %vm558_vm4, %v2175_v24, 0.0 }
 0x305   : > { %v2208_v2 = vadd.f32 %v2207_v30, %v2206_v34  ;;  %v2177_v34 = vmul.f32 %v4082_v37, %v4082_v37  ;;  %v2227_v43 = vsel %vm558_vm4, %v2176_v3, 0.0 }
 0x307   : > { %v2210_v51 = vadd.f32 %v2209_v16, %v2208_v2  ;;  %v2178_v2 = vmul.f32 %v4089_v29, %v4089_v29  ;;  %v2229_v17 = vsel %vm558_vm4, %v2177_v34, 0.0 }
 0x309   : > { %v2212_v58 = vadd.f32 %v2211_v11, %v2210_v51  ;;  %v2179_v51 = vmul.f32 %v4096_v15, %v4096_v15 }
 0x30b   : > { %v2214_v38 = vadd.f32 %v2213_v33, %v2212_v58  ;;  %v2231_v58 = vsel %vm558_vm4, %v2178_v2, 0.0  ;;  %v2181_v33 = vmul.f32 %v4110_v22, %v4110_v22 }
 0x30d   : > { %v2216_v49 = vadd.f32 %v2215_v14, %v2214_v38  ;;  %v2233_v38 = vsel %vm558_vm4, %v2179_v51, 0.0  ;;  %v2237_v5 = vsel %vm558_vm4, %v2181_v33, 0.0 }
 0x30f   : > { %v2218_v44 = vadd.f32 %v2217_v35, %v2216_v49  ;;  %v2183_v49 = vmul.f32 %v3927_v18, %v3927_v18 }
 0x311   : > { %v2220_v12 = vadd.f32 %v2219_v47, %v2218_v44  ;;  %v2184_v44 = vmul.f32 %v3930_v0, %v3930_v0  ;;  %v2241_v24 = vsel %vm558_vm4, %v2183_v49, 0.0 }
 0x313   : > { %v2222_v62 = vadd.f32 %v2221_v10, %v2220_v12  ;;  %v2185_v12 = vmul.f32 %v3933_v27, %v3933_v27  ;;  %v2243_v3 = vsel %vm558_vm4, %v2184_v44, 0.0 }
 0x315   : > { %v2224_v55 = vadd.f32 %v2223_v42, %v2222_v62  ;;  %v2186_v62 = vmul.f32 %v3936_v7, %v3936_v7  ;;  %v2245_v34 = vsel %vm558_vm4, %v2185_v12, 0.0 }
 0x317   : > { %v2226_v30 = vadd.f32 %v2225_v9, %v2224_v55  ;;  %v2187_v55 = vmul.f32 %v3939_v59, %v3939_v59 }
 0x319   : > { %v2228_v16 = vadd.f32 %v2227_v43, %v2226_v30  ;;  %v2247_v30 = vsel %vm558_vm4, %v2186_v62, 0.0  ;;  %v2249_v43 = vsel %vm558_vm4, %v2187_v55, 0.0 }
 0x31b   : > { %v2230_v11 = vadd.f32 %v2229_v17, %v2228_v16 }
 0x31d   : > { %v2232_v25 = vadd.f32 %v2231_v58, %v2230_v11 }
 0x31f   : > { %v2234_v39 = vadd.f32 %v2233_v38, %v2232_v25 }
 0x321   : > { %v2236_v14 = vadd.f32 %v2235_v21, %v2234_v39 }
 0x323   : > { %v2238_v35 = vadd.f32 %v2237_v5, %v2236_v14 }
 0x325   : > { %v2240_v47 = vadd.f32 %v2239_v6, %v2238_v35  ;;  %v2258_v35 = vld [vmem:[%s4426_s2] sm:$0x1] }
 0x327   : > { %v2242_v10 = vadd.f32 %v2241_v24, %v2240_v47 }
 0x329   : > { %v2244_v42 = vadd.f32 %v2243_v3, %v2242_v10 }
 0x32b   : > { %v2246_v9 = vadd.f32 %v2245_v34, %v2244_v42 }
 0x32d   : > { %v2248_v2 = vadd.f32 %v2247_v30, %v2246_v9 }
 0x32f   : > { %v2250_v16 = vadd.f32 %v2249_v43, %v2248_v2 }
 0x331   : > { %v2251_v51 = vrot.slane %v2250_v16, 4 }
 0x333   : > { %v2252_v17 = vadd.f32 %v2251_v51, %v2250_v16 }
 0x335   : > { %v2253_v11 = vrot.slane %v2252_v17, 2 }
 0x337   : > { %v2254_v57 = vadd.f32 %v2253_v11, %v2252_v17 }
 0x339   : > { %v2255_v58 = vrot.slane %v2254_v57, 1 }
 0x33b   : > { %v2256_v25 = vadd.f32 %v2255_v58, %v2254_v57 }
 0x33d   : > { %v2257_v33 = vmul.f32 %v2256_v25, %v3917_v31 }
 0x33f   : > { %v2259_v38 = vadd.f32 1e-05, %v2257_v33 }
 0x341   : > { %2898 = vrsqrt.f32 %v2259_v38  ;;  %vm2266_vm9 = vweird.f32 %v2259_v38 }
 0x347   : > { %v2899_v39 = vpop.eup %2898 }
 0x348   : > { %v2261_v45 = vmul.f32 %v2899_v39, %v2259_v38  ;;  %vm2267_vm8 = vweird.f32 %v2899_v39 }
 0x349   : > { %vm2268_vm10 = vmor %vm2266_vm9, %vm2267_vm8 }
 0x34a   : > { %v2262_v21 = vmul.f32 %v2899_v39, %v2261_v45 }
 0x34c   : > { %v2263_v14 = vmul.f32 0.5, %v2262_v21 }
 0x34e   : > { %v2264_v49 = vsub.f32 1.5, %v2263_v14 }
 0x350   : > { %v2265_v5 = vmul.f32 %v2899_v39, %v2264_v49 }
 0x352   : > { %v2269_v44 = vsel %vm2268_vm10, %v2899_v39, %v2265_v5 }
 0x353   : > { %v2270_v6 = vmul.f32 %v2269_v44, %v2258_v35 }
 0x355   : > { %v2272_v47 = vperm.slane %v2270_v6, 0 }
 0x357   : > { %v2274_v31 = vmul.f32 %v2272_v47, %v3943_v4  ;;  %v2275_v12 = vmul.f32 %v2272_v47, %v3947_v1  ;;  %v2276_v24 = vmul.f32 %v2272_v47, %v3951_v26  ;;  %v2277_v10 = vmul.f32 %v2272_v47, %v3955_v56 }
 0x358   : > { %v2278_v62 = vmul.f32 %v2272_v47, %v3963_v50  ;;  %v2279_v3 = vmul.f32 %v2272_v47, %v3969_v8  ;;  %v2280_v42 = vmul.f32 %v2272_v47, %v3977_v13  ;;  %v2281_v55 = vmul.f32 %v2272_v47, %v3984_v63  ;;  %v2895_v63 = vld [vmem:[%s4427_s3] ss:$0 sm:$0xff] }
 0x359   : > { %v2282_v34 = vmul.f32 %v2272_v47, %v3991_v48  ;;  %v2283_v9 = vmul.f32 %v2272_v47, %v3998_v52  ;;  %v2284_v4 = vmul.f32 %v2272_v47, %v4005_v36  ;;  %v2285_v1 = vmul.f32 %v2272_v47, %v4012_v28 }
 0x35a   : > { %v2286_v26 = vmul.f32 %v2272_v47, %v4019_v40  ;;  %v2287_v56 = vmul.f32 %v2272_v47, %v4026_v61  ;;  %v2288_v50 = vmul.f32 %v2272_v47, %v4033_v23  ;;  %v2289_v8 = vmul.f32 %v2272_v47, %v4040_v19 }
 0x35b   : > { %v2290_v13 = vmul.f32 %v2272_v47, %v4047_v20  ;;  %v2291_v48 = vmul.f32 %v2272_v47, %v4054_v60  ;;  %v2292_v52 = vmul.f32 %v2272_v47, %v4061_v53  ;;  %v2293_v36 = vmul.f32 %v2272_v47, %v4068_v41 }
 0x35c   : > { %v2294_v28 = vmul.f32 %v2272_v47, %v4075_v54  ;;  %v2295_v40 = vmul.f32 %v2272_v47, %v4082_v37  ;;  %v2296_v61 = vmul.f32 %v2272_v47, %v4089_v29  ;;  %v2297_v23 = vmul.f32 %v2272_v47, %v4096_v15 }
 0x35d   : > { %v2298_v19 = vmul.f32 %v2272_v47, %v4103_v32  ;;  %v2299_v20 = vmul.f32 %v2272_v47, %v4110_v22  ;;  %v2300_v30 = vmul.f32 %v2272_v47, %v3924_v46  ;;  %v2301_v60 = vmul.f32 %v2272_v47, %v3927_v18 }
 0x35e   : > { %v2302_v53 = vmul.f32 %v2272_v47, %v3930_v0  ;;  %v2303_v41 = vmul.f32 %v2272_v47, %v3933_v27  ;;  %v2304_v54 = vmul.f32 %v2272_v47, %v3936_v7  ;;  %v2305_v37 = vmul.f32 %v2272_v47, %v3939_v59 }
 0x35f   : > { %v2310_v2 = vadd.f32 %v2895_v63, %v2274_v31  ;;  %v2311_v29 = vadd.f32 %v2895_v63, %v2275_v12  ;;  %v2312_v43 = vadd.f32 %v2895_v63, %v2276_v24  ;;  %v2313_v15 = vadd.f32 %v2895_v63, %v2277_v10 }
 0x360   : > { %v2314_v16 = vadd.f32 %v2895_v63, %v2278_v62  ;;  %v2315_v32 = vadd.f32 %v2895_v63, %v2279_v3  ;;  %v2316_v51 = vadd.f32 %v2895_v63, %v2280_v42  ;;  %v2317_v22 = vadd.f32 %v2895_v63, %v2281_v55 }
 0x361   : > { %v4180_v17 = vadd.f32 %v2895_v63, %v2282_v34  ;;  %v4182_v46 = vadd.f32 %v2895_v63, %v2283_v9  ;;  %v4184_v18 = vadd.f32 %v2895_v63, %v2284_v4  ;;  %v4186_v0 = vadd.f32 %v2895_v63, %v2285_v1 }
 0x362   : > { %v4188_v27 = vadd.f32 %v2895_v63, %v2286_v26  ;;  %v4190_v7 = vadd.f32 %v2895_v63, %v2287_v56  ;;  %v4192_v59 = vadd.f32 %v2895_v63, %v2288_v50  ;;  %v4194_v11 = vadd.f32 %v2895_v63, %v2289_v8 }
 0x363   : > { %v4196_v57 = vadd.f32 %v2895_v63, %v2290_v13  ;;  %v4198_v58 = vadd.f32 %v2895_v63, %v2291_v48  ;;  %v4200_v25 = vadd.f32 %v2895_v63, %v2292_v52  ;;  %v4202_v33 = vadd.f32 %v2895_v63, %v2293_v36 }
 0x364   : > { %v4204_v38 = vadd.f32 %v2895_v63, %v2294_v28  ;;  %v4206_v39 = vadd.f32 %v2895_v63, %v2295_v40  ;;  %v4208_v45 = vadd.f32 %v2895_v63, %v2296_v61  ;;  %v4210_v21 = vadd.f32 %v2895_v63, %v2297_v23 }
 0x365   : > { %v2374_v14 = vmul.f32 0.01, %v2310_v2  ;;  %v4212_v49 = vadd.f32 %v2895_v63, %v2298_v19  ;;  %v4214_v5 = vadd.f32 %v2895_v63, %v2299_v20  ;;  %vm2342_vm11 = vcmp.gt.f32.partialorder %v2310_v2, 0.0 }
 0x366   : > { %v2375_v35 = vmul.f32 0.01, %v2311_v29  ;;  %v4216_v44 = vadd.f32 %v2895_v63, %v2300_v30  ;;  %v4218_v6 = vadd.f32 %v2895_v63, %v2301_v60  ;;  %vm2343_vm12 = vcmp.gt.f32.partialorder %v2311_v29, 0.0 }
 0x367   : > { %v2376_v47 = vmul.f32 0.01, %v2312_v43  ;;  %v4220_v31 = vadd.f32 %v2895_v63, %v2302_v53  ;;  %v4222_v12 = vadd.f32 %v2895_v63, %v2303_v41  ;;  %vm2344_vm13 = vcmp.gt.f32.partialorder %v2312_v43, 0.0 }
 0x368   : > { %v2377_v24 = vmul.f32 0.01, %v2313_v15  ;;  %v4224_v10 = vadd.f32 %v2895_v63, %v2304_v54  ;;  %vm2345_vm14 = vcmp.gt.f32.partialorder %v2313_v15, 0.0  ;;  %v2378_v62 = vmul.f32 0.01, %v2314_v16 }
 0x369   : > { %v2406_v3 = vsel %vm2342_vm11, %v2310_v2, %v2374_v14  ;;  %v4226_v42 = vadd.f32 %v2895_v63, %v2305_v37  ;;  %vm2346_vm15 = vcmp.gt.f32.partialorder %v2314_v16, 0.0  ;;  %v2379_v55 = vmul.f32 0.01, %v2315_v32 }
 0x36a   : > { %v2407_v34 = vsel %vm2343_vm12, %v2311_v29, %v2375_v35  ;;  %vm2347_vm0 = vcmp.gt.f32.partialorder %v2315_v32, 0.0  ;;  %vm2348_vm1 = vcmp.gt.f32.partialorder %v2316_v51, 0.0  ;;  %v2380_v9 = vmul.f32 0.01, %v2316_v51 }
 0x36b   : > { %v2408_v4 = vsel %vm2344_vm13, %v2312_v43, %v2376_v47  ;;  %vm2349_vm2 = vcmp.gt.f32.partialorder %v2317_v22, 0.0  ;;  %v2381_v1 = vmul.f32 0.01, %v2317_v22  ;;  %v2409_v26 = vsel %vm2345_vm14, %v2313_v15, %v2377_v24 }
 0x36c   : > { %v2438_v56 = vpack.c.bf16 %v2406_v3, %v2406_v3  ;;  %vm2350_vm3 = vcmp.gt.f32.partialorder %v4180_v17, 0.0  ;;  %v2382_v50 = vmul.f32 0.01, %v4180_v17  ;;  %v2410_v8 = vsel %vm2346_vm15, %v2314_v16, %v2378_v62 }
 0x36d   : > { %v2439_v13 = vpack.c.bf16 %v2407_v34, %v2407_v34  ;;  %vm2351_vm4 = vcmp.gt.f32.partialorder %v4182_v46, 0.0  ;;  %v2383_v63 = vmul.f32 0.01, %v4182_v46  ;;  %v2411_v48 = vsel %vm2347_vm0, %v2315_v32, %v2379_v55 }
 0x36e   : > { %v2440_v52 = vpack.c.bf16 %v2408_v4, %v2408_v4  ;;  %v2384_v36 = vmul.f32 0.01, %v4184_v18  ;;  %v2412_v28 = vsel %vm2348_vm1, %v2316_v51, %v2380_v9  ;;  %v2441_v40 = vpack.c.bf16 %v2409_v26, %v2409_v26  ;;  %2471 = vst.msk [vmem:[%s4233_s25] sm:$0xf] %vm2470_vm5, %v2438_v56 }
 0x36f   : > { %vm2352_vm6 = vcmp.gt.f32.partialorder %v4184_v18, 0.0  ;;  %v2385_v61 = vmul.f32 0.01, %v4186_v0  ;;  %v2413_v23 = vsel %vm2349_vm2, %v2317_v22, %v2381_v1  ;;  %v2442_v19 = vpack.c.bf16 %v2410_v8, %v2410_v8  ;;  %2472 = vst.msk [vmem:[%s4233_s25 + $0x4] sm:$0xf] %vm2470_vm5, %v2439_v13 }
 0x370   : > { %vm2353_vm7 = vcmp.gt.f32.partialorder %v4186_v0, 0.0  ;;  %v2386_v20 = vmul.f32 0.01, %v4188_v27  ;;  %v2414_v30 = vsel %vm2350_vm3, %v4180_v17, %v2382_v50  ;;  %v2443_v60 = vpack.c.bf16 %v2411_v48, %v2411_v48  ;;  %2473 = vst.msk [vmem:[%s4233_s25 + $0x8] sm:$0xf] %vm2470_vm5, %v2440_v52 }
 0x371   : > { %vm2354_vm8 = vcmp.gt.f32.partialorder %v4188_v27, 0.0  ;;  %v2387_v53 = vmul.f32 0.01, %v4190_v7  ;;  %v2415_v41 = vsel %vm2351_vm4, %v4182_v46, %v2383_v63  ;;  %v2444_v54 = vpack.c.bf16 %v2412_v28, %v2412_v28  ;;  %2474 = vst.msk [vmem:[%s4233_s25 + $0xc] sm:$0xf] %vm2470_vm5, %v2441_v40 }
 0x372   : > { %vm2355_vm9 = vcmp.gt.f32.partialorder %v4190_v7, 0.0  ;;  %v2388_v37 = vmul.f32 0.01, %v4192_v59  ;;  %v2416_v2 = vsel %vm2352_vm6, %v4184_v18, %v2384_v36  ;;  %v2445_v29 = vpack.c.bf16 %v2413_v23, %v2413_v23  ;;  %2475 = vst.msk [vmem:[%s4233_s25 + $0x10] sm:$0xf] %vm2470_vm5, %v2442_v19 }
 0x373   : > { %vm2356_vm10 = vcmp.gt.f32.partialorder %v4192_v59, 0.0  ;;  %v2389_v43 = vmul.f32 0.01, %v4194_v11  ;;  %v2417_v15 = vsel %vm2353_vm7, %v4186_v0, %v2385_v61  ;;  %v2446_v16 = vpack.c.bf16 %v2414_v30, %v2414_v30  ;;  %2476 = vst.msk [vmem:[%s4233_s25 + $0x14] sm:$0xf] %vm2470_vm5, %v2443_v60 }
 0x374   : > { %vm2357_vm11 = vcmp.gt.f32.partialorder %v4194_v11, 0.0  ;;  %v2390_v32 = vmul.f32 0.01, %v4196_v57  ;;  %v2418_v51 = vsel %vm2354_vm8, %v4188_v27, %v2386_v20  ;;  %v2447_v22 = vpack.c.bf16 %v2415_v41, %v2415_v41  ;;  %2477 = vst.msk [vmem:[%s4233_s25 + $0x18] sm:$0xf] %vm2470_vm5, %v2444_v54 }
 0x375   : > { %vm2358_vm12 = vcmp.gt.f32.partialorder %v4196_v57, 0.0  ;;  %v2391_v17 = vmul.f32 0.01, %v4198_v58  ;;  %v2419_v46 = vsel %vm2355_vm9, %v4190_v7, %v2387_v53  ;;  %v2448_v18 = vpack.c.bf16 %v2416_v2, %v2416_v2  ;;  %2478 = vst.msk [vmem:[%s4233_s25 + $0x1c] sm:$0xf] %vm2470_vm5, %v2445_v29 }
 0x376   : > { %vm2359_vm13 = vcmp.gt.f32.partialorder %v4198_v58, 0.0  ;;  %v2392_v0 = vmul.f32 0.01, %v4200_v25  ;;  %v2420_v27 = vsel %vm2356_vm10, %v4192_v59, %v2388_v37  ;;  %v2449_v14 = vpack.c.bf16 %v2417_v15, %v2417_v15  ;;  %2479 = vst.msk [vmem:[%s4233_s25 + $0x20] sm:$0xf] %vm2470_vm5, %v2446_v16 }
 0x377   : > { %vm2360_vm14 = vcmp.gt.f32.partialorder %v4200_v25, 0.0  ;;  %v2393_v7 = vmul.f32 0.01, %v4202_v33  ;;  %v2421_v35 = vsel %vm2357_vm11, %v4194_v11, %v2389_v43  ;;  %v2450_v47 = vpack.c.bf16 %v2418_v51, %v2418_v51  ;;  %2480 = vst.msk [vmem:[%s4233_s25 + $0x24] sm:$0xf] %vm2470_vm5, %v2447_v22 }
 0x378   : > { %vm2361_vm15 = vcmp.gt.f32.partialorder %v4202_v33, 0.0  ;;  %v2394_v59 = vmul.f32 0.01, %v4204_v38  ;;  %v2422_v24 = vsel %vm2358_vm12, %v4196_v57, %v2390_v32  ;;  %v2451_v62 = vpack.c.bf16 %v2419_v46, %v2419_v46  ;;  %2481 = vst.msk [vmem:[%s4233_s25 + $0x28] sm:$0xf] %vm2470_vm5, %v2448_v18 }
 0x379   : > { %vm2362_vm0 = vcmp.gt.f32.partialorder %v4204_v38, 0.0  ;;  %v2395_v11 = vmul.f32 0.01, %v4206_v39  ;;  %v2423_v3 = vsel %vm2359_vm13, %v4198_v58, %v2391_v17  ;;  %v2452_v55 = vpack.c.bf16 %v2420_v27, %v2420_v27  ;;  %2482 = vst.msk [vmem:[%s4233_s25 + $0x2c] sm:$0xf] %vm2470_vm5, %v2449_v14 }
 0x37a   : > { %vm2363_vm1 = vcmp.gt.f32.partialorder %v4206_v39, 0.0  ;;  %v2396_v57 = vmul.f32 0.01, %v4208_v45  ;;  %v2424_v34 = vsel %vm2360_vm14, %v4200_v25, %v2392_v0  ;;  %v2453_v9 = vpack.c.bf16 %v2421_v35, %v2421_v35  ;;  %2483 = vst.msk [vmem:[%s4233_s25 + $0x30] sm:$0xf] %vm2470_vm5, %v2450_v47 }
 0x37b   : > { %vm2364_vm2 = vcmp.gt.f32.partialorder %v4208_v45, 0.0  ;;  %v2397_v58 = vmul.f32 0.01, %v4210_v21  ;;  %v2425_v4 = vsel %vm2361_vm15, %v4202_v33, %v2393_v7  ;;  %v2454_v1 = vpack.c.bf16 %v2422_v24, %v2422_v24  ;;  %2484 = vst.msk [vmem:[%s4233_s25 + $0x34] sm:$0xf] %vm2470_vm5, %v2451_v62 }
 0x37c   : > { %vm2365_vm3 = vcmp.gt.f32.partialorder %v4210_v21, 0.0  ;;  %v2398_v25 = vmul.f32 0.01, %v4212_v49  ;;  %v2426_v26 = vsel %vm2362_vm0, %v4204_v38, %v2394_v59  ;;  %v2455_v56 = vpack.c.bf16 %v2423_v3, %v2423_v3  ;;  %2485 = vst.msk [vmem:[%s4233_s25 + $0x38] sm:$0xf] %vm2470_vm5, %v2452_v55 }
 0x37d   : > { %vm2366_vm4 = vcmp.gt.f32.partialorder %v4212_v49, 0.0  ;;  %v2399_v33 = vmul.f32 0.01, %v4214_v5  ;;  %v2427_v50 = vsel %vm2363_vm1, %v4206_v39, %v2395_v11  ;;  %v2456_v8 = vpack.c.bf16 %v2424_v34, %v2424_v34  ;;  %2486 = vst.msk [vmem:[%s4233_s25 + $0x3c] sm:$0xf] %vm2470_vm5, %v2453_v9 }
 0x37e   : > { %vm2367_vm6 = vcmp.gt.f32.partialorder %v4214_v5, 0.0  ;;  %v2400_v38 = vmul.f32 0.01, %v4216_v44  ;;  %v2428_v13 = vsel %vm2364_vm2, %v4208_v45, %v2396_v57  ;;  %v2457_v63 = vpack.c.bf16 %v2425_v4, %v2425_v4  ;;  %2487 = vst.msk [vmem:[%s4233_s25 + $0x40] sm:$0xf] %vm2470_vm5, %v2454_v1 }
 0x37f   : > { %vm2368_vm7 = vcmp.gt.f32.partialorder %v4216_v44, 0.0  ;;  %v2401_v39 = vmul.f32 0.01, %v4218_v6  ;;  %v2429_v48 = vsel %vm2365_vm3, %v4210_v21, %v2397_v58  ;;  %v2458_v52 = vpack.c.bf16 %v2426_v26, %v2426_v26  ;;  %2488 = vst.msk [vmem:[%s4233_s25 + $0x44] sm:$0xf] %vm2470_vm5, %v2455_v56 }
 0x380   : > { %vm2369_vm8 = vcmp.gt.f32.partialorder %v4218_v6, 0.0  ;;  %v2402_v45 = vmul.f32 0.01, %v4220_v31  ;;  %v2430_v36 = vsel %vm2366_vm4, %v4212_v49, %v2398_v25  ;;  %v2459_v28 = vpack.c.bf16 %v2427_v50, %v2427_v50  ;;  %2489 = vst.msk [vmem:[%s4233_s25 + $0x48] sm:$0xf] %vm2470_vm5, %v2456_v8 }
 0x381   : > { %vm2370_vm9 = vcmp.gt.f32.partialorder %v4220_v31, 0.0  ;;  %v2403_v21 = vmul.f32 0.01, %v4222_v12  ;;  %v2431_v40 = vsel %vm2367_vm6, %v4214_v5, %v2399_v33  ;;  %v2460_v61 = vpack.c.bf16 %v2428_v13, %v2428_v13  ;;  %2490 = vst.msk [vmem:[%s4233_s25 + $0x4c] sm:$0xf] %vm2470_vm5, %v2457_v63 }
 0x382   : > { %vm2371_vm10 = vcmp.gt.f32.partialorder %v4222_v12, 0.0  ;;  %v2404_v49 = vmul.f32 0.01, %v4224_v10  ;;  %v2432_v23 = vsel %vm2368_vm7, %v4216_v44, %v2400_v38  ;;  %v2461_v19 = vpack.c.bf16 %v2429_v48, %v2429_v48  ;;  %2491 = vst.msk [vmem:[%s4233_s25 + $0x50] sm:$0xf] %vm2470_vm5, %v2458_v52 }
 0x383   : > { %vm2372_vm11 = vcmp.gt.f32.partialorder %v4224_v10, 0.0  ;;  %v2405_v5 = vmul.f32 0.01, %v4226_v42  ;;  %v2433_v20 = vsel %vm2369_vm8, %v4218_v6, %v2401_v39  ;;  %v2462_v30 = vpack.c.bf16 %v2430_v36, %v2430_v36  ;;  %2492 = vst.msk [vmem:[%s4233_s25 + $0x54] sm:$0xf] %vm2470_vm5, %v2459_v28 }
 0x384   : > { %vm2373_vm12 = vcmp.gt.f32.partialorder %v4226_v42, 0.0  ;;  %v2434_v44 = vsel %vm2370_vm9, %v4220_v31, %v2402_v45  ;;  %v2463_v60 = vpack.c.bf16 %v2431_v40, %v2431_v40  ;;  %v2435_v53 = vsel %vm2371_vm10, %v4222_v12, %v2403_v21  ;;  %2493 = vst.msk [vmem:[%s4233_s25 + $0x58] sm:$0xf] %vm2470_vm5, %v2460_v61 }
 0x385   : > { %v2464_v6 = vpack.c.bf16 %v2432_v23, %v2432_v23  ;;  %v2436_v41 = vsel %vm2372_vm11, %v4224_v10, %v2404_v49  ;;  %v2465_v54 = vpack.c.bf16 %v2433_v20, %v2433_v20  ;;  %2494 = vst.msk [vmem:[%s4233_s25 + $0x5c] sm:$0xf] %vm2470_vm5, %v2461_v19  ;;  %v2437_v31 = vsel %vm2373_vm12, %v4226_v42, %v2405_v5 }
 0x386   : > { %v2466_v37 = vpack.c.bf16 %v2434_v44, %v2434_v44  ;;  %2495 = vst.msk [vmem:[%s4233_s25 + $0x60] sm:$0xf] %vm2470_vm5, %v2462_v30  ;;  %v2467_v2 = vpack.c.bf16 %v2435_v53, %v2435_v53  ;;  %v2468_v12 = vpack.c.bf16 %v2436_v41, %v2436_v41  ;;  %v2469_v29 = vpack.c.bf16 %v2437_v31, %v2437_v31 }
 0x387   : > { %2496 = vst.msk [vmem:[%s4233_s25 + $0x64] sm:$0xf] %vm2470_vm5, %v2463_v60 }
 0x388   : > { %2497 = vst.msk [vmem:[%s4233_s25 + $0x68] sm:$0xf] %vm2470_vm5, %v2464_v6 }
 0x389   : > { %2498 = vst.msk [vmem:[%s4233_s25 + $0x6c] sm:$0xf] %vm2470_vm5, %v2465_v54 }
 0x38a   : > { %2499 = vst.msk [vmem:[%s4233_s25 + $0x70] sm:$0xf] %vm2470_vm5, %v2466_v37 }
 0x38b   : > { %2500 = vst.msk [vmem:[%s4233_s25 + $0x74] sm:$0xf] %vm2470_vm5, %v2467_v2 }
 0x38c   : > { %2501 = vst.msk [vmem:[%s4233_s25 + $0x78] sm:$0xf] %vm2470_vm5, %v2468_v12 }
 0x38d   : > { %2502 = vst.msk [vmem:[%s4233_s25 + $0x7c] sm:$0xf] %vm2470_vm5, %v2469_v29 }
 0x38e PF: > { %s14_s17 = sadd.s32 1, %s2922_s17   ;;  %s4531_s15 = smov %s2918_s16 }
 0x38f   : > { %p11_p5 = scmp.ge.s32.totalorder %s14_s17, 4   ;;  %s4532_s16 = smov %s4534_s18 }
 0x391   :  { %13 = sbr.rel (!%p11_p5) target bundleno = 2 (0x2), region = 83 }

// kernel: _lambda_.10
= control target key start
LH: loop header
LB: loop body
LE: loop exit
PB: predicated region body
PF: predicated region fallthrough
CT: control target
= control target key end

     0   :  { %s1363_s24 = smov 0   ;;  %s1365_s25 = smov 0   ;;  %s1516_s0 = inlined_call_operand.vmem [shape: bf16[2,5,5,16], index: 0, kind: input, shape index: {}]   ;;  %s1517_s1 = inlined_call_operand.vmem [shape: bf16[2,5,5,16], index: 1, kind: input, shape index: {}]   ;;  %s1518_s2 = inlined_call_operand.vmem [shape: bf16[2,5,5,16], index: 2, kind: input, shape index: {}]   ;;  %s1519_s3 = inlined_call_operand.vmem [shape: bf16[2,5,5,16], index: 3, kind: input, shape index: {}]   ;;  %s1520_s4 = inlined_call_operand.vmem [shape: bf16[9,16,32], index: 4, kind: input, shape index: {}]   ;;  %s1521_s5 = inlined_call_operand.vmem [shape: f32[1,32], index: 5, kind: input, shape index: {}]   ;;  %s1522_s6 = inlined_call_operand.vmem [shape: f32[1,32], index: 6, kind: input, shape index: {}]   ;;  %s1523_s7 = inlined_call_operand.vmem [shape: bf16[2,4,4,32], index: 7, kind: output, shape index: {}]  }
   0x1   :  { %s1367_s26 = smov 0  }
   0x2 LB: > { %s29_s27 = sadd.s32 1, %s1316_s25  ;;  %p1187_p0 = scmp.ge.s32.totalorder %s1320_s26, 1  ;;  %s1320_s26 = sphi %s1367_s26, %s17_s26   ;;  %s1316_s25 = sphi %s1365_s25, %s1529_s25   ;;  %s1312_s24 = sphi %s1363_s24, %s1528_s24  }
   0x3   : > { %p31_p1 = scmp.ge.s32.totalorder %s29_s27, 2  ;;  %p306_p2 = scmp.lt.s32.totalorder %s1320_s26, 3 }
   0x5   : > { %s1531_s27 = smov (%p31_p1, %s29_s27), 0  ;;  %p307_p3 = pnand %p1187_p0, %p306_p2 }
   0x6   : > { %p366_p4 = scmp.lt.s32.totalorder (!%p307_p3), %s1312_s24, 1 }
   0x7   : > { %310 = sbr.rel (%p307_p3) target bundleno = 327 (0x147), region = 48 }
   0xc   : > { %v1259_v0 = vld [vmem:[%s1520_s4 + $0x30] sm:$0xff]  ;;  %s1533_s24 = smov (!%p366_p4, %s1312_s24), 1  ;;  %vm504_vm0 = vcmask 1041408   ;;  %vm507_vm1 = vcmask 1043458   ;;  %vm446_vm2 = vcmask 130048   ;;  %v1258_v14 = vld [vmem:[%s1520_s4] sm:$0xff] }
   0xd   : > { %v1260_v1 = vld [vmem:[%s1520_s4 + $0x10] sm:$0xff]  ;;  %456 = vmatpush.bf16.msra.mxu0 %v1259_v0  ;;  %s1390_s9 = smul.u32 20, %s1533_s24  ;;  %v1261_v15 = vld [vmem:[%s1520_s4 + $0x40] sm:$0xff]  ;;  %vm531_vm3 = vsmask.f32 1280  ;;  %487 = vmatpush.bf16.msra.mxu1 %v1258_v14  ;;  %v1262_v48 = vld [vmem:[%s1520_s4 + $0x8] sm:$0xff] }
   0xe   : > { %633 = vmatpush.bf16.msra.mxu2 %v1260_v1  ;;  %vm532_vm4 = vsmask.f32 3336  ;;  %vm534_vm5 = vsmask.f32 5392  ;;  %669 = vmatpush.bf16.msra.mxu3 %v1261_v15  ;;  %vm536_vm8 = vsmask.f32 7448 }
   0xf   : > { %s370_s12 = scalar_lea.vmem %s1516_s0, %s1390_s9  ;;  %vm1416_vm6 = vmor %vm531_vm3, %vm532_vm4  ;;  %s375_s8 = scalar_lea.vmem %s1517_s1, %s1390_s9  ;;  %vm950_vm10 = vcmask 261120  }
  0x10   : > { %v406_v2 = vld [vmem:[%s370_s12 + $0x4] sm:$0x7]  ;;  %v407_v3 = vld [vmem:[%s370_s12 + $0x8] sm:$0x7]  ;;  %v408_v4 = vld [vmem:[%s370_s12 + $0xc] sm:$0x7]  ;;  %s385_s17 = scalar_lea.vmem %s1519_s3, %s1390_s9 }
  0x11   : > { %v1396_v5 = vld [vmem:[%s370_s12 + $0x10] sm:$0x7]  ;;  %429 = vst [vmem:[#allocation1] ss:$4 sm:$0xff] %v406_v2  ;;  %v405_v6 = vld [vmem:[%s370_s12] sm:$0x7]  ;;  %vm535_vm7 = vmor %vm1416_vm6, %vm534_vm5  ;;  %708 = vmatpush.bf16.msrb.mxu0 %v1262_v48  ;;  %s380_s12 = scalar_lea.vmem %s1518_s2, %s1390_s9 }
  0x12   : > { %432 = vst [vmem:[#allocation1 + $0x1] ss:$4 sm:$0xff] %v407_v3  ;;  %v499_v7 = vrot.slane %v405_v6, 2  ;;  %v500_v8 = vrot.slane %v406_v2, 2  ;;  %v501_v9 = vrot.slane %v407_v3, 2  ;;  %v502_v10 = vrot.slane %v408_v4, 2  ;;  %vm1429_vm9 = vmor %vm535_vm7, %vm536_vm8 }
  0x13   : > { %435 = vst [vmem:[#allocation1 + $0x2] ss:$4 sm:$0xff] %v408_v4  ;;  %v503_v20 = vrot.slane %v1396_v5, 2  ;;  %s1257_s21 = sshll.u32 %s1533_s24, 3 }
  0x14   : > { %438 = vst [vmem:[#allocation1 + $0x3] ss:$4 sm:$0xff] %v1396_v5  ;;  %v506_v11 = vsel %vm504_vm0, %v405_v6, %v499_v7  ;;  %v508_v12 = vsel %vm507_vm1, %v405_v6, %v499_v7  ;;  %v512_v13 = vsel %vm504_vm0, %v406_v2, %v500_v8  ;;  %v517_v16 = vsel %vm504_vm0, %v407_v3, %v501_v9  ;;  %s403_s28 = scalar_lea.vmem %s1523_s7, %s1257_s21 }
  0x15   : > { %v510_v17 = vrot.slane %v508_v12, 2  ;;  %v513_v18 = vsel %vm507_vm1, %v406_v2, %v500_v8  ;;  %v538_v19 = vshrl.u32 %v506_v11, 16  ;;  %v518_v21 = vsel %vm507_vm1, %v407_v3, %v501_v9  ;;  %v1263_v12 = vld [vmem:[%s1520_s4 + $0x38] sm:$0xff] }
  0x16   : > { %v523_v22 = vsel %vm507_vm1, %v408_v4, %v502_v10  ;;  %v541_v23 = vshll.u32 %v506_v11, 16  ;;  %v551_v24 = vshrl.u32 %v512_v13, 16  ;;  %v522_v25 = vsel %vm504_vm0, %v408_v4, %v502_v10  ;;  %744 = vmatpush.bf16.msrb.mxu1 %v1263_v12 }
  0x17   : > { %v540_v26 = vrot.slane %v538_v19, 6  ;;  %v554_v27 = vshll.u32 %v512_v13, 16  ;;  %v564_v28 = vshrl.u32 %v517_v16, 16  ;;  %v515_v29 = vrot.slane %v513_v18, 2  ;;  %v1264_v13 = vld [vmem:[%s1520_s4 + $0x18] sm:$0xff]  ;;  %v1265_v18 = vld [vmem:[%s1520_s4 + $0x28] sm:$0xff] }
  0x18   : > { %v543_v30 = vrot.slane %v541_v23, 7  ;;  %v553_v31 = vrot.slane %v551_v24, 6  ;;  %v567_v32 = vshll.u32 %v517_v16, 16  ;;  %v520_v33 = vrot.slane %v518_v21, 2  ;;  %783 = vmatpush.bf16.msrb.mxu2 %v1264_v13  ;;  %902 = vmatpush.bf16.msrb.mxu3 %v1265_v18  ;;  %v410_v19 = vld [vmem:[%s375_s8] sm:$0x7] }
  0x19   : > { %v525_v34 = vrot.slane %v523_v22, 2  ;;  %v556_v35 = vrot.slane %v554_v27, 7  ;;  %v566_v36 = vrot.slane %v564_v28, 6  ;;  %v577_v40 = vshrl.u32 %v522_v25, 16  ;;  %v412_v22 = vld [vmem:[%s375_s8 + $0x8] sm:$0x7] }
  0x1a   : > { %v569_v39 = vrot.slane %v567_v32, 7  ;;  %v580_v41 = vshll.u32 %v522_v25, 16  ;;  %v544_v42 = vor.u32 %v543_v30, %v540_v26  ;;  %v547_v43 = vshll.u32 %v510_v17, 16  ;;  %v413_v23 = vld [vmem:[%s375_s8 + $0xc] sm:$0x7]  ;;  %v1266_v24 = vld [vmem:[%s1520_s4 + $0x20] sm:$0xff] }
  0x1b   : > { %v439_v37 = vld.sshfl [vmem:[#allocation1] sm:$0xff pattern:$0x73625140]  ;;  %v557_v44 = vor.u32 %v556_v35, %v553_v31  ;;  %v560_v45 = vshll.u32 %v515_v29, 16  ;;  %v579_v46 = vrot.slane %v577_v40, 6  ;;  %v573_v50 = vshll.u32 %v520_v33, 16 }
  0x1c   : > { %1200 = vmatmul.msk.bf16.vlgmr.msra.gmra.mxu0 %vm446_vm2, %v439_v37  ;;  %466 = vst [vmem:[#allocation1 + $0x1] ss:$4 sm:$0xff] %v406_v2  ;;  %v582_v47 = vrot.slane %v580_v41, 7  ;;  %v570_v49 = vor.u32 %v569_v39, %v566_v36  ;;  %v586_v52 = vshll.u32 %v525_v34, 16  ;;  %v527_v53 = vsel %vm504_vm0, %v1396_v5, %v503_v20  ;;  %v415_v25 = vld [vmem:[%s380_s12] sm:$0x7] }
  0x1d   : > { %468 = vst [vmem:[#allocation1 + $0x2] ss:$4 sm:$0xff] %v407_v3  ;;  %v545_v54 = vrot.slane %v544_v42, 2  ;;  %v549_v55 = vrot.slane %v547_v43, 7  ;;  %v558_v57 = vrot.slane %v557_v44, 2  ;;  %v562_v58 = vrot.slane %v560_v45, 7  ;;  %941 = vmatpush.bf16.msra.mxu0 %v1266_v24 }
  0x1e   : > { %470 = vst [vmem:[#allocation1 + $0x3] ss:$4 sm:$0xff] %v408_v4  ;;  %v583_v51 = vor.u32 %v582_v47, %v579_v46  ;;  %v571_v59 = vrot.slane %v570_v49, 2  ;;  %v575_v60 = vrot.slane %v573_v50, 7  ;;  %v590_v61 = vshrl.u32 %v527_v53, 16 }
  0x1f   : > { %464 = vst [vmem:[#allocation1] ss:$4 sm:$0xff] %v405_v6  ;;  %v593_v62 = vshll.u32 %v527_v53, 16  ;;  %v588_v0 = vrot.slane %v586_v52, 7  ;;  %v528_v1 = vsel %vm507_vm1, %v1396_v5, %v503_v20  ;;  %v550_v2 = vsel %vm1429_vm9, %v545_v54, %v549_v55  ;;  %v411_v20 = vld [vmem:[%s375_s8 + $0x4] sm:$0x7] }
  0x20   : > { %v584_v63 = vrot.slane %v583_v51, 2  ;;  %v563_v3 = vsel %vm1429_vm9, %v558_v57, %v562_v58  ;;  %v576_v6 = vsel %vm1429_vm9, %v571_v59, %v575_v60  ;;  %v530_v7 = vrot.slane %v528_v1, 2  ;;  %v416_v26 = vld [vmem:[%s380_s12 + $0x4] sm:$0x7]  ;;  %v417_v27 = vld [vmem:[%s380_s12 + $0x8] sm:$0x7] }
  0x21   : > { %v592_v8 = vrot.slane %v590_v61, 6  ;;  %v595_v9 = vrot.slane %v593_v62, 7  ;;  %v418_v28 = vld [vmem:[%s380_s12 + $0xc] sm:$0x7]  ;;  %v796_v29 = vrot.slane %v415_v25, 2  ;;  %v797_v30 = vrot.slane %v416_v26, 2 }
  0x22   : > { %v589_v10 = vsel %vm1429_vm9, %v584_v63, %v588_v0  ;;  %v599_v11 = vshll.u32 %v530_v7, 16  ;;  %v798_v31 = vrot.slane %v417_v27, 2  ;;  %v799_v33 = vrot.slane %v418_v28, 2  ;;  %v414_v34 = vld [vmem:[%s375_s8 + $0x10] sm:$0x7] }
  0x23   : > { %v596_v5 = vor.u32 %v595_v9, %v592_v8  ;;  %v801_v35 = vsel %vm504_vm0, %v415_v25, %v796_v29  ;;  %v806_v36 = vsel %vm504_vm0, %v416_v26, %v797_v30  ;;  %v802_v41 = vsel %vm507_vm1, %v415_v25, %v796_v29  ;;  %v421_v24 = vld [vmem:[%s385_s17 + $0x8] sm:$0x7] }
  0x24   : > { %v601_v15 = vrot.slane %v599_v11, 7  ;;  %v811_v37 = vsel %vm504_vm0, %v417_v27, %v798_v31  ;;  %v816_v38 = vsel %vm504_vm0, %v418_v28, %v799_v33  ;;  %v820_v39 = vshrl.u32 %v801_v35, 16 }
  0x25   : > { %v597_v14 = vrot.slane %v596_v5, 2  ;;  %v823_v40 = vshll.u32 %v801_v35, 16  ;;  %v833_v42 = vshrl.u32 %v806_v36, 16  ;;  %v836_v43 = vshll.u32 %v806_v36, 16 }
  0x26   : > { %v471_v4 = vld.sshfl [vmem:[#allocation1] sm:$0xff pattern:$0x73625140]  ;;  %v807_v44 = vsel %vm507_vm1, %v416_v26, %v797_v30  ;;  %v846_v45 = vshrl.u32 %v811_v37, 16  ;;  %v849_v46 = vshll.u32 %v811_v37, 16  ;;  %v812_v47 = vsel %vm507_vm1, %v417_v27, %v798_v31 }
  0x27   : > { %607 = vst [vmem:[#allocation1] ss:$4 sm:$0xff] %v550_v2  ;;  %1205 = vmatmul.msk.bf16.vlgmr.msra.gmra.mxu1 %vm446_vm2, %v471_v4  ;;  %v602_v17 = vsel %vm1429_vm9, %v597_v14, %v601_v15  ;;  %v859_v48 = vshrl.u32 %v816_v38, 16  ;;  %v862_v49 = vshll.u32 %v816_v38, 16  ;;  %v804_v50 = vrot.slane %v802_v41, 2 }
  0x28   : > { %610 = vst [vmem:[#allocation1 + $0x1] ss:$4 sm:$0xff] %v563_v3  ;;  %v817_v51 = vsel %vm507_vm1, %v418_v28, %v799_v33  ;;  %v822_v52 = vrot.slane %v820_v39, 6  ;;  %v825_v53 = vrot.slane %v823_v40, 7  ;;  %v809_v54 = vrot.slane %v807_v44, 2 }
  0x29   : > { %613 = vst [vmem:[#allocation1 + $0x2] ss:$4 sm:$0xff] %v576_v6  ;;  %v835_v55 = vrot.slane %v833_v42, 6  ;;  %v838_v57 = vrot.slane %v836_v43, 7  ;;  %v814_v58 = vrot.slane %v812_v47, 2  ;;  %v848_v59 = vrot.slane %v846_v45, 6 }
  0x2a   : > { %616 = vst [vmem:[#allocation1 + $0x3] ss:$4 sm:$0xff] %v589_v10  ;;  %v851_v60 = vrot.slane %v849_v46, 7  ;;  %v819_v62 = vrot.slane %v817_v51, 2  ;;  %v861_v63 = vrot.slane %v859_v48, 6  ;;  %v864_v0 = vrot.slane %v862_v49, 7 }
  0x2b   : > { %v826_v1 = vor.u32 %v825_v53, %v822_v52  ;;  %v829_v2 = vshll.u32 %v804_v50, 16  ;;  %v842_v4 = vshll.u32 %v809_v54, 16  ;;  %v855_v7 = vshll.u32 %v814_v58, 16 }
  0x2c   : > { %v865_v8 = vor.u32 %v864_v0, %v861_v63  ;;  %v868_v9 = vshll.u32 %v819_v62, 16  ;;  %v1322_v48 = vmov 16.0   ;;  %vm1022_vm1 = vcmask 254976  }
  0x2d   : > { %v831_v5 = vrot.slane %v829_v2, 7  ;;  %v844_v12 = vrot.slane %v842_v4, 7  ;;  %v857_v14 = vrot.slane %v855_v7, 7  ;;  %1294 = vrcp.f32 %v1322_v48 }
  0x2e   : > { %v866_v15 = vrot.slane %v865_v8, 2 }
  0x31   : > { %v617_v16 = vld.sshfl [vmem:[#allocation1] sm:$0xff pattern:$0x73625140] }
  0x32   : > { %1212 = vmatmul.msk.bf16.vlgmr.msra.gmra.mxu2 %vm446_vm2, %v617_v16  ;;  %645 = vst [vmem:[#allocation1] ss:$4 sm:$0xff] %v563_v3  ;;  %v839_v3 = vor.u32 %v838_v57, %v835_v55  ;;  %v870_v16 = vrot.slane %v868_v9, 7 }
  0x33   : > { %647 = vst [vmem:[#allocation1 + $0x1] ss:$4 sm:$0xff] %v576_v6  ;;  %v852_v6 = vor.u32 %v851_v60, %v848_v59  ;;  %v1295_v59 = vpop.eup %1294 }
  0x34   : > { %649 = vst [vmem:[#allocation1 + $0x2] ss:$4 sm:$0xff] %v589_v10  ;;  %v827_v10 = vrot.slane %v826_v1, 2  ;;  %v840_v11 = vrot.slane %v839_v3, 2  ;;  %v961_v62 = vmul.f32 16.0, %v1295_v59  ;;  %vm965_vm11 = vweird.f32 %v1295_v59 }
  0x35   : > { %652 = vst [vmem:[#allocation1 + $0x3] ss:$4 sm:$0xff] %v602_v17  ;;  %v853_v13 = vrot.slane %v852_v6, 2 }
  0x36   : > { %v832_v17 = vsel %vm1429_vm9, %v827_v10, %v831_v5  ;;  %v845_v18 = vsel %vm1429_vm9, %v840_v11, %v844_v12  ;;  %v962_v3 = vsub.f32 1.0, %v961_v62 }
  0x38   : > { %v963_v7 = vmul.f32 %v1295_v59, %v962_v3 }
  0x3a   : > { %v964_v10 = vadd.f32 %v1295_v59, %v963_v7 }
  0x3c   : > { %v653_v21 = vld.sshfl [vmem:[#allocation1] sm:$0xff pattern:$0x73625140]  ;;  %v966_v12 = vsel %vm965_vm11, %v1295_v59, %v964_v10 }
  0x3d   : > { %1219 = vmatmul.msk.bf16.vlgmr.msra.gmra.mxu3 %vm446_vm2, %v653_v21  ;;  %682 = vst [vmem:[#allocation1] ss:$4 sm:$0xff] %v410_v19  ;;  %v871_v21 = vsel %vm1429_vm9, %v866_v15, %v870_v16 }
  0x3e   : > { %685 = vst [vmem:[#allocation1 + $0x1] ss:$4 sm:$0xff] %v411_v20 }
  0x3f   : > { %688 = vst [vmem:[#allocation1 + $0x2] ss:$4 sm:$0xff] %v412_v22 }
  0x40   : > { %691 = vst [vmem:[#allocation1 + $0x3] ss:$4 sm:$0xff] %v413_v23 }
  0x47   : > { %v692_v32 = vld.sshfl [vmem:[#allocation1] sm:$0xff pattern:$0x73625140] }
  0x48   : > { %1226 = vmatmul.msk.bf16.vlgmr.msrb.gmra.mxu0 %vm446_vm2, %v692_v32  ;;  %720 = vst [vmem:[#allocation1] ss:$4 sm:$0xff] %v411_v20  ;;  %v858_v20 = vsel %vm1429_vm9, %v853_v13, %v857_v14 }
  0x49   : > { %722 = vst [vmem:[#allocation1 + $0x1] ss:$4 sm:$0xff] %v412_v22  ;;  %v419_v22 = vld [vmem:[%s385_s17] sm:$0x7] }
  0x4a   : > { %724 = vst [vmem:[#allocation1 + $0x2] ss:$4 sm:$0xff] %v413_v23  ;;  %v420_v23 = vld [vmem:[%s385_s17 + $0x4] sm:$0x7] }
  0x4b   : > { %727 = vst [vmem:[#allocation1 + $0x3] ss:$4 sm:$0xff] %v414_v34 }
  0x52   : > { %v728_v61 = vld.sshfl [vmem:[#allocation1] sm:$0xff pattern:$0x73625140] }
  0x53   : > { %1233 = vmatmul.msk.bf16.vlgmr.msrb.gmra.mxu1 %vm446_vm2, %v728_v61  ;;  %757 = vst [vmem:[#allocation1] ss:$4 sm:$0xff] %v415_v25 }
  0x54   : > { %760 = vst [vmem:[#allocation1 + $0x1] ss:$4 sm:$0xff] %v416_v26  ;;  %v422_v26 = vld [vmem:[%s385_s17 + $0xc] sm:$0x7] }
  0x55   : > { %763 = vst [vmem:[#allocation1 + $0x2] ss:$4 sm:$0xff] %v417_v27 }
  0x56   : > { %766 = vst [vmem:[#allocation1 + $0x3] ss:$4 sm:$0xff] %v418_v28 }
  0x5d   : > { %v767_v19 = vld.sshfl [vmem:[#allocation1] sm:$0xff pattern:$0x73625140] }
  0x5e   : > { %1240 = vmatmul.msk.bf16.vlgmr.msrb.gmra.mxu2 %vm446_vm2, %v767_v19  ;;  %876 = vst [vmem:[#allocation1] ss:$4 sm:$0xff] %v832_v17 }
  0x5f   : > { %879 = vst [vmem:[#allocation1 + $0x1] ss:$4 sm:$0xff] %v845_v18 }
  0x60   : > { %882 = vst [vmem:[#allocation1 + $0x2] ss:$4 sm:$0xff] %v858_v20 }
  0x61   : > { %885 = vst [vmem:[#allocation1 + $0x3] ss:$4 sm:$0xff] %v871_v21 }
  0x68   : > { %v886_v25 = vld.sshfl [vmem:[#allocation1] sm:$0xff pattern:$0x73625140] }
  0x69   : > { %1247 = vmatmul.msk.bf16.vlgmr.msrb.gmra.mxu3 %vm446_vm2, %v886_v25  ;;  %915 = vst [vmem:[#allocation1] ss:$4 sm:$0xff] %v419_v22 }
  0x6a   : > { %918 = vst [vmem:[#allocation1 + $0x1] ss:$4 sm:$0xff] %v420_v23 }
  0x6b   : > { %921 = vst [vmem:[#allocation1 + $0x2] ss:$4 sm:$0xff] %v421_v24 }
  0x6c   : > { %924 = vst [vmem:[#allocation1 + $0x3] ss:$4 sm:$0xff] %v422_v26 }
  0x73   : > { %v925_v56 = vld.sshfl [vmem:[#allocation1] sm:$0xff pattern:$0x73625140] }
  0x74   : > { %1254 = vmatmul.msk.bf16.vlgmr.msra.gmra.mxu0 %vm446_vm2, %v925_v56 }
  0x99   : > { %v458_v27 = vpop.f32.mrf.mxu0 }
  0xa1   : > { %v460_v29 = vpop.f32.mrf.mxu0 }
  0xa4   : > { %v489_v28 = vpop.f32.mrf.mxu1 }
  0xa5   : > { %v490_v35 = vadd.f32 %v489_v28, %v458_v27 }
  0xac   : > { %v491_v32 = vpop.f32.mrf.mxu1 }
  0xad   : > { %v492_v39 = vadd.f32 %v491_v32, %v460_v29 }
  0xb5   : > { %v635_v30 = vpop.f32.mrf.mxu2 }
  0xb6   : > { %v640_v36 = vadd.f32 %v635_v30, %v490_v35 }
  0xbd   : > { %v637_v34 = vpop.f32.mrf.mxu2 }
  0xbe   : > { %v641_v43 = vadd.f32 %v637_v34, %v492_v39  ;;  %v982_v34 = vld [vmem:[%s1521_s5] sm:$0x1] }
  0xbf   : > { %v1293_v39 = vld [vmem:[%s1522_s6] ss:$0 sm:$0xff] }
  0xc0   : > { %v671_v31 = vpop.f32.mrf.mxu3 }
  0xc1   : > { %v676_v41 = vadd.f32 %v671_v31, %v640_v36 }
  0xc5   : > { %v710_v33 = vpop.f32.mrf.mxu0 }
  0xc6   : > { %v715_v44 = vadd.f32 %v710_v33, %v676_v41 }
  0xc8   : > { %v673_v37 = vpop.f32.mrf.mxu3 }
  0xc9   : > { %v677_v45 = vadd.f32 %v673_v37, %v641_v43 }
  0xcd   : > { %v712_v42 = vpop.f32.mrf.mxu0 }
  0xce   : > { %v716_v49 = vadd.f32 %v712_v42, %v677_v45 }
  0xd0   : > { %v746_v38 = vpop.f32.mrf.mxu1 }
  0xd1   : > { %v751_v50 = vadd.f32 %v746_v38, %v715_v44 }
  0xd8   : > { %v748_v47 = vpop.f32.mrf.mxu1 }
  0xd9   : > { %v752_v53 = vadd.f32 %v748_v47, %v716_v49 }
  0xe1   : > { %v785_v40 = vpop.f32.mrf.mxu2 }
  0xe2   : > { %v790_v54 = vadd.f32 %v785_v40, %v751_v50 }
  0xe9   : > { %v787_v51 = vpop.f32.mrf.mxu2 }
  0xea   : > { %v791_v55 = vadd.f32 %v787_v51, %v752_v53 }
  0xec   : > { %v904_v46 = vpop.f32.mrf.mxu3 }
  0xed   : > { %v909_v57 = vadd.f32 %v904_v46, %v790_v54 }
  0xf1   : > { %v943_v52 = vpop.f32.mrf.mxu0 }
  0xf2   : > { %v948_v61 = vadd.f32 %v943_v52, %v909_v57 }
  0xf4   : > { %v906_v58 = vpop.f32.mrf.mxu3  ;;  %v951_v1 = vsel %vm950_vm10, %v948_v61, 0.0 }
  0xf5   : > { %v910_v60 = vadd.f32 %v906_v58, %v791_v55 }
  0xf9   : > { %v945_v63 = vpop.f32.mrf.mxu0 }
  0xfa   : > { %v949_v0 = vadd.f32 %v945_v63, %v910_v60 }
  0xfc   : > { %v952_v2 = vsel %vm950_vm10, %v949_v0, 0.0 }
  0xfd   : > { %v953_v4 = vadd.f32 %v952_v2, %v951_v1 }
  0xff   : > { %v954_v6 = vrot.slane %v953_v4, 4 }
 0x101   : > { %v955_v8 = vadd.f32 %v954_v6, %v953_v4 }
 0x103   : > { %v956_v9 = vrot.slane %v955_v8, 2 }
 0x105   : > { %v957_v5 = vadd.f32 %v956_v9, %v955_v8 }
 0x107   : > { %v958_v11 = vrot.slane %v957_v5, 1 }
 0x109   : > { %v959_v13 = vadd.f32 %v958_v11, %v957_v5 }
 0x10b   : > { %v967_v14 = vmul.f32 %v966_v12, %v959_v13 }
 0x10d   : > { %v968_v15 = vsub.f32 %v948_v61, %v967_v14  ;;  %v969_v16 = vsub.f32 %v949_v0, %v967_v14 }
 0x10f   : > { %v970_v17 = vmul.f32 %v968_v15, %v968_v15  ;;  %v971_v18 = vmul.f32 %v969_v16, %v969_v16 }
 0x111   : > { %v972_v19 = vsel %vm950_vm10, %v970_v17, 0.0  ;;  %v973_v20 = vsel %vm950_vm10, %v971_v18, 0.0 }
 0x112   : > { %v974_v21 = vadd.f32 %v973_v20, %v972_v19 }
 0x114   : > { %v975_v22 = vrot.slane %v974_v21, 4 }
 0x116   : > { %v976_v23 = vadd.f32 %v975_v22, %v974_v21 }
 0x118   : > { %v977_v24 = vrot.slane %v976_v23, 2 }
 0x11a   : > { %v978_v25 = vadd.f32 %v977_v24, %v976_v23 }
 0x11c   : > { %v979_v26 = vrot.slane %v978_v25, 1 }
 0x11e   : > { %v980_v56 = vadd.f32 %v979_v26, %v978_v25 }
 0x120   : > { %v981_v27 = vmul.f32 %v980_v56, %v966_v12 }
 0x122   : > { %v983_v28 = vadd.f32 1e-05, %v981_v27 }
 0x124   : > { %1296 = vrsqrt.f32 %v983_v28  ;;  %vm990_vm13 = vweird.f32 %v983_v28 }
 0x12a   : > { %v1297_v29 = vpop.eup %1296 }
 0x12b   : > { %v985_v30 = vmul.f32 %v1297_v29, %v983_v28  ;;  %vm991_vm12 = vweird.f32 %v1297_v29 }
 0x12c   : > { %vm992_vm14 = vmor %vm990_vm13, %vm991_vm12 }
 0x12d   : > { %v986_v31 = vmul.f32 %v1297_v29, %v985_v30 }
 0x12f   : > { %v987_v32 = vmul.f32 0.5, %v986_v31 }
 0x131   : > { %v988_v33 = vsub.f32 1.5, %v987_v32 }
 0x133   : > { %v989_v35 = vmul.f32 %v1297_v29, %v988_v33 }
 0x135   : > { %v993_v36 = vsel %vm992_vm14, %v1297_v29, %v989_v35 }
 0x136   : > { %v994_v37 = vmul.f32 %v993_v36, %v982_v34 }
 0x138   : > { %v996_v38 = vperm.slane %v994_v37, 0 }
 0x13a   : > { %v998_v40 = vmul.f32 %v996_v38, %v968_v15  ;;  %v999_v41 = vmul.f32 %v996_v38, %v969_v16 }
 0x13c   : > { %v1004_v42 = vadd.f32 %v1293_v39, %v998_v40  ;;  %v1005_v43 = vadd.f32 %v1293_v39, %v999_v41 }
 0x13e   : > { %vm1006_vm15 = vcmp.gt.f32.partialorder %v1004_v42, 0.0  ;;  %vm1007_vm0 = vcmp.gt.f32.partialorder %v1005_v43, 0.0  ;;  %v1008_v44 = vmul.f32 0.01, %v1004_v42  ;;  %v1009_v45 = vmul.f32 0.01, %v1005_v43 }
 0x140   : > { %v1010_v46 = vsel %vm1006_vm15, %v1004_v42, %v1008_v44  ;;  %v1011_v47 = vsel %vm1007_vm0, %v1005_v43, %v1009_v45 }
 0x141   : > { %v1014_v48 = vrot.slane %v1010_v46, 4  ;;  %v1015_v49 = vrot.slane %v1011_v47, 4  ;;  %v1018_v50 = vpack.c.bf16 %v1010_v46, %v1010_v46  ;;  %v1020_v51 = vpack.c.bf16 %v1011_v47, %v1011_v47 }
 0x143   : > { %v1019_v52 = vpack.c.bf16 %v1014_v48, %v1014_v48  ;;  %v1021_v53 = vpack.c.bf16 %v1015_v49, %v1015_v49  ;;  %1023 = vst.msk [vmem:[%s403_s28] sm:$0x3] %vm1022_vm1, %v1018_v50 }
 0x144   : > { %1025 = vst.msk [vmem:[%s403_s28 + $0x4] sm:$0x3] %vm1022_vm1, %v1020_v51 }
 0x145   : > { %1024 = vst.msk [vmem:[%s403_s28 + $0x2] sm:$0x3] %vm1022_vm1, %v1019_v52 }
 0x146   : > { %1026 = vst.msk [vmem:[%s403_s28 + $0x6] sm:$0x3] %vm1022_vm1, %v1021_v53 }
 0x147 PF: > { %s17_s26 = sadd.s32 1, %s1320_s26   ;;  %s1528_s24 = smov %s1316_s25 }
 0x148   : > { %p14_p5 = scmp.ge.s32.totalorder %s17_s26, 4   ;;  %s1529_s25 = smov %s1531_s27 }
 0x14a   :  { %16 = sbr.rel (!%p14_p5) target bundleno = 2 (0x2), region = 131 }

// kernel: _lambda_.11
= control target key start
LH: loop header
LB: loop body
LE: loop exit
PB: predicated region body
PF: predicated region fallthrough
CT: control target
= control target key end

     0   :  { %s1256_s15 = smov 0   ;;  %s1258_s16 = smov 0   ;;  %s1474_s0 = inlined_call_operand.vmem [shape: bf16[2,4,4,32], index: 0, kind: input, shape index: {}]   ;;  %s1475_s1 = inlined_call_operand.vmem [shape: bf16[9,32,32], index: 1, kind: input, shape index: {}]   ;;  %s1476_s2 = inlined_call_operand.vmem [shape: f32[1,32], index: 2, kind: input, shape index: {}]   ;;  %s1477_s3 = inlined_call_operand.vmem [shape: f32[1,32], index: 3, kind: input, shape index: {}]   ;;  %s1478_s4 = inlined_call_operand.vmem [shape: bf16[2,4,4,32], index: 4, kind: output, shape index: {}]  }
   0x1   :  { %s1260_s17 = smov 0  }
   0x2 LB: > { %s26_s18 = sadd.s32 1, %s1223_s16  ;;  %p1029_p0 = scmp.ge.s32.totalorder %s1227_s17, 1  ;;  %s1227_s17 = sphi %s1260_s17, %s14_s17   ;;  %s1223_s16 = sphi %s1258_s16, %s1488_s16   ;;  %s1219_s15 = sphi %s1256_s15, %s1487_s15  }
   0x3   : > { %p28_p1 = scmp.ge.s32.totalorder %s26_s18, 2  ;;  %p201_p2 = scmp.lt.s32.totalorder %s1227_s17, 3 }
   0x5   : > { %s1490_s18 = smov (%p28_p1, %s26_s18), 0  ;;  %p202_p3 = pnand %p1029_p0, %p201_p2 }
   0x6   : > { %p240_p4 = scmp.lt.s32.totalorder (!%p202_p3), %s1219_s15, 1 }
   0x7   : > { %205 = sbr.rel (%p202_p3) target bundleno = 348 (0x15c), region = 36 }
   0xc   : > { %v1159_v0 = vld [vmem:[%s1475_s1 + $0x38] sm:$0xff]  ;;  %v1161_v1 = vld [vmem:[%s1475_s1 + $0x68] sm:$0xff]  ;;  %v1158_v2 = vld [vmem:[%s1475_s1 + $0x30] sm:$0xff]  ;;  %s1492_s15 = smov (!%p240_p4, %s1219_s15), 1  ;;  %vm310_vm0 = vsmask.f32 256 }
   0xd   : > { %365 = vmatpush.bf16.msra.mxu0 %v1159_v0  ;;  %443 = vmatpush.bf16.msra.mxu2 %v1161_v1  ;;  %s1154_s25 = sshll.u32 %s1492_s15, 3  ;;  %v1157_v5 = vld [vmem:[%s1475_s1 + $0x8] sm:$0xff]  ;;  %v1160_v6 = vld [vmem:[%s1475_s1 + $0x60] sm:$0xff]  ;;  %v1163_v7 = vld [vmem:[%s1475_s1 + $0x18] sm:$0xff]  ;;  %vm309_vm1 = vcmask 1040384   ;;  %vm316_vm3 = vcmask 1042432  }
   0xe   : > { %s244_s28 = scalar_lea.vmem %s1474_s0, %s1154_s25  ;;  %402 = vmatpush.bf16.msra.mxu1 %v1157_v5  ;;  %572 = vmatpush.bf16.msra.mxu3 %v1163_v7  ;;  %vm317_vm2 = vsmask.f32 2304  ;;  %vm1302_vm4 = vmand %vm309_vm1, %vm310_vm0  ;;  %v1156_v39 = vld [vmem:[%s1475_s1] sm:$0xff]  ;;  %v1162_v40 = vld [vmem:[%s1475_s1 + $0x10] sm:$0xff]  ;;  %vm356_vm6 = vcmask 261120   ;;  %v1229_v44 = vmov 0   ;;  %s262_s22 = scalar_lea.vmem %s1478_s4, %s1154_s25 }
   0xf   : > { %v264_v3 = vld [vmem:[%s244_s28] sm:$0x3]  ;;  %v265_v4 = vld [vmem:[%s244_s28 + $0x2] sm:$0x3]  ;;  %v266_v8 = vld [vmem:[%s244_s28 + $0x4] sm:$0x3] }
  0x10   : > { %269 = vst [vmem:[#allocation1] ss:$4 sm:$0xff] %v264_v3  ;;  %v267_v9 = vld [vmem:[%s244_s28 + $0x6] sm:$0x3]  ;;  %vm1306_vm5 = vmand %vm316_vm3, %vm317_vm2  ;;  %v1165_v43 = vld [vmem:[%s1475_s1 + $0x48] sm:$0xff]  ;;  %v1358_v48 = vrot.slane %v1229_v44, 2 }
  0x11   : > { %366 = vmatpush.bf16.msra.mxu0 %v1158_v2  ;;  %273 = vst [vmem:[#allocation1 + $0x20] ss:$4 sm:$0xff] %v265_v4  ;;  %444 = vmatpush.bf16.msra.mxu2 %v1160_v6  ;;  %v1164_v47 = vld [vmem:[%s1475_s1 + $0x40] sm:$0xff]  ;;  %vm463_vm7 = vsmask.f32 1280  ;;  %v472_v54 = vrot.slane %v1229_v44, 6 }
  0x12   : > { %403 = vmatpush.bf16.msra.mxu1 %v1156_v39  ;;  %573 = vmatpush.bf16.msra.mxu3 %v1162_v40  ;;  %vm464_vm8 = vsmask.f32 3336  ;;  %v475_v55 = vrot.slane %v1229_v44, 7  ;;  %vm466_vm9 = vsmask.f32 5392  ;;  %v479_v2 = vshll.u32 %v1358_v48, 16 }
  0x13   : > { %vm465_vm10 = vmor %vm463_vm7, %vm464_vm8  ;;  %vm468_vm12 = vsmask.f32 7448  ;;  %v1166_v18 = vld [vmem:[%s1475_s1 + $0x70] sm:$0xff]  ;;  %vm669_vm14 = vcmask 1042434   ;;  %vm671_vm0 = vcmask 1044484   ;;  %vm673_vm3 = vcmask 1046534  }
  0x14   : > { %v476_v1 = vor.u32 %v475_v55, %v472_v54  ;;  %vm467_vm11 = vmor %vm465_vm10, %vm466_vm9  ;;  %v1170_v55 = vld [vmem:[%s1475_s1 + $0x50] sm:$0xff]  ;;  %vm900_vm10 = vcmask 254976  }
  0x15   : > { %616 = vmatpush.bf16.msrb.mxu0 %v1165_v43  ;;  %vm1385_vm13 = vmor %vm467_vm11, %vm468_vm12 }
  0x16   : > { %vm670_vm15 = vmor %vm309_vm1, %vm669_vm14 }
  0x17   : > { %v270_v10 = vld.sshfl [vmem:[#allocation1] sm:$0xff pattern:$0x73625140]  ;;  %vm672_vm2 = vmor %vm670_vm15, %vm671_vm0 }
  0x18   : > { %v274_v11 = vld.sshfl [vmem:[#allocation1 + $0x20] sm:$0xff pattern:$0x73625140]  ;;  %276 = vst [vmem:[#allocation1] ss:$4 sm:$0xff] %v266_v8  ;;  %v281_v12 = vshrl.u32 %v270_v10, 16 }
  0x19   : > { %279 = vst [vmem:[#allocation1 + $0x20] ss:$4 sm:$0xff] %v267_v9  ;;  %v284_v13 = vshll.u32 %v270_v10, 16  ;;  %v287_v14 = vshrl.u32 %v274_v11, 16  ;;  %v290_v15 = vshll.u32 %v274_v11, 16  ;;  %617 = vmatpush.bf16.msrb.mxu0 %v1164_v47  ;;  %v1167_v9 = vld [vmem:[%s1475_s1 + $0x78] sm:$0xff] }
  0x1a   : > { %v283_v16 = vrot.slane %v281_v12, 7  ;;  %v477_v10 = vrot.slane %v476_v1, 2  ;;  %v481_v11 = vrot.slane %v479_v2, 7  ;;  %659 = vmatpush.bf16.msrb.mxu1 %v1167_v9 }
  0x1b   : > { %v289_v17 = vrot.slane %v287_v14, 7  ;;  %v1169_v14 = vld [vmem:[%s1475_s1 + $0x28] sm:$0xff] }
  0x1c   : > { %v286_v19 = vor.u32 %v284_v13, %v283_v16  ;;  %732 = vmatpush.bf16.msrb.mxu2 %v1169_v14 }
  0x1d   : > { %v292_v21 = vor.u32 %v290_v15, %v289_v17 }
  0x1e   : > { %v312_v22 = vsel %vm1302_vm4, 0, %v286_v19  ;;  %660 = vmatpush.bf16.msrb.mxu1 %v1166_v18 }
  0x1f   : > { %v277_v23 = vld.sshfl [vmem:[#allocation1] sm:$0xff pattern:$0x73625140]  ;;  %v313_v24 = vsel %vm1302_vm4, 0, %v292_v21  ;;  %v1316_v25 = vsel %vm1306_vm5, %v312_v22, 0 }
  0x20   : > { %v280_v26 = vld.sshfl [vmem:[#allocation1 + $0x20] sm:$0xff pattern:$0x73625140]  ;;  %v293_v27 = vshrl.u32 %v277_v23, 16  ;;  %v296_v28 = vshll.u32 %v277_v23, 16  ;;  %v1320_v29 = vsel %vm1306_vm5, %v313_v24, 0  ;;  %v482_v23 = vsel %vm1385_vm13, %v477_v10, %v481_v11 }
  0x21   : > { %v299_v30 = vshrl.u32 %v280_v26, 16  ;;  %v302_v31 = vshll.u32 %v280_v26, 16  ;;  %333 = vst [vmem:[#allocation1] ss:$4 sm:$0xff] %v1316_v25  ;;  %v483_v45 = vshrl.u32 %v1316_v25, 16  ;;  %v486_v46 = vshll.u32 %v1316_v25, 16 }
  0x22   : > { %v295_v32 = vrot.slane %v293_v27, 7  ;;  %336 = vst [vmem:[#allocation1 + $0x1] ss:$4 sm:$0xff] %v1320_v29  ;;  %v459_v49 = vrot.slane %v1316_v25, 2  ;;  %v496_v50 = vshrl.u32 %v1320_v29, 16  ;;  %v499_v51 = vshll.u32 %v1320_v29, 16 }
  0x23   : > { %v301_v33 = vrot.slane %v299_v30, 7  ;;  %v485_v56 = vrot.slane %v483_v45, 6  ;;  %v488_v57 = vrot.slane %v486_v46, 7  ;;  %v460_v58 = vrot.slane %v1320_v29, 2 }
  0x24   : > { %v298_v34 = vor.u32 %v296_v28, %v295_v32  ;;  %v498_v59 = vrot.slane %v496_v50, 6  ;;  %v501_v60 = vrot.slane %v499_v51, 7  ;;  %v492_v4 = vshll.u32 %v459_v49, 16 }
  0x25   : > { %v304_v35 = vor.u32 %v302_v31, %v301_v33  ;;  %v489_v3 = vor.u32 %v488_v57, %v485_v56  ;;  %v505_v6 = vshll.u32 %v460_v58, 16  ;;  %v1109_v30 = vrot.slane %v1316_v25, 9  ;;  %v1173_v56 = vld [vmem:[%s1475_s1 + $0x88] sm:$0xff] }
  0x26   : > { %v314_v36 = vsel %vm1302_vm4, 0, %v298_v34  ;;  %v502_v5 = vor.u32 %v501_v60, %v498_v59  ;;  %v494_v13 = vrot.slane %v492_v4, 7  ;;  %v681_v34 = vrot.slane %v459_v49, 7  ;;  %v1172_v59 = vld [vmem:[%s1475_s1 + $0x80] sm:$0xff] }
  0x27   : > { %v315_v37 = vsel %vm1302_vm4, 0, %v304_v35  ;;  %v1330_v38 = vsel %vm1306_vm5, %v314_v36, 0  ;;  %v490_v12 = vrot.slane %v489_v3, 2  ;;  %v507_v20 = vrot.slane %v505_v6, 7  ;;  %vm1403_vm4 = vmor %vm672_vm2, %vm673_vm3 }
  0x28   : > { %v1340_v41 = vsel %vm1306_vm5, %v315_v37, 0  ;;  %339 = vst [vmem:[#allocation1 + $0x2] ss:$4 sm:$0xff] %v1330_v38  ;;  %v509_v52 = vshrl.u32 %v1330_v38, 16  ;;  %v512_v53 = vshll.u32 %v1330_v38, 16  ;;  %v461_v62 = vrot.slane %v1330_v38, 2 }
  0x29   : > { %342 = vst [vmem:[#allocation1 + $0x3] ss:$4 sm:$0xff] %v1340_v41  ;;  %v522_v16 = vshrl.u32 %v1340_v41, 16  ;;  %v525_v17 = vshll.u32 %v1340_v41, 16  ;;  %v503_v19 = vrot.slane %v502_v5, 2  ;;  %v495_v24 = vsel %vm1385_vm13, %v490_v12, %v494_v13 }
  0x2a   : > { %v511_v63 = vrot.slane %v509_v52, 6  ;;  %v514_v0 = vrot.slane %v512_v53, 7  ;;  %v518_v8 = vshll.u32 %v461_v62, 16  ;;  %v462_v26 = vrot.slane %v1340_v41, 2 }
  0x2b   : > { %v524_v27 = vrot.slane %v522_v16, 6  ;;  %v527_v28 = vrot.slane %v525_v17, 7  ;;  %v508_v32 = vsel %vm1385_vm13, %v503_v19, %v507_v20  ;;  %v1110_v35 = vrot.slane %v1320_v29, 9 }
  0x2c   : > { %v515_v7 = vor.u32 %v514_v0, %v511_v63  ;;  %v520_v22 = vrot.slane %v518_v8, 7  ;;  %v685_v36 = vrot.slane %v460_v58, 7  ;;  %v1111_v39 = vrot.slane %v1330_v38, 9 }
  0x2d   : > { %v689_v40 = vrot.slane %v461_v62, 7  ;;  %v528_v45 = vor.u32 %v527_v28, %v524_v27  ;;  %v531_v46 = vshll.u32 %v462_v26, 16  ;;  %v1112_v52 = vrot.slane %v1340_v41, 9 }
  0x2e   : > { %v516_v21 = vrot.slane %v515_v7, 2  ;;  %v686_v43 = vsel %vm1403_vm4, %v1110_v35, %v685_v36  ;;  %v693_v53 = vrot.slane %v462_v26, 7  ;;  %v677_v58 = vrot.slane %v1358_v48, 7 }
  0x2f   : > { %v529_v47 = vrot.slane %v528_v45, 2  ;;  %v533_v49 = vrot.slane %v531_v46, 7  ;;  %v1230_v20 = vmov 16.0  }
  0x30   : > { %v343_v42 = vld.sshfl [vmem:[#allocation1] sm:$0xff pattern:$0x73625140]  ;;  %v521_v37 = vsel %vm1385_vm13, %v516_v21, %v520_v22  ;;  %v694_v54 = vsel %vm1403_vm4, %v1112_v52, %v693_v53  ;;  %1201 = vrcp.f32 %v1230_v20 }
  0x31   : > { %1046 = vmatmul.msk.bf16.vlgmr.msra.gmra.mxu0 %vm356_vm6, %v343_v42  ;;  %376 = vst [vmem:[#allocation1 + $0x1] ss:$4 sm:$0xff] %v1316_v25  ;;  %v1171_v42 = vld [vmem:[%s1475_s1 + $0x58] sm:$0xff]  ;;  %v1168_v25 = vld [vmem:[%s1475_s1 + $0x20] sm:$0xff]  ;;  %v534_v51 = vsel %vm1385_vm13, %v529_v47, %v533_v49 }
  0x32   : > { %378 = vst [vmem:[#allocation1 + $0x2] ss:$4 sm:$0xff] %v1320_v29  ;;  %776 = vmatpush.bf16.msrb.mxu3 %v1171_v42  ;;  %733 = vmatpush.bf16.msrb.mxu2 %v1168_v25 }
  0x33   : > { %380 = vst [vmem:[#allocation1 + $0x3] ss:$4 sm:$0xff] %v1330_v38  ;;  %819 = vmatpush.bf16.msra.mxu0 %v1173_v56 }
  0x34   : > { %374 = vst [vmem:[#allocation1] ss:$4 sm:$0xff] %v1229_v44 }
  0x36   : > { %777 = vmatpush.bf16.msrb.mxu3 %v1170_v55 }
  0x37   : > { %820 = vmatpush.bf16.msra.mxu0 %v1172_v59 }
  0x3b   : > { %v381_v61 = vld.sshfl [vmem:[#allocation1] sm:$0xff pattern:$0x73625140] }
  0x3c   : > { %415 = vst [vmem:[#allocation1] ss:$4 sm:$0xff] %v1320_v29  ;;  %1055 = vmatmul.msk.bf16.vlgmr.msra.gmra.mxu1 %vm356_vm6, %v381_v61  ;;  %v682_v29 = vsel %vm1403_vm4, %v1109_v30, %v681_v34 }
  0x3d   : > { %417 = vst [vmem:[#allocation1 + $0x1] ss:$4 sm:$0xff] %v1330_v38  ;;  %v690_v38 = vsel %vm1403_vm4, %v1111_v39, %v689_v40 }
  0x3e   : > { %419 = vst [vmem:[#allocation1 + $0x2] ss:$4 sm:$0xff] %v1340_v41  ;;  %v1108_v41 = vrot.slane %v1229_v44, 9 }
  0x3f   : > { %421 = vst [vmem:[#allocation1 + $0x3] ss:$4 sm:$0xff] %v1229_v44 }
  0x40   : > { %v678_v60 = vsel %vm1403_vm4, %v1108_v41, %v677_v58 }
  0x46   : > { %v422_v31 = vld.sshfl [vmem:[#allocation1] sm:$0xff pattern:$0x73625140] }
  0x47   : > { %1068 = vmatmul.msk.bf16.vlgmr.msra.gmra.mxu2 %vm356_vm6, %v422_v31  ;;  %541 = vst [vmem:[#allocation1] ss:$4 sm:$0xff] %v482_v23 }
  0x48   : > { %544 = vst [vmem:[#allocation1 + $0x1] ss:$4 sm:$0xff] %v495_v24 }
  0x49   : > { %547 = vst [vmem:[#allocation1 + $0x2] ss:$4 sm:$0xff] %v508_v32 }
  0x4a   : > { %550 = vst [vmem:[#allocation1 + $0x3] ss:$4 sm:$0xff] %v521_v37 }
  0x51   : > { %v551_v50 = vld.sshfl [vmem:[#allocation1] sm:$0xff pattern:$0x73625140] }
  0x52   : > { %1081 = vmatmul.msk.bf16.vlgmr.msra.gmra.mxu3 %vm356_vm6, %v551_v50  ;;  %587 = vst [vmem:[#allocation1] ss:$4 sm:$0xff] %v495_v24 }
  0x53   : > { %589 = vst [vmem:[#allocation1 + $0x1] ss:$4 sm:$0xff] %v508_v32 }
  0x54   : > { %591 = vst [vmem:[#allocation1 + $0x2] ss:$4 sm:$0xff] %v521_v37 }
  0x55   : > { %594 = vst [vmem:[#allocation1 + $0x3] ss:$4 sm:$0xff] %v534_v51 }
  0x5c   : > { %v595_v57 = vld.sshfl [vmem:[#allocation1] sm:$0xff pattern:$0x73625140] }
  0x5d   : > { %1094 = vmatmul.msk.bf16.vlgmr.msrb.gmra.mxu0 %vm356_vm6, %v595_v57  ;;  %631 = vst [vmem:[#allocation1] ss:$4 sm:$0xff] %v508_v32  ;;  %v1202_v32 = vpop.eup %1201 }
  0x5e   : > { %633 = vst [vmem:[#allocation1 + $0x1] ss:$4 sm:$0xff] %v521_v37  ;;  %v839_v35 = vmul.f32 16.0, %v1202_v32  ;;  %vm843_vm1 = vweird.f32 %v1202_v32 }
  0x5f   : > { %635 = vst [vmem:[#allocation1 + $0x2] ss:$4 sm:$0xff] %v534_v51 }
  0x60   : > { %637 = vst [vmem:[#allocation1 + $0x3] ss:$4 sm:$0xff] %v482_v23  ;;  %v840_v42 = vsub.f32 1.0, %v839_v35 }
  0x67   : > { %v638_v61 = vld.sshfl [vmem:[#allocation1] sm:$0xff pattern:$0x73625140] }
  0x68   : > { %1107 = vmatmul.msk.bf16.vlgmr.msrb.gmra.mxu1 %vm356_vm6, %v638_v61  ;;  %701 = vst [vmem:[#allocation1] ss:$4 sm:$0xff] %v678_v60 }
  0x69   : > { %704 = vst [vmem:[#allocation1 + $0x1] ss:$4 sm:$0xff] %v682_v29 }
  0x6a   : > { %707 = vst [vmem:[#allocation1 + $0x2] ss:$4 sm:$0xff] %v686_v43 }
  0x6b   : > { %710 = vst [vmem:[#allocation1 + $0x3] ss:$4 sm:$0xff] %v690_v38 }
  0x72   : > { %v711_v62 = vld.sshfl [vmem:[#allocation1] sm:$0xff pattern:$0x73625140] }
  0x73   : > { %1125 = vmatmul.msk.bf16.vlgmr.msrb.gmra.mxu2 %vm356_vm6, %v711_v62  ;;  %747 = vst [vmem:[#allocation1] ss:$4 sm:$0xff] %v682_v29 }
  0x74   : > { %749 = vst [vmem:[#allocation1 + $0x1] ss:$4 sm:$0xff] %v686_v43 }
  0x75   : > { %751 = vst [vmem:[#allocation1 + $0x2] ss:$4 sm:$0xff] %v690_v38 }
  0x76   : > { %754 = vst [vmem:[#allocation1 + $0x3] ss:$4 sm:$0xff] %v694_v54 }
  0x7d   : > { %v755_v44 = vld.sshfl [vmem:[#allocation1] sm:$0xff pattern:$0x73625140] }
  0x7e   : > { %1138 = vmatmul.msk.bf16.vlgmr.msrb.gmra.mxu3 %vm356_vm6, %v755_v44  ;;  %791 = vst [vmem:[#allocation1] ss:$4 sm:$0xff] %v686_v43  ;;  %v841_v43 = vmul.f32 %v1202_v32, %v840_v42 }
  0x7f   : > { %793 = vst [vmem:[#allocation1 + $0x1] ss:$4 sm:$0xff] %v690_v38 }
  0x80   : > { %795 = vst [vmem:[#allocation1 + $0x2] ss:$4 sm:$0xff] %v694_v54  ;;  %v842_v46 = vadd.f32 %v1202_v32, %v841_v43 }
  0x81   : > { %797 = vst [vmem:[#allocation1 + $0x3] ss:$4 sm:$0xff] %v678_v60 }
  0x82   : > { %v844_v50 = vsel %vm843_vm1, %v1202_v32, %v842_v46 }
  0x88   : > { %v798_v48 = vld.sshfl [vmem:[#allocation1] sm:$0xff pattern:$0x73625140] }
  0x89   : > { %1151 = vmatmul.msk.bf16.vlgmr.msra.gmra.mxu0 %vm356_vm6, %v798_v48 }
  0xae   : > { %v368_v63 = vpop.f32.mrf.mxu0 }
  0xb6   : > { %v370_v1 = vpop.f32.mrf.mxu0 }
  0xb9   : > { %v405_v0 = vpop.f32.mrf.mxu1 }
  0xba   : > { %v406_v7 = vadd.f32 %v405_v0, %v368_v63 }
  0xc1   : > { %v407_v4 = vpop.f32.mrf.mxu1 }
  0xc2   : > { %v408_v11 = vadd.f32 %v407_v4, %v370_v1 }
  0xca   : > { %v446_v2 = vpop.f32.mrf.mxu2 }
  0xcb   : > { %v451_v8 = vadd.f32 %v446_v2, %v406_v7 }
  0xd2   : > { %v448_v6 = vpop.f32.mrf.mxu2 }
  0xd3   : > { %v452_v15 = vadd.f32 %v448_v6, %v408_v11  ;;  %v860_v6 = vld [vmem:[%s1476_s2] sm:$0x1] }
  0xd4   : > { %v1200_v11 = vld [vmem:[%s1477_s3] ss:$0 sm:$0xff] }
  0xd5   : > { %v575_v3 = vpop.f32.mrf.mxu3 }
  0xd6   : > { %v580_v13 = vadd.f32 %v575_v3, %v451_v8 }
  0xda   : > { %v619_v5 = vpop.f32.mrf.mxu0 }
  0xdb   : > { %v624_v16 = vadd.f32 %v619_v5, %v580_v13 }
  0xdd   : > { %v577_v9 = vpop.f32.mrf.mxu3 }
  0xde   : > { %v581_v17 = vadd.f32 %v577_v9, %v452_v15 }
  0xe2   : > { %v621_v14 = vpop.f32.mrf.mxu0 }
  0xe3   : > { %v625_v21 = vadd.f32 %v621_v14, %v581_v17 }
  0xe5   : > { %v662_v10 = vpop.f32.mrf.mxu1 }
  0xe6   : > { %v667_v22 = vadd.f32 %v662_v10, %v624_v16 }
  0xed   : > { %v664_v19 = vpop.f32.mrf.mxu1 }
  0xee   : > { %v668_v26 = vadd.f32 %v664_v19, %v625_v21 }
  0xf6   : > { %v735_v12 = vpop.f32.mrf.mxu2 }
  0xf7   : > { %v740_v27 = vadd.f32 %v735_v12, %v667_v22 }
  0xfe   : > { %v737_v23 = vpop.f32.mrf.mxu2 }
  0xff   : > { %v741_v28 = vadd.f32 %v737_v23, %v668_v26 }
 0x101   : > { %v779_v18 = vpop.f32.mrf.mxu3 }
 0x102   : > { %v784_v30 = vadd.f32 %v779_v18, %v740_v27 }
 0x106   : > { %v822_v24 = vpop.f32.mrf.mxu0 }
 0x107   : > { %v827_v34 = vadd.f32 %v822_v24, %v784_v30 }
 0x109   : > { %v781_v31 = vpop.f32.mrf.mxu3  ;;  %v829_v39 = vsel %vm356_vm6, %v827_v34, 0.0 }
 0x10a   : > { %v785_v33 = vadd.f32 %v781_v31, %v741_v28 }
 0x10e   : > { %v824_v36 = vpop.f32.mrf.mxu0 }
 0x10f   : > { %v828_v37 = vadd.f32 %v824_v36, %v785_v33 }
 0x111   : > { %v830_v40 = vsel %vm356_vm6, %v828_v37, 0.0 }
 0x112   : > { %v831_v25 = vadd.f32 %v830_v40, %v829_v39 }
 0x114   : > { %v832_v29 = vrot.slane %v831_v25, 4 }
 0x116   : > { %v833_v38 = vadd.f32 %v832_v29, %v831_v25 }
 0x118   : > { %v834_v45 = vrot.slane %v833_v38, 2 }
 0x11a   : > { %v835_v47 = vadd.f32 %v834_v45, %v833_v38 }
 0x11c   : > { %v836_v49 = vrot.slane %v835_v47, 1 }
 0x11e   : > { %v837_v51 = vadd.f32 %v836_v49, %v835_v47 }
 0x120   : > { %v845_v52 = vmul.f32 %v844_v50, %v837_v51 }
 0x122   : > { %v846_v53 = vsub.f32 %v827_v34, %v845_v52  ;;  %v847_v54 = vsub.f32 %v828_v37, %v845_v52 }
 0x124   : > { %v848_v55 = vmul.f32 %v846_v53, %v846_v53  ;;  %v849_v56 = vmul.f32 %v847_v54, %v847_v54 }
 0x126   : > { %v850_v57 = vsel %vm356_vm6, %v848_v55, 0.0  ;;  %v851_v41 = vsel %vm356_vm6, %v849_v56, 0.0 }
 0x127   : > { %v852_v58 = vadd.f32 %v851_v41, %v850_v57 }
 0x129   : > { %v853_v59 = vrot.slane %v852_v58, 4 }
 0x12b   : > { %v854_v60 = vadd.f32 %v853_v59, %v852_v58 }
 0x12d   : > { %v855_v61 = vrot.slane %v854_v60, 2 }
 0x12f   : > { %v856_v62 = vadd.f32 %v855_v61, %v854_v60 }
 0x131   : > { %v857_v44 = vrot.slane %v856_v62, 1 }
 0x133   : > { %v858_v48 = vadd.f32 %v857_v44, %v856_v62 }
 0x135   : > { %v859_v63 = vmul.f32 %v858_v48, %v844_v50 }
 0x137   : > { %v861_v0 = vadd.f32 1e-05, %v859_v63 }
 0x139   : > { %1203 = vrsqrt.f32 %v861_v0  ;;  %vm868_vm6 = vweird.f32 %v861_v0 }
 0x13f   : > { %v1204_v1 = vpop.eup %1203 }
 0x140   : > { %v863_v2 = vmul.f32 %v1204_v1, %v861_v0  ;;  %vm869_vm5 = vweird.f32 %v1204_v1 }
 0x141   : > { %vm870_vm7 = vmor %vm868_vm6, %vm869_vm5 }
 0x142   : > { %v864_v3 = vmul.f32 %v1204_v1, %v863_v2 }
 0x144   : > { %v865_v4 = vmul.f32 0.5, %v864_v3 }
 0x146   : > { %v866_v5 = vsub.f32 1.5, %v865_v4 }
 0x148   : > { %v867_v7 = vmul.f32 %v1204_v1, %v866_v5 }
 0x14a   : > { %v871_v8 = vsel %vm870_vm7, %v1204_v1, %v867_v7 }
 0x14b   : > { %v872_v9 = vmul.f32 %v871_v8, %v860_v6 }
 0x14d   : > { %v874_v10 = vperm.slane %v872_v9, 0 }
 0x14f   : > { %v876_v12 = vmul.f32 %v874_v10, %v846_v53  ;;  %v877_v13 = vmul.f32 %v874_v10, %v847_v54 }
 0x151   : > { %v882_v14 = vadd.f32 %v1200_v11, %v876_v12  ;;  %v883_v15 = vadd.f32 %v1200_v11, %v877_v13 }
 0x153   : > { %vm884_vm8 = vcmp.gt.f32.partialorder %v882_v14, 0.0  ;;  %vm885_vm9 = vcmp.gt.f32.partialorder %v883_v15, 0.0  ;;  %v886_v16 = vmul.f32 0.01, %v882_v14  ;;  %v887_v17 = vmul.f32 0.01, %v883_v15 }
 0x155   : > { %v888_v18 = vsel %vm884_vm8, %v882_v14, %v886_v16  ;;  %v889_v19 = vsel %vm885_vm9, %v883_v15, %v887_v17 }
 0x156   : > { %v892_v20 = vrot.slane %v888_v18, 4  ;;  %v893_v21 = vrot.slane %v889_v19, 4  ;;  %v896_v22 = vpack.c.bf16 %v888_v18, %v888_v18  ;;  %v898_v23 = vpack.c.bf16 %v889_v19, %v889_v19 }
 0x158   : > { %v897_v24 = vpack.c.bf16 %v892_v20, %v892_v20  ;;  %v899_v26 = vpack.c.bf16 %v893_v21, %v893_v21  ;;  %901 = vst.msk [vmem:[%s262_s22] sm:$0x3] %vm900_vm10, %v896_v22 }
 0x159   : > { %903 = vst.msk [vmem:[%s262_s22 + $0x4] sm:$0x3] %vm900_vm10, %v898_v23 }
 0x15a   : > { %902 = vst.msk [vmem:[%s262_s22 + $0x2] sm:$0x3] %vm900_vm10, %v897_v24 }
 0x15b   : > { %904 = vst.msk [vmem:[%s262_s22 + $0x6] sm:$0x3] %vm900_vm10, %v899_v26 }
 0x15c PF: > { %s14_s17 = sadd.s32 1, %s1227_s17   ;;  %s1487_s15 = smov %s1223_s16 }
 0x15d   : > { %p11_p5 = scmp.ge.s32.totalorder %s14_s17, 4   ;;  %s1488_s16 = smov %s1490_s18 }
 0x15f   :  { %13 = sbr.rel (!%p11_p5) target bundleno = 2 (0x2), region = 111 }

</bundles_post_ra>
